<compile_context>
chip_gen: v7x
topology: tpu7x:2x2x1
jax: 0.10.0
libtpu: 0.0.40
codegen_flags: <defaults>
</compile_context>

<pallas_src>
import jax
import jax.numpy as jnp
from jax.experimental import pallas as pl
from jax.experimental.pallas import tpu as pltpu


def _inception_kernel(x_ref, w_ref, b_ref, o_ref, xpad_ref, patch_ref):
    # x_ref    : (1, H, W, Cin)     bf16  un-padded input image
    # w_ref    : (26*Cin, 4*Cq)     bf16  fused im2col weight matrix
    # b_ref    : (1, 4*Cq)          f32   fused bias
    # o_ref    : (1, H*W, 4*Cq)     f32   output slab
    # xpad_ref : (H+4, W+4, Cin)    f32   scratch: zero-padded image (pad = 2)
    # patch_ref: (H, W, 26*Cin)     f32   scratch: im2col patch matrix
    H, W, Cin = x_ref.shape[1], x_ref.shape[2], x_ref.shape[3]

    # ---- zero-pad (pad = 2) once, entirely in VMEM ----
    xpad_ref[...] = jnp.zeros_like(xpad_ref)
    xpad_ref[2:2 + H, 2:2 + W, :] = x_ref[0].astype(jnp.float32)

    # ---- im2col: the 25 taps of the 5x5 footprint ----
    # Tap (dy, dx) also carries the 3x3 conv (taps (1..3, 1..3)) and the 1x1
    # conv (tap (2, 2)); the fused weight matrix embeds those kernels at the
    # matching rows, zero elsewhere.
    for dy in range(5):
        for dx in range(5):
            t = dy * 5 + dx
            patch_ref[:, :, t * Cin:(t + 1) * Cin] = \
                xpad_ref[dy:dy + H, dx:dx + W, :]

    # ---- 3x3 max-pool, stride 1, pad 1, -inf padding (PyTorch semantics) ----
    # Reuse the zero-padded image: mask its pad=1 ring to -inf with iota masks.
    Hp, Wp = H + 2, W + 2
    xp1 = xpad_ref[1:1 + Hp, 1:1 + Wp, :]
    r = jax.lax.broadcasted_iota(jnp.int32, (Hp, Wp, Cin), 0)
    c = jax.lax.broadcasted_iota(jnp.int32, (Hp, Wp, Cin), 1)
    border = (r == 0) | (r == Hp - 1) | (c == 0) | (c == Wp - 1)
    xm = jnp.where(border, -jnp.inf, xp1)
    pooled = xm[0:H, 0:W, :]
    for dy in range(3):
        for dx in range(3):
            if dy == 0 and dx == 0:
                continue
            pooled = jnp.maximum(pooled, xm[dy:dy + H, dx:dx + W, :])
    patch_ref[:, :, 25 * Cin:26 * Cin] = pooled

    # ---- one fused matmul for all four branches (bf16 MXU, f32 accumulate) ----
    patches = patch_ref[...].reshape(H * W, 26 * Cin).astype(jnp.bfloat16)
    y = jnp.dot(patches, w_ref[...], preferred_element_type=jnp.float32)
    y = jnp.maximum(y + b_ref[...], 0.0)          # fused bias + ReLU
    o_ref[0] = y.astype(o_ref.dtype)              # single wide store


def inception_block_v1a(x_nchw, params):
    """x_nchw: (N, Cin, H, W) float32 -> (N, 4*(out_c//4), H, W) float32."""
    # Single layout transpose at the boundary (would vanish if the producer
    # emitted NHWC directly).
    x = jnp.transpose(x_nchw, (0, 2, 3, 1))
    N, H, W, Cin = x.shape

    (w1, b1) = params["conv1"]
    (w3, b3) = params["conv2"]
    (w5, b5) = params["conv3"]
    Cq = w1.shape[0]

    # ---- host-side fused weight matrix: rows = 26 taps x Cin, cols = branches ----
    w1_k = jnp.transpose(w1, (2, 3, 1, 0)).reshape(Cin, Cq)   # (Cin, Cq)
    w3_k = jnp.transpose(w3, (2, 3, 1, 0))                    # (3, 3, Cin, Cq)
    w5_k = jnp.transpose(w5, (2, 3, 1, 0))                    # (5, 5, Cin, Cq)
    wbig = jnp.zeros((26, Cin, 4 * Cq), jnp.float32)
    wbig = wbig.at[2 * 5 + 2, :, 0:Cq].set(w1_k)              # 1x1 @ center tap
    for dy in range(3):
        for dx in range(3):
            wbig = wbig.at[(dy + 1) * 5 + (dx + 1), :, Cq:2 * Cq].set(w3_k[dy, dx])
    for dy in range(5):
        for dx in range(5):
            wbig = wbig.at[dy * 5 + dx, :, 2 * Cq:3 * Cq].set(w5_k[dy, dx])
    wbig = wbig.at[25, :, 3 * Cq:4 * Cq].set(w1_k)            # 1x1 on pooled pixel
    wbig = wbig.reshape(26 * Cin, 4 * Cq).astype(jnp.bfloat16)
    bias = jnp.concatenate([b1, b3, b5, b1]).reshape(1, 4 * Cq).astype(jnp.float32)

    out = pl.pallas_call(
        _inception_kernel,
        out_shape=jax.ShapeDtypeStruct((N, H * W, 4 * Cq), jnp.float32),
        grid=(N,),
        in_specs=[
            pl.BlockSpec((1, H, W, Cin), lambda n: (n, 0, 0, 0)),
            pl.BlockSpec((26 * Cin, 4 * Cq), lambda n: (0, 0)),
            pl.BlockSpec((1, 4 * Cq), lambda n: (0, 0)),
        ],
        out_specs=pl.BlockSpec((1, H * W, 4 * Cq), lambda n: (n, 0, 0)),
        scratch_shapes=[
            pltpu.VMEM((H + 4, W + 4, Cin), jnp.float32),     # padded image
            pltpu.VMEM((H, W, 26 * Cin), jnp.float32),        # im2col buffer
        ],
        compiler_params=pltpu.CompilerParams(
            dimension_semantics=("parallel",)),
    )(x.astype(jnp.bfloat16), wbig, bias)

    out = out.reshape(N, H, W, 4 * Cq)
    return jnp.transpose(out, (0, 3, 1, 2))   # back to NCHW


def init_params(key, in_c, out_c, eps=1e-5):
    """Deterministic Conv + BatchNorm parameters, BN folded into (w, b)."""
    cq = out_c // 4
    keys = jax.random.split(key, 18)

    def conv_bn(ks, ksz):
        kw, kb, kg, kbt, kmn, kvr = ks
        fan_in = in_c * ksz * ksz
        bound = 1.0 / (fan_in ** 0.5)
        w = jax.random.uniform(kw, (cq, in_c, ksz, ksz), jnp.float32, -bound, bound)
        b = jax.random.uniform(kb, (cq,), jnp.float32, -bound, bound)
        gamma = jax.random.uniform(kg, (cq,), jnp.float32, 0.5, 1.5)
        beta = 0.1 * jax.random.normal(kbt, (cq,), jnp.float32)
        mean = 0.1 * jax.random.normal(kmn, (cq,), jnp.float32)
        var = jax.random.uniform(kvr, (cq,), jnp.float32, 0.5, 1.5)
        scale = gamma / jnp.sqrt(var + eps)
        w_eff = w * scale[:, None, None, None]
        b_eff = (b - mean) * scale + beta
        return w_eff, b_eff

    return {"conv1": conv_bn(keys[0:6], 1),
            "conv2": conv_bn(keys[6:12], 3),
            "conv3": conv_bn(keys[12:18], 5)}


def reference(x_nchw, params):
    """Pure-JAX reference (lax.conv + reduce_window) in f32, returns NCHW."""
    x = jnp.transpose(x_nchw, (0, 2, 3, 1)).astype(jnp.float32)

    def branch(xin, wb, pad):
        w, b = wb
        y = jax.lax.conv_general_dilated(
            xin, jnp.transpose(w, (2, 3, 1, 0)), (1, 1),
            [(pad, pad), (pad, pad)],
            dimension_numbers=("NHWC", "HWIO", "NHWC"),
            precision=jax.lax.Precision.HIGHEST)
        return jnp.maximum(y + b, 0.0)

    pool = jax.lax.reduce_window(x, -jnp.inf, jax.lax.max,
                                 (1, 3, 3, 1), (1, 1, 1, 1),
                                 [(0, 0), (1, 1), (1, 1), (0, 0)])
    outs = [branch(x, params["conv1"], 0),
            branch(x, params["conv2"], 1),
            branch(x, params["conv3"], 2),
            branch(pool, params["conv1"], 0)]
    return jnp.transpose(jnp.concatenate(outs, axis=-1), (0, 3, 1, 2))


if __name__ == "__main__":
    key = jax.random.PRNGKey(0)
    kx, kp = jax.random.split(key)

    N, Cin, H, W = 2, 4, 16, 16
    out_c = 8                      # each branch produces out_c // 4 = 2 channels

    x = jax.random.normal(kx, (N, Cin, H, W), jnp.float32)
    params = init_params(kp, Cin, out_c)

    y = inception_block_v1a(x, params)
    y = jax.block_until_ready(y)

    y_ref = reference(x, params)
    assert y.shape == (N, 4 * (out_c // 4), H, W), y.shape
    err = float(jnp.max(jnp.abs(y - y_ref)))
    # bf16 MXU matmul vs. f32 HIGHEST reference -> slightly looser tolerance.
    assert jnp.allclose(y, y_ref, atol=3e-2, rtol=3e-2), err

    print("KERNEL_OK")
</pallas_src>

<mosaic_0001>
module attributes {stable_mosaic.version = 11 : i64} {
  func.func @_inception_kernel(%arg0: i32, %arg1: memref<1x16x16x4xbf16, #tpu.memory_space<vmem>>, %arg2: memref<104x8xbf16, #tpu.memory_space<vmem>>, %arg3: memref<1x8xf32, #tpu.memory_space<vmem>>, %arg4: memref<1x256x8xf32, #tpu.memory_space<vmem>>, %arg5: memref<20x20x4xf32, #tpu.memory_space<vmem>>, %arg6: memref<16x16x104xf32, #tpu.memory_space<vmem>>) attributes {dimension_semantics = [#tpu.dimension_semantics<parallel>], iteration_bounds = array<i64: 2>, scalar_prefetch = 0 : i64, scratch_operands = 2 : i64, tpu.core_type = #tpu.core_type<tc>, window_params = [{transform_indices = @transform_0, window_bounds = array<i64: 1, 16, 16, 4>}, {pipeline_mode = #tpu.pipeline_mode<synchronous>, transform_indices = @transform_1, window_bounds = array<i64: 104, 8>}, {pipeline_mode = #tpu.pipeline_mode<synchronous>, transform_indices = @transform_2, window_bounds = array<i64: 1, 8>}, {transform_indices = @transform_3, window_bounds = array<i64: 1, 256, 8>}]} {
    %cst = arith.constant 0.000000e+00 : f32
    %0 = vector.broadcast %cst : f32 to vector<20x20x4xf32>
    %c0 = arith.constant 0 : index
    %c0_0 = arith.constant 0 : index
    %c0_1 = arith.constant 0 : index
    %1 = vector.load %arg5[%c0, %c0_0, %c0_1] : memref<20x20x4xf32, #tpu.memory_space<vmem>>, vector<20x20x4xf32>
    tpu.vector_store %arg5[%c0, %c0_0, %c0_1], %0 {strides = array<i32>} : memref<20x20x4xf32, #tpu.memory_space<vmem>>, vector<20x20x4xf32>,
    %c0_2 = arith.constant 0 : index
    %c0_3 = arith.constant 0 : index
    %c0_4 = arith.constant 0 : index
    %c0_5 = arith.constant 0 : index
    %2 = vector.load %arg1[%c0_2, %c0_3, %c0_4, %c0_5] : memref<1x16x16x4xbf16, #tpu.memory_space<vmem>>, vector<1x16x16x4xbf16>
    %3 = vector.shape_cast %2 : vector<1x16x16x4xbf16> to vector<16x16x4xbf16>
    %4 = arith.extf %3 : vector<16x16x4xbf16> to vector<16x16x4xf32>
    %c2 = arith.constant 2 : index
    %c2_6 = arith.constant 2 : index
    %c0_7 = arith.constant 0 : index
    %5 = vector.load %arg5[%c2, %c2_6, %c0_7] : memref<20x20x4xf32, #tpu.memory_space<vmem>>, vector<16x16x4xf32>
    tpu.vector_store %arg5[%c2, %c2_6, %c0_7], %4 {strides = array<i32>} : memref<20x20x4xf32, #tpu.memory_space<vmem>>, vector<16x16x4xf32>,
    %c0_8 = arith.constant 0 : index
    %c0_9 = arith.constant 0 : index
    %c0_10 = arith.constant 0 : index
    %6 = vector.load %arg5[%c0_8, %c0_9, %c0_10] : memref<20x20x4xf32, #tpu.memory_space<vmem>>, vector<16x16x4xf32>
    %c0_11 = arith.constant 0 : index
    %c0_12 = arith.constant 0 : index
    %c0_13 = arith.constant 0 : index
    %7 = vector.load %arg6[%c0_11, %c0_12, %c0_13] : memref<16x16x104xf32, #tpu.memory_space<vmem>>, vector<16x16x4xf32>
    tpu.vector_store %arg6[%c0_11, %c0_12, %c0_13], %6 {strides = array<i32>} : memref<16x16x104xf32, #tpu.memory_space<vmem>>, vector<16x16x4xf32>,
    %c0_14 = arith.constant 0 : index
    %c1 = arith.constant 1 : index
    %c0_15 = arith.constant 0 : index
    %8 = vector.load %arg5[%c0_14, %c1, %c0_15] : memref<20x20x4xf32, #tpu.memory_space<vmem>>, vector<16x16x4xf32>
    %c0_16 = arith.constant 0 : index
    %c0_17 = arith.constant 0 : index
    %c4 = arith.constant 4 : index
    %9 = vector.load %arg6[%c0_16, %c0_17, %c4] : memref<16x16x104xf32, #tpu.memory_space<vmem>>, vector<16x16x4xf32>
    tpu.vector_store %arg6[%c0_16, %c0_17, %c4], %8 {strides = array<i32>} : memref<16x16x104xf32, #tpu.memory_space<vmem>>, vector<16x16x4xf32>,
    %c0_18 = arith.constant 0 : index
    %c2_19 = arith.constant 2 : index
    %c0_20 = arith.constant 0 : index
    %10 = vector.load %arg5[%c0_18, %c2_19, %c0_20] : memref<20x20x4xf32, #tpu.memory_space<vmem>>, vector<16x16x4xf32>
    %c0_21 = arith.constant 0 : index
    %c0_22 = arith.constant 0 : index
    %c8 = arith.constant 8 : index
    %11 = vector.load %arg6[%c0_21, %c0_22, %c8] : memref<16x16x104xf32, #tpu.memory_space<vmem>>, vector<16x16x4xf32>
    tpu.vector_store %arg6[%c0_21, %c0_22, %c8], %10 {strides = array<i32>} : memref<16x16x104xf32, #tpu.memory_space<vmem>>, vector<16x16x4xf32>,
    %c0_23 = arith.constant 0 : index
    %c3 = arith.constant 3 : index
    %c0_24 = arith.constant 0 : index
    %12 = vector.load %arg5[%c0_23, %c3, %c0_24] : memref<20x20x4xf32, #tpu.memory_space<vmem>>, vector<16x16x4xf32>
    %c0_25 = arith.constant 0 : index
    %c0_26 = arith.constant 0 : index
    %c12 = arith.constant 12 : index
    %13 = vector.load %arg6[%c0_25, %c0_26, %c12] : memref<16x16x104xf32, #tpu.memory_space<vmem>>, vector<16x16x4xf32>
    tpu.vector_store %arg6[%c0_25, %c0_26, %c12], %12 {strides = array<i32>} : memref<16x16x104xf32, #tpu.memory_space<vmem>>, vector<16x16x4xf32>,
    %c0_27 = arith.constant 0 : index
    %c4_28 = arith.constant 4 : index
    %c0_29 = arith.constant 0 : index
    %14 = vector.load %arg5[%c0_27, %c4_28, %c0_29] : memref<20x20x4xf32, #tpu.memory_space<vmem>>, vector<16x16x4xf32>
    %c0_30 = arith.constant 0 : index
    %c0_31 = arith.constant 0 : index
    %c16 = arith.constant 16 : index
    %15 = vector.load %arg6[%c0_30, %c0_31, %c16] : memref<16x16x104xf32, #tpu.memory_space<vmem>>, vector<16x16x4xf32>
    tpu.vector_store %arg6[%c0_30, %c0_31, %c16], %14 {strides = array<i32>} : memref<16x16x104xf32, #tpu.memory_space<vmem>>, vector<16x16x4xf32>,
    %c1_32 = arith.constant 1 : index
    %c0_33 = arith.constant 0 : index
    %c0_34 = arith.constant 0 : index
    %16 = vector.load %arg5[%c1_32, %c0_33, %c0_34] : memref<20x20x4xf32, #tpu.memory_space<vmem>>, vector<16x16x4xf32>
    %c0_35 = arith.constant 0 : index
    %c0_36 = arith.constant 0 : index
    %c20 = arith.constant 20 : index
    %17 = vector.load %arg6[%c0_35, %c0_36, %c20] : memref<16x16x104xf32, #tpu.memory_space<vmem>>, vector<16x16x4xf32>
    tpu.vector_store %arg6[%c0_35, %c0_36, %c20], %16 {strides = array<i32>} : memref<16x16x104xf32, #tpu.memory_space<vmem>>, vector<16x16x4xf32>,
    %c1_37 = arith.constant 1 : index
    %c1_38 = arith.constant 1 : index
    %c0_39 = arith.constant 0 : index
    %18 = vector.load %arg5[%c1_37, %c1_38, %c0_39] : memref<20x20x4xf32, #tpu.memory_space<vmem>>, vector<16x16x4xf32>
    %c0_40 = arith.constant 0 : index
    %c0_41 = arith.constant 0 : index
    %c24 = arith.constant 24 : index
    %19 = vector.load %arg6[%c0_40, %c0_41, %c24] : memref<16x16x104xf32, #tpu.memory_space<vmem>>, vector<16x16x4xf32>
    tpu.vector_store %arg6[%c0_40, %c0_41, %c24], %18 {strides = array<i32>} : memref<16x16x104xf32, #tpu.memory_space<vmem>>, vector<16x16x4xf32>,
    %c1_42 = arith.constant 1 : index
    %c2_43 = arith.constant 2 : index
    %c0_44 = arith.constant 0 : index
    %20 = vector.load %arg5[%c1_42, %c2_43, %c0_44] : memref<20x20x4xf32, #tpu.memory_space<vmem>>, vector<16x16x4xf32>
    %c0_45 = arith.constant 0 : index
    %c0_46 = arith.constant 0 : index
    %c28 = arith.constant 28 : index
    %21 = vector.load %arg6[%c0_45, %c0_46, %c28] : memref<16x16x104xf32, #tpu.memory_space<vmem>>, vector<16x16x4xf32>
    tpu.vector_store %arg6[%c0_45, %c0_46, %c28], %20 {strides = array<i32>} : memref<16x16x104xf32, #tpu.memory_space<vmem>>, vector<16x16x4xf32>,
    %c1_47 = arith.constant 1 : index
    %c3_48 = arith.constant 3 : index
    %c0_49 = arith.constant 0 : index
    %22 = vector.load %arg5[%c1_47, %c3_48, %c0_49] : memref<20x20x4xf32, #tpu.memory_space<vmem>>, vector<16x16x4xf32>
    %c0_50 = arith.constant 0 : index
    %c0_51 = arith.constant 0 : index
    %c32 = arith.constant 32 : index
    %23 = vector.load %arg6[%c0_50, %c0_51, %c32] : memref<16x16x104xf32, #tpu.memory_space<vmem>>, vector<16x16x4xf32>
    tpu.vector_store %arg6[%c0_50, %c0_51, %c32], %22 {strides = array<i32>} : memref<16x16x104xf32, #tpu.memory_space<vmem>>, vector<16x16x4xf32>,
    %c1_52 = arith.constant 1 : index
    %c4_53 = arith.constant 4 : index
    %c0_54 = arith.constant 0 : index
    %24 = vector.load %arg5[%c1_52, %c4_53, %c0_54] : memref<20x20x4xf32, #tpu.memory_space<vmem>>, vector<16x16x4xf32>
    %c0_55 = arith.constant 0 : index
    %c0_56 = arith.constant 0 : index
    %c36 = arith.constant 36 : index
    %25 = vector.load %arg6[%c0_55, %c0_56, %c36] : memref<16x16x104xf32, #tpu.memory_space<vmem>>, vector<16x16x4xf32>
    tpu.vector_store %arg6[%c0_55, %c0_56, %c36], %24 {strides = array<i32>} : memref<16x16x104xf32, #tpu.memory_space<vmem>>, vector<16x16x4xf32>,
    %c2_57 = arith.constant 2 : index
    %c0_58 = arith.constant 0 : index
    %c0_59 = arith.constant 0 : index
    %26 = vector.load %arg5[%c2_57, %c0_58, %c0_59] : memref<20x20x4xf32, #tpu.memory_space<vmem>>, vector<16x16x4xf32>
    %c0_60 = arith.constant 0 : index
    %c0_61 = arith.constant 0 : index
    %c40 = arith.constant 40 : index
    %27 = vector.load %arg6[%c0_60, %c0_61, %c40] : memref<16x16x104xf32, #tpu.memory_space<vmem>>, vector<16x16x4xf32>
    tpu.vector_store %arg6[%c0_60, %c0_61, %c40], %26 {strides = array<i32>} : memref<16x16x104xf32, #tpu.memory_space<vmem>>, vector<16x16x4xf32>,
    %c2_62 = arith.constant 2 : index
    %c1_63 = arith.constant 1 : index
    %c0_64 = arith.constant 0 : index
    %28 = vector.load %arg5[%c2_62, %c1_63, %c0_64] : memref<20x20x4xf32, #tpu.memory_space<vmem>>, vector<16x16x4xf32>
    %c0_65 = arith.constant 0 : index
    %c0_66 = arith.constant 0 : index
    %c44 = arith.constant 44 : index
    %29 = vector.load %arg6[%c0_65, %c0_66, %c44] : memref<16x16x104xf32, #tpu.memory_space<vmem>>, vector<16x16x4xf32>
    tpu.vector_store %arg6[%c0_65, %c0_66, %c44], %28 {strides = array<i32>} : memref<16x16x104xf32, #tpu.memory_space<vmem>>, vector<16x16x4xf32>,
    %c2_67 = arith.constant 2 : index
    %c2_68 = arith.constant 2 : index
    %c0_69 = arith.constant 0 : index
    %30 = vector.load %arg5[%c2_67, %c2_68, %c0_69] : memref<20x20x4xf32, #tpu.memory_space<vmem>>, vector<16x16x4xf32>
    %c0_70 = arith.constant 0 : index
    %c0_71 = arith.constant 0 : index
    %c48 = arith.constant 48 : index
    %31 = vector.load %arg6[%c0_70, %c0_71, %c48] : memref<16x16x104xf32, #tpu.memory_space<vmem>>, vector<16x16x4xf32>
    tpu.vector_store %arg6[%c0_70, %c0_71, %c48], %30 {strides = array<i32>} : memref<16x16x104xf32, #tpu.memory_space<vmem>>, vector<16x16x4xf32>,
    %c2_72 = arith.constant 2 : index
    %c3_73 = arith.constant 3 : index
    %c0_74 = arith.constant 0 : index
    %32 = vector.load %arg5[%c2_72, %c3_73, %c0_74] : memref<20x20x4xf32, #tpu.memory_space<vmem>>, vector<16x16x4xf32>
    %c0_75 = arith.constant 0 : index
    %c0_76 = arith.constant 0 : index
    %c52 = arith.constant 52 : index
    %33 = vector.load %arg6[%c0_75, %c0_76, %c52] : memref<16x16x104xf32, #tpu.memory_space<vmem>>, vector<16x16x4xf32>
    tpu.vector_store %arg6[%c0_75, %c0_76, %c52], %32 {strides = array<i32>} : memref<16x16x104xf32, #tpu.memory_space<vmem>>, vector<16x16x4xf32>,
    %c2_77 = arith.constant 2 : index
    %c4_78 = arith.constant 4 : index
    %c0_79 = arith.constant 0 : index
    %34 = vector.load %arg5[%c2_77, %c4_78, %c0_79] : memref<20x20x4xf32, #tpu.memory_space<vmem>>, vector<16x16x4xf32>
    %c0_80 = arith.constant 0 : index
    %c0_81 = arith.constant 0 : index
    %c56 = arith.constant 56 : index
    %35 = vector.load %arg6[%c0_80, %c0_81, %c56] : memref<16x16x104xf32, #tpu.memory_space<vmem>>, vector<16x16x4xf32>
    tpu.vector_store %arg6[%c0_80, %c0_81, %c56], %34 {strides = array<i32>} : memref<16x16x104xf32, #tpu.memory_space<vmem>>, vector<16x16x4xf32>,
    %c3_82 = arith.constant 3 : index
    %c0_83 = arith.constant 0 : index
    %c0_84 = arith.constant 0 : index
    %36 = vector.load %arg5[%c3_82, %c0_83, %c0_84] : memref<20x20x4xf32, #tpu.memory_space<vmem>>, vector<16x16x4xf32>
    %c0_85 = arith.constant 0 : index
    %c0_86 = arith.constant 0 : index
    %c60 = arith.constant 60 : index
    %37 = vector.load %arg6[%c0_85, %c0_86, %c60] : memref<16x16x104xf32, #tpu.memory_space<vmem>>, vector<16x16x4xf32>
    tpu.vector_store %arg6[%c0_85, %c0_86, %c60], %36 {strides = array<i32>} : memref<16x16x104xf32, #tpu.memory_space<vmem>>, vector<16x16x4xf32>,
    %c3_87 = arith.constant 3 : index
    %c1_88 = arith.constant 1 : index
    %c0_89 = arith.constant 0 : index
    %38 = vector.load %arg5[%c3_87, %c1_88, %c0_89] : memref<20x20x4xf32, #tpu.memory_space<vmem>>, vector<16x16x4xf32>
    %c0_90 = arith.constant 0 : index
    %c0_91 = arith.constant 0 : index
    %c64 = arith.constant 64 : index
    %39 = vector.load %arg6[%c0_90, %c0_91, %c64] : memref<16x16x104xf32, #tpu.memory_space<vmem>>, vector<16x16x4xf32>
    tpu.vector_store %arg6[%c0_90, %c0_91, %c64], %38 {strides = array<i32>} : memref<16x16x104xf32, #tpu.memory_space<vmem>>, vector<16x16x4xf32>,
    %c3_92 = arith.constant 3 : index
    %c2_93 = arith.constant 2 : index
    %c0_94 = arith.constant 0 : index
    %40 = vector.load %arg5[%c3_92, %c2_93, %c0_94] : memref<20x20x4xf32, #tpu.memory_space<vmem>>, vector<16x16x4xf32>
    %c0_95 = arith.constant 0 : index
    %c0_96 = arith.constant 0 : index
    %c68 = arith.constant 68 : index
    %41 = vector.load %arg6[%c0_95, %c0_96, %c68] : memref<16x16x104xf32, #tpu.memory_space<vmem>>, vector<16x16x4xf32>
    tpu.vector_store %arg6[%c0_95, %c0_96, %c68], %40 {strides = array<i32>} : memref<16x16x104xf32, #tpu.memory_space<vmem>>, vector<16x16x4xf32>,
    %c3_97 = arith.constant 3 : index
    %c3_98 = arith.constant 3 : index
    %c0_99 = arith.constant 0 : index
    %42 = vector.load %arg5[%c3_97, %c3_98, %c0_99] : memref<20x20x4xf32, #tpu.memory_space<vmem>>, vector<16x16x4xf32>
    %c0_100 = arith.constant 0 : index
    %c0_101 = arith.constant 0 : index
    %c72 = arith.constant 72 : index
    %43 = vector.load %arg6[%c0_100, %c0_101, %c72] : memref<16x16x104xf32, #tpu.memory_space<vmem>>, vector<16x16x4xf32>
    tpu.vector_store %arg6[%c0_100, %c0_101, %c72], %42 {strides = array<i32>} : memref<16x16x104xf32, #tpu.memory_space<vmem>>, vector<16x16x4xf32>,
    %c3_102 = arith.constant 3 : index
    %c4_103 = arith.constant 4 : index
    %c0_104 = arith.constant 0 : index
    %44 = vector.load %arg5[%c3_102, %c4_103, %c0_104] : memref<20x20x4xf32, #tpu.memory_space<vmem>>, vector<16x16x4xf32>
    %c0_105 = arith.constant 0 : index
    %c0_106 = arith.constant 0 : index
    %c76 = arith.constant 76 : index
    %45 = vector.load %arg6[%c0_105, %c0_106, %c76] : memref<16x16x104xf32, #tpu.memory_space<vmem>>, vector<16x16x4xf32>
    tpu.vector_store %arg6[%c0_105, %c0_106, %c76], %44 {strides = array<i32>} : memref<16x16x104xf32, #tpu.memory_space<vmem>>, vector<16x16x4xf32>,
    %c4_107 = arith.constant 4 : index
    %c0_108 = arith.constant 0 : index
    %c0_109 = arith.constant 0 : index
    %46 = vector.load %arg5[%c4_107, %c0_108, %c0_109] : memref<20x20x4xf32, #tpu.memory_space<vmem>>, vector<16x16x4xf32>
    %c0_110 = arith.constant 0 : index
    %c0_111 = arith.constant 0 : index
    %c80 = arith.constant 80 : index
    %47 = vector.load %arg6[%c0_110, %c0_111, %c80] : memref<16x16x104xf32, #tpu.memory_space<vmem>>, vector<16x16x4xf32>
    tpu.vector_store %arg6[%c0_110, %c0_111, %c80], %46 {strides = array<i32>} : memref<16x16x104xf32, #tpu.memory_space<vmem>>, vector<16x16x4xf32>,
    %c4_112 = arith.constant 4 : index
    %c1_113 = arith.constant 1 : index
    %c0_114 = arith.constant 0 : index
    %48 = vector.load %arg5[%c4_112, %c1_113, %c0_114] : memref<20x20x4xf32, #tpu.memory_space<vmem>>, vector<16x16x4xf32>
    %c0_115 = arith.constant 0 : index
    %c0_116 = arith.constant 0 : index
    %c84 = arith.constant 84 : index
    %49 = vector.load %arg6[%c0_115, %c0_116, %c84] : memref<16x16x104xf32, #tpu.memory_space<vmem>>, vector<16x16x4xf32>
    tpu.vector_store %arg6[%c0_115, %c0_116, %c84], %48 {strides = array<i32>} : memref<16x16x104xf32, #tpu.memory_space<vmem>>, vector<16x16x4xf32>,
    %c4_117 = arith.constant 4 : index
    %c2_118 = arith.constant 2 : index
    %c0_119 = arith.constant 0 : index
    %50 = vector.load %arg5[%c4_117, %c2_118, %c0_119] : memref<20x20x4xf32, #tpu.memory_space<vmem>>, vector<16x16x4xf32>
    %c0_120 = arith.constant 0 : index
    %c0_121 = arith.constant 0 : index
    %c88 = arith.constant 88 : index
    %51 = vector.load %arg6[%c0_120, %c0_121, %c88] : memref<16x16x104xf32, #tpu.memory_space<vmem>>, vector<16x16x4xf32>
    tpu.vector_store %arg6[%c0_120, %c0_121, %c88], %50 {strides = array<i32>} : memref<16x16x104xf32, #tpu.memory_space<vmem>>, vector<16x16x4xf32>,
    %c4_122 = arith.constant 4 : index
    %c3_123 = arith.constant 3 : index
    %c0_124 = arith.constant 0 : index
    %52 = vector.load %arg5[%c4_122, %c3_123, %c0_124] : memref<20x20x4xf32, #tpu.memory_space<vmem>>, vector<16x16x4xf32>
    %c0_125 = arith.constant 0 : index
    %c0_126 = arith.constant 0 : index
    %c92 = arith.constant 92 : index
    %53 = vector.load %arg6[%c0_125, %c0_126, %c92] : memref<16x16x104xf32, #tpu.memory_space<vmem>>, vector<16x16x4xf32>
    tpu.vector_store %arg6[%c0_125, %c0_126, %c92], %52 {strides = array<i32>} : memref<16x16x104xf32, #tpu.memory_space<vmem>>, vector<16x16x4xf32>,
    %c4_127 = arith.constant 4 : index
    %c4_128 = arith.constant 4 : index
    %c0_129 = arith.constant 0 : index
    %54 = vector.load %arg5[%c4_127, %c4_128, %c0_129] : memref<20x20x4xf32, #tpu.memory_space<vmem>>, vector<16x16x4xf32>
    %c0_130 = arith.constant 0 : index
    %c0_131 = arith.constant 0 : index
    %c96 = arith.constant 96 : index
    %55 = vector.load %arg6[%c0_130, %c0_131, %c96] : memref<16x16x104xf32, #tpu.memory_space<vmem>>, vector<16x16x4xf32>
    tpu.vector_store %arg6[%c0_130, %c0_131, %c96], %54 {strides = array<i32>} : memref<16x16x104xf32, #tpu.memory_space<vmem>>, vector<16x16x4xf32>,
    %c1_132 = arith.constant 1 : index
    %c1_133 = arith.constant 1 : index
    %c0_134 = arith.constant 0 : index
    %56 = vector.load %arg5[%c1_132, %c1_133, %c0_134] : memref<20x20x4xf32, #tpu.memory_space<vmem>>, vector<18x18x4xf32>
    %57 = tpu.iota {dimensions = array<i32: 0>} : vector<18x18x4xi32>
    %58 = tpu.iota {dimensions = array<i32: 1>} : vector<18x18x4xi32>
    %c0_i32 = arith.constant 0 : i32
    %59 = vector.broadcast %c0_i32 : i32 to vector<18x18x4xi32>
    %60 = arith.cmpi eq, %57, %59 : vector<18x18x4xi32>
    %c17_i32 = arith.constant 17 : i32
    %61 = vector.broadcast %c17_i32 : i32 to vector<18x18x4xi32>
    %62 = arith.cmpi eq, %57, %61 : vector<18x18x4xi32>
    %63 = arith.ori %60, %62 : vector<18x18x4xi1>
    %c0_i32_135 = arith.constant 0 : i32
    %64 = vector.broadcast %c0_i32_135 : i32 to vector<18x18x4xi32>
    %65 = arith.cmpi eq, %58, %64 : vector<18x18x4xi32>
    %66 = arith.ori %63, %65 : vector<18x18x4xi1>
    %c17_i32_136 = arith.constant 17 : i32
    %67 = vector.broadcast %c17_i32_136 : i32 to vector<18x18x4xi32>
    %68 = arith.cmpi eq, %58, %67 : vector<18x18x4xi32>
    %69 = arith.ori %66, %68 : vector<18x18x4xi1>
    %cst_137 = arith.constant 0xFF800000 : f32
    %70 = vector.broadcast %cst_137 : f32 to vector<18x18x4xf32>
    %71 = arith.select %69, %70, %56 : vector<18x18x4xi1>, vector<18x18x4xf32>
    %72 = vector.extract_strided_slice %71 {offsets = [0, 0, 0], sizes = [16, 16, 4], strides = [1, 1, 1]} : vector<18x18x4xf32> to vector<16x16x4xf32>
    %73 = vector.extract_strided_slice %71 {offsets = [0, 1, 0], sizes = [16, 16, 4], strides = [1, 1, 1]} : vector<18x18x4xf32> to vector<16x16x4xf32>
    %74 = arith.maximumf %72, %73 : vector<16x16x4xf32>
    %75 = vector.extract_strided_slice %71 {offsets = [0, 2, 0], sizes = [16, 16, 4], strides = [1, 1, 1]} : vector<18x18x4xf32> to vector<16x16x4xf32>
    %76 = arith.maximumf %74, %75 : vector<16x16x4xf32>
    %77 = vector.extract_strided_slice %71 {offsets = [1, 0, 0], sizes = [16, 16, 4], strides = [1, 1, 1]} : vector<18x18x4xf32> to vector<16x16x4xf32>
    %78 = arith.maximumf %76, %77 : vector<16x16x4xf32>
    %79 = vector.extract_strided_slice %71 {offsets = [1, 1, 0], sizes = [16, 16, 4], strides = [1, 1, 1]} : vector<18x18x4xf32> to vector<16x16x4xf32>
    %80 = arith.maximumf %78, %79 : vector<16x16x4xf32>
    %81 = vector.extract_strided_slice %71 {offsets = [1, 2, 0], sizes = [16, 16, 4], strides = [1, 1, 1]} : vector<18x18x4xf32> to vector<16x16x4xf32>
    %82 = arith.maximumf %80, %81 : vector<16x16x4xf32>
    %83 = vector.extract_strided_slice %71 {offsets = [2, 0, 0], sizes = [16, 16, 4], strides = [1, 1, 1]} : vector<18x18x4xf32> to vector<16x16x4xf32>
    %84 = arith.maximumf %82, %83 : vector<16x16x4xf32>
    %85 = vector.extract_strided_slice %71 {offsets = [2, 1, 0], sizes = [16, 16, 4], strides = [1, 1, 1]} : vector<18x18x4xf32> to vector<16x16x4xf32>
    %86 = arith.maximumf %84, %85 : vector<16x16x4xf32>
    %87 = vector.extract_strided_slice %71 {offsets = [2, 2, 0], sizes = [16, 16, 4], strides = [1, 1, 1]} : vector<18x18x4xf32> to vector<16x16x4xf32>
    %88 = arith.maximumf %86, %87 : vector<16x16x4xf32>
    %c0_138 = arith.constant 0 : index
    %c0_139 = arith.constant 0 : index
    %c100 = arith.constant 100 : index
    %89 = vector.load %arg6[%c0_138, %c0_139, %c100] : memref<16x16x104xf32, #tpu.memory_space<vmem>>, vector<16x16x4xf32>
    tpu.vector_store %arg6[%c0_138, %c0_139, %c100], %88 {strides = array<i32>} : memref<16x16x104xf32, #tpu.memory_space<vmem>>, vector<16x16x4xf32>,
    %c0_140 = arith.constant 0 : index
    %c0_141 = arith.constant 0 : index
    %c0_142 = arith.constant 0 : index
    %90 = vector.load %arg6[%c0_140, %c0_141, %c0_142] : memref<16x16x104xf32, #tpu.memory_space<vmem>>, vector<16x16x104xf32>
    %91 = vector.shape_cast %90 : vector<16x16x104xf32> to vector<256x104xf32>
    %92 = arith.truncf %91 : vector<256x104xf32> to vector<256x104xbf16>
    %c0_143 = arith.constant 0 : index
    %c0_144 = arith.constant 0 : index
    %93 = vector.load %arg2[%c0_143, %c0_144] : memref<104x8xbf16, #tpu.memory_space<vmem>>, vector<104x8xbf16>
    %cst_145 = arith.constant dense<0.000000e+00> : vector<256x8xf32>
    %94 = tpu.matmul %92, %93, %cst_145 {dimension_numbers = #tpu.dot_dimension_numbers<[1], [0], [0], [1], [0, 0, 1, 1], [], []>} : vector<256x104xbf16>, vector<104x8xbf16>, vector<256x8xf32> -> vector<256x8xf32>
    %c0_146 = arith.constant 0 : index
    %c0_147 = arith.constant 0 : index
    %95 = vector.load %arg3[%c0_146, %c0_147] : memref<1x8xf32, #tpu.memory_space<vmem>>, vector<1x8xf32>
    %96 = vector.broadcast %95 : vector<1x8xf32> to vector<256x8xf32>
    %97 = arith.addf %94, %96 : vector<256x8xf32>
    %cst_148 = arith.constant 0.000000e+00 : f32
    %98 = vector.broadcast %cst_148 : f32 to vector<256x8xf32>
    %99 = arith.maximumf %97, %98 : vector<256x8xf32>
    %c0_149 = arith.constant 0 : index
    %c0_150 = arith.constant 0 : index
    %c0_151 = arith.constant 0 : index
    %100 = vector.load %arg4[%c0_149, %c0_150, %c0_151] : memref<1x256x8xf32, #tpu.memory_space<vmem>>, vector<1x256x8xf32>
    %101 = vector.shape_cast %100 : vector<1x256x8xf32> to vector<256x8xf32>
    %102 = vector.shape_cast %99 : vector<256x8xf32> to vector<1x256x8xf32>
    tpu.vector_store %arg4[%c0_149, %c0_150, %c0_151], %102 {strides = array<i32>} : memref<1x256x8xf32, #tpu.memory_space<vmem>>, vector<1x256x8xf32>,
    return
  }
  func.func @transform_0(%arg0: i32) -> (i32, i32, i32, i32) {
    %c0_i32 = arith.constant 0 : i32
    %c0_i32_0 = arith.constant 0 : i32
    %c0_i32_1 = arith.constant 0 : i32
    %c0_i32_2 = arith.constant 0 : i32
    return %arg0, %c0_i32, %c0_i32_0, %c0_i32_1 : i32, i32, i32, i32
  }
  func.func @transform_1(%arg0: i32) -> (i32, i32) {
    %c0_i32 = arith.constant 0 : i32
    %c0_i32_0 = arith.constant 0 : i32
    %c0_i32_1 = arith.constant 0 : i32
    return %c0_i32, %c0_i32_0 : i32, i32
  }
  func.func @transform_2(%arg0: i32) -> (i32, i32) {
    %c0_i32 = arith.constant 0 : i32
    %c0_i32_0 = arith.constant 0 : i32
    %c0_i32_1 = arith.constant 0 : i32
    return %c0_i32, %c0_i32_0 : i32, i32
  }
  func.func @transform_3(%arg0: i32) -> (i32, i32, i32) {
    %c0_i32 = arith.constant 0 : i32
    %c0_i32_0 = arith.constant 0 : i32
    %c0_i32_1 = arith.constant 0 : i32
    return %arg0, %c0_i32, %c0_i32_0 : i32, i32, i32
  }
}

</mosaic_0001>

<bundles_post_ra>
// kernel: tpu_custom_call.1
= control target key start
LH: loop header
LB: loop body
LE: loop exit
PB: predicated region body
PF: predicated region fallthrough
CT: control target
= control target key end

     0   :  { %s6651_s12 = smov 0   ;;  %s9628_s0 = inlined_call_operand.vmem [shape: bf16[2,16,16,4], index: 0, kind: input, shape index: {}]   ;;  %s9629_s1 = inlined_call_operand.vmem [shape: bf16[104,8], index: 1, kind: input, shape index: {}]   ;;  %s9630_s2 = inlined_call_operand.vmem [shape: f32[1,8], index: 2, kind: input, shape index: {}]   ;;  %s9631_s3 = inlined_call_operand.vmem [shape: f32[2,256,8], index: 3, kind: output, shape index: {}]  }
   0x1 LB: > { %s6326_s13 = sadd.s32 4294967295, %s6602_s12   ;;  %p6330_p0 = scmp.ge.s32.totalorder %s6602_s12, 1  ;;  %s6602_s12 = sphi %s6651_s12, %s13_s12  }
   0x2   : > { %p137_p1 = scmp.lt.s32.totalorder %s6602_s12, 3 }
   0x4   : > { %p138_p2 = pnand %p6330_p0, %p137_p1 }
   0x6   : > { %141 = sbr.rel (%p138_p2) target bundleno = 1987 (0x7c3), region = 32 }
   0xd   : > { %vm172_vm0 = vcmask 31744   ;;  %vm175_vm1 = vcmask 27648   ;;  %p6661_p3 = scmp.lt.s32.totalorder %s6326_s13, 1  ;;  %v6604_v0 = vmov 0.0   ;;  %s6605_s19 = smov 4   ;;  %vm555_vm2 = vcmask 64544  }
   0xe   : > { %177 = vst.msk [vmem:[#allocation2 + $0x18] sm:$0xff] %vm172_vm0, %v6604_v0  ;;  %178 = vst.msk [vmem:[#allocation2 + $0x20] sm:$0xff] %vm172_vm0, %v6604_v0  ;;  %s6606_s20 = smov 8   ;;  %s6607_s21 = smov 12   ;;  %vm748_vm3 = vcmask 97344   ;;  %vm941_vm4 = vcmask 130144  }
   0xf   : > { %173 = vst.msk [vmem:[#allocation2] sm:$0xff] %vm172_vm0, %v6604_v0  ;;  %174 = vst.msk [vmem:[#allocation2 + $0x8] sm:$0xff] %vm172_vm0, %v6604_v0  ;;  %s9714_s13 = smov (!%p6661_p3, %s6326_s13), 1  ;;  %s6608_s22 = smov 16   ;;  %vm1134_vm5 = vcmask 162944   ;;  %vm1328_vm6 = vcmask 195744  }
  0x10   : > { %180 = vst.msk [vmem:[#allocation2 + $0x30] sm:$0xff] %vm172_vm0, %v6604_v0  ;;  %181 = vst.msk [vmem:[#allocation2 + $0x38] sm:$0xff] %vm172_vm0, %v6604_v0  ;;  %s6361_s15 = sshll.u32 %s9714_s13, 7  ;;  %s6609_s23 = smov 20   ;;  %vm1521_vm7 = vcmask 228544   ;;  %vm1714_vm8 = vcmask 261344  }
  0x11   : > { %183 = vst.msk [vmem:[#allocation2 + $0x48] sm:$0xff] %vm172_vm0, %v6604_v0  ;;  %184 = vst.msk [vmem:[#allocation2 + $0x50] sm:$0xff] %vm172_vm0, %v6604_v0  ;;  %s6735_s18 = scalar_lea.vmem %s9628_s0, %s6361_s15  ;;  %s6610_s24 = smov 24   ;;  %vm1907_vm9 = vcmask 294144   ;;  %vm2100_vm10 = vcmask 326944   ;;  %vm2293_vm11 = vcmask 359744  }
  0x12   : > { %186 = vst.msk [vmem:[#allocation2 + $0x60] sm:$0xff] %vm172_vm0, %v6604_v0  ;;  %187 = vst.msk [vmem:[#allocation2 + $0x68] sm:$0xff] %vm172_vm0, %v6604_v0  ;;  %v6364_v1 = vld [vmem:[%s6735_s18] sm:$0xff]   ;;  %v6427_v2 = vld [vmem:[%s6735_s18 + $0x8] sm:$0xff]   ;;  %s6611_s25 = smov 28   ;;  %s6612_s26 = smov 32  }
  0x13   : > { %189 = vst.msk [vmem:[#allocation2 + $0x78] sm:$0xff] %vm172_vm0, %v6604_v0  ;;  %190 = vst.msk [vmem:[#allocation2 + $0x80] sm:$0xff] %vm172_vm0, %v6604_v0  ;;  %v6428_v3 = vld [vmem:[%s6735_s18 + $0x10] sm:$0xff]   ;;  %v6365_v4 = vunpack.c.l.bf16 %v6364_v1  ;;  %v6366_v5 = vunpack.c.h.bf16 %v6364_v1  ;;  %v6369_v6 = vunpack.c.l.bf16 %v6427_v2  ;;  %v6370_v7 = vunpack.c.h.bf16 %v6427_v2  ;;  %v6429_v8 = vld [vmem:[%s6735_s18 + $0x18] sm:$0xff]   ;;  %s6613_s27 = smov 36   ;;  %s6614_s28 = smov 40  }
  0x14   : > { %192 = vst.msk [vmem:[#allocation2 + $0x90] sm:$0xff] %vm172_vm0, %v6604_v0  ;;  %193 = vst.msk [vmem:[#allocation2 + $0x98] sm:$0xff] %vm172_vm0, %v6604_v0  ;;  %v6430_v9 = vld [vmem:[%s6735_s18 + $0x20] sm:$0xff]   ;;  %v6431_v10 = vld [vmem:[%s6735_s18 + $0x28] sm:$0xff]   ;;  %v6373_v14 = vunpack.c.l.bf16 %v6428_v3  ;;  %v6374_v15 = vunpack.c.h.bf16 %v6428_v3  ;;  %v6377_v16 = vunpack.c.l.bf16 %v6429_v8  ;;  %v6378_v17 = vunpack.c.h.bf16 %v6429_v8  ;;  %s6615_s29 = smov 44   ;;  %s6616_s30 = smov 48  }
  0x15   : > { %195 = vst.msk [vmem:[#allocation2 + $0xa8] sm:$0xff] %vm172_vm0, %v6604_v0  ;;  %196 = vst.msk [vmem:[#allocation2 + $0xb0] sm:$0xff] %vm172_vm0, %v6604_v0  ;;  %v397_v11 = vld [vmem:[#allocation2 + $0x19] sm:$0xff]  ;;  %v6381_v19 = vunpack.c.l.bf16 %v6430_v9  ;;  %v6382_v20 = vunpack.c.h.bf16 %v6430_v9  ;;  %v6385_v21 = vunpack.c.l.bf16 %v6431_v10  ;;  %v6386_v22 = vunpack.c.h.bf16 %v6431_v10  ;;  %v6432_v23 = vld [vmem:[%s6735_s18 + $0x30] sm:$0xff]   ;;  %s6617_s4 = smov 52   ;;  %s6618_s5 = smov 56  }
  0x16   : > { %198 = vst.msk [vmem:[#allocation2 + $0xc0] sm:$0xff] %vm172_vm0, %v6604_v0  ;;  %199 = vst.msk [vmem:[#allocation2 + $0xc8] sm:$0xff] %vm172_vm0, %v6604_v0  ;;  %v395_v12 = vld [vmem:[#allocation2 + $0x1] sm:$0xff]  ;;  %463 = vrot.lane.b32.xlu1 %v397_v11, %s6605_s19  ;;  %v6433_v24 = vld [vmem:[%s6735_s18 + $0x38] sm:$0xff]   ;;  %v6389_v25 = vunpack.c.l.bf16 %v6432_v23  ;;  %v6390_v26 = vunpack.c.h.bf16 %v6432_v23  ;;  %vm2486_vm12 = vcmask 392544   ;;  %vm2679_vm13 = vcmask 425344  }
  0x17   : > { %201 = vst.msk [vmem:[#allocation2 + $0xd8] sm:$0xff] %vm172_vm0, %v6604_v0  ;;  %202 = vst.msk [vmem:[#allocation2 + $0xe0] sm:$0xff] %vm172_vm0, %v6604_v0  ;;  %459 = vrot.lane.b32.xlu0 %v395_v12, %s6605_s19  ;;  %v6393_v27 = vunpack.c.l.bf16 %v6433_v24  ;;  %v6394_v28 = vunpack.c.h.bf16 %v6433_v24  ;;  %v6434_v29 = vld [vmem:[%s6735_s18 + $0x40] sm:$0xff]   ;;  %v6435_v30 = vld [vmem:[%s6735_s18 + $0x48] sm:$0xff]   ;;  %vm2872_vm14 = vcmask 458144   ;;  %s6619_s6 = smov 60  }
  0x18   : > { %204 = vst.msk [vmem:[#allocation2 + $0xf0] sm:$0xff] %vm172_vm0, %v6604_v0  ;;  %205 = vst.msk [vmem:[#allocation2 + $0xf8] sm:$0xff] %vm172_vm0, %v6604_v0  ;;  %v6436_v31 = vld [vmem:[%s6735_s18 + $0x50] sm:$0xff]   ;;  %v6397_v32 = vunpack.c.l.bf16 %v6434_v29  ;;  %v6398_v33 = vunpack.c.h.bf16 %v6434_v29  ;;  %v6401_v34 = vunpack.c.l.bf16 %v6435_v30  ;;  %v6402_v35 = vunpack.c.h.bf16 %v6435_v30  ;;  %v6437_v36 = vld [vmem:[%s6735_s18 + $0x58] sm:$0xff]   ;;  %s6620_s7 = smov 64   ;;  %s6621_s8 = smov 68  }
  0x19   : > { %207 = vst.msk [vmem:[#allocation2 + $0x108] sm:$0xff] %vm172_vm0, %v6604_v0  ;;  %208 = vst.msk [vmem:[#allocation2 + $0x110] sm:$0xff] %vm172_vm0, %v6604_v0  ;;  %v6438_v37 = vld [vmem:[%s6735_s18 + $0x60] sm:$0xff]   ;;  %v6439_v38 = vld [vmem:[%s6735_s18 + $0x68] sm:$0xff]   ;;  %v6405_v39 = vunpack.c.l.bf16 %v6436_v31  ;;  %v6406_v40 = vunpack.c.h.bf16 %v6436_v31  ;;  %v6409_v41 = vunpack.c.l.bf16 %v6437_v36  ;;  %v6410_v42 = vunpack.c.h.bf16 %v6437_v36  ;;  %s6622_s9 = smov 72   ;;  %s6623_s10 = smov 76  }
  0x1a   : > { %210 = vst.msk [vmem:[#allocation2 + $0x120] sm:$0xff] %vm172_vm0, %v6604_v0  ;;  %211 = vst.msk [vmem:[#allocation2 + $0x128] sm:$0xff] %vm172_vm0, %v6604_v0  ;;  %v6413_v43 = vunpack.c.l.bf16 %v6438_v37  ;;  %v6414_v44 = vunpack.c.h.bf16 %v6438_v37  ;;  %v6417_v45 = vunpack.c.l.bf16 %v6439_v38  ;;  %v6418_v46 = vunpack.c.h.bf16 %v6439_v38  ;;  %v6775_v47 = vld [vmem:[#allocation2 + $0x18] sm:$0xff]  ;;  %v331_v48 = vld [vmem:[#allocation2] sm:$0xff]  ;;  %s6624_s11 = smov 80   ;;  %s6625_s14 = smov 84  }
  0x1b   : > { %213 = vst.msk [vmem:[#allocation2 + $0x138] sm:$0xff] %vm172_vm0, %v6604_v0  ;;  %214 = vst.msk [vmem:[#allocation2 + $0x140] sm:$0xff] %vm172_vm0, %v6604_v0  ;;  %v6784_v49 = vld [vmem:[#allocation2 + $0x20] sm:$0xff]  ;;  %v332_v50 = vld [vmem:[#allocation2 + $0x8] sm:$0xff]  ;;  %vm3065_vm15 = vcmask 490944   ;;  %s6627_s15 = smov 88  }
  0x1c   : > { %216 = vst.msk [vmem:[#allocation2 + $0x150] sm:$0xff] %vm172_vm0, %v6604_v0  ;;  %217 = vst.msk [vmem:[#allocation2 + $0x158] sm:$0xff] %vm172_vm0, %v6604_v0  ;;  %s6628_s16 = smov 92  }
  0x1d   : > { %219 = vst.msk [vmem:[#allocation2 + $0x168] sm:$0xff] %vm172_vm0, %v6604_v0  ;;  %220 = vst.msk [vmem:[#allocation2 + $0x170] sm:$0xff] %vm172_vm0, %v6604_v0 }
  0x1e   : > { %222 = vst.msk [vmem:[#allocation2 + $0x180] sm:$0xff] %vm172_vm0, %v6604_v0  ;;  %223 = vst.msk [vmem:[#allocation2 + $0x188] sm:$0xff] %vm172_vm0, %v6604_v0 }
  0x1f   : > { %225 = vst.msk [vmem:[#allocation2 + $0x198] sm:$0xff] %vm172_vm0, %v6604_v0  ;;  %226 = vst.msk [vmem:[#allocation2 + $0x1a0] sm:$0xff] %vm172_vm0, %v6604_v0 }
  0x20   : > { %228 = vst.msk [vmem:[#allocation2 + $0x1b0] sm:$0xff] %vm172_vm0, %v6604_v0  ;;  %229 = vst.msk [vmem:[#allocation2 + $0x1b8] sm:$0xff] %vm172_vm0, %v6604_v0 }
  0x21   : > { %231 = vst.msk [vmem:[#allocation2 + $0x1c8] sm:$0xff] %vm172_vm0, %v6604_v0  ;;  %232 = vst.msk [vmem:[#allocation2 + $0x1d0] sm:$0xff] %vm172_vm0, %v6604_v0 }
  0x22   : > { %179 = vst.msk [vmem:[#allocation2 + $0x28] sm:$0xf] %vm175_vm1, %v6604_v0  ;;  %176 = vst.msk [vmem:[#allocation2 + $0x10] sm:$0xf] %vm175_vm1, %v6604_v0 }
  0x23   : > { %182 = vst.msk [vmem:[#allocation2 + $0x40] sm:$0xf] %vm175_vm1, %v6604_v0  ;;  %185 = vst.msk [vmem:[#allocation2 + $0x58] sm:$0xf] %vm175_vm1, %v6604_v0 }
  0x24   : > { %188 = vst.msk [vmem:[#allocation2 + $0x70] sm:$0xf] %vm175_vm1, %v6604_v0  ;;  %191 = vst.msk [vmem:[#allocation2 + $0x88] sm:$0xf] %vm175_vm1, %v6604_v0 }
  0x25   : > { %194 = vst.msk [vmem:[#allocation2 + $0xa0] sm:$0xf] %vm175_vm1, %v6604_v0  ;;  %197 = vst.msk [vmem:[#allocation2 + $0xb8] sm:$0xf] %vm175_vm1, %v6604_v0 }
  0x26   : > { %200 = vst.msk [vmem:[#allocation2 + $0xd0] sm:$0xf] %vm175_vm1, %v6604_v0  ;;  %203 = vst.msk [vmem:[#allocation2 + $0xe8] sm:$0xf] %vm175_vm1, %v6604_v0 }
  0x27   : > { %206 = vst.msk [vmem:[#allocation2 + $0x100] sm:$0xf] %vm175_vm1, %v6604_v0  ;;  %209 = vst.msk [vmem:[#allocation2 + $0x118] sm:$0xf] %vm175_vm1, %v6604_v0 }
  0x28   : > { %212 = vst.msk [vmem:[#allocation2 + $0x130] sm:$0xf] %vm175_vm1, %v6604_v0  ;;  %215 = vst.msk [vmem:[#allocation2 + $0x148] sm:$0xf] %vm175_vm1, %v6604_v0 }
  0x29   : > { %218 = vst.msk [vmem:[#allocation2 + $0x160] sm:$0xf] %vm175_vm1, %v6604_v0  ;;  %221 = vst.msk [vmem:[#allocation2 + $0x178] sm:$0xf] %vm175_vm1, %v6604_v0  ;;  %v398_v13 = vld [vmem:[#allocation2 + $0x21] sm:$0xff]  ;;  %v396_v18 = vld [vmem:[#allocation2 + $0x9] sm:$0xff] }
  0x2a   : > { %224 = vst.msk [vmem:[#allocation2 + $0x190] sm:$0xf] %vm175_vm1, %v6604_v0  ;;  %227 = vst.msk [vmem:[#allocation2 + $0x1a8] sm:$0xf] %vm175_vm1, %v6604_v0  ;;  %465 = vrot.lane.b32.xlu1 %v398_v13, %s6605_s19  ;;  %461 = vrot.lane.b32.xlu0 %v396_v18, %s6605_s19 }
  0x2b   : > { %230 = vst.msk [vmem:[#allocation2 + $0x1c0] sm:$0xf] %vm175_vm1, %v6604_v0  ;;  %233 = vst.msk [vmem:[#allocation2 + $0x1d8] sm:$0xf] %vm175_vm1, %v6604_v0  ;;  %vm3452_vm1 = vcmask 556544  }
  0x2c   : > { %299 = vst.msk [vmem:[#allocation2 + $0x32] sm:$0xff] %vm172_vm0, %v6365_v4  ;;  %300 = vst.msk [vmem:[#allocation2 + $0x3a] sm:$0xff] %vm172_vm0, %v6366_v5 }
  0x2d   : > { %301 = vst.msk [vmem:[#allocation2 + $0x4a] sm:$0xff] %vm172_vm0, %v6369_v6  ;;  %302 = vst.msk [vmem:[#allocation2 + $0x52] sm:$0xff] %vm172_vm0, %v6370_v7 }
  0x2e   : > { %303 = vst.msk [vmem:[#allocation2 + $0x62] sm:$0xff] %vm172_vm0, %v6373_v14  ;;  %304 = vst.msk [vmem:[#allocation2 + $0x6a] sm:$0xff] %vm172_vm0, %v6374_v15 }
  0x2f   : > { %305 = vst.msk [vmem:[#allocation2 + $0x7a] sm:$0xff] %vm172_vm0, %v6377_v16  ;;  %306 = vst.msk [vmem:[#allocation2 + $0x82] sm:$0xff] %vm172_vm0, %v6378_v17 }
  0x30   : > { %307 = vst.msk [vmem:[#allocation2 + $0x92] sm:$0xff] %vm172_vm0, %v6381_v19  ;;  %308 = vst.msk [vmem:[#allocation2 + $0x9a] sm:$0xff] %vm172_vm0, %v6382_v20 }
  0x31   : > { %309 = vst.msk [vmem:[#allocation2 + $0xaa] sm:$0xff] %vm172_vm0, %v6385_v21  ;;  %310 = vst.msk [vmem:[#allocation2 + $0xb2] sm:$0xff] %vm172_vm0, %v6386_v22 }
  0x32   : > { %311 = vst.msk [vmem:[#allocation2 + $0xc2] sm:$0xff] %vm172_vm0, %v6389_v25  ;;  %312 = vst.msk [vmem:[#allocation2 + $0xca] sm:$0xff] %vm172_vm0, %v6390_v26 }
  0x33   : > { %313 = vst.msk [vmem:[#allocation2 + $0xda] sm:$0xff] %vm172_vm0, %v6393_v27  ;;  %314 = vst.msk [vmem:[#allocation2 + $0xe2] sm:$0xff] %vm172_vm0, %v6394_v28  ;;  %v400_v51 = vld [vmem:[#allocation2 + $0x39] sm:$0xff]  ;;  %v399_v52 = vld [vmem:[#allocation2 + $0x31] sm:$0xff] }
  0x34   : > { %315 = vst.msk [vmem:[#allocation2 + $0xf2] sm:$0xff] %vm172_vm0, %v6397_v32  ;;  %316 = vst.msk [vmem:[#allocation2 + $0xfa] sm:$0xff] %vm172_vm0, %v6398_v33  ;;  %469 = vrot.lane.b32.xlu1 %v400_v51, %s6605_s19  ;;  %467 = vrot.lane.b32.xlu0 %v399_v52, %s6605_s19  ;;  %v402_v53 = vld [vmem:[#allocation2 + $0x51] sm:$0xff]  ;;  %v401_v54 = vld [vmem:[#allocation2 + $0x49] sm:$0xff] }
  0x35   : > { %317 = vst.msk [vmem:[#allocation2 + $0x10a] sm:$0xff] %vm172_vm0, %v6401_v34  ;;  %318 = vst.msk [vmem:[#allocation2 + $0x112] sm:$0xff] %vm172_vm0, %v6402_v35  ;;  %v404_v55 = vld [vmem:[#allocation2 + $0x69] sm:$0xff]  ;;  %v403_v56 = vld [vmem:[#allocation2 + $0x61] sm:$0xff] }
  0x36   : > { %319 = vst.msk [vmem:[#allocation2 + $0x122] sm:$0xff] %vm172_vm0, %v6405_v39  ;;  %320 = vst.msk [vmem:[#allocation2 + $0x12a] sm:$0xff] %vm172_vm0, %v6406_v40  ;;  %v406_v57 = vld [vmem:[#allocation2 + $0x81] sm:$0xff]  ;;  %v405_v58 = vld [vmem:[#allocation2 + $0x79] sm:$0xff] }
  0x37   : > { %321 = vst.msk [vmem:[#allocation2 + $0x13a] sm:$0xff] %vm172_vm0, %v6409_v41  ;;  %322 = vst.msk [vmem:[#allocation2 + $0x142] sm:$0xff] %vm172_vm0, %v6410_v42  ;;  %v408_v59 = vld [vmem:[#allocation2 + $0x99] sm:$0xff]  ;;  %v407_v60 = vld [vmem:[#allocation2 + $0x91] sm:$0xff] }
  0x38   : > { %365 = vst.msk [vmem:[#allocation3 + $0x10] sm:$0xff] %vm172_vm0, %v6775_v47  ;;  %363 = vst.msk [vmem:[#allocation3] sm:$0xff] %vm172_vm0, %v331_v48  ;;  %473 = vrot.lane.b32.xlu1 %v402_v53, %s6605_s19  ;;  %471 = vrot.lane.b32.xlu0 %v401_v54, %s6605_s19  ;;  %v410_v61 = vld [vmem:[#allocation2 + $0xb1] sm:$0xff]  ;;  %v409_v62 = vld [vmem:[#allocation2 + $0xa9] sm:$0xff] }
  0x39   : > { %323 = vst.msk [vmem:[#allocation2 + $0x152] sm:$0xff] %vm172_vm0, %v6413_v43  ;;  %324 = vst.msk [vmem:[#allocation2 + $0x15a] sm:$0xff] %vm172_vm0, %v6414_v44  ;;  %v6803_v63 = vld [vmem:[#allocation2 + $0x38] sm:$0xff]  ;;  %v6805_v0 = vld [vmem:[#allocation2 + $0x30] sm:$0xff] }
  0x3a   : > { %325 = vst.msk [vmem:[#allocation2 + $0x16a] sm:$0xff] %vm172_vm0, %v6417_v45  ;;  %326 = vst.msk [vmem:[#allocation2 + $0x172] sm:$0xff] %vm172_vm0, %v6418_v46  ;;  %v6811_v1 = vld [vmem:[#allocation2 + $0x50] sm:$0xff]  ;;  %v6813_v2 = vld [vmem:[#allocation2 + $0x48] sm:$0xff] }
  0x3b   : > { %366 = vst.msk [vmem:[#allocation3 + $0x18] sm:$0xff] %vm172_vm0, %v6784_v49  ;;  %364 = vst.msk [vmem:[#allocation3 + $0x8] sm:$0xff] %vm172_vm0, %v332_v50  ;;  %v6819_v3 = vld [vmem:[#allocation2 + $0x68] sm:$0xff]  ;;  %v6821_v4 = vld [vmem:[#allocation2 + $0x60] sm:$0xff] }
  0x3c   : > { %477 = vrot.lane.b32.xlu1 %v404_v55, %s6605_s19  ;;  %475 = vrot.lane.b32.xlu0 %v403_v56, %s6605_s19  ;;  %368 = vst.msk [vmem:[#allocation3 + $0x28] sm:$0xff] %vm172_vm0, %v6803_v63  ;;  %367 = vst.msk [vmem:[#allocation3 + $0x20] sm:$0xff] %vm172_vm0, %v6805_v0  ;;  %v6823_v5 = vld [vmem:[#allocation2 + $0x80] sm:$0xff]  ;;  %v412_v6 = vld [vmem:[#allocation2 + $0xc9] sm:$0xff] }
  0x3d   : > { %370 = vst.msk [vmem:[#allocation3 + $0x38] sm:$0xff] %vm172_vm0, %v6811_v1  ;;  %369 = vst.msk [vmem:[#allocation3 + $0x30] sm:$0xff] %vm172_vm0, %v6813_v2  ;;  %v6833_v7 = vld [vmem:[#allocation2 + $0x78] sm:$0xff]  ;;  %v411_v8 = vld [vmem:[#allocation2 + $0xc1] sm:$0xff] }
  0x3e   : > { %372 = vst.msk [vmem:[#allocation3 + $0x48] sm:$0xff] %vm172_vm0, %v6819_v3  ;;  %371 = vst.msk [vmem:[#allocation3 + $0x40] sm:$0xff] %vm172_vm0, %v6821_v4  ;;  %v6837_v9 = vld [vmem:[#allocation2 + $0x98] sm:$0xff]  ;;  %v6839_v10 = vld [vmem:[#allocation2 + $0x90] sm:$0xff] }
  0x3f   : > { %374 = vst.msk [vmem:[#allocation3 + $0x58] sm:$0xff] %vm172_vm0, %v6823_v5  ;;  %373 = vst.msk [vmem:[#allocation3 + $0x50] sm:$0xff] %vm172_vm0, %v6833_v7  ;;  %v6845_v11 = vld [vmem:[#allocation2 + $0xb0] sm:$0xff]  ;;  %v6847_v12 = vld [vmem:[#allocation2 + $0xa8] sm:$0xff] }
  0x40   : > { %481 = vrot.lane.b32.xlu1 %v406_v57, %s6605_s19  ;;  %479 = vrot.lane.b32.xlu0 %v405_v58, %s6605_s19  ;;  %376 = vst.msk [vmem:[#allocation3 + $0x68] sm:$0xff] %vm172_vm0, %v6837_v9  ;;  %375 = vst.msk [vmem:[#allocation3 + $0x60] sm:$0xff] %vm172_vm0, %v6839_v10  ;;  %v6853_v13 = vld [vmem:[#allocation2 + $0xc8] sm:$0xff]  ;;  %v6859_v15 = vld [vmem:[#allocation2 + $0xc0] sm:$0xff] }
  0x41   : > { %378 = vst.msk [vmem:[#allocation3 + $0x78] sm:$0xff] %vm172_vm0, %v6845_v11  ;;  %377 = vst.msk [vmem:[#allocation3 + $0x70] sm:$0xff] %vm172_vm0, %v6847_v12  ;;  %v414_v14 = vld [vmem:[#allocation2 + $0xe1] sm:$0xff]  ;;  %v413_v16 = vld [vmem:[#allocation2 + $0xd9] sm:$0xff] }
  0x42   : > { %380 = vst.msk [vmem:[#allocation3 + $0x88] sm:$0xff] %vm172_vm0, %v6853_v13  ;;  %379 = vst.msk [vmem:[#allocation3 + $0x80] sm:$0xff] %vm172_vm0, %v6859_v15  ;;  %v6863_v17 = vld [vmem:[#allocation2 + $0xe0] sm:$0xff]  ;;  %v6865_v18 = vld [vmem:[#allocation2 + $0xd8] sm:$0xff] }
  0x43   : > { %382 = vst.msk [vmem:[#allocation3 + $0x98] sm:$0xff] %vm172_vm0, %v6863_v17  ;;  %381 = vst.msk [vmem:[#allocation3 + $0x90] sm:$0xff] %vm172_vm0, %v6865_v18  ;;  %v6871_v19 = vld [vmem:[#allocation2 + $0xf8] sm:$0xff]  ;;  %v6873_v20 = vld [vmem:[#allocation2 + $0xf0] sm:$0xff] }
  0x44   : > { %485 = vrot.lane.b32.xlu1 %v408_v59, %s6605_s19  ;;  %483 = vrot.lane.b32.xlu0 %v407_v60, %s6605_s19  ;;  %384 = vst.msk [vmem:[#allocation3 + $0xa8] sm:$0xff] %vm172_vm0, %v6871_v19  ;;  %383 = vst.msk [vmem:[#allocation3 + $0xa0] sm:$0xff] %vm172_vm0, %v6873_v20  ;;  %v6879_v21 = vld [vmem:[#allocation2 + $0x110] sm:$0xff]  ;;  %v416_v22 = vld [vmem:[#allocation2 + $0xf9] sm:$0xff] }
  0x45   : > { %386 = vst.msk [vmem:[#allocation3 + $0xb8] sm:$0xff] %vm172_vm0, %v6879_v21  ;;  %v6885_v23 = vld [vmem:[#allocation2 + $0x108] sm:$0xff]  ;;  %v415_v24 = vld [vmem:[#allocation2 + $0xf1] sm:$0xff]  ;;  %v6891_v26 = vld [vmem:[#allocation2 + $0x120] sm:$0xff] }
  0x46   : > { %385 = vst.msk [vmem:[#allocation3 + $0xb0] sm:$0xff] %vm172_vm0, %v6885_v23  ;;  %v6889_v25 = vld [vmem:[#allocation2 + $0x128] sm:$0xff]  ;;  %387 = vst.msk [vmem:[#allocation3 + $0xc0] sm:$0xff] %vm172_vm0, %v6891_v26  ;;  %v6897_v27 = vld [vmem:[#allocation2 + $0x140] sm:$0xff] }
  0x47   : > { %388 = vst.msk [vmem:[#allocation3 + $0xc8] sm:$0xff] %vm172_vm0, %v6889_v25  ;;  %v6899_v28 = vld [vmem:[#allocation2 + $0x138] sm:$0xff]  ;;  %390 = vst.msk [vmem:[#allocation3 + $0xd8] sm:$0xff] %vm172_vm0, %v6897_v27  ;;  %v417_v31 = vld [vmem:[#allocation2 + $0x109] sm:$0xff] }
  0x48   : > { %489 = vrot.lane.b32.xlu1 %v410_v61, %s6605_s19  ;;  %487 = vrot.lane.b32.xlu0 %v409_v62, %s6605_s19  ;;  %389 = vst.msk [vmem:[#allocation3 + $0xd0] sm:$0xff] %vm172_vm0, %v6899_v28  ;;  %v6907_v29 = vld [vmem:[#allocation2 + $0x158] sm:$0xff]  ;;  %v6911_v32 = vld [vmem:[#allocation2 + $0x150] sm:$0xff]  ;;  %v419_v35 = vld [vmem:[#allocation2 + $0x121] sm:$0xff] }
  0x49   : > { %v418_v30 = vld [vmem:[#allocation2 + $0x111] sm:$0xff]  ;;  %392 = vst.msk [vmem:[#allocation3 + $0xe8] sm:$0xff] %vm172_vm0, %v6907_v29  ;;  %391 = vst.msk [vmem:[#allocation3 + $0xe0] sm:$0xff] %vm172_vm0, %v6911_v32  ;;  %v420_v34 = vld [vmem:[#allocation2 + $0x129] sm:$0xff] }
  0x4a   : > { %v6917_v33 = vld [vmem:[#allocation2 + $0x170] sm:$0xff]  ;;  %v6921_v36 = vld [vmem:[#allocation2 + $0x168] sm:$0xff]  ;;  %v421_v38 = vld [vmem:[#allocation2 + $0x139] sm:$0xff] }
  0x4b   : > { %394 = vst.msk [vmem:[#allocation3 + $0xf8] sm:$0xff] %vm172_vm0, %v6917_v33  ;;  %393 = vst.msk [vmem:[#allocation3 + $0xf0] sm:$0xff] %vm172_vm0, %v6921_v36  ;;  %v422_v37 = vld [vmem:[#allocation2 + $0x141] sm:$0xff]  ;;  %v424_v39 = vld [vmem:[#allocation2 + $0x159] sm:$0xff] }
  0x4c   : > { %493 = vrot.lane.b32.xlu1 %v412_v6, %s6605_s19  ;;  %491 = vrot.lane.b32.xlu0 %v411_v8, %s6605_s19  ;;  %v423_v40 = vld [vmem:[#allocation2 + $0x151] sm:$0xff]  ;;  %v425_v42 = vld [vmem:[#allocation2 + $0x169] sm:$0xff]  ;;  %v590_v46 = vld [vmem:[#allocation2 + $0x1a] sm:$0xff] }
  0x4d   : > { %v426_v41 = vld [vmem:[#allocation2 + $0x171] sm:$0xff]  ;;  %v588_v44 = vld [vmem:[#allocation2 + $0x2] sm:$0xff]  ;;  %v593_v48 = vld [vmem:[#allocation2 + $0x3a] sm:$0xff] }
  0x4e   : > { %v589_v43 = vld [vmem:[#allocation2 + $0xa] sm:$0xff]  ;;  %v591_v45 = vld [vmem:[#allocation2 + $0x22] sm:$0xff]  ;;  %v592_v50 = vld [vmem:[#allocation2 + $0x32] sm:$0xff] }
  0x4f   : > { %v595_v51 = vld [vmem:[#allocation2 + $0x52] sm:$0xff]  ;;  %v594_v52 = vld [vmem:[#allocation2 + $0x4a] sm:$0xff]  ;;  %v596_v54 = vld [vmem:[#allocation2 + $0x62] sm:$0xff] }
  0x50   : > { %497 = vrot.lane.b32.xlu1 %v414_v14, %s6605_s19  ;;  %495 = vrot.lane.b32.xlu0 %v413_v16, %s6605_s19  ;;  %v597_v53 = vld [vmem:[#allocation2 + $0x6a] sm:$0xff]  ;;  %v599_v55 = vld [vmem:[#allocation2 + $0x82] sm:$0xff]  ;;  %v598_v56 = vld [vmem:[#allocation2 + $0x7a] sm:$0xff] }
  0x51   : > { %v601_v57 = vld [vmem:[#allocation2 + $0x9a] sm:$0xff]  ;;  %v600_v58 = vld [vmem:[#allocation2 + $0x92] sm:$0xff]  ;;  %v602_v60 = vld [vmem:[#allocation2 + $0xaa] sm:$0xff] }
  0x52   : > { %v603_v59 = vld [vmem:[#allocation2 + $0xb2] sm:$0xff]  ;;  %v605_v61 = vld [vmem:[#allocation2 + $0xca] sm:$0xff]  ;;  %v604_v62 = vld [vmem:[#allocation2 + $0xc2] sm:$0xff] }
  0x53   : > { %v607_v6 = vld [vmem:[#allocation2 + $0xe2] sm:$0xff]  ;;  %v606_v8 = vld [vmem:[#allocation2 + $0xda] sm:$0xff]  ;;  %v608_v16 = vld [vmem:[#allocation2 + $0xf2] sm:$0xff] }
  0x54   : > { %501 = vrot.lane.b32.xlu1 %v416_v22, %s6605_s19  ;;  %499 = vrot.lane.b32.xlu0 %v415_v24, %s6605_s19  ;;  %v609_v14 = vld [vmem:[#allocation2 + $0xfa] sm:$0xff]  ;;  %v611_v22 = vld [vmem:[#allocation2 + $0x112] sm:$0xff]  ;;  %v610_v24 = vld [vmem:[#allocation2 + $0x10a] sm:$0xff] }
  0x58   : > { %505 = vrot.lane.b32.xlu1 %v418_v30, %s6605_s19  ;;  %503 = vrot.lane.b32.xlu0 %v417_v31, %s6605_s19  ;;  %v613_v30 = vld [vmem:[#allocation2 + $0x12a] sm:$0xff]  ;;  %v612_v31 = vld [vmem:[#allocation2 + $0x122] sm:$0xff] }
  0x5c   : > { %509 = vrot.lane.b32.xlu1 %v420_v34, %s6605_s19  ;;  %507 = vrot.lane.b32.xlu0 %v419_v35, %s6605_s19  ;;  %v615_v34 = vld [vmem:[#allocation2 + $0x142] sm:$0xff]  ;;  %v614_v35 = vld [vmem:[#allocation2 + $0x13a] sm:$0xff] }
  0x60   : > { %513 = vrot.lane.b32.xlu1 %v422_v37, %s6605_s19  ;;  %511 = vrot.lane.b32.xlu0 %v421_v38, %s6605_s19 }
  0x64   : > { %517 = vrot.lane.b32.xlu1 %v424_v39, %s6605_s19  ;;  %515 = vrot.lane.b32.xlu0 %v423_v40, %s6605_s19  ;;  %v617_v39 = vld [vmem:[#allocation2 + $0x15a] sm:$0xff]  ;;  %v616_v40 = vld [vmem:[#allocation2 + $0x152] sm:$0xff] }
  0x68   : > { %521 = vrot.lane.b32.xlu1 %v426_v41, %s6605_s19  ;;  %519 = vrot.lane.b32.xlu0 %v425_v42, %s6605_s19 }
  0x6c   : > { %654 = vrot.lane.b32.xlu1 %v589_v43, %s6606_s20  ;;  %652 = vrot.lane.b32.xlu0 %v588_v44, %s6606_s20  ;;  %v619_v43 = vld [vmem:[#allocation2 + $0x172] sm:$0xff]  ;;  %v618_v44 = vld [vmem:[#allocation2 + $0x16a] sm:$0xff] }
  0x70   : > { %658 = vrot.lane.b32.xlu1 %v591_v45, %s6606_s20  ;;  %656 = vrot.lane.b32.xlu0 %v590_v46, %s6606_s20 }
  0x74   : > { %662 = vrot.lane.b32.xlu1 %v593_v48, %s6606_s20  ;;  %660 = vrot.lane.b32.xlu0 %v592_v50, %s6606_s20  ;;  %v782_v48 = vld [vmem:[#allocation2 + $0xb] sm:$0xff]  ;;  %v781_v50 = vld [vmem:[#allocation2 + $0x3] sm:$0xff] }
  0x78   : > { %666 = vrot.lane.b32.xlu1 %v595_v51, %s6606_s20  ;;  %664 = vrot.lane.b32.xlu0 %v594_v52, %s6606_s20 }
  0x7c   : > { %670 = vrot.lane.b32.xlu1 %v597_v53, %s6606_s20  ;;  %668 = vrot.lane.b32.xlu0 %v596_v54, %s6606_s20  ;;  %v784_v53 = vld [vmem:[#allocation2 + $0x23] sm:$0xff]  ;;  %v783_v54 = vld [vmem:[#allocation2 + $0x1b] sm:$0xff] }
  0x80   : > { %674 = vrot.lane.b32.xlu1 %v599_v55, %s6606_s20  ;;  %672 = vrot.lane.b32.xlu0 %v598_v56, %s6606_s20 }
  0x84   : > { %678 = vrot.lane.b32.xlu1 %v601_v57, %s6606_s20  ;;  %676 = vrot.lane.b32.xlu0 %v600_v58, %s6606_s20  ;;  %v786_v57 = vld [vmem:[#allocation2 + $0x3b] sm:$0xff]  ;;  %v785_v58 = vld [vmem:[#allocation2 + $0x33] sm:$0xff] }
  0x88   : > { %682 = vrot.lane.b32.xlu1 %v603_v59, %s6606_s20  ;;  %680 = vrot.lane.b32.xlu0 %v602_v60, %s6606_s20  ;;  %v464_v37 = vpop.permute.xlu1 %463 }
  0x89   : > { %v460_v38 = vpop.permute.xlu0 %459  ;;  %558 = vst.msk [vmem:[#allocation3 + $0x10] sm:$0xff] %vm555_vm2, %v464_v37  ;;  %v794_v37 = vld [vmem:[#allocation2 + $0x9b] sm:$0xff] }
  0x8a   : > { %556 = vst.msk [vmem:[#allocation3] sm:$0xff] %vm555_vm2, %v460_v38  ;;  %v793_v38 = vld [vmem:[#allocation2 + $0x93] sm:$0xff] }
  0x8c   : > { %686 = vrot.lane.b32.xlu1 %v605_v61, %s6606_s20  ;;  %684 = vrot.lane.b32.xlu0 %v604_v62, %s6606_s20  ;;  %v788_v61 = vld [vmem:[#allocation2 + $0x53] sm:$0xff]  ;;  %v787_v62 = vld [vmem:[#allocation2 + $0x4b] sm:$0xff] }
  0x90   : > { %690 = vrot.lane.b32.xlu1 %v607_v6, %s6606_s20  ;;  %688 = vrot.lane.b32.xlu0 %v606_v8, %s6606_s20 }
  0x94   : > { %694 = vrot.lane.b32.xlu1 %v609_v14, %s6606_s20  ;;  %692 = vrot.lane.b32.xlu0 %v608_v16, %s6606_s20  ;;  %v790_v14 = vld [vmem:[#allocation2 + $0x6b] sm:$0xff]  ;;  %v789_v16 = vld [vmem:[#allocation2 + $0x63] sm:$0xff] }
  0x98   : > { %698 = vrot.lane.b32.xlu1 %v611_v22, %s6606_s20  ;;  %696 = vrot.lane.b32.xlu0 %v610_v24, %s6606_s20 }
  0x9c   : > { %702 = vrot.lane.b32.xlu1 %v613_v30, %s6606_s20  ;;  %700 = vrot.lane.b32.xlu0 %v612_v31, %s6606_s20  ;;  %v466_v41 = vpop.permute.xlu1 %465  ;;  %v462_v42 = vpop.permute.xlu0 %461  ;;  %v792_v30 = vld [vmem:[#allocation2 + $0x83] sm:$0xff]  ;;  %v791_v31 = vld [vmem:[#allocation2 + $0x7b] sm:$0xff] }
  0x9d   : > { %559 = vst.msk [vmem:[#allocation3 + $0x18] sm:$0xff] %vm555_vm2, %v466_v41  ;;  %557 = vst.msk [vmem:[#allocation3 + $0x8] sm:$0xff] %vm555_vm2, %v462_v42  ;;  %v796_v41 = vld [vmem:[#allocation2 + $0xb3] sm:$0xff]  ;;  %v795_v42 = vld [vmem:[#allocation2 + $0xab] sm:$0xff] }
  0xa0   : > { %706 = vrot.lane.b32.xlu1 %v615_v34, %s6606_s20  ;;  %704 = vrot.lane.b32.xlu0 %v614_v35, %s6606_s20 }
  0xa4   : > { %710 = vrot.lane.b32.xlu1 %v617_v39, %s6606_s20  ;;  %708 = vrot.lane.b32.xlu0 %v616_v40, %s6606_s20 }
  0xa6   : > { %v470_v45 = vpop.permute.xlu1 %469  ;;  %v468_v46 = vpop.permute.xlu0 %467 }
  0xa7   : > { %561 = vst.msk [vmem:[#allocation3 + $0x28] sm:$0xff] %vm555_vm2, %v470_v45  ;;  %560 = vst.msk [vmem:[#allocation3 + $0x20] sm:$0xff] %vm555_vm2, %v468_v46  ;;  %v798_v45 = vld [vmem:[#allocation2 + $0xcb] sm:$0xff]  ;;  %v797_v46 = vld [vmem:[#allocation2 + $0xc3] sm:$0xff] }
  0xa8   : > { %714 = vrot.lane.b32.xlu1 %v619_v43, %s6606_s20  ;;  %712 = vrot.lane.b32.xlu0 %v618_v44, %s6606_s20 }
  0xaa   : > { %v474_v51 = vpop.permute.xlu1 %473  ;;  %v472_v52 = vpop.permute.xlu0 %471 }
  0xab   : > { %563 = vst.msk [vmem:[#allocation3 + $0x38] sm:$0xff] %vm555_vm2, %v474_v51  ;;  %562 = vst.msk [vmem:[#allocation3 + $0x30] sm:$0xff] %vm555_vm2, %v472_v52  ;;  %v800_v51 = vld [vmem:[#allocation2 + $0xe3] sm:$0xff]  ;;  %v799_v52 = vld [vmem:[#allocation2 + $0xdb] sm:$0xff] }
  0xac   : > { %847 = vrot.lane.b32.xlu1 %v782_v48, %s6607_s21  ;;  %845 = vrot.lane.b32.xlu0 %v781_v50, %s6607_s21 }
  0xae   : > { %v478_v55 = vpop.permute.xlu1 %477  ;;  %v476_v56 = vpop.permute.xlu0 %475 }
  0xaf   : > { %565 = vst.msk [vmem:[#allocation3 + $0x48] sm:$0xff] %vm555_vm2, %v478_v55  ;;  %564 = vst.msk [vmem:[#allocation3 + $0x40] sm:$0xff] %vm555_vm2, %v476_v56  ;;  %v802_v55 = vld [vmem:[#allocation2 + $0xfb] sm:$0xff]  ;;  %v801_v56 = vld [vmem:[#allocation2 + $0xf3] sm:$0xff] }
  0xb0   : > { %851 = vrot.lane.b32.xlu1 %v784_v53, %s6607_s21  ;;  %849 = vrot.lane.b32.xlu0 %v783_v54, %s6607_s21 }
  0xb2   : > { %v482_v59 = vpop.permute.xlu1 %481  ;;  %v480_v60 = vpop.permute.xlu0 %479 }
  0xb3   : > { %567 = vst.msk [vmem:[#allocation3 + $0x58] sm:$0xff] %vm555_vm2, %v482_v59  ;;  %566 = vst.msk [vmem:[#allocation3 + $0x50] sm:$0xff] %vm555_vm2, %v480_v60  ;;  %v804_v59 = vld [vmem:[#allocation2 + $0x113] sm:$0xff]  ;;  %v803_v60 = vld [vmem:[#allocation2 + $0x10b] sm:$0xff] }
  0xb4   : > { %855 = vrot.lane.b32.xlu1 %v786_v57, %s6607_s21  ;;  %853 = vrot.lane.b32.xlu0 %v785_v58, %s6607_s21 }
  0xb6   : > { %v486_v6 = vpop.permute.xlu1 %485  ;;  %v484_v8 = vpop.permute.xlu0 %483 }
  0xb7   : > { %569 = vst.msk [vmem:[#allocation3 + $0x68] sm:$0xff] %vm555_vm2, %v486_v6  ;;  %568 = vst.msk [vmem:[#allocation3 + $0x60] sm:$0xff] %vm555_vm2, %v484_v8  ;;  %v806_v6 = vld [vmem:[#allocation2 + $0x12b] sm:$0xff]  ;;  %v805_v8 = vld [vmem:[#allocation2 + $0x123] sm:$0xff] }
  0xb8   : > { %859 = vrot.lane.b32.xlu1 %v788_v61, %s6607_s21  ;;  %857 = vrot.lane.b32.xlu0 %v787_v62, %s6607_s21 }
  0xba   : > { %v490_v22 = vpop.permute.xlu1 %489  ;;  %v488_v24 = vpop.permute.xlu0 %487 }
  0xbb   : > { %571 = vst.msk [vmem:[#allocation3 + $0x78] sm:$0xff] %vm555_vm2, %v490_v22  ;;  %570 = vst.msk [vmem:[#allocation3 + $0x70] sm:$0xff] %vm555_vm2, %v488_v24  ;;  %v808_v22 = vld [vmem:[#allocation2 + $0x143] sm:$0xff]  ;;  %v807_v24 = vld [vmem:[#allocation2 + $0x13b] sm:$0xff] }
  0xbc   : > { %863 = vrot.lane.b32.xlu1 %v790_v14, %s6607_s21  ;;  %861 = vrot.lane.b32.xlu0 %v789_v16, %s6607_s21 }
  0xbe   : > { %v494_v34 = vpop.permute.xlu1 %493  ;;  %v492_v35 = vpop.permute.xlu0 %491 }
  0xbf   : > { %573 = vst.msk [vmem:[#allocation3 + $0x88] sm:$0xff] %vm555_vm2, %v494_v34  ;;  %572 = vst.msk [vmem:[#allocation3 + $0x80] sm:$0xff] %vm555_vm2, %v492_v35 }
  0xc0   : > { %867 = vrot.lane.b32.xlu1 %v792_v30, %s6607_s21  ;;  %865 = vrot.lane.b32.xlu0 %v791_v31, %s6607_s21  ;;  %v6440_v30 = vld [vmem:[%s6735_s18 + $0x70] sm:$0xff]  }
  0xc1   : > { %v6421_v35 = vunpack.c.l.bf16 %v6440_v30 }
  0xc2   : > { %v498_v39 = vpop.permute.xlu1 %497  ;;  %v496_v40 = vpop.permute.xlu0 %495 }
  0xc3   : > { %575 = vst.msk [vmem:[#allocation3 + $0x98] sm:$0xff] %vm555_vm2, %v498_v39  ;;  %574 = vst.msk [vmem:[#allocation3 + $0x90] sm:$0xff] %vm555_vm2, %v496_v40  ;;  %v809_v39 = vld [vmem:[#allocation2 + $0x153] sm:$0xff] }
  0xc4   : > { %871 = vrot.lane.b32.xlu1 %v794_v37, %s6607_s21  ;;  %869 = vrot.lane.b32.xlu0 %v793_v38, %s6607_s21  ;;  %v6422_v37 = vunpack.c.h.bf16 %v6440_v30  ;;  %327 = vst.msk [vmem:[#allocation2 + $0x182] sm:$0xff] %vm172_vm0, %v6421_v35  ;;  %v810_v38 = vld [vmem:[#allocation2 + $0x15b] sm:$0xff] }
  0xc5   : > { %v984_v30 = vld [vmem:[#allocation2 + $0x7c] sm:$0xff] }
  0xc6   : > { %v502_v43 = vpop.permute.xlu1 %501  ;;  %v500_v44 = vpop.permute.xlu0 %499  ;;  %328 = vst.msk [vmem:[#allocation2 + $0x18a] sm:$0xff] %vm172_vm0, %v6422_v37  ;;  %v987_v35 = vld [vmem:[#allocation2 + $0x9c] sm:$0xff]  ;;  %v986_v37 = vld [vmem:[#allocation2 + $0x94] sm:$0xff] }
  0xc7   : > { %577 = vst.msk [vmem:[#allocation3 + $0xa8] sm:$0xff] %vm555_vm2, %v502_v43  ;;  %576 = vst.msk [vmem:[#allocation3 + $0xa0] sm:$0xff] %vm555_vm2, %v500_v44  ;;  %v811_v43 = vld [vmem:[#allocation2 + $0x16b] sm:$0xff] }
  0xc8   : > { %875 = vrot.lane.b32.xlu1 %v796_v41, %s6607_s21  ;;  %873 = vrot.lane.b32.xlu0 %v795_v42, %s6607_s21  ;;  %v812_v42 = vld [vmem:[#allocation2 + $0x173] sm:$0xff] }
  0xca   : > { %v506_v48 = vpop.permute.xlu1 %505  ;;  %v504_v50 = vpop.permute.xlu0 %503 }
  0xcb   : > { %579 = vst.msk [vmem:[#allocation3 + $0xb8] sm:$0xff] %vm555_vm2, %v506_v48  ;;  %578 = vst.msk [vmem:[#allocation3 + $0xb0] sm:$0xff] %vm555_vm2, %v504_v50  ;;  %v974_v48 = vld [vmem:[#allocation2 + $0x4] sm:$0xff] }
  0xcc   : > { %879 = vrot.lane.b32.xlu1 %v798_v45, %s6607_s21  ;;  %877 = vrot.lane.b32.xlu0 %v797_v46, %s6607_s21  ;;  %v975_v46 = vld [vmem:[#allocation2 + $0xc] sm:$0xff] }
  0xce   : > { %v510_v53 = vpop.permute.xlu1 %509  ;;  %v508_v54 = vpop.permute.xlu0 %507 }
  0xcf   : > { %581 = vst.msk [vmem:[#allocation3 + $0xc8] sm:$0xff] %vm555_vm2, %v510_v53  ;;  %580 = vst.msk [vmem:[#allocation3 + $0xc0] sm:$0xff] %vm555_vm2, %v508_v54  ;;  %v976_v53 = vld [vmem:[#allocation2 + $0x1c] sm:$0xff] }
  0xd0   : > { %883 = vrot.lane.b32.xlu1 %v800_v51, %s6607_s21  ;;  %881 = vrot.lane.b32.xlu0 %v799_v52, %s6607_s21  ;;  %v977_v52 = vld [vmem:[#allocation2 + $0x24] sm:$0xff] }
  0xd2   : > { %v514_v57 = vpop.permute.xlu1 %513  ;;  %v512_v58 = vpop.permute.xlu0 %511 }
  0xd3   : > { %583 = vst.msk [vmem:[#allocation3 + $0xd8] sm:$0xff] %vm555_vm2, %v514_v57  ;;  %582 = vst.msk [vmem:[#allocation3 + $0xd0] sm:$0xff] %vm555_vm2, %v512_v58  ;;  %v978_v57 = vld [vmem:[#allocation2 + $0x34] sm:$0xff] }
  0xd4   : > { %887 = vrot.lane.b32.xlu1 %v802_v55, %s6607_s21  ;;  %885 = vrot.lane.b32.xlu0 %v801_v56, %s6607_s21  ;;  %v979_v56 = vld [vmem:[#allocation2 + $0x3c] sm:$0xff] }
  0xd6   : > { %v518_v61 = vpop.permute.xlu1 %517  ;;  %v516_v62 = vpop.permute.xlu0 %515 }
  0xd7   : > { %585 = vst.msk [vmem:[#allocation3 + $0xe8] sm:$0xff] %vm555_vm2, %v518_v61  ;;  %584 = vst.msk [vmem:[#allocation3 + $0xe0] sm:$0xff] %vm555_vm2, %v516_v62  ;;  %v980_v61 = vld [vmem:[#allocation2 + $0x4c] sm:$0xff] }
  0xd8   : > { %891 = vrot.lane.b32.xlu1 %v804_v59, %s6607_s21  ;;  %889 = vrot.lane.b32.xlu0 %v803_v60, %s6607_s21  ;;  %v981_v60 = vld [vmem:[#allocation2 + $0x54] sm:$0xff] }
  0xda   : > { %v522_v14 = vpop.permute.xlu1 %521  ;;  %v520_v16 = vpop.permute.xlu0 %519 }
  0xdb   : > { %587 = vst.msk [vmem:[#allocation3 + $0xf8] sm:$0xff] %vm555_vm2, %v522_v14  ;;  %586 = vst.msk [vmem:[#allocation3 + $0xf0] sm:$0xff] %vm555_vm2, %v520_v16  ;;  %v982_v14 = vld [vmem:[#allocation2 + $0x64] sm:$0xff]  ;;  %vm3645_vm2 = vcmask 589344  }
  0xdc   : > { %895 = vrot.lane.b32.xlu1 %v806_v6, %s6607_s21  ;;  %893 = vrot.lane.b32.xlu0 %v805_v8, %s6607_s21  ;;  %v983_v8 = vld [vmem:[#allocation2 + $0x6c] sm:$0xff] }
  0xde   : > { %v655_v31 = vpop.permute.xlu1 %654  ;;  %v653_v34 = vpop.permute.xlu0 %652 }
  0xdf   : > { %750 = vst.msk [vmem:[#allocation3 + $0x8] sm:$0xff] %vm748_vm3, %v655_v31  ;;  %749 = vst.msk [vmem:[#allocation3] sm:$0xff] %vm748_vm3, %v653_v34 }
  0xe0   : > { %899 = vrot.lane.b32.xlu1 %v808_v22, %s6607_s21  ;;  %897 = vrot.lane.b32.xlu0 %v807_v24, %s6607_s21  ;;  %v985_v24 = vld [vmem:[#allocation2 + $0x84] sm:$0xff] }
  0xe2   : > { %v659_v40 = vpop.permute.xlu1 %658  ;;  %v657_v41 = vpop.permute.xlu0 %656 }
  0xe3   : > { %752 = vst.msk [vmem:[#allocation3 + $0x18] sm:$0xff] %vm748_vm3, %v659_v40  ;;  %751 = vst.msk [vmem:[#allocation3 + $0x10] sm:$0xff] %vm748_vm3, %v657_v41  ;;  %v989_v40 = vld [vmem:[#allocation2 + $0xb4] sm:$0xff]  ;;  %v988_v41 = vld [vmem:[#allocation2 + $0xac] sm:$0xff] }
  0xe4   : > { %903 = vrot.lane.b32.xlu1 %v810_v38, %s6607_s21  ;;  %901 = vrot.lane.b32.xlu0 %v809_v39, %s6607_s21 }
  0xe6   : > { %v663_v44 = vpop.permute.xlu1 %662  ;;  %v661_v45 = vpop.permute.xlu0 %660 }
  0xe7   : > { %754 = vst.msk [vmem:[#allocation3 + $0x28] sm:$0xff] %vm748_vm3, %v663_v44  ;;  %753 = vst.msk [vmem:[#allocation3 + $0x20] sm:$0xff] %vm748_vm3, %v661_v45  ;;  %v991_v44 = vld [vmem:[#allocation2 + $0xcc] sm:$0xff]  ;;  %v990_v45 = vld [vmem:[#allocation2 + $0xc4] sm:$0xff] }
  0xe8   : > { %907 = vrot.lane.b32.xlu1 %v812_v42, %s6607_s21  ;;  %905 = vrot.lane.b32.xlu0 %v811_v43, %s6607_s21 }
  0xea   : > { %v667_v50 = vpop.permute.xlu1 %666  ;;  %v665_v51 = vpop.permute.xlu0 %664 }
  0xeb   : > { %756 = vst.msk [vmem:[#allocation3 + $0x38] sm:$0xff] %vm748_vm3, %v667_v50  ;;  %755 = vst.msk [vmem:[#allocation3 + $0x30] sm:$0xff] %vm748_vm3, %v665_v51  ;;  %v993_v50 = vld [vmem:[#allocation2 + $0xe4] sm:$0xff]  ;;  %v992_v51 = vld [vmem:[#allocation2 + $0xdc] sm:$0xff] }
  0xec   : > { %1040 = vrot.lane.b32.xlu1 %v975_v46, %s6608_s22  ;;  %1038 = vrot.lane.b32.xlu0 %v974_v48, %s6608_s22 }
  0xee   : > { %v671_v54 = vpop.permute.xlu1 %670  ;;  %v669_v55 = vpop.permute.xlu0 %668 }
  0xef   : > { %758 = vst.msk [vmem:[#allocation3 + $0x48] sm:$0xff] %vm748_vm3, %v671_v54  ;;  %757 = vst.msk [vmem:[#allocation3 + $0x40] sm:$0xff] %vm748_vm3, %v669_v55  ;;  %v995_v54 = vld [vmem:[#allocation2 + $0xfc] sm:$0xff]  ;;  %v994_v55 = vld [vmem:[#allocation2 + $0xf4] sm:$0xff] }
  0xf0   : > { %1044 = vrot.lane.b32.xlu1 %v977_v52, %s6608_s22  ;;  %1042 = vrot.lane.b32.xlu0 %v976_v53, %s6608_s22 }
  0xf2   : > { %v675_v58 = vpop.permute.xlu1 %674  ;;  %v673_v59 = vpop.permute.xlu0 %672 }
  0xf3   : > { %760 = vst.msk [vmem:[#allocation3 + $0x58] sm:$0xff] %vm748_vm3, %v675_v58  ;;  %759 = vst.msk [vmem:[#allocation3 + $0x50] sm:$0xff] %vm748_vm3, %v673_v59  ;;  %v997_v58 = vld [vmem:[#allocation2 + $0x114] sm:$0xff]  ;;  %v996_v59 = vld [vmem:[#allocation2 + $0x10c] sm:$0xff] }
  0xf4   : > { %1048 = vrot.lane.b32.xlu1 %v979_v56, %s6608_s22  ;;  %1046 = vrot.lane.b32.xlu0 %v978_v57, %s6608_s22 }
  0xf6   : > { %v679_v62 = vpop.permute.xlu1 %678  ;;  %v677_v6 = vpop.permute.xlu0 %676 }
  0xf7   : > { %762 = vst.msk [vmem:[#allocation3 + $0x68] sm:$0xff] %vm748_vm3, %v679_v62  ;;  %761 = vst.msk [vmem:[#allocation3 + $0x60] sm:$0xff] %vm748_vm3, %v677_v6  ;;  %v999_v62 = vld [vmem:[#allocation2 + $0x12c] sm:$0xff]  ;;  %v998_v6 = vld [vmem:[#allocation2 + $0x124] sm:$0xff] }
  0xf8   : > { %1052 = vrot.lane.b32.xlu1 %v981_v60, %s6608_s22  ;;  %1050 = vrot.lane.b32.xlu0 %v980_v61, %s6608_s22 }
  0xfa   : > { %v683_v16 = vpop.permute.xlu1 %682  ;;  %v681_v22 = vpop.permute.xlu0 %680 }
  0xfb   : > { %764 = vst.msk [vmem:[#allocation3 + $0x78] sm:$0xff] %vm748_vm3, %v683_v16  ;;  %763 = vst.msk [vmem:[#allocation3 + $0x70] sm:$0xff] %vm748_vm3, %v681_v22  ;;  %v1001_v16 = vld [vmem:[#allocation2 + $0x144] sm:$0xff]  ;;  %v1000_v22 = vld [vmem:[#allocation2 + $0x13c] sm:$0xff] }
  0xfc   : > { %1056 = vrot.lane.b32.xlu1 %v983_v8, %s6608_s22  ;;  %1054 = vrot.lane.b32.xlu0 %v982_v14, %s6608_s22 }
  0xfe   : > { %v687_v31 = vpop.permute.xlu1 %686  ;;  %v685_v34 = vpop.permute.xlu0 %684 }
  0xff   : > { %766 = vst.msk [vmem:[#allocation3 + $0x88] sm:$0xff] %vm748_vm3, %v687_v31  ;;  %765 = vst.msk [vmem:[#allocation3 + $0x80] sm:$0xff] %vm748_vm3, %v685_v34  ;;  %v1003_v31 = vld [vmem:[#allocation2 + $0x15c] sm:$0xff]  ;;  %v1002_v34 = vld [vmem:[#allocation2 + $0x154] sm:$0xff] }
 0x100   : > { %1060 = vrot.lane.b32.xlu1 %v985_v24, %s6608_s22  ;;  %1058 = vrot.lane.b32.xlu0 %v984_v30, %s6608_s22 }
 0x102   : > { %v691_v38 = vpop.permute.xlu1 %690  ;;  %v689_v39 = vpop.permute.xlu0 %688 }
 0x103   : > { %768 = vst.msk [vmem:[#allocation3 + $0x98] sm:$0xff] %vm748_vm3, %v691_v38  ;;  %767 = vst.msk [vmem:[#allocation3 + $0x90] sm:$0xff] %vm748_vm3, %v689_v39  ;;  %v1005_v38 = vld [vmem:[#allocation2 + $0x174] sm:$0xff]  ;;  %v1004_v39 = vld [vmem:[#allocation2 + $0x16c] sm:$0xff] }
 0x104   : > { %1064 = vrot.lane.b32.xlu1 %v987_v35, %s6608_s22  ;;  %1062 = vrot.lane.b32.xlu0 %v986_v37, %s6608_s22 }
 0x106   : > { %v695_v42 = vpop.permute.xlu1 %694  ;;  %v693_v43 = vpop.permute.xlu0 %692 }
 0x107   : > { %770 = vst.msk [vmem:[#allocation3 + $0xa8] sm:$0xff] %vm748_vm3, %v695_v42  ;;  %769 = vst.msk [vmem:[#allocation3 + $0xa0] sm:$0xff] %vm748_vm3, %v693_v43 }
 0x108   : > { %1068 = vrot.lane.b32.xlu1 %v989_v40, %s6608_s22  ;;  %1066 = vrot.lane.b32.xlu0 %v988_v41, %s6608_s22 }
 0x10a   : > { %v699_v46 = vpop.permute.xlu1 %698  ;;  %v697_v48 = vpop.permute.xlu0 %696 }
 0x10b   : > { %772 = vst.msk [vmem:[#allocation3 + $0xb8] sm:$0xff] %vm748_vm3, %v699_v46  ;;  %771 = vst.msk [vmem:[#allocation3 + $0xb0] sm:$0xff] %vm748_vm3, %v697_v48 }
 0x10c   : > { %1072 = vrot.lane.b32.xlu1 %v991_v44, %s6608_s22  ;;  %1070 = vrot.lane.b32.xlu0 %v990_v45, %s6608_s22 }
 0x10e   : > { %v703_v52 = vpop.permute.xlu1 %702  ;;  %v701_v53 = vpop.permute.xlu0 %700 }
 0x10f   : > { %774 = vst.msk [vmem:[#allocation3 + $0xc8] sm:$0xff] %vm748_vm3, %v703_v52  ;;  %773 = vst.msk [vmem:[#allocation3 + $0xc0] sm:$0xff] %vm748_vm3, %v701_v53 }
 0x110   : > { %1076 = vrot.lane.b32.xlu1 %v993_v50, %s6608_s22  ;;  %1074 = vrot.lane.b32.xlu0 %v992_v51, %s6608_s22 }
 0x112   : > { %v707_v56 = vpop.permute.xlu1 %706  ;;  %v705_v57 = vpop.permute.xlu0 %704 }
 0x113   : > { %776 = vst.msk [vmem:[#allocation3 + $0xd8] sm:$0xff] %vm748_vm3, %v707_v56  ;;  %775 = vst.msk [vmem:[#allocation3 + $0xd0] sm:$0xff] %vm748_vm3, %v705_v57  ;;  %v1366_v56 = vld [vmem:[#allocation2 + $0x51] sm:$0xff]  ;;  %v1365_v57 = vld [vmem:[#allocation2 + $0x49] sm:$0xff] }
 0x114   : > { %1080 = vrot.lane.b32.xlu1 %v995_v54, %s6608_s22  ;;  %1078 = vrot.lane.b32.xlu0 %v994_v55, %s6608_s22 }
 0x116   : > { %v711_v60 = vpop.permute.xlu1 %710  ;;  %v709_v61 = vpop.permute.xlu0 %708 }
 0x117   : > { %778 = vst.msk [vmem:[#allocation3 + $0xe8] sm:$0xff] %vm748_vm3, %v711_v60  ;;  %777 = vst.msk [vmem:[#allocation3 + $0xe0] sm:$0xff] %vm748_vm3, %v709_v61  ;;  %v1368_v60 = vld [vmem:[#allocation2 + $0x69] sm:$0xff]  ;;  %v1367_v61 = vld [vmem:[#allocation2 + $0x61] sm:$0xff] }
 0x118   : > { %1084 = vrot.lane.b32.xlu1 %v997_v58, %s6608_s22  ;;  %1082 = vrot.lane.b32.xlu0 %v996_v59, %s6608_s22 }
 0x11a   : > { %v715_v8 = vpop.permute.xlu1 %714  ;;  %v713_v14 = vpop.permute.xlu0 %712 }
 0x11b   : > { %780 = vst.msk [vmem:[#allocation3 + $0xf8] sm:$0xff] %vm748_vm3, %v715_v8  ;;  %779 = vst.msk [vmem:[#allocation3 + $0xf0] sm:$0xff] %vm748_vm3, %v713_v14  ;;  %v1370_v8 = vld [vmem:[#allocation2 + $0x81] sm:$0xff]  ;;  %v1369_v14 = vld [vmem:[#allocation2 + $0x79] sm:$0xff]  ;;  %vm3838_vm3 = vcmask 622144  }
 0x11c   : > { %1088 = vrot.lane.b32.xlu1 %v999_v62, %s6608_s22  ;;  %1086 = vrot.lane.b32.xlu0 %v998_v6, %s6608_s22 }
 0x11e   : > { %v848_v24 = vpop.permute.xlu1 %847  ;;  %v846_v30 = vpop.permute.xlu0 %845 }
 0x11f   : > { %943 = vst.msk [vmem:[#allocation3 + $0x8] sm:$0xff] %vm941_vm4, %v848_v24  ;;  %942 = vst.msk [vmem:[#allocation3] sm:$0xff] %vm941_vm4, %v846_v30  ;;  %v1372_v24 = vld [vmem:[#allocation2 + $0x99] sm:$0xff]  ;;  %v1371_v30 = vld [vmem:[#allocation2 + $0x91] sm:$0xff] }
 0x120   : > { %1092 = vrot.lane.b32.xlu1 %v1001_v16, %s6608_s22  ;;  %1090 = vrot.lane.b32.xlu0 %v1000_v22, %s6608_s22 }
 0x122   : > { %v852_v35 = vpop.permute.xlu1 %851  ;;  %v850_v37 = vpop.permute.xlu0 %849 }
 0x123   : > { %945 = vst.msk [vmem:[#allocation3 + $0x18] sm:$0xff] %vm941_vm4, %v852_v35  ;;  %944 = vst.msk [vmem:[#allocation3 + $0x10] sm:$0xff] %vm941_vm4, %v850_v37  ;;  %v1374_v35 = vld [vmem:[#allocation2 + $0xb1] sm:$0xff]  ;;  %v1373_v37 = vld [vmem:[#allocation2 + $0xa9] sm:$0xff] }
 0x124   : > { %1096 = vrot.lane.b32.xlu1 %v1003_v31, %s6608_s22  ;;  %1094 = vrot.lane.b32.xlu0 %v1002_v34, %s6608_s22 }
 0x126   : > { %v856_v40 = vpop.permute.xlu1 %855  ;;  %v854_v41 = vpop.permute.xlu0 %853 }
 0x127   : > { %947 = vst.msk [vmem:[#allocation3 + $0x28] sm:$0xff] %vm941_vm4, %v856_v40  ;;  %946 = vst.msk [vmem:[#allocation3 + $0x20] sm:$0xff] %vm941_vm4, %v854_v41  ;;  %v1376_v40 = vld [vmem:[#allocation2 + $0xc9] sm:$0xff]  ;;  %v1375_v41 = vld [vmem:[#allocation2 + $0xc1] sm:$0xff] }
 0x128   : > { %1100 = vrot.lane.b32.xlu1 %v1005_v38, %s6608_s22  ;;  %1098 = vrot.lane.b32.xlu0 %v1004_v39, %s6608_s22 }
 0x12a   : > { %v860_v42 = vpop.permute.xlu1 %859  ;;  %v858_v43 = vpop.permute.xlu0 %857 }
 0x12b   : > { %949 = vst.msk [vmem:[#allocation3 + $0x38] sm:$0xff] %vm941_vm4, %v860_v42  ;;  %948 = vst.msk [vmem:[#allocation3 + $0x30] sm:$0xff] %vm941_vm4, %v858_v43 }
 0x12c   : > { %1234 = vrot.lane.b32.xlu1 %v6784_v49, %s6609_s23  ;;  %1232 = vrot.lane.b32.xlu0 %v6775_v47, %s6609_s23 }
 0x12e   : > { %v864_v44 = vpop.permute.xlu1 %863  ;;  %v862_v45 = vpop.permute.xlu0 %861 }
 0x12f   : > { %951 = vst.msk [vmem:[#allocation3 + $0x48] sm:$0xff] %vm941_vm4, %v864_v44  ;;  %950 = vst.msk [vmem:[#allocation3 + $0x40] sm:$0xff] %vm941_vm4, %v862_v45  ;;  %v1378_v44 = vld [vmem:[#allocation2 + $0xe1] sm:$0xff]  ;;  %v1377_v45 = vld [vmem:[#allocation2 + $0xd9] sm:$0xff] }
 0x130   : > { %1238 = vrot.lane.b32.xlu1 %v6803_v63, %s6609_s23  ;;  %1236 = vrot.lane.b32.xlu0 %v6805_v0, %s6609_s23 }
 0x132   : > { %v868_v46 = vpop.permute.xlu1 %867  ;;  %v866_v48 = vpop.permute.xlu0 %865 }
 0x133   : > { %953 = vst.msk [vmem:[#allocation3 + $0x58] sm:$0xff] %vm941_vm4, %v868_v46  ;;  %952 = vst.msk [vmem:[#allocation3 + $0x50] sm:$0xff] %vm941_vm4, %v866_v48 }
 0x134   : > { %1242 = vrot.lane.b32.xlu1 %v6811_v1, %s6609_s23  ;;  %1240 = vrot.lane.b32.xlu0 %v6813_v2, %s6609_s23 }
 0x136   : > { %v872_v47 = vpop.permute.xlu1 %871  ;;  %v870_v49 = vpop.permute.xlu0 %869 }
 0x137   : > { %955 = vst.msk [vmem:[#allocation3 + $0x68] sm:$0xff] %vm941_vm4, %v872_v47  ;;  %954 = vst.msk [vmem:[#allocation3 + $0x60] sm:$0xff] %vm941_vm4, %v870_v49  ;;  %v1380_v47 = vld [vmem:[#allocation2 + $0xf9] sm:$0xff]  ;;  %v1379_v49 = vld [vmem:[#allocation2 + $0xf1] sm:$0xff] }
 0x138   : > { %1246 = vrot.lane.b32.xlu1 %v6819_v3, %s6609_s23  ;;  %1244 = vrot.lane.b32.xlu0 %v6821_v4, %s6609_s23 }
 0x13a   : > { %v876_v63 = vpop.permute.xlu1 %875  ;;  %v874_v0 = vpop.permute.xlu0 %873 }
 0x13b   : > { %957 = vst.msk [vmem:[#allocation3 + $0x78] sm:$0xff] %vm941_vm4, %v876_v63  ;;  %956 = vst.msk [vmem:[#allocation3 + $0x70] sm:$0xff] %vm941_vm4, %v874_v0 }
 0x13c   : > { %1250 = vrot.lane.b32.xlu1 %v6823_v5, %s6609_s23  ;;  %1248 = vrot.lane.b32.xlu0 %v6833_v7, %s6609_s23 }
 0x13e   : > { %v880_v1 = vpop.permute.xlu1 %879  ;;  %v878_v2 = vpop.permute.xlu0 %877 }
 0x13f   : > { %959 = vst.msk [vmem:[#allocation3 + $0x88] sm:$0xff] %vm941_vm4, %v880_v1  ;;  %958 = vst.msk [vmem:[#allocation3 + $0x80] sm:$0xff] %vm941_vm4, %v878_v2  ;;  %v1382_v1 = vld [vmem:[#allocation2 + $0x111] sm:$0xff]  ;;  %v1381_v2 = vld [vmem:[#allocation2 + $0x109] sm:$0xff] }
 0x140   : > { %1254 = vrot.lane.b32.xlu1 %v6837_v9, %s6609_s23  ;;  %1252 = vrot.lane.b32.xlu0 %v6839_v10, %s6609_s23 }
 0x142   : > { %v884_v3 = vpop.permute.xlu1 %883  ;;  %v882_v4 = vpop.permute.xlu0 %881 }
 0x143   : > { %961 = vst.msk [vmem:[#allocation3 + $0x98] sm:$0xff] %vm941_vm4, %v884_v3  ;;  %960 = vst.msk [vmem:[#allocation3 + $0x90] sm:$0xff] %vm941_vm4, %v882_v4 }
 0x144   : > { %1258 = vrot.lane.b32.xlu1 %v6845_v11, %s6609_s23  ;;  %1256 = vrot.lane.b32.xlu0 %v6847_v12, %s6609_s23 }
 0x146   : > { %v888_v5 = vpop.permute.xlu1 %887  ;;  %v886_v7 = vpop.permute.xlu0 %885 }
 0x147   : > { %963 = vst.msk [vmem:[#allocation3 + $0xa8] sm:$0xff] %vm941_vm4, %v888_v5  ;;  %962 = vst.msk [vmem:[#allocation3 + $0xa0] sm:$0xff] %vm941_vm4, %v886_v7  ;;  %v1384_v5 = vld [vmem:[#allocation2 + $0x129] sm:$0xff]  ;;  %v1383_v7 = vld [vmem:[#allocation2 + $0x121] sm:$0xff] }
 0x148   : > { %1262 = vrot.lane.b32.xlu1 %v6853_v13, %s6609_s23  ;;  %1260 = vrot.lane.b32.xlu0 %v6859_v15, %s6609_s23 }
 0x14a   : > { %v892_v9 = vpop.permute.xlu1 %891  ;;  %v890_v10 = vpop.permute.xlu0 %889 }
 0x14b   : > { %965 = vst.msk [vmem:[#allocation3 + $0xb8] sm:$0xff] %vm941_vm4, %v892_v9  ;;  %964 = vst.msk [vmem:[#allocation3 + $0xb0] sm:$0xff] %vm941_vm4, %v890_v10 }
 0x14c   : > { %1266 = vrot.lane.b32.xlu1 %v6863_v17, %s6609_s23  ;;  %1264 = vrot.lane.b32.xlu0 %v6865_v18, %s6609_s23 }
 0x14e   : > { %v896_v11 = vpop.permute.xlu1 %895  ;;  %v894_v12 = vpop.permute.xlu0 %893 }
 0x14f   : > { %967 = vst.msk [vmem:[#allocation3 + $0xc8] sm:$0xff] %vm941_vm4, %v896_v11  ;;  %966 = vst.msk [vmem:[#allocation3 + $0xc0] sm:$0xff] %vm941_vm4, %v894_v12  ;;  %v1386_v11 = vld [vmem:[#allocation2 + $0x141] sm:$0xff]  ;;  %v1385_v12 = vld [vmem:[#allocation2 + $0x139] sm:$0xff] }
 0x150   : > { %1270 = vrot.lane.b32.xlu1 %v6871_v19, %s6609_s23  ;;  %1268 = vrot.lane.b32.xlu0 %v6873_v20, %s6609_s23 }
 0x152   : > { %v900_v13 = vpop.permute.xlu1 %899  ;;  %v898_v15 = vpop.permute.xlu0 %897 }
 0x153   : > { %969 = vst.msk [vmem:[#allocation3 + $0xd8] sm:$0xff] %vm941_vm4, %v900_v13  ;;  %968 = vst.msk [vmem:[#allocation3 + $0xd0] sm:$0xff] %vm941_vm4, %v898_v15 }
 0x154   : > { %1274 = vrot.lane.b32.xlu1 %v6879_v21, %s6609_s23  ;;  %1272 = vrot.lane.b32.xlu0 %v6885_v23, %s6609_s23 }
 0x156   : > { %v904_v17 = vpop.permute.xlu1 %903  ;;  %v902_v18 = vpop.permute.xlu0 %901 }
 0x157   : > { %971 = vst.msk [vmem:[#allocation3 + $0xe8] sm:$0xff] %vm941_vm4, %v904_v17  ;;  %970 = vst.msk [vmem:[#allocation3 + $0xe0] sm:$0xff] %vm941_vm4, %v902_v18  ;;  %v1388_v17 = vld [vmem:[#allocation2 + $0x159] sm:$0xff]  ;;  %v1387_v18 = vld [vmem:[#allocation2 + $0x151] sm:$0xff] }
 0x158   : > { %1278 = vrot.lane.b32.xlu1 %v6889_v25, %s6609_s23  ;;  %1276 = vrot.lane.b32.xlu0 %v6891_v26, %s6609_s23 }
 0x15a   : > { %v908_v19 = vpop.permute.xlu1 %907  ;;  %v906_v20 = vpop.permute.xlu0 %905 }
 0x15b   : > { %973 = vst.msk [vmem:[#allocation3 + $0xf8] sm:$0xff] %vm941_vm4, %v908_v19  ;;  %972 = vst.msk [vmem:[#allocation3 + $0xf0] sm:$0xff] %vm941_vm4, %v906_v20 }
 0x15c   : > { %1282 = vrot.lane.b32.xlu1 %v6897_v27, %s6609_s23  ;;  %1280 = vrot.lane.b32.xlu0 %v6899_v28, %s6609_s23  ;;  %v1199_v27 = vld [vmem:[#allocation2 + $0x188] sm:$0xff]  ;;  %v1198_v28 = vld [vmem:[#allocation2 + $0x180] sm:$0xff] }
 0x15e   : > { %v1041_v21 = vpop.permute.xlu1 %1040  ;;  %v1039_v23 = vpop.permute.xlu0 %1038 }
 0x15f   : > { %1136 = vst.msk [vmem:[#allocation3 + $0x8] sm:$0xff] %vm1134_vm5, %v1041_v21  ;;  %1135 = vst.msk [vmem:[#allocation3] sm:$0xff] %vm1134_vm5, %v1039_v23  ;;  %v1390_v21 = vld [vmem:[#allocation2 + $0x171] sm:$0xff]  ;;  %v1389_v23 = vld [vmem:[#allocation2 + $0x169] sm:$0xff] }
 0x160   : > { %1286 = vrot.lane.b32.xlu1 %v6907_v29, %s6609_s23  ;;  %1284 = vrot.lane.b32.xlu0 %v6911_v32, %s6609_s23  ;;  %v1362_v29 = vld [vmem:[#allocation2 + $0x21] sm:$0xff]  ;;  %v1361_v32 = vld [vmem:[#allocation2 + $0x19] sm:$0xff] }
 0x162   : > { %v1045_v25 = vpop.permute.xlu1 %1044  ;;  %v1043_v26 = vpop.permute.xlu0 %1042 }
 0x163   : > { %1138 = vst.msk [vmem:[#allocation3 + $0x18] sm:$0xff] %vm1134_vm5, %v1045_v25  ;;  %1137 = vst.msk [vmem:[#allocation3 + $0x10] sm:$0xff] %vm1134_vm5, %v1043_v26 }
 0x164   : > { %1290 = vrot.lane.b32.xlu1 %v6917_v33, %s6609_s23  ;;  %1288 = vrot.lane.b32.xlu0 %v6921_v36, %s6609_s23  ;;  %v1364_v33 = vld [vmem:[#allocation2 + $0x39] sm:$0xff]  ;;  %v1363_v36 = vld [vmem:[#allocation2 + $0x31] sm:$0xff] }
 0x166   : > { %v1049_v50 = vpop.permute.xlu1 %1048  ;;  %v1047_v51 = vpop.permute.xlu0 %1046 }
 0x167   : > { %1140 = vst.msk [vmem:[#allocation3 + $0x28] sm:$0xff] %vm1134_vm5, %v1049_v50  ;;  %1139 = vst.msk [vmem:[#allocation3 + $0x20] sm:$0xff] %vm1134_vm5, %v1047_v51 }
 0x168   : > { %1294 = vrot.lane.b32.xlu1 %v1199_v27, %s6609_s23  ;;  %1292 = vrot.lane.b32.xlu0 %v1198_v28, %s6609_s23  ;;  %v1392_v27 = vld [vmem:[#allocation2 + $0x189] sm:$0xff]  ;;  %v1391_v28 = vld [vmem:[#allocation2 + $0x181] sm:$0xff]  ;;  %s6629_s23 = smov 96  }
 0x16a   : > { %v1053_v52 = vpop.permute.xlu1 %1052  ;;  %v1051_v53 = vpop.permute.xlu0 %1050 }
 0x16b   : > { %1142 = vst.msk [vmem:[#allocation3 + $0x38] sm:$0xff] %vm1134_vm5, %v1053_v52  ;;  %1141 = vst.msk [vmem:[#allocation3 + $0x30] sm:$0xff] %vm1134_vm5, %v1051_v53 }
 0x16c   : > { %1427 = vrot.lane.b32.xlu1 %v1362_v29, %s6610_s24  ;;  %1425 = vrot.lane.b32.xlu0 %v1361_v32, %s6610_s24  ;;  %v1555_v29 = vld [vmem:[#allocation2 + $0x22] sm:$0xff]  ;;  %v1554_v32 = vld [vmem:[#allocation2 + $0x1a] sm:$0xff] }
 0x16e   : > { %v1057_v54 = vpop.permute.xlu1 %1056  ;;  %v1055_v55 = vpop.permute.xlu0 %1054 }
 0x16f   : > { %1144 = vst.msk [vmem:[#allocation3 + $0x48] sm:$0xff] %vm1134_vm5, %v1057_v54  ;;  %1143 = vst.msk [vmem:[#allocation3 + $0x40] sm:$0xff] %vm1134_vm5, %v1055_v55 }
 0x170   : > { %1431 = vrot.lane.b32.xlu1 %v1364_v33, %s6610_s24  ;;  %1429 = vrot.lane.b32.xlu0 %v1363_v36, %s6610_s24  ;;  %v1557_v33 = vld [vmem:[#allocation2 + $0x3a] sm:$0xff]  ;;  %v1556_v36 = vld [vmem:[#allocation2 + $0x32] sm:$0xff] }
 0x172   : > { %v1061_v58 = vpop.permute.xlu1 %1060  ;;  %v1059_v59 = vpop.permute.xlu0 %1058 }
 0x173   : > { %1146 = vst.msk [vmem:[#allocation3 + $0x58] sm:$0xff] %vm1134_vm5, %v1061_v58  ;;  %1145 = vst.msk [vmem:[#allocation3 + $0x50] sm:$0xff] %vm1134_vm5, %v1059_v59 }
 0x174   : > { %1435 = vrot.lane.b32.xlu1 %v1366_v56, %s6610_s24  ;;  %1433 = vrot.lane.b32.xlu0 %v1365_v57, %s6610_s24  ;;  %v1559_v56 = vld [vmem:[#allocation2 + $0x52] sm:$0xff]  ;;  %v1558_v57 = vld [vmem:[#allocation2 + $0x4a] sm:$0xff] }
 0x176   : > { %v1065_v62 = vpop.permute.xlu1 %1064  ;;  %v1063_v6 = vpop.permute.xlu0 %1062 }
 0x177   : > { %1148 = vst.msk [vmem:[#allocation3 + $0x68] sm:$0xff] %vm1134_vm5, %v1065_v62  ;;  %1147 = vst.msk [vmem:[#allocation3 + $0x60] sm:$0xff] %vm1134_vm5, %v1063_v6 }
 0x178   : > { %1439 = vrot.lane.b32.xlu1 %v1368_v60, %s6610_s24  ;;  %1437 = vrot.lane.b32.xlu0 %v1367_v61, %s6610_s24  ;;  %v1561_v60 = vld [vmem:[#allocation2 + $0x6a] sm:$0xff]  ;;  %v1560_v61 = vld [vmem:[#allocation2 + $0x62] sm:$0xff] }
 0x17a   : > { %v1069_v16 = vpop.permute.xlu1 %1068  ;;  %v1067_v22 = vpop.permute.xlu0 %1066 }
 0x17b   : > { %1150 = vst.msk [vmem:[#allocation3 + $0x78] sm:$0xff] %vm1134_vm5, %v1069_v16  ;;  %1149 = vst.msk [vmem:[#allocation3 + $0x70] sm:$0xff] %vm1134_vm5, %v1067_v22 }
 0x17c   : > { %1443 = vrot.lane.b32.xlu1 %v1370_v8, %s6610_s24  ;;  %1441 = vrot.lane.b32.xlu0 %v1369_v14, %s6610_s24  ;;  %v1563_v8 = vld [vmem:[#allocation2 + $0x82] sm:$0xff]  ;;  %v1562_v14 = vld [vmem:[#allocation2 + $0x7a] sm:$0xff] }
 0x17e   : > { %v1073_v31 = vpop.permute.xlu1 %1072  ;;  %v1071_v34 = vpop.permute.xlu0 %1070 }
 0x17f   : > { %1152 = vst.msk [vmem:[#allocation3 + $0x88] sm:$0xff] %vm1134_vm5, %v1073_v31  ;;  %1151 = vst.msk [vmem:[#allocation3 + $0x80] sm:$0xff] %vm1134_vm5, %v1071_v34 }
 0x180   : > { %1447 = vrot.lane.b32.xlu1 %v1372_v24, %s6610_s24  ;;  %1445 = vrot.lane.b32.xlu0 %v1371_v30, %s6610_s24  ;;  %v1565_v24 = vld [vmem:[#allocation2 + $0x9a] sm:$0xff]  ;;  %v1564_v30 = vld [vmem:[#allocation2 + $0x92] sm:$0xff] }
 0x182   : > { %v1077_v38 = vpop.permute.xlu1 %1076  ;;  %v1075_v39 = vpop.permute.xlu0 %1074 }
 0x183   : > { %1154 = vst.msk [vmem:[#allocation3 + $0x98] sm:$0xff] %vm1134_vm5, %v1077_v38  ;;  %1153 = vst.msk [vmem:[#allocation3 + $0x90] sm:$0xff] %vm1134_vm5, %v1075_v39 }
 0x184   : > { %1451 = vrot.lane.b32.xlu1 %v1374_v35, %s6610_s24  ;;  %1449 = vrot.lane.b32.xlu0 %v1373_v37, %s6610_s24  ;;  %v1567_v35 = vld [vmem:[#allocation2 + $0xb2] sm:$0xff]  ;;  %v1566_v37 = vld [vmem:[#allocation2 + $0xaa] sm:$0xff] }
 0x186   : > { %v1081_v42 = vpop.permute.xlu1 %1080  ;;  %v1079_v43 = vpop.permute.xlu0 %1078 }
 0x187   : > { %1156 = vst.msk [vmem:[#allocation3 + $0xa8] sm:$0xff] %vm1134_vm5, %v1081_v42  ;;  %1155 = vst.msk [vmem:[#allocation3 + $0xa0] sm:$0xff] %vm1134_vm5, %v1079_v43 }
 0x188   : > { %1455 = vrot.lane.b32.xlu1 %v1376_v40, %s6610_s24  ;;  %1453 = vrot.lane.b32.xlu0 %v1375_v41, %s6610_s24  ;;  %v1569_v40 = vld [vmem:[#allocation2 + $0xca] sm:$0xff]  ;;  %v1568_v41 = vld [vmem:[#allocation2 + $0xc2] sm:$0xff] }
 0x18a   : > { %v1085_v46 = vpop.permute.xlu1 %1084  ;;  %v1083_v48 = vpop.permute.xlu0 %1082 }
 0x18b   : > { %1158 = vst.msk [vmem:[#allocation3 + $0xb8] sm:$0xff] %vm1134_vm5, %v1085_v46  ;;  %1157 = vst.msk [vmem:[#allocation3 + $0xb0] sm:$0xff] %vm1134_vm5, %v1083_v48 }
 0x18c   : > { %1459 = vrot.lane.b32.xlu1 %v1378_v44, %s6610_s24  ;;  %1457 = vrot.lane.b32.xlu0 %v1377_v45, %s6610_s24  ;;  %v1571_v44 = vld [vmem:[#allocation2 + $0xe2] sm:$0xff]  ;;  %v1570_v45 = vld [vmem:[#allocation2 + $0xda] sm:$0xff] }
 0x18e   : > { %v1089_v63 = vpop.permute.xlu1 %1088  ;;  %v1087_v0 = vpop.permute.xlu0 %1086 }
 0x18f   : > { %1160 = vst.msk [vmem:[#allocation3 + $0xc8] sm:$0xff] %vm1134_vm5, %v1089_v63  ;;  %1159 = vst.msk [vmem:[#allocation3 + $0xc0] sm:$0xff] %vm1134_vm5, %v1087_v0 }
 0x190   : > { %1463 = vrot.lane.b32.xlu1 %v1380_v47, %s6610_s24  ;;  %1461 = vrot.lane.b32.xlu0 %v1379_v49, %s6610_s24  ;;  %v1573_v47 = vld [vmem:[#allocation2 + $0xfa] sm:$0xff]  ;;  %v1572_v49 = vld [vmem:[#allocation2 + $0xf2] sm:$0xff] }
 0x192   : > { %v1093_v3 = vpop.permute.xlu1 %1092  ;;  %v1091_v4 = vpop.permute.xlu0 %1090 }
 0x193   : > { %1162 = vst.msk [vmem:[#allocation3 + $0xd8] sm:$0xff] %vm1134_vm5, %v1093_v3  ;;  %1161 = vst.msk [vmem:[#allocation3 + $0xd0] sm:$0xff] %vm1134_vm5, %v1091_v4 }
 0x194   : > { %1467 = vrot.lane.b32.xlu1 %v1382_v1, %s6610_s24  ;;  %1465 = vrot.lane.b32.xlu0 %v1381_v2, %s6610_s24  ;;  %v1575_v1 = vld [vmem:[#allocation2 + $0x112] sm:$0xff]  ;;  %v1574_v2 = vld [vmem:[#allocation2 + $0x10a] sm:$0xff] }
 0x196   : > { %v1097_v9 = vpop.permute.xlu1 %1096  ;;  %v1095_v10 = vpop.permute.xlu0 %1094 }
 0x197   : > { %1164 = vst.msk [vmem:[#allocation3 + $0xe8] sm:$0xff] %vm1134_vm5, %v1097_v9  ;;  %1163 = vst.msk [vmem:[#allocation3 + $0xe0] sm:$0xff] %vm1134_vm5, %v1095_v10 }
 0x198   : > { %1471 = vrot.lane.b32.xlu1 %v1384_v5, %s6610_s24  ;;  %1469 = vrot.lane.b32.xlu0 %v1383_v7, %s6610_s24  ;;  %v1577_v5 = vld [vmem:[#allocation2 + $0x12a] sm:$0xff]  ;;  %v1576_v7 = vld [vmem:[#allocation2 + $0x122] sm:$0xff] }
 0x19a   : > { %v1101_v13 = vpop.permute.xlu1 %1100  ;;  %v1099_v15 = vpop.permute.xlu0 %1098 }
 0x19b   : > { %1166 = vst.msk [vmem:[#allocation3 + $0xf8] sm:$0xff] %vm1134_vm5, %v1101_v13  ;;  %1165 = vst.msk [vmem:[#allocation3 + $0xf0] sm:$0xff] %vm1134_vm5, %v1099_v15 }
 0x19c   : > { %1475 = vrot.lane.b32.xlu1 %v1386_v11, %s6610_s24  ;;  %1473 = vrot.lane.b32.xlu0 %v1385_v12, %s6610_s24  ;;  %v1579_v11 = vld [vmem:[#allocation2 + $0x142] sm:$0xff]  ;;  %v1578_v12 = vld [vmem:[#allocation2 + $0x13a] sm:$0xff] }
 0x19e   : > { %v1235_v19 = vpop.permute.xlu1 %1234  ;;  %v1233_v20 = vpop.permute.xlu0 %1232 }
 0x19f   : > { %1330 = vst.msk [vmem:[#allocation3 + $0x8] sm:$0xff] %vm1328_vm6, %v1235_v19  ;;  %1329 = vst.msk [vmem:[#allocation3] sm:$0xff] %vm1328_vm6, %v1233_v20 }
 0x1a0   : > { %1479 = vrot.lane.b32.xlu1 %v1388_v17, %s6610_s24  ;;  %1477 = vrot.lane.b32.xlu0 %v1387_v18, %s6610_s24  ;;  %v1581_v17 = vld [vmem:[#allocation2 + $0x15a] sm:$0xff]  ;;  %v1580_v18 = vld [vmem:[#allocation2 + $0x152] sm:$0xff] }
 0x1a2   : > { %v1239_v25 = vpop.permute.xlu1 %1238  ;;  %v1237_v26 = vpop.permute.xlu0 %1236 }
 0x1a3   : > { %1332 = vst.msk [vmem:[#allocation3 + $0x18] sm:$0xff] %vm1328_vm6, %v1239_v25  ;;  %1331 = vst.msk [vmem:[#allocation3 + $0x10] sm:$0xff] %vm1328_vm6, %v1237_v26 }
 0x1a4   : > { %1483 = vrot.lane.b32.xlu1 %v1390_v21, %s6610_s24  ;;  %1481 = vrot.lane.b32.xlu0 %v1389_v23, %s6610_s24  ;;  %v1583_v21 = vld [vmem:[#allocation2 + $0x172] sm:$0xff]  ;;  %v1582_v23 = vld [vmem:[#allocation2 + $0x16a] sm:$0xff] }
 0x1a6   : > { %v1243_v50 = vpop.permute.xlu1 %1242  ;;  %v1241_v51 = vpop.permute.xlu0 %1240 }
 0x1a7   : > { %1334 = vst.msk [vmem:[#allocation3 + $0x28] sm:$0xff] %vm1328_vm6, %v1243_v50  ;;  %1333 = vst.msk [vmem:[#allocation3 + $0x20] sm:$0xff] %vm1328_vm6, %v1241_v51 }
 0x1a8   : > { %1487 = vrot.lane.b32.xlu1 %v1392_v27, %s6610_s24  ;;  %1485 = vrot.lane.b32.xlu0 %v1391_v28, %s6610_s24  ;;  %v1585_v27 = vld [vmem:[#allocation2 + $0x18a] sm:$0xff]  ;;  %v1584_v28 = vld [vmem:[#allocation2 + $0x182] sm:$0xff] }
 0x1aa   : > { %v1247_v52 = vpop.permute.xlu1 %1246  ;;  %v1245_v53 = vpop.permute.xlu0 %1244 }
 0x1ab   : > { %1336 = vst.msk [vmem:[#allocation3 + $0x38] sm:$0xff] %vm1328_vm6, %v1247_v52  ;;  %1335 = vst.msk [vmem:[#allocation3 + $0x30] sm:$0xff] %vm1328_vm6, %v1245_v53 }
 0x1ac   : > { %1620 = vrot.lane.b32.xlu1 %v1555_v29, %s6611_s25  ;;  %1618 = vrot.lane.b32.xlu0 %v1554_v32, %s6611_s25  ;;  %v1748_v29 = vld [vmem:[#allocation2 + $0x23] sm:$0xff]  ;;  %v1747_v32 = vld [vmem:[#allocation2 + $0x1b] sm:$0xff] }
 0x1ae   : > { %v1251_v54 = vpop.permute.xlu1 %1250  ;;  %v1249_v55 = vpop.permute.xlu0 %1248 }
 0x1af   : > { %1338 = vst.msk [vmem:[#allocation3 + $0x48] sm:$0xff] %vm1328_vm6, %v1251_v54  ;;  %1337 = vst.msk [vmem:[#allocation3 + $0x40] sm:$0xff] %vm1328_vm6, %v1249_v55 }
 0x1b0   : > { %1624 = vrot.lane.b32.xlu1 %v1557_v33, %s6611_s25  ;;  %1622 = vrot.lane.b32.xlu0 %v1556_v36, %s6611_s25  ;;  %v1750_v33 = vld [vmem:[#allocation2 + $0x3b] sm:$0xff]  ;;  %v1749_v36 = vld [vmem:[#allocation2 + $0x33] sm:$0xff] }
 0x1b2   : > { %v1255_v58 = vpop.permute.xlu1 %1254  ;;  %v1253_v59 = vpop.permute.xlu0 %1252 }
 0x1b3   : > { %1340 = vst.msk [vmem:[#allocation3 + $0x58] sm:$0xff] %vm1328_vm6, %v1255_v58  ;;  %1339 = vst.msk [vmem:[#allocation3 + $0x50] sm:$0xff] %vm1328_vm6, %v1253_v59 }
 0x1b4   : > { %1628 = vrot.lane.b32.xlu1 %v1559_v56, %s6611_s25  ;;  %1626 = vrot.lane.b32.xlu0 %v1558_v57, %s6611_s25  ;;  %v1752_v56 = vld [vmem:[#allocation2 + $0x53] sm:$0xff]  ;;  %v1751_v57 = vld [vmem:[#allocation2 + $0x4b] sm:$0xff] }
 0x1b6   : > { %v1259_v62 = vpop.permute.xlu1 %1258  ;;  %v1257_v6 = vpop.permute.xlu0 %1256 }
 0x1b7   : > { %1342 = vst.msk [vmem:[#allocation3 + $0x68] sm:$0xff] %vm1328_vm6, %v1259_v62  ;;  %1341 = vst.msk [vmem:[#allocation3 + $0x60] sm:$0xff] %vm1328_vm6, %v1257_v6 }
 0x1b8   : > { %1632 = vrot.lane.b32.xlu1 %v1561_v60, %s6611_s25  ;;  %1630 = vrot.lane.b32.xlu0 %v1560_v61, %s6611_s25  ;;  %v1754_v60 = vld [vmem:[#allocation2 + $0x6b] sm:$0xff]  ;;  %v1753_v61 = vld [vmem:[#allocation2 + $0x63] sm:$0xff] }
 0x1ba   : > { %v1263_v16 = vpop.permute.xlu1 %1262  ;;  %v1261_v22 = vpop.permute.xlu0 %1260 }
 0x1bb   : > { %1344 = vst.msk [vmem:[#allocation3 + $0x78] sm:$0xff] %vm1328_vm6, %v1263_v16  ;;  %1343 = vst.msk [vmem:[#allocation3 + $0x70] sm:$0xff] %vm1328_vm6, %v1261_v22 }
 0x1bc   : > { %1636 = vrot.lane.b32.xlu1 %v1563_v8, %s6611_s25  ;;  %1634 = vrot.lane.b32.xlu0 %v1562_v14, %s6611_s25  ;;  %v1756_v8 = vld [vmem:[#allocation2 + $0x83] sm:$0xff]  ;;  %v1755_v14 = vld [vmem:[#allocation2 + $0x7b] sm:$0xff] }
 0x1be   : > { %v1267_v31 = vpop.permute.xlu1 %1266  ;;  %v1265_v34 = vpop.permute.xlu0 %1264 }
 0x1bf   : > { %1346 = vst.msk [vmem:[#allocation3 + $0x88] sm:$0xff] %vm1328_vm6, %v1267_v31  ;;  %1345 = vst.msk [vmem:[#allocation3 + $0x80] sm:$0xff] %vm1328_vm6, %v1265_v34 }
 0x1c0   : > { %1640 = vrot.lane.b32.xlu1 %v1565_v24, %s6611_s25  ;;  %1638 = vrot.lane.b32.xlu0 %v1564_v30, %s6611_s25  ;;  %v1758_v24 = vld [vmem:[#allocation2 + $0x9b] sm:$0xff]  ;;  %v1757_v30 = vld [vmem:[#allocation2 + $0x93] sm:$0xff] }
 0x1c2   : > { %v1271_v38 = vpop.permute.xlu1 %1270  ;;  %v1269_v39 = vpop.permute.xlu0 %1268 }
 0x1c3   : > { %1348 = vst.msk [vmem:[#allocation3 + $0x98] sm:$0xff] %vm1328_vm6, %v1271_v38  ;;  %1347 = vst.msk [vmem:[#allocation3 + $0x90] sm:$0xff] %vm1328_vm6, %v1269_v39 }
 0x1c4   : > { %1644 = vrot.lane.b32.xlu1 %v1567_v35, %s6611_s25  ;;  %1642 = vrot.lane.b32.xlu0 %v1566_v37, %s6611_s25  ;;  %v1760_v35 = vld [vmem:[#allocation2 + $0xb3] sm:$0xff]  ;;  %v1759_v37 = vld [vmem:[#allocation2 + $0xab] sm:$0xff] }
 0x1c6   : > { %v1275_v42 = vpop.permute.xlu1 %1274  ;;  %v1273_v43 = vpop.permute.xlu0 %1272 }
 0x1c7   : > { %1350 = vst.msk [vmem:[#allocation3 + $0xa8] sm:$0xff] %vm1328_vm6, %v1275_v42  ;;  %1349 = vst.msk [vmem:[#allocation3 + $0xa0] sm:$0xff] %vm1328_vm6, %v1273_v43 }
 0x1c8   : > { %1648 = vrot.lane.b32.xlu1 %v1569_v40, %s6611_s25  ;;  %1646 = vrot.lane.b32.xlu0 %v1568_v41, %s6611_s25  ;;  %v1762_v40 = vld [vmem:[#allocation2 + $0xcb] sm:$0xff]  ;;  %v1761_v41 = vld [vmem:[#allocation2 + $0xc3] sm:$0xff] }
 0x1ca   : > { %v1279_v46 = vpop.permute.xlu1 %1278  ;;  %v1277_v48 = vpop.permute.xlu0 %1276 }
 0x1cb   : > { %1352 = vst.msk [vmem:[#allocation3 + $0xb8] sm:$0xff] %vm1328_vm6, %v1279_v46  ;;  %1351 = vst.msk [vmem:[#allocation3 + $0xb0] sm:$0xff] %vm1328_vm6, %v1277_v48 }
 0x1cc   : > { %1652 = vrot.lane.b32.xlu1 %v1571_v44, %s6611_s25  ;;  %1650 = vrot.lane.b32.xlu0 %v1570_v45, %s6611_s25  ;;  %v1764_v44 = vld [vmem:[#allocation2 + $0xe3] sm:$0xff]  ;;  %v1763_v45 = vld [vmem:[#allocation2 + $0xdb] sm:$0xff] }
 0x1ce   : > { %v1283_v63 = vpop.permute.xlu1 %1282  ;;  %v1281_v0 = vpop.permute.xlu0 %1280 }
 0x1cf   : > { %1354 = vst.msk [vmem:[#allocation3 + $0xc8] sm:$0xff] %vm1328_vm6, %v1283_v63  ;;  %1353 = vst.msk [vmem:[#allocation3 + $0xc0] sm:$0xff] %vm1328_vm6, %v1281_v0 }
 0x1d0   : > { %1656 = vrot.lane.b32.xlu1 %v1573_v47, %s6611_s25  ;;  %1654 = vrot.lane.b32.xlu0 %v1572_v49, %s6611_s25  ;;  %v1766_v47 = vld [vmem:[#allocation2 + $0xfb] sm:$0xff]  ;;  %v1765_v49 = vld [vmem:[#allocation2 + $0xf3] sm:$0xff] }
 0x1d2   : > { %v1287_v3 = vpop.permute.xlu1 %1286  ;;  %v1285_v4 = vpop.permute.xlu0 %1284 }
 0x1d3   : > { %1356 = vst.msk [vmem:[#allocation3 + $0xd8] sm:$0xff] %vm1328_vm6, %v1287_v3  ;;  %1355 = vst.msk [vmem:[#allocation3 + $0xd0] sm:$0xff] %vm1328_vm6, %v1285_v4 }
 0x1d4   : > { %1660 = vrot.lane.b32.xlu1 %v1575_v1, %s6611_s25  ;;  %1658 = vrot.lane.b32.xlu0 %v1574_v2, %s6611_s25  ;;  %v1768_v1 = vld [vmem:[#allocation2 + $0x113] sm:$0xff]  ;;  %v1767_v2 = vld [vmem:[#allocation2 + $0x10b] sm:$0xff] }
 0x1d6   : > { %v1291_v9 = vpop.permute.xlu1 %1290  ;;  %v1289_v10 = vpop.permute.xlu0 %1288 }
 0x1d7   : > { %1358 = vst.msk [vmem:[#allocation3 + $0xe8] sm:$0xff] %vm1328_vm6, %v1291_v9  ;;  %1357 = vst.msk [vmem:[#allocation3 + $0xe0] sm:$0xff] %vm1328_vm6, %v1289_v10 }
 0x1d8   : > { %1664 = vrot.lane.b32.xlu1 %v1577_v5, %s6611_s25  ;;  %1662 = vrot.lane.b32.xlu0 %v1576_v7, %s6611_s25  ;;  %v1770_v5 = vld [vmem:[#allocation2 + $0x12b] sm:$0xff]  ;;  %v1769_v7 = vld [vmem:[#allocation2 + $0x123] sm:$0xff] }
 0x1da   : > { %v1295_v13 = vpop.permute.xlu1 %1294  ;;  %v1293_v15 = vpop.permute.xlu0 %1292 }
 0x1db   : > { %1360 = vst.msk [vmem:[#allocation3 + $0xf8] sm:$0xff] %vm1328_vm6, %v1295_v13  ;;  %1359 = vst.msk [vmem:[#allocation3 + $0xf0] sm:$0xff] %vm1328_vm6, %v1293_v15  ;;  %vm5208_vm6 = vcmask 1046528  }
 0x1dc   : > { %1668 = vrot.lane.b32.xlu1 %v1579_v11, %s6611_s25  ;;  %1666 = vrot.lane.b32.xlu0 %v1578_v12, %s6611_s25  ;;  %v1772_v11 = vld [vmem:[#allocation2 + $0x143] sm:$0xff]  ;;  %v1771_v12 = vld [vmem:[#allocation2 + $0x13b] sm:$0xff] }
 0x1de   : > { %v1428_v19 = vpop.permute.xlu1 %1427  ;;  %v1426_v20 = vpop.permute.xlu0 %1425 }
 0x1df   : > { %1523 = vst.msk [vmem:[#allocation3 + $0x8] sm:$0xff] %vm1521_vm7, %v1428_v19  ;;  %1522 = vst.msk [vmem:[#allocation3] sm:$0xff] %vm1521_vm7, %v1426_v20  ;;  %v6441_v19 = vld [vmem:[%s6735_s18 + $0x78] sm:$0xff]  }
 0x1e0   : > { %1672 = vrot.lane.b32.xlu1 %v1581_v17, %s6611_s25  ;;  %1670 = vrot.lane.b32.xlu0 %v1580_v18, %s6611_s25  ;;  %v1774_v17 = vld [vmem:[#allocation2 + $0x15b] sm:$0xff]  ;;  %v1773_v18 = vld [vmem:[#allocation2 + $0x153] sm:$0xff] }
 0x1e2   : > { %v1432_v25 = vpop.permute.xlu1 %1431  ;;  %v1430_v26 = vpop.permute.xlu0 %1429 }
 0x1e3   : > { %1525 = vst.msk [vmem:[#allocation3 + $0x18] sm:$0xff] %vm1521_vm7, %v1432_v25  ;;  %1524 = vst.msk [vmem:[#allocation3 + $0x10] sm:$0xff] %vm1521_vm7, %v1430_v26  ;;  %v6426_v25 = vunpack.c.h.bf16 %v6441_v19  ;;  %v1776_v26 = vld [vmem:[#allocation2 + $0x173] sm:$0xff] }
 0x1e4   : > { %1676 = vrot.lane.b32.xlu1 %v1583_v21, %s6611_s25  ;;  %1674 = vrot.lane.b32.xlu0 %v1582_v23, %s6611_s25  ;;  %v6425_v23 = vunpack.c.l.bf16 %v6441_v19 }
 0x1e5   : > { %330 = vst.msk [vmem:[#allocation2 + $0x1a2] sm:$0xff] %vm172_vm0, %v6426_v25 }
 0x1e6   : > { %v1436_v50 = vpop.permute.xlu1 %1435  ;;  %v1434_v51 = vpop.permute.xlu0 %1433  ;;  %329 = vst.msk [vmem:[#allocation2 + $0x19a] sm:$0xff] %vm172_vm0, %v6425_v23  ;;  %vm3259_vm0 = vcmask 523744  }
 0x1e7   : > { %1527 = vst.msk [vmem:[#allocation3 + $0x28] sm:$0xff] %vm1521_vm7, %v1436_v50  ;;  %1526 = vst.msk [vmem:[#allocation3 + $0x20] sm:$0xff] %vm1521_vm7, %v1434_v51  ;;  %v1778_v51 = vld [vmem:[#allocation2 + $0x18b] sm:$0xff] }
 0x1e8   : > { %1680 = vrot.lane.b32.xlu1 %v1585_v27, %s6611_s25  ;;  %1678 = vrot.lane.b32.xlu0 %v1584_v28, %s6611_s25  ;;  %v1775_v27 = vld [vmem:[#allocation2 + $0x16b] sm:$0xff] }
 0x1ea   : > { %v1440_v52 = vpop.permute.xlu1 %1439  ;;  %v1438_v53 = vpop.permute.xlu0 %1437 }
 0x1eb   : > { %1529 = vst.msk [vmem:[#allocation3 + $0x38] sm:$0xff] %vm1521_vm7, %v1440_v52  ;;  %1528 = vst.msk [vmem:[#allocation3 + $0x30] sm:$0xff] %vm1521_vm7, %v1438_v53  ;;  %v1941_v53 = vld [vmem:[#allocation2 + $0x24] sm:$0xff] }
 0x1ec   : > { %1813 = vrot.lane.b32.xlu1 %v1748_v29, %s6612_s26  ;;  %1811 = vrot.lane.b32.xlu0 %v1747_v32, %s6612_s26  ;;  %v1777_v29 = vld [vmem:[#allocation2 + $0x183] sm:$0xff] }
 0x1ee   : > { %v1444_v54 = vpop.permute.xlu1 %1443  ;;  %v1442_v55 = vpop.permute.xlu0 %1441 }
 0x1ef   : > { %1531 = vst.msk [vmem:[#allocation3 + $0x48] sm:$0xff] %vm1521_vm7, %v1444_v54  ;;  %1530 = vst.msk [vmem:[#allocation3 + $0x40] sm:$0xff] %vm1521_vm7, %v1442_v55  ;;  %v1943_v55 = vld [vmem:[#allocation2 + $0x3c] sm:$0xff] }
 0x1f0   : > { %1817 = vrot.lane.b32.xlu1 %v1750_v33, %s6612_s26  ;;  %1815 = vrot.lane.b32.xlu0 %v1749_v36, %s6612_s26  ;;  %v1940_v33 = vld [vmem:[#allocation2 + $0x1c] sm:$0xff] }
 0x1f2   : > { %v1448_v58 = vpop.permute.xlu1 %1447  ;;  %v1446_v59 = vpop.permute.xlu0 %1445 }
 0x1f3   : > { %1533 = vst.msk [vmem:[#allocation3 + $0x58] sm:$0xff] %vm1521_vm7, %v1448_v58  ;;  %1532 = vst.msk [vmem:[#allocation3 + $0x50] sm:$0xff] %vm1521_vm7, %v1446_v59  ;;  %v1945_v59 = vld [vmem:[#allocation2 + $0x54] sm:$0xff] }
 0x1f4   : > { %1821 = vrot.lane.b32.xlu1 %v1752_v56, %s6612_s26  ;;  %1819 = vrot.lane.b32.xlu0 %v1751_v57, %s6612_s26  ;;  %v1942_v56 = vld [vmem:[#allocation2 + $0x34] sm:$0xff] }
 0x1f6   : > { %v1452_v62 = vpop.permute.xlu1 %1451  ;;  %v1450_v6 = vpop.permute.xlu0 %1449 }
 0x1f7   : > { %1535 = vst.msk [vmem:[#allocation3 + $0x68] sm:$0xff] %vm1521_vm7, %v1452_v62  ;;  %1534 = vst.msk [vmem:[#allocation3 + $0x60] sm:$0xff] %vm1521_vm7, %v1450_v6  ;;  %v1947_v6 = vld [vmem:[#allocation2 + $0x6c] sm:$0xff] }
 0x1f8   : > { %1825 = vrot.lane.b32.xlu1 %v1754_v60, %s6612_s26  ;;  %1823 = vrot.lane.b32.xlu0 %v1753_v61, %s6612_s26  ;;  %v1944_v60 = vld [vmem:[#allocation2 + $0x4c] sm:$0xff] }
 0x1fa   : > { %v1456_v16 = vpop.permute.xlu1 %1455  ;;  %v1454_v22 = vpop.permute.xlu0 %1453 }
 0x1fb   : > { %1537 = vst.msk [vmem:[#allocation3 + $0x78] sm:$0xff] %vm1521_vm7, %v1456_v16  ;;  %1536 = vst.msk [vmem:[#allocation3 + $0x70] sm:$0xff] %vm1521_vm7, %v1454_v22  ;;  %v1949_v22 = vld [vmem:[#allocation2 + $0x84] sm:$0xff] }
 0x1fc   : > { %1829 = vrot.lane.b32.xlu1 %v1756_v8, %s6612_s26  ;;  %1827 = vrot.lane.b32.xlu0 %v1755_v14, %s6612_s26  ;;  %v1946_v8 = vld [vmem:[#allocation2 + $0x64] sm:$0xff] }
 0x1fe   : > { %v1460_v31 = vpop.permute.xlu1 %1459  ;;  %v1458_v34 = vpop.permute.xlu0 %1457 }
 0x1ff   : > { %1539 = vst.msk [vmem:[#allocation3 + $0x88] sm:$0xff] %vm1521_vm7, %v1460_v31  ;;  %1538 = vst.msk [vmem:[#allocation3 + $0x80] sm:$0xff] %vm1521_vm7, %v1458_v34  ;;  %v1951_v34 = vld [vmem:[#allocation2 + $0x9c] sm:$0xff] }
 0x200   : > { %1833 = vrot.lane.b32.xlu1 %v1758_v24, %s6612_s26  ;;  %1831 = vrot.lane.b32.xlu0 %v1757_v30, %s6612_s26  ;;  %v1948_v24 = vld [vmem:[#allocation2 + $0x7c] sm:$0xff] }
 0x202   : > { %v1464_v38 = vpop.permute.xlu1 %1463  ;;  %v1462_v39 = vpop.permute.xlu0 %1461 }
 0x203   : > { %1541 = vst.msk [vmem:[#allocation3 + $0x98] sm:$0xff] %vm1521_vm7, %v1464_v38  ;;  %1540 = vst.msk [vmem:[#allocation3 + $0x90] sm:$0xff] %vm1521_vm7, %v1462_v39  ;;  %v1953_v39 = vld [vmem:[#allocation2 + $0xb4] sm:$0xff] }
 0x204   : > { %1837 = vrot.lane.b32.xlu1 %v1760_v35, %s6612_s26  ;;  %1835 = vrot.lane.b32.xlu0 %v1759_v37, %s6612_s26  ;;  %v1950_v35 = vld [vmem:[#allocation2 + $0x94] sm:$0xff] }
 0x206   : > { %v1468_v42 = vpop.permute.xlu1 %1467  ;;  %v1466_v43 = vpop.permute.xlu0 %1465 }
 0x207   : > { %1543 = vst.msk [vmem:[#allocation3 + $0xa8] sm:$0xff] %vm1521_vm7, %v1468_v42  ;;  %1542 = vst.msk [vmem:[#allocation3 + $0xa0] sm:$0xff] %vm1521_vm7, %v1466_v43  ;;  %v1955_v43 = vld [vmem:[#allocation2 + $0xcc] sm:$0xff] }
 0x208   : > { %1841 = vrot.lane.b32.xlu1 %v1762_v40, %s6612_s26  ;;  %1839 = vrot.lane.b32.xlu0 %v1761_v41, %s6612_s26  ;;  %v1952_v40 = vld [vmem:[#allocation2 + $0xac] sm:$0xff] }
 0x20a   : > { %v1472_v46 = vpop.permute.xlu1 %1471  ;;  %v1470_v48 = vpop.permute.xlu0 %1469 }
 0x20b   : > { %1545 = vst.msk [vmem:[#allocation3 + $0xb8] sm:$0xff] %vm1521_vm7, %v1472_v46  ;;  %1544 = vst.msk [vmem:[#allocation3 + $0xb0] sm:$0xff] %vm1521_vm7, %v1470_v48  ;;  %v1957_v48 = vld [vmem:[#allocation2 + $0xe4] sm:$0xff] }
 0x20c   : > { %1845 = vrot.lane.b32.xlu1 %v1764_v44, %s6612_s26  ;;  %1843 = vrot.lane.b32.xlu0 %v1763_v45, %s6612_s26  ;;  %v1954_v44 = vld [vmem:[#allocation2 + $0xc4] sm:$0xff] }
 0x20e   : > { %v1476_v63 = vpop.permute.xlu1 %1475  ;;  %v1474_v0 = vpop.permute.xlu0 %1473 }
 0x20f   : > { %1547 = vst.msk [vmem:[#allocation3 + $0xc8] sm:$0xff] %vm1521_vm7, %v1476_v63  ;;  %1546 = vst.msk [vmem:[#allocation3 + $0xc0] sm:$0xff] %vm1521_vm7, %v1474_v0  ;;  %v1959_v0 = vld [vmem:[#allocation2 + $0xfc] sm:$0xff] }
 0x210   : > { %1849 = vrot.lane.b32.xlu1 %v1766_v47, %s6612_s26  ;;  %1847 = vrot.lane.b32.xlu0 %v1765_v49, %s6612_s26  ;;  %v1956_v47 = vld [vmem:[#allocation2 + $0xdc] sm:$0xff] }
 0x212   : > { %v1480_v3 = vpop.permute.xlu1 %1479  ;;  %v1478_v4 = vpop.permute.xlu0 %1477 }
 0x213   : > { %1549 = vst.msk [vmem:[#allocation3 + $0xd8] sm:$0xff] %vm1521_vm7, %v1480_v3  ;;  %1548 = vst.msk [vmem:[#allocation3 + $0xd0] sm:$0xff] %vm1521_vm7, %v1478_v4  ;;  %v1961_v4 = vld [vmem:[#allocation2 + $0x114] sm:$0xff] }
 0x214   : > { %1853 = vrot.lane.b32.xlu1 %v1768_v1, %s6612_s26  ;;  %1851 = vrot.lane.b32.xlu0 %v1767_v2, %s6612_s26  ;;  %v1958_v1 = vld [vmem:[#allocation2 + $0xf4] sm:$0xff] }
 0x216   : > { %v1484_v9 = vpop.permute.xlu1 %1483  ;;  %v1482_v10 = vpop.permute.xlu0 %1481 }
 0x217   : > { %1551 = vst.msk [vmem:[#allocation3 + $0xe8] sm:$0xff] %vm1521_vm7, %v1484_v9  ;;  %1550 = vst.msk [vmem:[#allocation3 + $0xe0] sm:$0xff] %vm1521_vm7, %v1482_v10  ;;  %v1963_v10 = vld [vmem:[#allocation2 + $0x12c] sm:$0xff] }
 0x218   : > { %1857 = vrot.lane.b32.xlu1 %v1770_v5, %s6612_s26  ;;  %1855 = vrot.lane.b32.xlu0 %v1769_v7, %s6612_s26  ;;  %v1960_v5 = vld [vmem:[#allocation2 + $0x10c] sm:$0xff] }
 0x21a   : > { %v1488_v13 = vpop.permute.xlu1 %1487  ;;  %v1486_v15 = vpop.permute.xlu0 %1485 }
 0x21b   : > { %1553 = vst.msk [vmem:[#allocation3 + $0xf8] sm:$0xff] %vm1521_vm7, %v1488_v13  ;;  %1552 = vst.msk [vmem:[#allocation3 + $0xf0] sm:$0xff] %vm1521_vm7, %v1486_v15  ;;  %v1965_v15 = vld [vmem:[#allocation2 + $0x144] sm:$0xff]  ;;  %vm5353_vm7 = vcmask 1045504  }
 0x21c   : > { %1861 = vrot.lane.b32.xlu1 %v1772_v11, %s6612_s26  ;;  %1859 = vrot.lane.b32.xlu0 %v1771_v12, %s6612_s26  ;;  %v1962_v11 = vld [vmem:[#allocation2 + $0x124] sm:$0xff] }
 0x21e   : > { %v1621_v20 = vpop.permute.xlu1 %1620  ;;  %v1619_v21 = vpop.permute.xlu0 %1618 }
 0x21f   : > { %1716 = vst.msk [vmem:[#allocation3 + $0x8] sm:$0xff] %vm1714_vm8, %v1621_v20  ;;  %1715 = vst.msk [vmem:[#allocation3] sm:$0xff] %vm1714_vm8, %v1619_v21  ;;  %v1967_v20 = vld [vmem:[#allocation2 + $0x15c] sm:$0xff]  ;;  %v1966_v21 = vld [vmem:[#allocation2 + $0x154] sm:$0xff] }
 0x220   : > { %1865 = vrot.lane.b32.xlu1 %v1774_v17, %s6612_s26  ;;  %1863 = vrot.lane.b32.xlu0 %v1773_v18, %s6612_s26  ;;  %v1964_v17 = vld [vmem:[#allocation2 + $0x13c] sm:$0xff] }
 0x222   : > { %v1625_v28 = vpop.permute.xlu1 %1624  ;;  %v1623_v50 = vpop.permute.xlu0 %1622 }
 0x223   : > { %1718 = vst.msk [vmem:[#allocation3 + $0x18] sm:$0xff] %vm1714_vm8, %v1625_v28  ;;  %1717 = vst.msk [vmem:[#allocation3 + $0x10] sm:$0xff] %vm1714_vm8, %v1623_v50 }
 0x224   : > { %1869 = vrot.lane.b32.xlu1 %v1776_v26, %s6612_s26  ;;  %1867 = vrot.lane.b32.xlu0 %v1775_v27, %s6612_s26  ;;  %v1969_v26 = vld [vmem:[#allocation2 + $0x174] sm:$0xff]  ;;  %v1968_v27 = vld [vmem:[#allocation2 + $0x16c] sm:$0xff] }
 0x226   : > { %v1629_v32 = vpop.permute.xlu1 %1628  ;;  %v1627_v52 = vpop.permute.xlu0 %1626 }
 0x227   : > { %1720 = vst.msk [vmem:[#allocation3 + $0x28] sm:$0xff] %vm1714_vm8, %v1629_v32  ;;  %1719 = vst.msk [vmem:[#allocation3 + $0x20] sm:$0xff] %vm1714_vm8, %v1627_v52 }
 0x228   : > { %1873 = vrot.lane.b32.xlu1 %v1778_v51, %s6612_s26  ;;  %1871 = vrot.lane.b32.xlu0 %v1777_v29, %s6612_s26  ;;  %v1971_v51 = vld [vmem:[#allocation2 + $0x18c] sm:$0xff]  ;;  %v1970_v29 = vld [vmem:[#allocation2 + $0x184] sm:$0xff] }
 0x22a   : > { %v1633_v36 = vpop.permute.xlu1 %1632  ;;  %v1631_v54 = vpop.permute.xlu0 %1630 }
 0x22b   : > { %1722 = vst.msk [vmem:[#allocation3 + $0x38] sm:$0xff] %vm1714_vm8, %v1633_v36  ;;  %1721 = vst.msk [vmem:[#allocation3 + $0x30] sm:$0xff] %vm1714_vm8, %v1631_v54 }
 0x22c   : > { %2006 = vrot.lane.b32.xlu1 %v1941_v53, %s6613_s27  ;;  %2004 = vrot.lane.b32.xlu0 %v1940_v33, %s6613_s27  ;;  %v2134_v53 = vld [vmem:[#allocation2 + $0x38] sm:$0xff]  ;;  %v2133_v33 = vld [vmem:[#allocation2 + $0x30] sm:$0xff] }
 0x22e   : > { %v1637_v57 = vpop.permute.xlu1 %1636  ;;  %v1635_v58 = vpop.permute.xlu0 %1634 }
 0x22f   : > { %1724 = vst.msk [vmem:[#allocation3 + $0x48] sm:$0xff] %vm1714_vm8, %v1637_v57  ;;  %1723 = vst.msk [vmem:[#allocation3 + $0x40] sm:$0xff] %vm1714_vm8, %v1635_v58 }
 0x230   : > { %2010 = vrot.lane.b32.xlu1 %v1943_v55, %s6613_s27  ;;  %2008 = vrot.lane.b32.xlu0 %v1942_v56, %s6613_s27  ;;  %v2136_v55 = vld [vmem:[#allocation2 + $0x50] sm:$0xff]  ;;  %v2135_v56 = vld [vmem:[#allocation2 + $0x48] sm:$0xff] }
 0x232   : > { %v1641_v61 = vpop.permute.xlu1 %1640  ;;  %v1639_v62 = vpop.permute.xlu0 %1638 }
 0x233   : > { %1726 = vst.msk [vmem:[#allocation3 + $0x58] sm:$0xff] %vm1714_vm8, %v1641_v61  ;;  %1725 = vst.msk [vmem:[#allocation3 + $0x50] sm:$0xff] %vm1714_vm8, %v1639_v62 }
 0x234   : > { %2014 = vrot.lane.b32.xlu1 %v1945_v59, %s6613_s27  ;;  %2012 = vrot.lane.b32.xlu0 %v1944_v60, %s6613_s27  ;;  %v2138_v59 = vld [vmem:[#allocation2 + $0x68] sm:$0xff]  ;;  %v2137_v60 = vld [vmem:[#allocation2 + $0x60] sm:$0xff] }
 0x236   : > { %v1645_v14 = vpop.permute.xlu1 %1644  ;;  %v1643_v16 = vpop.permute.xlu0 %1642 }
 0x237   : > { %1728 = vst.msk [vmem:[#allocation3 + $0x68] sm:$0xff] %vm1714_vm8, %v1645_v14  ;;  %1727 = vst.msk [vmem:[#allocation3 + $0x60] sm:$0xff] %vm1714_vm8, %v1643_v16 }
 0x238   : > { %2018 = vrot.lane.b32.xlu1 %v1947_v6, %s6613_s27  ;;  %2016 = vrot.lane.b32.xlu0 %v1946_v8, %s6613_s27  ;;  %v2140_v6 = vld [vmem:[#allocation2 + $0x80] sm:$0xff]  ;;  %v2139_v8 = vld [vmem:[#allocation2 + $0x78] sm:$0xff] }
 0x23a   : > { %v1649_v30 = vpop.permute.xlu1 %1648  ;;  %v1647_v31 = vpop.permute.xlu0 %1646 }
 0x23b   : > { %1730 = vst.msk [vmem:[#allocation3 + $0x78] sm:$0xff] %vm1714_vm8, %v1649_v30  ;;  %1729 = vst.msk [vmem:[#allocation3 + $0x70] sm:$0xff] %vm1714_vm8, %v1647_v31 }
 0x23c   : > { %2022 = vrot.lane.b32.xlu1 %v1949_v22, %s6613_s27  ;;  %2020 = vrot.lane.b32.xlu0 %v1948_v24, %s6613_s27  ;;  %v2142_v22 = vld [vmem:[#allocation2 + $0x98] sm:$0xff]  ;;  %v2141_v24 = vld [vmem:[#allocation2 + $0x90] sm:$0xff] }
 0x23e   : > { %v1653_v37 = vpop.permute.xlu1 %1652  ;;  %v1651_v38 = vpop.permute.xlu0 %1650 }
 0x23f   : > { %1732 = vst.msk [vmem:[#allocation3 + $0x88] sm:$0xff] %vm1714_vm8, %v1653_v37  ;;  %1731 = vst.msk [vmem:[#allocation3 + $0x80] sm:$0xff] %vm1714_vm8, %v1651_v38 }
 0x240   : > { %2026 = vrot.lane.b32.xlu1 %v1951_v34, %s6613_s27  ;;  %2024 = vrot.lane.b32.xlu0 %v1950_v35, %s6613_s27  ;;  %v2144_v34 = vld [vmem:[#allocation2 + $0xb0] sm:$0xff]  ;;  %v2143_v35 = vld [vmem:[#allocation2 + $0xa8] sm:$0xff] }
 0x242   : > { %v1657_v41 = vpop.permute.xlu1 %1656  ;;  %v1655_v42 = vpop.permute.xlu0 %1654 }
 0x243   : > { %1734 = vst.msk [vmem:[#allocation3 + $0x98] sm:$0xff] %vm1714_vm8, %v1657_v41  ;;  %1733 = vst.msk [vmem:[#allocation3 + $0x90] sm:$0xff] %vm1714_vm8, %v1655_v42 }
 0x244   : > { %2030 = vrot.lane.b32.xlu1 %v1953_v39, %s6613_s27  ;;  %2028 = vrot.lane.b32.xlu0 %v1952_v40, %s6613_s27  ;;  %v2146_v39 = vld [vmem:[#allocation2 + $0xc8] sm:$0xff]  ;;  %v2145_v40 = vld [vmem:[#allocation2 + $0xc0] sm:$0xff] }
 0x246   : > { %v1661_v45 = vpop.permute.xlu1 %1660  ;;  %v1659_v46 = vpop.permute.xlu0 %1658 }
 0x247   : > { %1736 = vst.msk [vmem:[#allocation3 + $0xa8] sm:$0xff] %vm1714_vm8, %v1661_v45  ;;  %1735 = vst.msk [vmem:[#allocation3 + $0xa0] sm:$0xff] %vm1714_vm8, %v1659_v46 }
 0x248   : > { %2034 = vrot.lane.b32.xlu1 %v1955_v43, %s6613_s27  ;;  %2032 = vrot.lane.b32.xlu0 %v1954_v44, %s6613_s27  ;;  %v2148_v43 = vld [vmem:[#allocation2 + $0xe0] sm:$0xff]  ;;  %v2147_v44 = vld [vmem:[#allocation2 + $0xd8] sm:$0xff] }
 0x24a   : > { %v1665_v49 = vpop.permute.xlu1 %1664  ;;  %v1663_v63 = vpop.permute.xlu0 %1662 }
 0x24b   : > { %1738 = vst.msk [vmem:[#allocation3 + $0xb8] sm:$0xff] %vm1714_vm8, %v1665_v49  ;;  %1737 = vst.msk [vmem:[#allocation3 + $0xb0] sm:$0xff] %vm1714_vm8, %v1663_v63 }
 0x24c   : > { %2038 = vrot.lane.b32.xlu1 %v1957_v48, %s6613_s27  ;;  %2036 = vrot.lane.b32.xlu0 %v1956_v47, %s6613_s27  ;;  %v2150_v48 = vld [vmem:[#allocation2 + $0xf8] sm:$0xff]  ;;  %v2149_v47 = vld [vmem:[#allocation2 + $0xf0] sm:$0xff] }
 0x24e   : > { %v1669_v2 = vpop.permute.xlu1 %1668  ;;  %v1667_v3 = vpop.permute.xlu0 %1666 }
 0x24f   : > { %1740 = vst.msk [vmem:[#allocation3 + $0xc8] sm:$0xff] %vm1714_vm8, %v1669_v2  ;;  %1739 = vst.msk [vmem:[#allocation3 + $0xc0] sm:$0xff] %vm1714_vm8, %v1667_v3 }
 0x250   : > { %2042 = vrot.lane.b32.xlu1 %v1959_v0, %s6613_s27  ;;  %2040 = vrot.lane.b32.xlu0 %v1958_v1, %s6613_s27  ;;  %v2152_v0 = vld [vmem:[#allocation2 + $0x110] sm:$0xff]  ;;  %v2151_v1 = vld [vmem:[#allocation2 + $0x108] sm:$0xff] }
 0x252   : > { %v1673_v7 = vpop.permute.xlu1 %1672  ;;  %v1671_v9 = vpop.permute.xlu0 %1670 }
 0x253   : > { %1742 = vst.msk [vmem:[#allocation3 + $0xd8] sm:$0xff] %vm1714_vm8, %v1673_v7  ;;  %1741 = vst.msk [vmem:[#allocation3 + $0xd0] sm:$0xff] %vm1714_vm8, %v1671_v9 }
 0x254   : > { %2046 = vrot.lane.b32.xlu1 %v1961_v4, %s6613_s27  ;;  %2044 = vrot.lane.b32.xlu0 %v1960_v5, %s6613_s27  ;;  %v2154_v4 = vld [vmem:[#allocation2 + $0x128] sm:$0xff]  ;;  %v2153_v5 = vld [vmem:[#allocation2 + $0x120] sm:$0xff] }
 0x256   : > { %v1677_v12 = vpop.permute.xlu1 %1676  ;;  %v1675_v13 = vpop.permute.xlu0 %1674 }
 0x257   : > { %1744 = vst.msk [vmem:[#allocation3 + $0xe8] sm:$0xff] %vm1714_vm8, %v1677_v12  ;;  %1743 = vst.msk [vmem:[#allocation3 + $0xe0] sm:$0xff] %vm1714_vm8, %v1675_v13 }
 0x258   : > { %2050 = vrot.lane.b32.xlu1 %v1963_v10, %s6613_s27  ;;  %2048 = vrot.lane.b32.xlu0 %v1962_v11, %s6613_s27  ;;  %v2156_v10 = vld [vmem:[#allocation2 + $0x140] sm:$0xff]  ;;  %v2155_v11 = vld [vmem:[#allocation2 + $0x138] sm:$0xff] }
 0x25a   : > { %v1681_v18 = vpop.permute.xlu1 %1680  ;;  %v1679_v19 = vpop.permute.xlu0 %1678 }
 0x25b   : > { %1746 = vst.msk [vmem:[#allocation3 + $0xf8] sm:$0xff] %vm1714_vm8, %v1681_v18  ;;  %1745 = vst.msk [vmem:[#allocation3 + $0xf0] sm:$0xff] %vm1714_vm8, %v1679_v19  ;;  %vm4031_vm8 = vcmask 654944  }
 0x25c   : > { %2054 = vrot.lane.b32.xlu1 %v1965_v15, %s6613_s27  ;;  %2052 = vrot.lane.b32.xlu0 %v1964_v17, %s6613_s27  ;;  %v2158_v15 = vld [vmem:[#allocation2 + $0x158] sm:$0xff]  ;;  %v2157_v17 = vld [vmem:[#allocation2 + $0x150] sm:$0xff] }
 0x25e   : > { %v1814_v23 = vpop.permute.xlu1 %1813  ;;  %v1812_v25 = vpop.permute.xlu0 %1811 }
 0x25f   : > { %1909 = vst.msk [vmem:[#allocation3 + $0x8] sm:$0xff] %vm1907_vm9, %v1814_v23  ;;  %1908 = vst.msk [vmem:[#allocation3] sm:$0xff] %vm1907_vm9, %v1812_v25 }
 0x260   : > { %2058 = vrot.lane.b32.xlu1 %v1967_v20, %s6613_s27  ;;  %2056 = vrot.lane.b32.xlu0 %v1966_v21, %s6613_s27  ;;  %v2160_v20 = vld [vmem:[#allocation2 + $0x170] sm:$0xff]  ;;  %v2159_v21 = vld [vmem:[#allocation2 + $0x168] sm:$0xff] }
 0x262   : > { %v1818_v28 = vpop.permute.xlu1 %1817  ;;  %v1816_v50 = vpop.permute.xlu0 %1815 }
 0x263   : > { %1911 = vst.msk [vmem:[#allocation3 + $0x18] sm:$0xff] %vm1907_vm9, %v1818_v28  ;;  %1910 = vst.msk [vmem:[#allocation3 + $0x10] sm:$0xff] %vm1907_vm9, %v1816_v50 }
 0x264   : > { %2062 = vrot.lane.b32.xlu1 %v1969_v26, %s6613_s27  ;;  %2060 = vrot.lane.b32.xlu0 %v1968_v27, %s6613_s27  ;;  %v2162_v26 = vld [vmem:[#allocation2 + $0x188] sm:$0xff]  ;;  %v2161_v27 = vld [vmem:[#allocation2 + $0x180] sm:$0xff] }
 0x266   : > { %v1822_v32 = vpop.permute.xlu1 %1821  ;;  %v1820_v52 = vpop.permute.xlu0 %1819 }
 0x267   : > { %1913 = vst.msk [vmem:[#allocation3 + $0x28] sm:$0xff] %vm1907_vm9, %v1822_v32  ;;  %1912 = vst.msk [vmem:[#allocation3 + $0x20] sm:$0xff] %vm1907_vm9, %v1820_v52 }
 0x268   : > { %2066 = vrot.lane.b32.xlu1 %v1971_v51, %s6613_s27  ;;  %2064 = vrot.lane.b32.xlu0 %v1970_v29, %s6613_s27  ;;  %v2164_v51 = vld [vmem:[#allocation2 + $0x1a0] sm:$0xff]  ;;  %v2163_v29 = vld [vmem:[#allocation2 + $0x198] sm:$0xff] }
 0x26a   : > { %v1826_v36 = vpop.permute.xlu1 %1825  ;;  %v1824_v54 = vpop.permute.xlu0 %1823 }
 0x26b   : > { %1915 = vst.msk [vmem:[#allocation3 + $0x38] sm:$0xff] %vm1907_vm9, %v1826_v36  ;;  %1914 = vst.msk [vmem:[#allocation3 + $0x30] sm:$0xff] %vm1907_vm9, %v1824_v54 }
 0x26c   : > { %2199 = vrot.lane.b32.xlu1 %v2134_v53, %s6614_s28  ;;  %2197 = vrot.lane.b32.xlu0 %v2133_v33, %s6614_s28  ;;  %v2327_v53 = vld [vmem:[#allocation2 + $0x39] sm:$0xff]  ;;  %v2326_v33 = vld [vmem:[#allocation2 + $0x31] sm:$0xff] }
 0x26e   : > { %v1830_v57 = vpop.permute.xlu1 %1829  ;;  %v1828_v58 = vpop.permute.xlu0 %1827 }
 0x26f   : > { %1917 = vst.msk [vmem:[#allocation3 + $0x48] sm:$0xff] %vm1907_vm9, %v1830_v57  ;;  %1916 = vst.msk [vmem:[#allocation3 + $0x40] sm:$0xff] %vm1907_vm9, %v1828_v58 }
 0x270   : > { %2203 = vrot.lane.b32.xlu1 %v2136_v55, %s6614_s28  ;;  %2201 = vrot.lane.b32.xlu0 %v2135_v56, %s6614_s28  ;;  %v2329_v55 = vld [vmem:[#allocation2 + $0x51] sm:$0xff]  ;;  %v2328_v56 = vld [vmem:[#allocation2 + $0x49] sm:$0xff] }
 0x272   : > { %v1834_v61 = vpop.permute.xlu1 %1833  ;;  %v1832_v62 = vpop.permute.xlu0 %1831 }
 0x273   : > { %1919 = vst.msk [vmem:[#allocation3 + $0x58] sm:$0xff] %vm1907_vm9, %v1834_v61  ;;  %1918 = vst.msk [vmem:[#allocation3 + $0x50] sm:$0xff] %vm1907_vm9, %v1832_v62 }
 0x274   : > { %2207 = vrot.lane.b32.xlu1 %v2138_v59, %s6614_s28  ;;  %2205 = vrot.lane.b32.xlu0 %v2137_v60, %s6614_s28  ;;  %v2331_v59 = vld [vmem:[#allocation2 + $0x69] sm:$0xff]  ;;  %v2330_v60 = vld [vmem:[#allocation2 + $0x61] sm:$0xff] }
 0x276   : > { %v1838_v14 = vpop.permute.xlu1 %1837  ;;  %v1836_v16 = vpop.permute.xlu0 %1835 }
 0x277   : > { %1921 = vst.msk [vmem:[#allocation3 + $0x68] sm:$0xff] %vm1907_vm9, %v1838_v14  ;;  %1920 = vst.msk [vmem:[#allocation3 + $0x60] sm:$0xff] %vm1907_vm9, %v1836_v16 }
 0x278   : > { %2211 = vrot.lane.b32.xlu1 %v2140_v6, %s6614_s28  ;;  %2209 = vrot.lane.b32.xlu0 %v2139_v8, %s6614_s28  ;;  %v2333_v6 = vld [vmem:[#allocation2 + $0x81] sm:$0xff]  ;;  %v2332_v8 = vld [vmem:[#allocation2 + $0x79] sm:$0xff] }
 0x27a   : > { %v1842_v30 = vpop.permute.xlu1 %1841  ;;  %v1840_v31 = vpop.permute.xlu0 %1839 }
 0x27b   : > { %1923 = vst.msk [vmem:[#allocation3 + $0x78] sm:$0xff] %vm1907_vm9, %v1842_v30  ;;  %1922 = vst.msk [vmem:[#allocation3 + $0x70] sm:$0xff] %vm1907_vm9, %v1840_v31 }
 0x27c   : > { %2215 = vrot.lane.b32.xlu1 %v2142_v22, %s6614_s28  ;;  %2213 = vrot.lane.b32.xlu0 %v2141_v24, %s6614_s28  ;;  %v2335_v22 = vld [vmem:[#allocation2 + $0x99] sm:$0xff]  ;;  %v2334_v24 = vld [vmem:[#allocation2 + $0x91] sm:$0xff] }
 0x27e   : > { %v1846_v37 = vpop.permute.xlu1 %1845  ;;  %v1844_v38 = vpop.permute.xlu0 %1843 }
 0x27f   : > { %1925 = vst.msk [vmem:[#allocation3 + $0x88] sm:$0xff] %vm1907_vm9, %v1846_v37  ;;  %1924 = vst.msk [vmem:[#allocation3 + $0x80] sm:$0xff] %vm1907_vm9, %v1844_v38 }
 0x280   : > { %2219 = vrot.lane.b32.xlu1 %v2144_v34, %s6614_s28  ;;  %2217 = vrot.lane.b32.xlu0 %v2143_v35, %s6614_s28  ;;  %v2337_v34 = vld [vmem:[#allocation2 + $0xb1] sm:$0xff]  ;;  %v2336_v35 = vld [vmem:[#allocation2 + $0xa9] sm:$0xff] }
 0x282   : > { %v1850_v41 = vpop.permute.xlu1 %1849  ;;  %v1848_v42 = vpop.permute.xlu0 %1847 }
 0x283   : > { %1927 = vst.msk [vmem:[#allocation3 + $0x98] sm:$0xff] %vm1907_vm9, %v1850_v41  ;;  %1926 = vst.msk [vmem:[#allocation3 + $0x90] sm:$0xff] %vm1907_vm9, %v1848_v42 }
 0x284   : > { %2223 = vrot.lane.b32.xlu1 %v2146_v39, %s6614_s28  ;;  %2221 = vrot.lane.b32.xlu0 %v2145_v40, %s6614_s28  ;;  %v2339_v39 = vld [vmem:[#allocation2 + $0xc9] sm:$0xff]  ;;  %v2338_v40 = vld [vmem:[#allocation2 + $0xc1] sm:$0xff] }
 0x286   : > { %v1854_v45 = vpop.permute.xlu1 %1853  ;;  %v1852_v46 = vpop.permute.xlu0 %1851 }
 0x287   : > { %1929 = vst.msk [vmem:[#allocation3 + $0xa8] sm:$0xff] %vm1907_vm9, %v1854_v45  ;;  %1928 = vst.msk [vmem:[#allocation3 + $0xa0] sm:$0xff] %vm1907_vm9, %v1852_v46 }
 0x288   : > { %2227 = vrot.lane.b32.xlu1 %v2148_v43, %s6614_s28  ;;  %2225 = vrot.lane.b32.xlu0 %v2147_v44, %s6614_s28  ;;  %v2341_v43 = vld [vmem:[#allocation2 + $0xe1] sm:$0xff]  ;;  %v2340_v44 = vld [vmem:[#allocation2 + $0xd9] sm:$0xff] }
 0x28a   : > { %v1858_v49 = vpop.permute.xlu1 %1857  ;;  %v1856_v63 = vpop.permute.xlu0 %1855 }
 0x28b   : > { %1931 = vst.msk [vmem:[#allocation3 + $0xb8] sm:$0xff] %vm1907_vm9, %v1858_v49  ;;  %1930 = vst.msk [vmem:[#allocation3 + $0xb0] sm:$0xff] %vm1907_vm9, %v1856_v63 }
 0x28c   : > { %2231 = vrot.lane.b32.xlu1 %v2150_v48, %s6614_s28  ;;  %2229 = vrot.lane.b32.xlu0 %v2149_v47, %s6614_s28  ;;  %v2343_v48 = vld [vmem:[#allocation2 + $0xf9] sm:$0xff]  ;;  %v2342_v47 = vld [vmem:[#allocation2 + $0xf1] sm:$0xff] }
 0x28e   : > { %v1862_v2 = vpop.permute.xlu1 %1861  ;;  %v1860_v3 = vpop.permute.xlu0 %1859 }
 0x28f   : > { %1933 = vst.msk [vmem:[#allocation3 + $0xc8] sm:$0xff] %vm1907_vm9, %v1862_v2  ;;  %1932 = vst.msk [vmem:[#allocation3 + $0xc0] sm:$0xff] %vm1907_vm9, %v1860_v3 }
 0x290   : > { %2235 = vrot.lane.b32.xlu1 %v2152_v0, %s6614_s28  ;;  %2233 = vrot.lane.b32.xlu0 %v2151_v1, %s6614_s28  ;;  %v2345_v0 = vld [vmem:[#allocation2 + $0x111] sm:$0xff]  ;;  %v2344_v1 = vld [vmem:[#allocation2 + $0x109] sm:$0xff] }
 0x292   : > { %v1866_v7 = vpop.permute.xlu1 %1865  ;;  %v1864_v9 = vpop.permute.xlu0 %1863 }
 0x293   : > { %1935 = vst.msk [vmem:[#allocation3 + $0xd8] sm:$0xff] %vm1907_vm9, %v1866_v7  ;;  %1934 = vst.msk [vmem:[#allocation3 + $0xd0] sm:$0xff] %vm1907_vm9, %v1864_v9 }
 0x294   : > { %2239 = vrot.lane.b32.xlu1 %v2154_v4, %s6614_s28  ;;  %2237 = vrot.lane.b32.xlu0 %v2153_v5, %s6614_s28  ;;  %v2347_v4 = vld [vmem:[#allocation2 + $0x129] sm:$0xff]  ;;  %v2346_v5 = vld [vmem:[#allocation2 + $0x121] sm:$0xff] }
 0x296   : > { %v1870_v12 = vpop.permute.xlu1 %1869  ;;  %v1868_v13 = vpop.permute.xlu0 %1867 }
 0x297   : > { %1937 = vst.msk [vmem:[#allocation3 + $0xe8] sm:$0xff] %vm1907_vm9, %v1870_v12  ;;  %1936 = vst.msk [vmem:[#allocation3 + $0xe0] sm:$0xff] %vm1907_vm9, %v1868_v13 }
 0x298   : > { %2243 = vrot.lane.b32.xlu1 %v2156_v10, %s6614_s28  ;;  %2241 = vrot.lane.b32.xlu0 %v2155_v11, %s6614_s28  ;;  %v2349_v10 = vld [vmem:[#allocation2 + $0x141] sm:$0xff]  ;;  %v2348_v11 = vld [vmem:[#allocation2 + $0x139] sm:$0xff] }
 0x29a   : > { %v1874_v18 = vpop.permute.xlu1 %1873  ;;  %v1872_v19 = vpop.permute.xlu0 %1871 }
 0x29b   : > { %1939 = vst.msk [vmem:[#allocation3 + $0xf8] sm:$0xff] %vm1907_vm9, %v1874_v18  ;;  %1938 = vst.msk [vmem:[#allocation3 + $0xf0] sm:$0xff] %vm1907_vm9, %v1872_v19  ;;  %vm4225_vm9 = vcmask 687744  }
 0x29c   : > { %2247 = vrot.lane.b32.xlu1 %v2158_v15, %s6614_s28  ;;  %2245 = vrot.lane.b32.xlu0 %v2157_v17, %s6614_s28  ;;  %v2351_v15 = vld [vmem:[#allocation2 + $0x159] sm:$0xff]  ;;  %v2350_v17 = vld [vmem:[#allocation2 + $0x151] sm:$0xff] }
 0x29e   : > { %v2007_v23 = vpop.permute.xlu1 %2006  ;;  %v2005_v25 = vpop.permute.xlu0 %2004 }
 0x29f   : > { %2102 = vst.msk [vmem:[#allocation3 + $0x8] sm:$0xff] %vm2100_vm10, %v2007_v23  ;;  %2101 = vst.msk [vmem:[#allocation3] sm:$0xff] %vm2100_vm10, %v2005_v25 }
 0x2a0   : > { %2251 = vrot.lane.b32.xlu1 %v2160_v20, %s6614_s28  ;;  %2249 = vrot.lane.b32.xlu0 %v2159_v21, %s6614_s28  ;;  %v2353_v20 = vld [vmem:[#allocation2 + $0x171] sm:$0xff]  ;;  %v2352_v21 = vld [vmem:[#allocation2 + $0x169] sm:$0xff] }
 0x2a2   : > { %v2011_v28 = vpop.permute.xlu1 %2010  ;;  %v2009_v50 = vpop.permute.xlu0 %2008 }
 0x2a3   : > { %2104 = vst.msk [vmem:[#allocation3 + $0x18] sm:$0xff] %vm2100_vm10, %v2011_v28  ;;  %2103 = vst.msk [vmem:[#allocation3 + $0x10] sm:$0xff] %vm2100_vm10, %v2009_v50 }
 0x2a4   : > { %2255 = vrot.lane.b32.xlu1 %v2162_v26, %s6614_s28  ;;  %2253 = vrot.lane.b32.xlu0 %v2161_v27, %s6614_s28  ;;  %v2355_v26 = vld [vmem:[#allocation2 + $0x189] sm:$0xff]  ;;  %v2354_v27 = vld [vmem:[#allocation2 + $0x181] sm:$0xff] }
 0x2a6   : > { %v2015_v32 = vpop.permute.xlu1 %2014  ;;  %v2013_v52 = vpop.permute.xlu0 %2012 }
 0x2a7   : > { %2106 = vst.msk [vmem:[#allocation3 + $0x28] sm:$0xff] %vm2100_vm10, %v2015_v32  ;;  %2105 = vst.msk [vmem:[#allocation3 + $0x20] sm:$0xff] %vm2100_vm10, %v2013_v52 }
 0x2a8   : > { %2259 = vrot.lane.b32.xlu1 %v2164_v51, %s6614_s28  ;;  %2257 = vrot.lane.b32.xlu0 %v2163_v29, %s6614_s28  ;;  %v2357_v51 = vld [vmem:[#allocation2 + $0x1a1] sm:$0xff]  ;;  %v2356_v29 = vld [vmem:[#allocation2 + $0x199] sm:$0xff] }
 0x2aa   : > { %v2019_v36 = vpop.permute.xlu1 %2018  ;;  %v2017_v54 = vpop.permute.xlu0 %2016 }
 0x2ab   : > { %2108 = vst.msk [vmem:[#allocation3 + $0x38] sm:$0xff] %vm2100_vm10, %v2019_v36  ;;  %2107 = vst.msk [vmem:[#allocation3 + $0x30] sm:$0xff] %vm2100_vm10, %v2017_v54 }
 0x2ac   : > { %2392 = vrot.lane.b32.xlu1 %v2327_v53, %s6615_s29  ;;  %2390 = vrot.lane.b32.xlu0 %v2326_v33, %s6615_s29  ;;  %v2520_v53 = vld [vmem:[#allocation2 + $0x3a] sm:$0xff]  ;;  %v2519_v33 = vld [vmem:[#allocation2 + $0x32] sm:$0xff] }
 0x2ae   : > { %v2023_v57 = vpop.permute.xlu1 %2022  ;;  %v2021_v58 = vpop.permute.xlu0 %2020 }
 0x2af   : > { %2110 = vst.msk [vmem:[#allocation3 + $0x48] sm:$0xff] %vm2100_vm10, %v2023_v57  ;;  %2109 = vst.msk [vmem:[#allocation3 + $0x40] sm:$0xff] %vm2100_vm10, %v2021_v58 }
 0x2b0   : > { %2396 = vrot.lane.b32.xlu1 %v2329_v55, %s6615_s29  ;;  %2394 = vrot.lane.b32.xlu0 %v2328_v56, %s6615_s29  ;;  %v2522_v55 = vld [vmem:[#allocation2 + $0x52] sm:$0xff]  ;;  %v2521_v56 = vld [vmem:[#allocation2 + $0x4a] sm:$0xff] }
 0x2b2   : > { %v2027_v61 = vpop.permute.xlu1 %2026  ;;  %v2025_v62 = vpop.permute.xlu0 %2024 }
 0x2b3   : > { %2112 = vst.msk [vmem:[#allocation3 + $0x58] sm:$0xff] %vm2100_vm10, %v2027_v61  ;;  %2111 = vst.msk [vmem:[#allocation3 + $0x50] sm:$0xff] %vm2100_vm10, %v2025_v62 }
 0x2b4   : > { %2400 = vrot.lane.b32.xlu1 %v2331_v59, %s6615_s29  ;;  %2398 = vrot.lane.b32.xlu0 %v2330_v60, %s6615_s29  ;;  %v2524_v59 = vld [vmem:[#allocation2 + $0x6a] sm:$0xff]  ;;  %v2523_v60 = vld [vmem:[#allocation2 + $0x62] sm:$0xff] }
 0x2b6   : > { %v2031_v14 = vpop.permute.xlu1 %2030  ;;  %v2029_v16 = vpop.permute.xlu0 %2028 }
 0x2b7   : > { %2114 = vst.msk [vmem:[#allocation3 + $0x68] sm:$0xff] %vm2100_vm10, %v2031_v14  ;;  %2113 = vst.msk [vmem:[#allocation3 + $0x60] sm:$0xff] %vm2100_vm10, %v2029_v16 }
 0x2b8   : > { %2404 = vrot.lane.b32.xlu1 %v2333_v6, %s6615_s29  ;;  %2402 = vrot.lane.b32.xlu0 %v2332_v8, %s6615_s29  ;;  %v2526_v6 = vld [vmem:[#allocation2 + $0x82] sm:$0xff]  ;;  %v2525_v8 = vld [vmem:[#allocation2 + $0x7a] sm:$0xff] }
 0x2ba   : > { %v2035_v30 = vpop.permute.xlu1 %2034  ;;  %v2033_v31 = vpop.permute.xlu0 %2032 }
 0x2bb   : > { %2116 = vst.msk [vmem:[#allocation3 + $0x78] sm:$0xff] %vm2100_vm10, %v2035_v30  ;;  %2115 = vst.msk [vmem:[#allocation3 + $0x70] sm:$0xff] %vm2100_vm10, %v2033_v31 }
 0x2bc   : > { %2408 = vrot.lane.b32.xlu1 %v2335_v22, %s6615_s29  ;;  %2406 = vrot.lane.b32.xlu0 %v2334_v24, %s6615_s29  ;;  %v2528_v22 = vld [vmem:[#allocation2 + $0x9a] sm:$0xff]  ;;  %v2527_v24 = vld [vmem:[#allocation2 + $0x92] sm:$0xff] }
 0x2be   : > { %v2039_v37 = vpop.permute.xlu1 %2038  ;;  %v2037_v38 = vpop.permute.xlu0 %2036 }
 0x2bf   : > { %2118 = vst.msk [vmem:[#allocation3 + $0x88] sm:$0xff] %vm2100_vm10, %v2039_v37  ;;  %2117 = vst.msk [vmem:[#allocation3 + $0x80] sm:$0xff] %vm2100_vm10, %v2037_v38 }
 0x2c0   : > { %2412 = vrot.lane.b32.xlu1 %v2337_v34, %s6615_s29  ;;  %2410 = vrot.lane.b32.xlu0 %v2336_v35, %s6615_s29  ;;  %v2530_v34 = vld [vmem:[#allocation2 + $0xb2] sm:$0xff]  ;;  %v2529_v35 = vld [vmem:[#allocation2 + $0xaa] sm:$0xff] }
 0x2c2   : > { %v2043_v41 = vpop.permute.xlu1 %2042  ;;  %v2041_v42 = vpop.permute.xlu0 %2040 }
 0x2c3   : > { %2120 = vst.msk [vmem:[#allocation3 + $0x98] sm:$0xff] %vm2100_vm10, %v2043_v41  ;;  %2119 = vst.msk [vmem:[#allocation3 + $0x90] sm:$0xff] %vm2100_vm10, %v2041_v42 }
 0x2c4   : > { %2416 = vrot.lane.b32.xlu1 %v2339_v39, %s6615_s29  ;;  %2414 = vrot.lane.b32.xlu0 %v2338_v40, %s6615_s29  ;;  %v2532_v39 = vld [vmem:[#allocation2 + $0xca] sm:$0xff]  ;;  %v2531_v40 = vld [vmem:[#allocation2 + $0xc2] sm:$0xff] }
 0x2c6   : > { %v2047_v45 = vpop.permute.xlu1 %2046  ;;  %v2045_v46 = vpop.permute.xlu0 %2044 }
 0x2c7   : > { %2122 = vst.msk [vmem:[#allocation3 + $0xa8] sm:$0xff] %vm2100_vm10, %v2047_v45  ;;  %2121 = vst.msk [vmem:[#allocation3 + $0xa0] sm:$0xff] %vm2100_vm10, %v2045_v46 }
 0x2c8   : > { %2420 = vrot.lane.b32.xlu1 %v2341_v43, %s6615_s29  ;;  %2418 = vrot.lane.b32.xlu0 %v2340_v44, %s6615_s29  ;;  %v2534_v43 = vld [vmem:[#allocation2 + $0xe2] sm:$0xff]  ;;  %v2533_v44 = vld [vmem:[#allocation2 + $0xda] sm:$0xff] }
 0x2ca   : > { %v2051_v49 = vpop.permute.xlu1 %2050  ;;  %v2049_v63 = vpop.permute.xlu0 %2048 }
 0x2cb   : > { %2124 = vst.msk [vmem:[#allocation3 + $0xb8] sm:$0xff] %vm2100_vm10, %v2051_v49  ;;  %2123 = vst.msk [vmem:[#allocation3 + $0xb0] sm:$0xff] %vm2100_vm10, %v2049_v63 }
 0x2cc   : > { %2424 = vrot.lane.b32.xlu1 %v2343_v48, %s6615_s29  ;;  %2422 = vrot.lane.b32.xlu0 %v2342_v47, %s6615_s29  ;;  %v2536_v48 = vld [vmem:[#allocation2 + $0xfa] sm:$0xff]  ;;  %v2535_v47 = vld [vmem:[#allocation2 + $0xf2] sm:$0xff] }
 0x2ce   : > { %v2055_v2 = vpop.permute.xlu1 %2054  ;;  %v2053_v3 = vpop.permute.xlu0 %2052 }
 0x2cf   : > { %2126 = vst.msk [vmem:[#allocation3 + $0xc8] sm:$0xff] %vm2100_vm10, %v2055_v2  ;;  %2125 = vst.msk [vmem:[#allocation3 + $0xc0] sm:$0xff] %vm2100_vm10, %v2053_v3 }
 0x2d0   : > { %2428 = vrot.lane.b32.xlu1 %v2345_v0, %s6615_s29  ;;  %2426 = vrot.lane.b32.xlu0 %v2344_v1, %s6615_s29  ;;  %v2538_v0 = vld [vmem:[#allocation2 + $0x112] sm:$0xff]  ;;  %v2537_v1 = vld [vmem:[#allocation2 + $0x10a] sm:$0xff] }
 0x2d2   : > { %v2059_v7 = vpop.permute.xlu1 %2058  ;;  %v2057_v9 = vpop.permute.xlu0 %2056 }
 0x2d3   : > { %2128 = vst.msk [vmem:[#allocation3 + $0xd8] sm:$0xff] %vm2100_vm10, %v2059_v7  ;;  %2127 = vst.msk [vmem:[#allocation3 + $0xd0] sm:$0xff] %vm2100_vm10, %v2057_v9 }
 0x2d4   : > { %2432 = vrot.lane.b32.xlu1 %v2347_v4, %s6615_s29  ;;  %2430 = vrot.lane.b32.xlu0 %v2346_v5, %s6615_s29  ;;  %v2540_v4 = vld [vmem:[#allocation2 + $0x12a] sm:$0xff]  ;;  %v2539_v5 = vld [vmem:[#allocation2 + $0x122] sm:$0xff] }
 0x2d6   : > { %v2063_v12 = vpop.permute.xlu1 %2062  ;;  %v2061_v13 = vpop.permute.xlu0 %2060 }
 0x2d7   : > { %2130 = vst.msk [vmem:[#allocation3 + $0xe8] sm:$0xff] %vm2100_vm10, %v2063_v12  ;;  %2129 = vst.msk [vmem:[#allocation3 + $0xe0] sm:$0xff] %vm2100_vm10, %v2061_v13 }
 0x2d8   : > { %2436 = vrot.lane.b32.xlu1 %v2349_v10, %s6615_s29  ;;  %2434 = vrot.lane.b32.xlu0 %v2348_v11, %s6615_s29  ;;  %v2542_v10 = vld [vmem:[#allocation2 + $0x142] sm:$0xff]  ;;  %v2541_v11 = vld [vmem:[#allocation2 + $0x13a] sm:$0xff] }
 0x2da   : > { %v2067_v18 = vpop.permute.xlu1 %2066  ;;  %v2065_v19 = vpop.permute.xlu0 %2064 }
 0x2db   : > { %2132 = vst.msk [vmem:[#allocation3 + $0xf8] sm:$0xff] %vm2100_vm10, %v2067_v18  ;;  %2131 = vst.msk [vmem:[#allocation3 + $0xf0] sm:$0xff] %vm2100_vm10, %v2065_v19  ;;  %vm6041_vm10 = vcmask 1043456  }
 0x2dc   : > { %2440 = vrot.lane.b32.xlu1 %v2351_v15, %s6615_s29  ;;  %2438 = vrot.lane.b32.xlu0 %v2350_v17, %s6615_s29  ;;  %v2544_v15 = vld [vmem:[#allocation2 + $0x15a] sm:$0xff]  ;;  %v2543_v17 = vld [vmem:[#allocation2 + $0x152] sm:$0xff] }
 0x2de   : > { %v2200_v23 = vpop.permute.xlu1 %2199  ;;  %v2198_v25 = vpop.permute.xlu0 %2197 }
 0x2df   : > { %2295 = vst.msk [vmem:[#allocation3 + $0x8] sm:$0xff] %vm2293_vm11, %v2200_v23  ;;  %2294 = vst.msk [vmem:[#allocation3] sm:$0xff] %vm2293_vm11, %v2198_v25 }
 0x2e0   : > { %2444 = vrot.lane.b32.xlu1 %v2353_v20, %s6615_s29  ;;  %2442 = vrot.lane.b32.xlu0 %v2352_v21, %s6615_s29  ;;  %v2546_v20 = vld [vmem:[#allocation2 + $0x172] sm:$0xff]  ;;  %v2545_v21 = vld [vmem:[#allocation2 + $0x16a] sm:$0xff] }
 0x2e2   : > { %v2204_v28 = vpop.permute.xlu1 %2203  ;;  %v2202_v50 = vpop.permute.xlu0 %2201 }
 0x2e3   : > { %2297 = vst.msk [vmem:[#allocation3 + $0x18] sm:$0xff] %vm2293_vm11, %v2204_v28  ;;  %2296 = vst.msk [vmem:[#allocation3 + $0x10] sm:$0xff] %vm2293_vm11, %v2202_v50 }
 0x2e4   : > { %2448 = vrot.lane.b32.xlu1 %v2355_v26, %s6615_s29  ;;  %2446 = vrot.lane.b32.xlu0 %v2354_v27, %s6615_s29  ;;  %v2548_v26 = vld [vmem:[#allocation2 + $0x18a] sm:$0xff]  ;;  %v2547_v27 = vld [vmem:[#allocation2 + $0x182] sm:$0xff] }
 0x2e6   : > { %v2208_v32 = vpop.permute.xlu1 %2207  ;;  %v2206_v52 = vpop.permute.xlu0 %2205 }
 0x2e7   : > { %2299 = vst.msk [vmem:[#allocation3 + $0x28] sm:$0xff] %vm2293_vm11, %v2208_v32  ;;  %2298 = vst.msk [vmem:[#allocation3 + $0x20] sm:$0xff] %vm2293_vm11, %v2206_v52 }
 0x2e8   : > { %2452 = vrot.lane.b32.xlu1 %v2357_v51, %s6615_s29  ;;  %2450 = vrot.lane.b32.xlu0 %v2356_v29, %s6615_s29  ;;  %v2550_v51 = vld [vmem:[#allocation2 + $0x1a2] sm:$0xff]  ;;  %v2549_v29 = vld [vmem:[#allocation2 + $0x19a] sm:$0xff] }
 0x2ea   : > { %v2212_v36 = vpop.permute.xlu1 %2211  ;;  %v2210_v54 = vpop.permute.xlu0 %2209 }
 0x2eb   : > { %2301 = vst.msk [vmem:[#allocation3 + $0x38] sm:$0xff] %vm2293_vm11, %v2212_v36  ;;  %2300 = vst.msk [vmem:[#allocation3 + $0x30] sm:$0xff] %vm2293_vm11, %v2210_v54 }
 0x2ec   : > { %2585 = vrot.lane.b32.xlu1 %v2520_v53, %s6616_s30  ;;  %2583 = vrot.lane.b32.xlu0 %v2519_v33, %s6616_s30  ;;  %v2713_v53 = vld [vmem:[#allocation2 + $0x3b] sm:$0xff]  ;;  %v2712_v33 = vld [vmem:[#allocation2 + $0x33] sm:$0xff] }
 0x2ee   : > { %v2216_v57 = vpop.permute.xlu1 %2215  ;;  %v2214_v58 = vpop.permute.xlu0 %2213 }
 0x2ef   : > { %2303 = vst.msk [vmem:[#allocation3 + $0x48] sm:$0xff] %vm2293_vm11, %v2216_v57  ;;  %2302 = vst.msk [vmem:[#allocation3 + $0x40] sm:$0xff] %vm2293_vm11, %v2214_v58 }
 0x2f0   : > { %2589 = vrot.lane.b32.xlu1 %v2522_v55, %s6616_s30  ;;  %2587 = vrot.lane.b32.xlu0 %v2521_v56, %s6616_s30  ;;  %v2715_v55 = vld [vmem:[#allocation2 + $0x53] sm:$0xff]  ;;  %v2714_v56 = vld [vmem:[#allocation2 + $0x4b] sm:$0xff] }
 0x2f2   : > { %v2220_v61 = vpop.permute.xlu1 %2219  ;;  %v2218_v62 = vpop.permute.xlu0 %2217 }
 0x2f3   : > { %2305 = vst.msk [vmem:[#allocation3 + $0x58] sm:$0xff] %vm2293_vm11, %v2220_v61  ;;  %2304 = vst.msk [vmem:[#allocation3 + $0x50] sm:$0xff] %vm2293_vm11, %v2218_v62 }
 0x2f4   : > { %2593 = vrot.lane.b32.xlu1 %v2524_v59, %s6616_s30  ;;  %2591 = vrot.lane.b32.xlu0 %v2523_v60, %s6616_s30  ;;  %v2717_v59 = vld [vmem:[#allocation2 + $0x6b] sm:$0xff]  ;;  %v2716_v60 = vld [vmem:[#allocation2 + $0x63] sm:$0xff] }
 0x2f6   : > { %v2224_v14 = vpop.permute.xlu1 %2223  ;;  %v2222_v16 = vpop.permute.xlu0 %2221 }
 0x2f7   : > { %2307 = vst.msk [vmem:[#allocation3 + $0x68] sm:$0xff] %vm2293_vm11, %v2224_v14  ;;  %2306 = vst.msk [vmem:[#allocation3 + $0x60] sm:$0xff] %vm2293_vm11, %v2222_v16 }
 0x2f8   : > { %2597 = vrot.lane.b32.xlu1 %v2526_v6, %s6616_s30  ;;  %2595 = vrot.lane.b32.xlu0 %v2525_v8, %s6616_s30  ;;  %v2719_v6 = vld [vmem:[#allocation2 + $0x83] sm:$0xff]  ;;  %v2718_v8 = vld [vmem:[#allocation2 + $0x7b] sm:$0xff] }
 0x2fa   : > { %v2228_v30 = vpop.permute.xlu1 %2227  ;;  %v2226_v31 = vpop.permute.xlu0 %2225 }
 0x2fb   : > { %2309 = vst.msk [vmem:[#allocation3 + $0x78] sm:$0xff] %vm2293_vm11, %v2228_v30  ;;  %2308 = vst.msk [vmem:[#allocation3 + $0x70] sm:$0xff] %vm2293_vm11, %v2226_v31 }
 0x2fc   : > { %2601 = vrot.lane.b32.xlu1 %v2528_v22, %s6616_s30  ;;  %2599 = vrot.lane.b32.xlu0 %v2527_v24, %s6616_s30  ;;  %v2721_v22 = vld [vmem:[#allocation2 + $0x9b] sm:$0xff]  ;;  %v2720_v24 = vld [vmem:[#allocation2 + $0x93] sm:$0xff] }
 0x2fe   : > { %v2232_v37 = vpop.permute.xlu1 %2231  ;;  %v2230_v38 = vpop.permute.xlu0 %2229 }
 0x2ff   : > { %2311 = vst.msk [vmem:[#allocation3 + $0x88] sm:$0xff] %vm2293_vm11, %v2232_v37  ;;  %2310 = vst.msk [vmem:[#allocation3 + $0x80] sm:$0xff] %vm2293_vm11, %v2230_v38 }
 0x300   : > { %2605 = vrot.lane.b32.xlu1 %v2530_v34, %s6616_s30  ;;  %2603 = vrot.lane.b32.xlu0 %v2529_v35, %s6616_s30  ;;  %v2723_v34 = vld [vmem:[#allocation2 + $0xb3] sm:$0xff]  ;;  %v2722_v35 = vld [vmem:[#allocation2 + $0xab] sm:$0xff] }
 0x302   : > { %v2236_v41 = vpop.permute.xlu1 %2235  ;;  %v2234_v42 = vpop.permute.xlu0 %2233 }
 0x303   : > { %2313 = vst.msk [vmem:[#allocation3 + $0x98] sm:$0xff] %vm2293_vm11, %v2236_v41  ;;  %2312 = vst.msk [vmem:[#allocation3 + $0x90] sm:$0xff] %vm2293_vm11, %v2234_v42 }
 0x304   : > { %2609 = vrot.lane.b32.xlu1 %v2532_v39, %s6616_s30  ;;  %2607 = vrot.lane.b32.xlu0 %v2531_v40, %s6616_s30  ;;  %v2725_v39 = vld [vmem:[#allocation2 + $0xcb] sm:$0xff]  ;;  %v2724_v40 = vld [vmem:[#allocation2 + $0xc3] sm:$0xff] }
 0x306   : > { %v2240_v45 = vpop.permute.xlu1 %2239  ;;  %v2238_v46 = vpop.permute.xlu0 %2237 }
 0x307   : > { %2315 = vst.msk [vmem:[#allocation3 + $0xa8] sm:$0xff] %vm2293_vm11, %v2240_v45  ;;  %2314 = vst.msk [vmem:[#allocation3 + $0xa0] sm:$0xff] %vm2293_vm11, %v2238_v46 }
 0x308   : > { %2613 = vrot.lane.b32.xlu1 %v2534_v43, %s6616_s30  ;;  %2611 = vrot.lane.b32.xlu0 %v2533_v44, %s6616_s30  ;;  %v2727_v43 = vld [vmem:[#allocation2 + $0xe3] sm:$0xff]  ;;  %v2726_v44 = vld [vmem:[#allocation2 + $0xdb] sm:$0xff] }
 0x30a   : > { %v2244_v49 = vpop.permute.xlu1 %2243  ;;  %v2242_v63 = vpop.permute.xlu0 %2241 }
 0x30b   : > { %2317 = vst.msk [vmem:[#allocation3 + $0xb8] sm:$0xff] %vm2293_vm11, %v2244_v49  ;;  %2316 = vst.msk [vmem:[#allocation3 + $0xb0] sm:$0xff] %vm2293_vm11, %v2242_v63 }
 0x30c   : > { %2617 = vrot.lane.b32.xlu1 %v2536_v48, %s6616_s30  ;;  %2615 = vrot.lane.b32.xlu0 %v2535_v47, %s6616_s30  ;;  %v2729_v48 = vld [vmem:[#allocation2 + $0xfb] sm:$0xff]  ;;  %v2728_v47 = vld [vmem:[#allocation2 + $0xf3] sm:$0xff] }
 0x30e   : > { %v2248_v2 = vpop.permute.xlu1 %2247  ;;  %v2246_v3 = vpop.permute.xlu0 %2245 }
 0x30f   : > { %2319 = vst.msk [vmem:[#allocation3 + $0xc8] sm:$0xff] %vm2293_vm11, %v2248_v2  ;;  %2318 = vst.msk [vmem:[#allocation3 + $0xc0] sm:$0xff] %vm2293_vm11, %v2246_v3 }
 0x310   : > { %2621 = vrot.lane.b32.xlu1 %v2538_v0, %s6616_s30  ;;  %2619 = vrot.lane.b32.xlu0 %v2537_v1, %s6616_s30  ;;  %v2731_v0 = vld [vmem:[#allocation2 + $0x113] sm:$0xff]  ;;  %v2730_v1 = vld [vmem:[#allocation2 + $0x10b] sm:$0xff] }
 0x312   : > { %v2252_v7 = vpop.permute.xlu1 %2251  ;;  %v2250_v9 = vpop.permute.xlu0 %2249 }
 0x313   : > { %2321 = vst.msk [vmem:[#allocation3 + $0xd8] sm:$0xff] %vm2293_vm11, %v2252_v7  ;;  %2320 = vst.msk [vmem:[#allocation3 + $0xd0] sm:$0xff] %vm2293_vm11, %v2250_v9 }
 0x314   : > { %2625 = vrot.lane.b32.xlu1 %v2540_v4, %s6616_s30  ;;  %2623 = vrot.lane.b32.xlu0 %v2539_v5, %s6616_s30  ;;  %v2733_v4 = vld [vmem:[#allocation2 + $0x12b] sm:$0xff]  ;;  %v2732_v5 = vld [vmem:[#allocation2 + $0x123] sm:$0xff] }
 0x316   : > { %v2256_v12 = vpop.permute.xlu1 %2255  ;;  %v2254_v13 = vpop.permute.xlu0 %2253 }
 0x317   : > { %2323 = vst.msk [vmem:[#allocation3 + $0xe8] sm:$0xff] %vm2293_vm11, %v2256_v12  ;;  %2322 = vst.msk [vmem:[#allocation3 + $0xe0] sm:$0xff] %vm2293_vm11, %v2254_v13 }
 0x318   : > { %2629 = vrot.lane.b32.xlu1 %v2542_v10, %s6616_s30  ;;  %2627 = vrot.lane.b32.xlu0 %v2541_v11, %s6616_s30  ;;  %v2735_v10 = vld [vmem:[#allocation2 + $0x143] sm:$0xff]  ;;  %v2734_v11 = vld [vmem:[#allocation2 + $0x13b] sm:$0xff] }
 0x31a   : > { %v2260_v18 = vpop.permute.xlu1 %2259  ;;  %v2258_v19 = vpop.permute.xlu0 %2257 }
 0x31b   : > { %2325 = vst.msk [vmem:[#allocation3 + $0xf8] sm:$0xff] %vm2293_vm11, %v2260_v18  ;;  %2324 = vst.msk [vmem:[#allocation3 + $0xf0] sm:$0xff] %vm2293_vm11, %v2258_v19  ;;  %vm4418_vm11 = vcmask 720544  }
 0x31c   : > { %2633 = vrot.lane.b32.xlu1 %v2544_v15, %s6616_s30  ;;  %2631 = vrot.lane.b32.xlu0 %v2543_v17, %s6616_s30  ;;  %v2737_v15 = vld [vmem:[#allocation2 + $0x15b] sm:$0xff]  ;;  %v2736_v17 = vld [vmem:[#allocation2 + $0x153] sm:$0xff] }
 0x31e   : > { %v2393_v23 = vpop.permute.xlu1 %2392  ;;  %v2391_v25 = vpop.permute.xlu0 %2390 }
 0x31f   : > { %2488 = vst.msk [vmem:[#allocation3 + $0x8] sm:$0xff] %vm2486_vm12, %v2393_v23  ;;  %2487 = vst.msk [vmem:[#allocation3] sm:$0xff] %vm2486_vm12, %v2391_v25 }
 0x320   : > { %2637 = vrot.lane.b32.xlu1 %v2546_v20, %s6616_s30  ;;  %2635 = vrot.lane.b32.xlu0 %v2545_v21, %s6616_s30  ;;  %v2739_v20 = vld [vmem:[#allocation2 + $0x173] sm:$0xff]  ;;  %v2738_v21 = vld [vmem:[#allocation2 + $0x16b] sm:$0xff] }
 0x322   : > { %v2397_v28 = vpop.permute.xlu1 %2396  ;;  %v2395_v50 = vpop.permute.xlu0 %2394 }
 0x323   : > { %2490 = vst.msk [vmem:[#allocation3 + $0x18] sm:$0xff] %vm2486_vm12, %v2397_v28  ;;  %2489 = vst.msk [vmem:[#allocation3 + $0x10] sm:$0xff] %vm2486_vm12, %v2395_v50 }
 0x324   : > { %2641 = vrot.lane.b32.xlu1 %v2548_v26, %s6616_s30  ;;  %2639 = vrot.lane.b32.xlu0 %v2547_v27, %s6616_s30  ;;  %v2741_v26 = vld [vmem:[#allocation2 + $0x18b] sm:$0xff]  ;;  %v2740_v27 = vld [vmem:[#allocation2 + $0x183] sm:$0xff] }
 0x326   : > { %v2401_v32 = vpop.permute.xlu1 %2400  ;;  %v2399_v52 = vpop.permute.xlu0 %2398 }
 0x327   : > { %2492 = vst.msk [vmem:[#allocation3 + $0x28] sm:$0xff] %vm2486_vm12, %v2401_v32  ;;  %2491 = vst.msk [vmem:[#allocation3 + $0x20] sm:$0xff] %vm2486_vm12, %v2399_v52 }
 0x328   : > { %2645 = vrot.lane.b32.xlu1 %v2550_v51, %s6616_s30  ;;  %2643 = vrot.lane.b32.xlu0 %v2549_v29, %s6616_s30  ;;  %v2743_v51 = vld [vmem:[#allocation2 + $0x1a3] sm:$0xff]  ;;  %v2742_v29 = vld [vmem:[#allocation2 + $0x19b] sm:$0xff] }
 0x32a   : > { %v2405_v36 = vpop.permute.xlu1 %2404  ;;  %v2403_v54 = vpop.permute.xlu0 %2402 }
 0x32b   : > { %2494 = vst.msk [vmem:[#allocation3 + $0x38] sm:$0xff] %vm2486_vm12, %v2405_v36  ;;  %2493 = vst.msk [vmem:[#allocation3 + $0x30] sm:$0xff] %vm2486_vm12, %v2403_v54 }
 0x32c   : > { %2778 = vrot.lane.b32.xlu1 %v2713_v53, %s6617_s4  ;;  %2776 = vrot.lane.b32.xlu0 %v2712_v33, %s6617_s4  ;;  %v2906_v53 = vld [vmem:[#allocation2 + $0x3c] sm:$0xff]  ;;  %v2905_v33 = vld [vmem:[#allocation2 + $0x34] sm:$0xff] }
 0x32e   : > { %v2409_v57 = vpop.permute.xlu1 %2408  ;;  %v2407_v58 = vpop.permute.xlu0 %2406 }
 0x32f   : > { %2496 = vst.msk [vmem:[#allocation3 + $0x48] sm:$0xff] %vm2486_vm12, %v2409_v57  ;;  %2495 = vst.msk [vmem:[#allocation3 + $0x40] sm:$0xff] %vm2486_vm12, %v2407_v58 }
 0x330   : > { %2782 = vrot.lane.b32.xlu1 %v2715_v55, %s6617_s4  ;;  %2780 = vrot.lane.b32.xlu0 %v2714_v56, %s6617_s4  ;;  %v2908_v55 = vld [vmem:[#allocation2 + $0x54] sm:$0xff]  ;;  %v2907_v56 = vld [vmem:[#allocation2 + $0x4c] sm:$0xff] }
 0x332   : > { %v2413_v61 = vpop.permute.xlu1 %2412  ;;  %v2411_v62 = vpop.permute.xlu0 %2410 }
 0x333   : > { %2498 = vst.msk [vmem:[#allocation3 + $0x58] sm:$0xff] %vm2486_vm12, %v2413_v61  ;;  %2497 = vst.msk [vmem:[#allocation3 + $0x50] sm:$0xff] %vm2486_vm12, %v2411_v62 }
 0x334   : > { %2786 = vrot.lane.b32.xlu1 %v2717_v59, %s6617_s4  ;;  %2784 = vrot.lane.b32.xlu0 %v2716_v60, %s6617_s4  ;;  %v2910_v59 = vld [vmem:[#allocation2 + $0x6c] sm:$0xff]  ;;  %v2909_v60 = vld [vmem:[#allocation2 + $0x64] sm:$0xff] }
 0x336   : > { %v2417_v14 = vpop.permute.xlu1 %2416  ;;  %v2415_v16 = vpop.permute.xlu0 %2414 }
 0x337   : > { %2500 = vst.msk [vmem:[#allocation3 + $0x68] sm:$0xff] %vm2486_vm12, %v2417_v14  ;;  %2499 = vst.msk [vmem:[#allocation3 + $0x60] sm:$0xff] %vm2486_vm12, %v2415_v16 }
 0x338   : > { %2790 = vrot.lane.b32.xlu1 %v2719_v6, %s6617_s4  ;;  %2788 = vrot.lane.b32.xlu0 %v2718_v8, %s6617_s4  ;;  %v2912_v6 = vld [vmem:[#allocation2 + $0x84] sm:$0xff]  ;;  %v2911_v8 = vld [vmem:[#allocation2 + $0x7c] sm:$0xff] }
 0x33a   : > { %v2421_v30 = vpop.permute.xlu1 %2420  ;;  %v2419_v31 = vpop.permute.xlu0 %2418 }
 0x33b   : > { %2502 = vst.msk [vmem:[#allocation3 + $0x78] sm:$0xff] %vm2486_vm12, %v2421_v30  ;;  %2501 = vst.msk [vmem:[#allocation3 + $0x70] sm:$0xff] %vm2486_vm12, %v2419_v31 }
 0x33c   : > { %2794 = vrot.lane.b32.xlu1 %v2721_v22, %s6617_s4  ;;  %2792 = vrot.lane.b32.xlu0 %v2720_v24, %s6617_s4  ;;  %v2914_v22 = vld [vmem:[#allocation2 + $0x9c] sm:$0xff]  ;;  %v2913_v24 = vld [vmem:[#allocation2 + $0x94] sm:$0xff] }
 0x33e   : > { %v2425_v37 = vpop.permute.xlu1 %2424  ;;  %v2423_v38 = vpop.permute.xlu0 %2422 }
 0x33f   : > { %2504 = vst.msk [vmem:[#allocation3 + $0x88] sm:$0xff] %vm2486_vm12, %v2425_v37  ;;  %2503 = vst.msk [vmem:[#allocation3 + $0x80] sm:$0xff] %vm2486_vm12, %v2423_v38 }
 0x340   : > { %2798 = vrot.lane.b32.xlu1 %v2723_v34, %s6617_s4  ;;  %2796 = vrot.lane.b32.xlu0 %v2722_v35, %s6617_s4  ;;  %v2916_v34 = vld [vmem:[#allocation2 + $0xb4] sm:$0xff]  ;;  %v2915_v35 = vld [vmem:[#allocation2 + $0xac] sm:$0xff] }
 0x342   : > { %v2429_v41 = vpop.permute.xlu1 %2428  ;;  %v2427_v42 = vpop.permute.xlu0 %2426 }
 0x343   : > { %2506 = vst.msk [vmem:[#allocation3 + $0x98] sm:$0xff] %vm2486_vm12, %v2429_v41  ;;  %2505 = vst.msk [vmem:[#allocation3 + $0x90] sm:$0xff] %vm2486_vm12, %v2427_v42 }
 0x344   : > { %2802 = vrot.lane.b32.xlu1 %v2725_v39, %s6617_s4  ;;  %2800 = vrot.lane.b32.xlu0 %v2724_v40, %s6617_s4  ;;  %v2918_v39 = vld [vmem:[#allocation2 + $0xcc] sm:$0xff]  ;;  %v2917_v40 = vld [vmem:[#allocation2 + $0xc4] sm:$0xff] }
 0x346   : > { %v2433_v45 = vpop.permute.xlu1 %2432  ;;  %v2431_v46 = vpop.permute.xlu0 %2430 }
 0x347   : > { %2508 = vst.msk [vmem:[#allocation3 + $0xa8] sm:$0xff] %vm2486_vm12, %v2433_v45  ;;  %2507 = vst.msk [vmem:[#allocation3 + $0xa0] sm:$0xff] %vm2486_vm12, %v2431_v46 }
 0x348   : > { %2806 = vrot.lane.b32.xlu1 %v2727_v43, %s6617_s4  ;;  %2804 = vrot.lane.b32.xlu0 %v2726_v44, %s6617_s4  ;;  %v2920_v43 = vld [vmem:[#allocation2 + $0xe4] sm:$0xff]  ;;  %v2919_v44 = vld [vmem:[#allocation2 + $0xdc] sm:$0xff] }
 0x34a   : > { %v2437_v49 = vpop.permute.xlu1 %2436  ;;  %v2435_v63 = vpop.permute.xlu0 %2434 }
 0x34b   : > { %2510 = vst.msk [vmem:[#allocation3 + $0xb8] sm:$0xff] %vm2486_vm12, %v2437_v49  ;;  %2509 = vst.msk [vmem:[#allocation3 + $0xb0] sm:$0xff] %vm2486_vm12, %v2435_v63 }
 0x34c   : > { %2810 = vrot.lane.b32.xlu1 %v2729_v48, %s6617_s4  ;;  %2808 = vrot.lane.b32.xlu0 %v2728_v47, %s6617_s4  ;;  %v2922_v48 = vld [vmem:[#allocation2 + $0xfc] sm:$0xff]  ;;  %v2921_v47 = vld [vmem:[#allocation2 + $0xf4] sm:$0xff] }
 0x34e   : > { %v2441_v2 = vpop.permute.xlu1 %2440  ;;  %v2439_v3 = vpop.permute.xlu0 %2438 }
 0x34f   : > { %2512 = vst.msk [vmem:[#allocation3 + $0xc8] sm:$0xff] %vm2486_vm12, %v2441_v2  ;;  %2511 = vst.msk [vmem:[#allocation3 + $0xc0] sm:$0xff] %vm2486_vm12, %v2439_v3 }
 0x350   : > { %2814 = vrot.lane.b32.xlu1 %v2731_v0, %s6617_s4  ;;  %2812 = vrot.lane.b32.xlu0 %v2730_v1, %s6617_s4  ;;  %v2924_v0 = vld [vmem:[#allocation2 + $0x114] sm:$0xff]  ;;  %v2923_v1 = vld [vmem:[#allocation2 + $0x10c] sm:$0xff] }
 0x352   : > { %v2445_v7 = vpop.permute.xlu1 %2444  ;;  %v2443_v9 = vpop.permute.xlu0 %2442 }
 0x353   : > { %2514 = vst.msk [vmem:[#allocation3 + $0xd8] sm:$0xff] %vm2486_vm12, %v2445_v7  ;;  %2513 = vst.msk [vmem:[#allocation3 + $0xd0] sm:$0xff] %vm2486_vm12, %v2443_v9 }
 0x354   : > { %2818 = vrot.lane.b32.xlu1 %v2733_v4, %s6617_s4  ;;  %2816 = vrot.lane.b32.xlu0 %v2732_v5, %s6617_s4  ;;  %v2926_v4 = vld [vmem:[#allocation2 + $0x12c] sm:$0xff]  ;;  %v2925_v5 = vld [vmem:[#allocation2 + $0x124] sm:$0xff] }
 0x356   : > { %v2449_v12 = vpop.permute.xlu1 %2448  ;;  %v2447_v13 = vpop.permute.xlu0 %2446 }
 0x357   : > { %2516 = vst.msk [vmem:[#allocation3 + $0xe8] sm:$0xff] %vm2486_vm12, %v2449_v12  ;;  %2515 = vst.msk [vmem:[#allocation3 + $0xe0] sm:$0xff] %vm2486_vm12, %v2447_v13 }
 0x358   : > { %2822 = vrot.lane.b32.xlu1 %v2735_v10, %s6617_s4  ;;  %2820 = vrot.lane.b32.xlu0 %v2734_v11, %s6617_s4  ;;  %v2928_v10 = vld [vmem:[#allocation2 + $0x144] sm:$0xff]  ;;  %v2927_v11 = vld [vmem:[#allocation2 + $0x13c] sm:$0xff] }
 0x35a   : > { %v2453_v18 = vpop.permute.xlu1 %2452  ;;  %v2451_v19 = vpop.permute.xlu0 %2450 }
 0x35b   : > { %2518 = vst.msk [vmem:[#allocation3 + $0xf8] sm:$0xff] %vm2486_vm12, %v2453_v18  ;;  %2517 = vst.msk [vmem:[#allocation3 + $0xf0] sm:$0xff] %vm2486_vm12, %v2451_v19  ;;  %vm4611_vm12 = vcmask 753344  }
 0x35c   : > { %2826 = vrot.lane.b32.xlu1 %v2737_v15, %s6617_s4  ;;  %2824 = vrot.lane.b32.xlu0 %v2736_v17, %s6617_s4  ;;  %v2930_v15 = vld [vmem:[#allocation2 + $0x15c] sm:$0xff]  ;;  %v2929_v17 = vld [vmem:[#allocation2 + $0x154] sm:$0xff] }
 0x35e   : > { %v2586_v23 = vpop.permute.xlu1 %2585  ;;  %v2584_v25 = vpop.permute.xlu0 %2583 }
 0x35f   : > { %2681 = vst.msk [vmem:[#allocation3 + $0x8] sm:$0xff] %vm2679_vm13, %v2586_v23  ;;  %2680 = vst.msk [vmem:[#allocation3] sm:$0xff] %vm2679_vm13, %v2584_v25 }
 0x360   : > { %2830 = vrot.lane.b32.xlu1 %v2739_v20, %s6617_s4  ;;  %2828 = vrot.lane.b32.xlu0 %v2738_v21, %s6617_s4  ;;  %v2932_v20 = vld [vmem:[#allocation2 + $0x174] sm:$0xff]  ;;  %v2931_v21 = vld [vmem:[#allocation2 + $0x16c] sm:$0xff] }
 0x362   : > { %v2590_v28 = vpop.permute.xlu1 %2589  ;;  %v2588_v50 = vpop.permute.xlu0 %2587 }
 0x363   : > { %2683 = vst.msk [vmem:[#allocation3 + $0x18] sm:$0xff] %vm2679_vm13, %v2590_v28  ;;  %2682 = vst.msk [vmem:[#allocation3 + $0x10] sm:$0xff] %vm2679_vm13, %v2588_v50 }
 0x364   : > { %2834 = vrot.lane.b32.xlu1 %v2741_v26, %s6617_s4  ;;  %2832 = vrot.lane.b32.xlu0 %v2740_v27, %s6617_s4  ;;  %v2934_v26 = vld [vmem:[#allocation2 + $0x18c] sm:$0xff]  ;;  %v2933_v27 = vld [vmem:[#allocation2 + $0x184] sm:$0xff] }
 0x366   : > { %v2594_v32 = vpop.permute.xlu1 %2593  ;;  %v2592_v52 = vpop.permute.xlu0 %2591 }
 0x367   : > { %2685 = vst.msk [vmem:[#allocation3 + $0x28] sm:$0xff] %vm2679_vm13, %v2594_v32  ;;  %2684 = vst.msk [vmem:[#allocation3 + $0x20] sm:$0xff] %vm2679_vm13, %v2592_v52 }
 0x368   : > { %2838 = vrot.lane.b32.xlu1 %v2743_v51, %s6617_s4  ;;  %2836 = vrot.lane.b32.xlu0 %v2742_v29, %s6617_s4  ;;  %v2936_v51 = vld [vmem:[#allocation2 + $0x1a4] sm:$0xff]  ;;  %v2935_v29 = vld [vmem:[#allocation2 + $0x19c] sm:$0xff] }
 0x36a   : > { %v2598_v36 = vpop.permute.xlu1 %2597  ;;  %v2596_v54 = vpop.permute.xlu0 %2595 }
 0x36b   : > { %2687 = vst.msk [vmem:[#allocation3 + $0x38] sm:$0xff] %vm2679_vm13, %v2598_v36  ;;  %2686 = vst.msk [vmem:[#allocation3 + $0x30] sm:$0xff] %vm2679_vm13, %v2596_v54 }
 0x36c   : > { %2971 = vrot.lane.b32.xlu1 %v2906_v53, %s6618_s5  ;;  %2969 = vrot.lane.b32.xlu0 %v2905_v33, %s6618_s5  ;;  %v3100_v53 = vld [vmem:[#allocation2 + $0x50] sm:$0xff]  ;;  %v3099_v33 = vld [vmem:[#allocation2 + $0x48] sm:$0xff] }
 0x36e   : > { %v2602_v57 = vpop.permute.xlu1 %2601  ;;  %v2600_v58 = vpop.permute.xlu0 %2599 }
 0x36f   : > { %2689 = vst.msk [vmem:[#allocation3 + $0x48] sm:$0xff] %vm2679_vm13, %v2602_v57  ;;  %2688 = vst.msk [vmem:[#allocation3 + $0x40] sm:$0xff] %vm2679_vm13, %v2600_v58 }
 0x370   : > { %2975 = vrot.lane.b32.xlu1 %v2908_v55, %s6618_s5  ;;  %2973 = vrot.lane.b32.xlu0 %v2907_v56, %s6618_s5  ;;  %v3102_v55 = vld [vmem:[#allocation2 + $0x68] sm:$0xff]  ;;  %v3101_v56 = vld [vmem:[#allocation2 + $0x60] sm:$0xff] }
 0x372   : > { %v2606_v61 = vpop.permute.xlu1 %2605  ;;  %v2604_v62 = vpop.permute.xlu0 %2603 }
 0x373   : > { %2691 = vst.msk [vmem:[#allocation3 + $0x58] sm:$0xff] %vm2679_vm13, %v2606_v61  ;;  %2690 = vst.msk [vmem:[#allocation3 + $0x50] sm:$0xff] %vm2679_vm13, %v2604_v62 }
 0x374   : > { %2979 = vrot.lane.b32.xlu1 %v2910_v59, %s6618_s5  ;;  %2977 = vrot.lane.b32.xlu0 %v2909_v60, %s6618_s5  ;;  %v3104_v59 = vld [vmem:[#allocation2 + $0x80] sm:$0xff]  ;;  %v3103_v60 = vld [vmem:[#allocation2 + $0x78] sm:$0xff] }
 0x376   : > { %v2610_v14 = vpop.permute.xlu1 %2609  ;;  %v2608_v16 = vpop.permute.xlu0 %2607 }
 0x377   : > { %2693 = vst.msk [vmem:[#allocation3 + $0x68] sm:$0xff] %vm2679_vm13, %v2610_v14  ;;  %2692 = vst.msk [vmem:[#allocation3 + $0x60] sm:$0xff] %vm2679_vm13, %v2608_v16 }
 0x378   : > { %2983 = vrot.lane.b32.xlu1 %v2912_v6, %s6618_s5  ;;  %2981 = vrot.lane.b32.xlu0 %v2911_v8, %s6618_s5  ;;  %v3106_v6 = vld [vmem:[#allocation2 + $0x98] sm:$0xff]  ;;  %v3105_v8 = vld [vmem:[#allocation2 + $0x90] sm:$0xff] }
 0x37a   : > { %v2614_v30 = vpop.permute.xlu1 %2613  ;;  %v2612_v31 = vpop.permute.xlu0 %2611 }
 0x37b   : > { %2695 = vst.msk [vmem:[#allocation3 + $0x78] sm:$0xff] %vm2679_vm13, %v2614_v30  ;;  %2694 = vst.msk [vmem:[#allocation3 + $0x70] sm:$0xff] %vm2679_vm13, %v2612_v31 }
 0x37c   : > { %2987 = vrot.lane.b32.xlu1 %v2914_v22, %s6618_s5  ;;  %2985 = vrot.lane.b32.xlu0 %v2913_v24, %s6618_s5  ;;  %v3108_v22 = vld [vmem:[#allocation2 + $0xb0] sm:$0xff]  ;;  %v3107_v24 = vld [vmem:[#allocation2 + $0xa8] sm:$0xff] }
 0x37e   : > { %v2618_v37 = vpop.permute.xlu1 %2617  ;;  %v2616_v38 = vpop.permute.xlu0 %2615 }
 0x37f   : > { %2697 = vst.msk [vmem:[#allocation3 + $0x88] sm:$0xff] %vm2679_vm13, %v2618_v37  ;;  %2696 = vst.msk [vmem:[#allocation3 + $0x80] sm:$0xff] %vm2679_vm13, %v2616_v38 }
 0x380   : > { %2991 = vrot.lane.b32.xlu1 %v2916_v34, %s6618_s5  ;;  %2989 = vrot.lane.b32.xlu0 %v2915_v35, %s6618_s5  ;;  %v3110_v34 = vld [vmem:[#allocation2 + $0xc8] sm:$0xff]  ;;  %v3109_v35 = vld [vmem:[#allocation2 + $0xc0] sm:$0xff] }
 0x382   : > { %v2622_v41 = vpop.permute.xlu1 %2621  ;;  %v2620_v42 = vpop.permute.xlu0 %2619 }
 0x383   : > { %2699 = vst.msk [vmem:[#allocation3 + $0x98] sm:$0xff] %vm2679_vm13, %v2622_v41  ;;  %2698 = vst.msk [vmem:[#allocation3 + $0x90] sm:$0xff] %vm2679_vm13, %v2620_v42 }
 0x384   : > { %2995 = vrot.lane.b32.xlu1 %v2918_v39, %s6618_s5  ;;  %2993 = vrot.lane.b32.xlu0 %v2917_v40, %s6618_s5  ;;  %v3112_v39 = vld [vmem:[#allocation2 + $0xe0] sm:$0xff]  ;;  %v3111_v40 = vld [vmem:[#allocation2 + $0xd8] sm:$0xff] }
 0x386   : > { %v2626_v45 = vpop.permute.xlu1 %2625  ;;  %v2624_v46 = vpop.permute.xlu0 %2623 }
 0x387   : > { %2701 = vst.msk [vmem:[#allocation3 + $0xa8] sm:$0xff] %vm2679_vm13, %v2626_v45  ;;  %2700 = vst.msk [vmem:[#allocation3 + $0xa0] sm:$0xff] %vm2679_vm13, %v2624_v46 }
 0x388   : > { %2999 = vrot.lane.b32.xlu1 %v2920_v43, %s6618_s5  ;;  %2997 = vrot.lane.b32.xlu0 %v2919_v44, %s6618_s5  ;;  %v3114_v43 = vld [vmem:[#allocation2 + $0xf8] sm:$0xff]  ;;  %v3113_v44 = vld [vmem:[#allocation2 + $0xf0] sm:$0xff] }
 0x38a   : > { %v2630_v49 = vpop.permute.xlu1 %2629  ;;  %v2628_v63 = vpop.permute.xlu0 %2627 }
 0x38b   : > { %2703 = vst.msk [vmem:[#allocation3 + $0xb8] sm:$0xff] %vm2679_vm13, %v2630_v49  ;;  %2702 = vst.msk [vmem:[#allocation3 + $0xb0] sm:$0xff] %vm2679_vm13, %v2628_v63 }
 0x38c   : > { %3003 = vrot.lane.b32.xlu1 %v2922_v48, %s6618_s5  ;;  %3001 = vrot.lane.b32.xlu0 %v2921_v47, %s6618_s5  ;;  %v3116_v48 = vld [vmem:[#allocation2 + $0x110] sm:$0xff]  ;;  %v3115_v47 = vld [vmem:[#allocation2 + $0x108] sm:$0xff] }
 0x38e   : > { %v2634_v2 = vpop.permute.xlu1 %2633  ;;  %v2632_v3 = vpop.permute.xlu0 %2631 }
 0x38f   : > { %2705 = vst.msk [vmem:[#allocation3 + $0xc8] sm:$0xff] %vm2679_vm13, %v2634_v2  ;;  %2704 = vst.msk [vmem:[#allocation3 + $0xc0] sm:$0xff] %vm2679_vm13, %v2632_v3 }
 0x390   : > { %3007 = vrot.lane.b32.xlu1 %v2924_v0, %s6618_s5  ;;  %3005 = vrot.lane.b32.xlu0 %v2923_v1, %s6618_s5  ;;  %v3118_v0 = vld [vmem:[#allocation2 + $0x128] sm:$0xff]  ;;  %v3117_v1 = vld [vmem:[#allocation2 + $0x120] sm:$0xff] }
 0x392   : > { %v2638_v7 = vpop.permute.xlu1 %2637  ;;  %v2636_v9 = vpop.permute.xlu0 %2635 }
 0x393   : > { %2707 = vst.msk [vmem:[#allocation3 + $0xd8] sm:$0xff] %vm2679_vm13, %v2638_v7  ;;  %2706 = vst.msk [vmem:[#allocation3 + $0xd0] sm:$0xff] %vm2679_vm13, %v2636_v9 }
 0x394   : > { %3011 = vrot.lane.b32.xlu1 %v2926_v4, %s6618_s5  ;;  %3009 = vrot.lane.b32.xlu0 %v2925_v5, %s6618_s5  ;;  %v3120_v4 = vld [vmem:[#allocation2 + $0x140] sm:$0xff]  ;;  %v3119_v5 = vld [vmem:[#allocation2 + $0x138] sm:$0xff] }
 0x396   : > { %v2642_v12 = vpop.permute.xlu1 %2641  ;;  %v2640_v13 = vpop.permute.xlu0 %2639 }
 0x397   : > { %2709 = vst.msk [vmem:[#allocation3 + $0xe8] sm:$0xff] %vm2679_vm13, %v2642_v12  ;;  %2708 = vst.msk [vmem:[#allocation3 + $0xe0] sm:$0xff] %vm2679_vm13, %v2640_v13 }
 0x398   : > { %3015 = vrot.lane.b32.xlu1 %v2928_v10, %s6618_s5  ;;  %3013 = vrot.lane.b32.xlu0 %v2927_v11, %s6618_s5  ;;  %v3122_v10 = vld [vmem:[#allocation2 + $0x158] sm:$0xff]  ;;  %v3121_v11 = vld [vmem:[#allocation2 + $0x150] sm:$0xff] }
 0x39a   : > { %v2646_v18 = vpop.permute.xlu1 %2645  ;;  %v2644_v19 = vpop.permute.xlu0 %2643 }
 0x39b   : > { %2711 = vst.msk [vmem:[#allocation3 + $0xf8] sm:$0xff] %vm2679_vm13, %v2646_v18  ;;  %2710 = vst.msk [vmem:[#allocation3 + $0xf0] sm:$0xff] %vm2679_vm13, %v2644_v19  ;;  %vm4804_vm13 = vcmask 786144  }
 0x39c   : > { %3019 = vrot.lane.b32.xlu1 %v2930_v15, %s6618_s5  ;;  %3017 = vrot.lane.b32.xlu0 %v2929_v17, %s6618_s5  ;;  %v3124_v15 = vld [vmem:[#allocation2 + $0x170] sm:$0xff]  ;;  %v3123_v17 = vld [vmem:[#allocation2 + $0x168] sm:$0xff] }
 0x39e   : > { %v2779_v23 = vpop.permute.xlu1 %2778  ;;  %v2777_v25 = vpop.permute.xlu0 %2776 }
 0x39f   : > { %2874 = vst.msk [vmem:[#allocation3 + $0x8] sm:$0xff] %vm2872_vm14, %v2779_v23  ;;  %2873 = vst.msk [vmem:[#allocation3] sm:$0xff] %vm2872_vm14, %v2777_v25 }
 0x3a0   : > { %3023 = vrot.lane.b32.xlu1 %v2932_v20, %s6618_s5  ;;  %3021 = vrot.lane.b32.xlu0 %v2931_v21, %s6618_s5  ;;  %v3126_v20 = vld [vmem:[#allocation2 + $0x188] sm:$0xff]  ;;  %v3125_v21 = vld [vmem:[#allocation2 + $0x180] sm:$0xff] }
 0x3a2   : > { %v2783_v28 = vpop.permute.xlu1 %2782  ;;  %v2781_v50 = vpop.permute.xlu0 %2780 }
 0x3a3   : > { %2876 = vst.msk [vmem:[#allocation3 + $0x18] sm:$0xff] %vm2872_vm14, %v2783_v28  ;;  %2875 = vst.msk [vmem:[#allocation3 + $0x10] sm:$0xff] %vm2872_vm14, %v2781_v50 }
 0x3a4   : > { %3027 = vrot.lane.b32.xlu1 %v2934_v26, %s6618_s5  ;;  %3025 = vrot.lane.b32.xlu0 %v2933_v27, %s6618_s5  ;;  %v3128_v26 = vld [vmem:[#allocation2 + $0x1a0] sm:$0xff]  ;;  %v3127_v27 = vld [vmem:[#allocation2 + $0x198] sm:$0xff] }
 0x3a6   : > { %v2787_v32 = vpop.permute.xlu1 %2786  ;;  %v2785_v52 = vpop.permute.xlu0 %2784 }
 0x3a7   : > { %2878 = vst.msk [vmem:[#allocation3 + $0x28] sm:$0xff] %vm2872_vm14, %v2787_v32  ;;  %2877 = vst.msk [vmem:[#allocation3 + $0x20] sm:$0xff] %vm2872_vm14, %v2785_v52 }
 0x3a8   : > { %3031 = vrot.lane.b32.xlu1 %v2936_v51, %s6618_s5  ;;  %3029 = vrot.lane.b32.xlu0 %v2935_v29, %s6618_s5  ;;  %v3130_v51 = vld [vmem:[#allocation2 + $0x1b8] sm:$0xff]  ;;  %v3129_v29 = vld [vmem:[#allocation2 + $0x1b0] sm:$0xff]  ;;  %s6630_s5 = smov 100  }
 0x3aa   : > { %v2791_v36 = vpop.permute.xlu1 %2790  ;;  %v2789_v54 = vpop.permute.xlu0 %2788 }
 0x3ab   : > { %2880 = vst.msk [vmem:[#allocation3 + $0x38] sm:$0xff] %vm2872_vm14, %v2791_v36  ;;  %2879 = vst.msk [vmem:[#allocation3 + $0x30] sm:$0xff] %vm2872_vm14, %v2789_v54 }
 0x3ac   : > { %3165 = vrot.lane.b32.xlu1 %v3100_v53, %s6619_s6  ;;  %3163 = vrot.lane.b32.xlu0 %v3099_v33, %s6619_s6  ;;  %v3293_v53 = vld [vmem:[#allocation2 + $0x51] sm:$0xff]  ;;  %v3292_v33 = vld [vmem:[#allocation2 + $0x49] sm:$0xff] }
 0x3ae   : > { %v2795_v57 = vpop.permute.xlu1 %2794  ;;  %v2793_v58 = vpop.permute.xlu0 %2792 }
 0x3af   : > { %2882 = vst.msk [vmem:[#allocation3 + $0x48] sm:$0xff] %vm2872_vm14, %v2795_v57  ;;  %2881 = vst.msk [vmem:[#allocation3 + $0x40] sm:$0xff] %vm2872_vm14, %v2793_v58 }
 0x3b0   : > { %3169 = vrot.lane.b32.xlu1 %v3102_v55, %s6619_s6  ;;  %3167 = vrot.lane.b32.xlu0 %v3101_v56, %s6619_s6  ;;  %v3295_v55 = vld [vmem:[#allocation2 + $0x69] sm:$0xff]  ;;  %v3294_v56 = vld [vmem:[#allocation2 + $0x61] sm:$0xff] }
 0x3b2   : > { %v2799_v61 = vpop.permute.xlu1 %2798  ;;  %v2797_v62 = vpop.permute.xlu0 %2796 }
 0x3b3   : > { %2884 = vst.msk [vmem:[#allocation3 + $0x58] sm:$0xff] %vm2872_vm14, %v2799_v61  ;;  %2883 = vst.msk [vmem:[#allocation3 + $0x50] sm:$0xff] %vm2872_vm14, %v2797_v62 }
 0x3b4   : > { %3173 = vrot.lane.b32.xlu1 %v3104_v59, %s6619_s6  ;;  %3171 = vrot.lane.b32.xlu0 %v3103_v60, %s6619_s6  ;;  %v3297_v59 = vld [vmem:[#allocation2 + $0x81] sm:$0xff]  ;;  %v3296_v60 = vld [vmem:[#allocation2 + $0x79] sm:$0xff] }
 0x3b6   : > { %v2803_v14 = vpop.permute.xlu1 %2802  ;;  %v2801_v16 = vpop.permute.xlu0 %2800 }
 0x3b7   : > { %2886 = vst.msk [vmem:[#allocation3 + $0x68] sm:$0xff] %vm2872_vm14, %v2803_v14  ;;  %2885 = vst.msk [vmem:[#allocation3 + $0x60] sm:$0xff] %vm2872_vm14, %v2801_v16 }
 0x3b8   : > { %3177 = vrot.lane.b32.xlu1 %v3106_v6, %s6619_s6  ;;  %3175 = vrot.lane.b32.xlu0 %v3105_v8, %s6619_s6  ;;  %v3299_v6 = vld [vmem:[#allocation2 + $0x99] sm:$0xff]  ;;  %v3298_v8 = vld [vmem:[#allocation2 + $0x91] sm:$0xff] }
 0x3ba   : > { %v2807_v30 = vpop.permute.xlu1 %2806  ;;  %v2805_v31 = vpop.permute.xlu0 %2804 }
 0x3bb   : > { %2888 = vst.msk [vmem:[#allocation3 + $0x78] sm:$0xff] %vm2872_vm14, %v2807_v30  ;;  %2887 = vst.msk [vmem:[#allocation3 + $0x70] sm:$0xff] %vm2872_vm14, %v2805_v31 }
 0x3bc   : > { %3181 = vrot.lane.b32.xlu1 %v3108_v22, %s6619_s6  ;;  %3179 = vrot.lane.b32.xlu0 %v3107_v24, %s6619_s6  ;;  %v3301_v22 = vld [vmem:[#allocation2 + $0xb1] sm:$0xff]  ;;  %v3300_v24 = vld [vmem:[#allocation2 + $0xa9] sm:$0xff] }
 0x3be   : > { %v2811_v37 = vpop.permute.xlu1 %2810  ;;  %v2809_v38 = vpop.permute.xlu0 %2808 }
 0x3bf   : > { %2890 = vst.msk [vmem:[#allocation3 + $0x88] sm:$0xff] %vm2872_vm14, %v2811_v37  ;;  %2889 = vst.msk [vmem:[#allocation3 + $0x80] sm:$0xff] %vm2872_vm14, %v2809_v38 }
 0x3c0   : > { %3185 = vrot.lane.b32.xlu1 %v3110_v34, %s6619_s6  ;;  %3183 = vrot.lane.b32.xlu0 %v3109_v35, %s6619_s6  ;;  %v3303_v34 = vld [vmem:[#allocation2 + $0xc9] sm:$0xff]  ;;  %v3302_v35 = vld [vmem:[#allocation2 + $0xc1] sm:$0xff] }
 0x3c2   : > { %v2815_v41 = vpop.permute.xlu1 %2814  ;;  %v2813_v42 = vpop.permute.xlu0 %2812 }
 0x3c3   : > { %2892 = vst.msk [vmem:[#allocation3 + $0x98] sm:$0xff] %vm2872_vm14, %v2815_v41  ;;  %2891 = vst.msk [vmem:[#allocation3 + $0x90] sm:$0xff] %vm2872_vm14, %v2813_v42 }
 0x3c4   : > { %3189 = vrot.lane.b32.xlu1 %v3112_v39, %s6619_s6  ;;  %3187 = vrot.lane.b32.xlu0 %v3111_v40, %s6619_s6  ;;  %v3305_v39 = vld [vmem:[#allocation2 + $0xe1] sm:$0xff]  ;;  %v3304_v40 = vld [vmem:[#allocation2 + $0xd9] sm:$0xff] }
 0x3c6   : > { %v2819_v45 = vpop.permute.xlu1 %2818  ;;  %v2817_v46 = vpop.permute.xlu0 %2816 }
 0x3c7   : > { %2894 = vst.msk [vmem:[#allocation3 + $0xa8] sm:$0xff] %vm2872_vm14, %v2819_v45  ;;  %2893 = vst.msk [vmem:[#allocation3 + $0xa0] sm:$0xff] %vm2872_vm14, %v2817_v46 }
 0x3c8   : > { %3193 = vrot.lane.b32.xlu1 %v3114_v43, %s6619_s6  ;;  %3191 = vrot.lane.b32.xlu0 %v3113_v44, %s6619_s6  ;;  %v3307_v43 = vld [vmem:[#allocation2 + $0xf9] sm:$0xff]  ;;  %v3306_v44 = vld [vmem:[#allocation2 + $0xf1] sm:$0xff] }
 0x3ca   : > { %v2823_v49 = vpop.permute.xlu1 %2822  ;;  %v2821_v63 = vpop.permute.xlu0 %2820 }
 0x3cb   : > { %2896 = vst.msk [vmem:[#allocation3 + $0xb8] sm:$0xff] %vm2872_vm14, %v2823_v49  ;;  %2895 = vst.msk [vmem:[#allocation3 + $0xb0] sm:$0xff] %vm2872_vm14, %v2821_v63 }
 0x3cc   : > { %3197 = vrot.lane.b32.xlu1 %v3116_v48, %s6619_s6  ;;  %3195 = vrot.lane.b32.xlu0 %v3115_v47, %s6619_s6  ;;  %v3309_v48 = vld [vmem:[#allocation2 + $0x111] sm:$0xff]  ;;  %v3308_v47 = vld [vmem:[#allocation2 + $0x109] sm:$0xff] }
 0x3ce   : > { %v2827_v2 = vpop.permute.xlu1 %2826  ;;  %v2825_v3 = vpop.permute.xlu0 %2824 }
 0x3cf   : > { %2898 = vst.msk [vmem:[#allocation3 + $0xc8] sm:$0xff] %vm2872_vm14, %v2827_v2  ;;  %2897 = vst.msk [vmem:[#allocation3 + $0xc0] sm:$0xff] %vm2872_vm14, %v2825_v3 }
 0x3d0   : > { %3201 = vrot.lane.b32.xlu1 %v3118_v0, %s6619_s6  ;;  %3199 = vrot.lane.b32.xlu0 %v3117_v1, %s6619_s6  ;;  %v3311_v0 = vld [vmem:[#allocation2 + $0x129] sm:$0xff]  ;;  %v3310_v1 = vld [vmem:[#allocation2 + $0x121] sm:$0xff] }
 0x3d2   : > { %v2831_v7 = vpop.permute.xlu1 %2830  ;;  %v2829_v9 = vpop.permute.xlu0 %2828 }
 0x3d3   : > { %2900 = vst.msk [vmem:[#allocation3 + $0xd8] sm:$0xff] %vm2872_vm14, %v2831_v7  ;;  %2899 = vst.msk [vmem:[#allocation3 + $0xd0] sm:$0xff] %vm2872_vm14, %v2829_v9 }
 0x3d4   : > { %3205 = vrot.lane.b32.xlu1 %v3120_v4, %s6619_s6  ;;  %3203 = vrot.lane.b32.xlu0 %v3119_v5, %s6619_s6  ;;  %v3313_v4 = vld [vmem:[#allocation2 + $0x141] sm:$0xff]  ;;  %v3312_v5 = vld [vmem:[#allocation2 + $0x139] sm:$0xff] }
 0x3d6   : > { %v2835_v12 = vpop.permute.xlu1 %2834  ;;  %v2833_v13 = vpop.permute.xlu0 %2832 }
 0x3d7   : > { %2902 = vst.msk [vmem:[#allocation3 + $0xe8] sm:$0xff] %vm2872_vm14, %v2835_v12  ;;  %2901 = vst.msk [vmem:[#allocation3 + $0xe0] sm:$0xff] %vm2872_vm14, %v2833_v13 }
 0x3d8   : > { %3209 = vrot.lane.b32.xlu1 %v3122_v10, %s6619_s6  ;;  %3207 = vrot.lane.b32.xlu0 %v3121_v11, %s6619_s6  ;;  %v3315_v10 = vld [vmem:[#allocation2 + $0x159] sm:$0xff]  ;;  %v3314_v11 = vld [vmem:[#allocation2 + $0x151] sm:$0xff] }
 0x3da   : > { %v2839_v18 = vpop.permute.xlu1 %2838  ;;  %v2837_v19 = vpop.permute.xlu0 %2836 }
 0x3db   : > { %2904 = vst.msk [vmem:[#allocation3 + $0xf8] sm:$0xff] %vm2872_vm14, %v2839_v18  ;;  %2903 = vst.msk [vmem:[#allocation3 + $0xf0] sm:$0xff] %vm2872_vm14, %v2837_v19  ;;  %vm4997_vm14 = vcmask 818944  }
 0x3dc   : > { %3213 = vrot.lane.b32.xlu1 %v3124_v15, %s6619_s6  ;;  %3211 = vrot.lane.b32.xlu0 %v3123_v17, %s6619_s6  ;;  %v3317_v15 = vld [vmem:[#allocation2 + $0x171] sm:$0xff]  ;;  %v3316_v17 = vld [vmem:[#allocation2 + $0x169] sm:$0xff] }
 0x3de   : > { %v2972_v23 = vpop.permute.xlu1 %2971  ;;  %v2970_v25 = vpop.permute.xlu0 %2969 }
 0x3df   : > { %3067 = vst.msk [vmem:[#allocation3 + $0x8] sm:$0xff] %vm3065_vm15, %v2972_v23  ;;  %3066 = vst.msk [vmem:[#allocation3] sm:$0xff] %vm3065_vm15, %v2970_v25 }
 0x3e0   : > { %3217 = vrot.lane.b32.xlu1 %v3126_v20, %s6619_s6  ;;  %3215 = vrot.lane.b32.xlu0 %v3125_v21, %s6619_s6  ;;  %v3319_v20 = vld [vmem:[#allocation2 + $0x189] sm:$0xff]  ;;  %v3318_v21 = vld [vmem:[#allocation2 + $0x181] sm:$0xff] }
 0x3e2   : > { %v2976_v28 = vpop.permute.xlu1 %2975  ;;  %v2974_v50 = vpop.permute.xlu0 %2973 }
 0x3e3   : > { %3069 = vst.msk [vmem:[#allocation3 + $0x18] sm:$0xff] %vm3065_vm15, %v2976_v28  ;;  %3068 = vst.msk [vmem:[#allocation3 + $0x10] sm:$0xff] %vm3065_vm15, %v2974_v50 }
 0x3e4   : > { %3221 = vrot.lane.b32.xlu1 %v3128_v26, %s6619_s6  ;;  %3219 = vrot.lane.b32.xlu0 %v3127_v27, %s6619_s6  ;;  %v3321_v26 = vld [vmem:[#allocation2 + $0x1a1] sm:$0xff]  ;;  %v3320_v27 = vld [vmem:[#allocation2 + $0x199] sm:$0xff] }
 0x3e6   : > { %v2980_v32 = vpop.permute.xlu1 %2979  ;;  %v2978_v52 = vpop.permute.xlu0 %2977 }
 0x3e7   : > { %3071 = vst.msk [vmem:[#allocation3 + $0x28] sm:$0xff] %vm3065_vm15, %v2980_v32  ;;  %3070 = vst.msk [vmem:[#allocation3 + $0x20] sm:$0xff] %vm3065_vm15, %v2978_v52 }
 0x3e8   : > { %3225 = vrot.lane.b32.xlu1 %v3130_v51, %s6619_s6  ;;  %3223 = vrot.lane.b32.xlu0 %v3129_v29, %s6619_s6  ;;  %v3323_v51 = vld [vmem:[#allocation2 + $0x1b9] sm:$0xff]  ;;  %v3322_v29 = vld [vmem:[#allocation2 + $0x1b1] sm:$0xff] }
 0x3ea   : > { %v2984_v36 = vpop.permute.xlu1 %2983  ;;  %v2982_v54 = vpop.permute.xlu0 %2981 }
 0x3eb   : > { %3073 = vst.msk [vmem:[#allocation3 + $0x38] sm:$0xff] %vm3065_vm15, %v2984_v36  ;;  %3072 = vst.msk [vmem:[#allocation3 + $0x30] sm:$0xff] %vm3065_vm15, %v2982_v54 }
 0x3ec   : > { %3358 = vrot.lane.b32.xlu1 %v3293_v53, %s6620_s7  ;;  %3356 = vrot.lane.b32.xlu0 %v3292_v33, %s6620_s7  ;;  %v3486_v53 = vld [vmem:[#allocation2 + $0x52] sm:$0xff]  ;;  %v3485_v33 = vld [vmem:[#allocation2 + $0x4a] sm:$0xff] }
 0x3ee   : > { %v2988_v57 = vpop.permute.xlu1 %2987  ;;  %v2986_v58 = vpop.permute.xlu0 %2985 }
 0x3ef   : > { %3075 = vst.msk [vmem:[#allocation3 + $0x48] sm:$0xff] %vm3065_vm15, %v2988_v57  ;;  %3074 = vst.msk [vmem:[#allocation3 + $0x40] sm:$0xff] %vm3065_vm15, %v2986_v58 }
 0x3f0   : > { %3362 = vrot.lane.b32.xlu1 %v3295_v55, %s6620_s7  ;;  %3360 = vrot.lane.b32.xlu0 %v3294_v56, %s6620_s7  ;;  %v3488_v55 = vld [vmem:[#allocation2 + $0x6a] sm:$0xff]  ;;  %v3487_v56 = vld [vmem:[#allocation2 + $0x62] sm:$0xff] }
 0x3f2   : > { %v2992_v61 = vpop.permute.xlu1 %2991  ;;  %v2990_v62 = vpop.permute.xlu0 %2989 }
 0x3f3   : > { %3077 = vst.msk [vmem:[#allocation3 + $0x58] sm:$0xff] %vm3065_vm15, %v2992_v61  ;;  %3076 = vst.msk [vmem:[#allocation3 + $0x50] sm:$0xff] %vm3065_vm15, %v2990_v62 }
 0x3f4   : > { %3366 = vrot.lane.b32.xlu1 %v3297_v59, %s6620_s7  ;;  %3364 = vrot.lane.b32.xlu0 %v3296_v60, %s6620_s7  ;;  %v3490_v59 = vld [vmem:[#allocation2 + $0x82] sm:$0xff]  ;;  %v3489_v60 = vld [vmem:[#allocation2 + $0x7a] sm:$0xff] }
 0x3f6   : > { %v2996_v14 = vpop.permute.xlu1 %2995  ;;  %v2994_v16 = vpop.permute.xlu0 %2993 }
 0x3f7   : > { %3079 = vst.msk [vmem:[#allocation3 + $0x68] sm:$0xff] %vm3065_vm15, %v2996_v14  ;;  %3078 = vst.msk [vmem:[#allocation3 + $0x60] sm:$0xff] %vm3065_vm15, %v2994_v16 }
 0x3f8   : > { %3370 = vrot.lane.b32.xlu1 %v3299_v6, %s6620_s7  ;;  %3368 = vrot.lane.b32.xlu0 %v3298_v8, %s6620_s7  ;;  %v3492_v6 = vld [vmem:[#allocation2 + $0x9a] sm:$0xff]  ;;  %v3491_v8 = vld [vmem:[#allocation2 + $0x92] sm:$0xff] }
 0x3fa   : > { %v3000_v30 = vpop.permute.xlu1 %2999  ;;  %v2998_v31 = vpop.permute.xlu0 %2997 }
 0x3fb   : > { %3081 = vst.msk [vmem:[#allocation3 + $0x78] sm:$0xff] %vm3065_vm15, %v3000_v30  ;;  %3080 = vst.msk [vmem:[#allocation3 + $0x70] sm:$0xff] %vm3065_vm15, %v2998_v31 }
 0x3fc   : > { %3374 = vrot.lane.b32.xlu1 %v3301_v22, %s6620_s7  ;;  %3372 = vrot.lane.b32.xlu0 %v3300_v24, %s6620_s7  ;;  %v3494_v22 = vld [vmem:[#allocation2 + $0xb2] sm:$0xff]  ;;  %v3493_v24 = vld [vmem:[#allocation2 + $0xaa] sm:$0xff] }
 0x3fe   : > { %v3004_v37 = vpop.permute.xlu1 %3003  ;;  %v3002_v38 = vpop.permute.xlu0 %3001 }
 0x3ff   : > { %3083 = vst.msk [vmem:[#allocation3 + $0x88] sm:$0xff] %vm3065_vm15, %v3004_v37  ;;  %3082 = vst.msk [vmem:[#allocation3 + $0x80] sm:$0xff] %vm3065_vm15, %v3002_v38 }
 0x400   : > { %3378 = vrot.lane.b32.xlu1 %v3303_v34, %s6620_s7  ;;  %3376 = vrot.lane.b32.xlu0 %v3302_v35, %s6620_s7  ;;  %v3496_v34 = vld [vmem:[#allocation2 + $0xca] sm:$0xff]  ;;  %v3495_v35 = vld [vmem:[#allocation2 + $0xc2] sm:$0xff] }
 0x402   : > { %v3008_v41 = vpop.permute.xlu1 %3007  ;;  %v3006_v42 = vpop.permute.xlu0 %3005 }
 0x403   : > { %3085 = vst.msk [vmem:[#allocation3 + $0x98] sm:$0xff] %vm3065_vm15, %v3008_v41  ;;  %3084 = vst.msk [vmem:[#allocation3 + $0x90] sm:$0xff] %vm3065_vm15, %v3006_v42 }
 0x404   : > { %3382 = vrot.lane.b32.xlu1 %v3305_v39, %s6620_s7  ;;  %3380 = vrot.lane.b32.xlu0 %v3304_v40, %s6620_s7  ;;  %v3498_v39 = vld [vmem:[#allocation2 + $0xe2] sm:$0xff]  ;;  %v3497_v40 = vld [vmem:[#allocation2 + $0xda] sm:$0xff] }
 0x406   : > { %v3012_v45 = vpop.permute.xlu1 %3011  ;;  %v3010_v46 = vpop.permute.xlu0 %3009 }
 0x407   : > { %3087 = vst.msk [vmem:[#allocation3 + $0xa8] sm:$0xff] %vm3065_vm15, %v3012_v45  ;;  %3086 = vst.msk [vmem:[#allocation3 + $0xa0] sm:$0xff] %vm3065_vm15, %v3010_v46 }
 0x408   : > { %3386 = vrot.lane.b32.xlu1 %v3307_v43, %s6620_s7  ;;  %3384 = vrot.lane.b32.xlu0 %v3306_v44, %s6620_s7  ;;  %v3500_v43 = vld [vmem:[#allocation2 + $0xfa] sm:$0xff]  ;;  %v3499_v44 = vld [vmem:[#allocation2 + $0xf2] sm:$0xff] }
 0x40a   : > { %v3016_v49 = vpop.permute.xlu1 %3015  ;;  %v3014_v63 = vpop.permute.xlu0 %3013 }
 0x40b   : > { %3089 = vst.msk [vmem:[#allocation3 + $0xb8] sm:$0xff] %vm3065_vm15, %v3016_v49  ;;  %3088 = vst.msk [vmem:[#allocation3 + $0xb0] sm:$0xff] %vm3065_vm15, %v3014_v63 }
 0x40c   : > { %3390 = vrot.lane.b32.xlu1 %v3309_v48, %s6620_s7  ;;  %3388 = vrot.lane.b32.xlu0 %v3308_v47, %s6620_s7  ;;  %v3502_v48 = vld [vmem:[#allocation2 + $0x112] sm:$0xff]  ;;  %v3501_v47 = vld [vmem:[#allocation2 + $0x10a] sm:$0xff] }
 0x40e   : > { %v3020_v2 = vpop.permute.xlu1 %3019  ;;  %v3018_v3 = vpop.permute.xlu0 %3017 }
 0x40f   : > { %3091 = vst.msk [vmem:[#allocation3 + $0xc8] sm:$0xff] %vm3065_vm15, %v3020_v2  ;;  %3090 = vst.msk [vmem:[#allocation3 + $0xc0] sm:$0xff] %vm3065_vm15, %v3018_v3 }
 0x410   : > { %3394 = vrot.lane.b32.xlu1 %v3311_v0, %s6620_s7  ;;  %3392 = vrot.lane.b32.xlu0 %v3310_v1, %s6620_s7  ;;  %v3504_v0 = vld [vmem:[#allocation2 + $0x12a] sm:$0xff]  ;;  %v3503_v1 = vld [vmem:[#allocation2 + $0x122] sm:$0xff] }
 0x412   : > { %v3024_v7 = vpop.permute.xlu1 %3023  ;;  %v3022_v9 = vpop.permute.xlu0 %3021 }
 0x413   : > { %3093 = vst.msk [vmem:[#allocation3 + $0xd8] sm:$0xff] %vm3065_vm15, %v3024_v7  ;;  %3092 = vst.msk [vmem:[#allocation3 + $0xd0] sm:$0xff] %vm3065_vm15, %v3022_v9 }
 0x414   : > { %3398 = vrot.lane.b32.xlu1 %v3313_v4, %s6620_s7  ;;  %3396 = vrot.lane.b32.xlu0 %v3312_v5, %s6620_s7  ;;  %v3506_v4 = vld [vmem:[#allocation2 + $0x142] sm:$0xff]  ;;  %v3505_v5 = vld [vmem:[#allocation2 + $0x13a] sm:$0xff] }
 0x416   : > { %v3028_v12 = vpop.permute.xlu1 %3027  ;;  %v3026_v13 = vpop.permute.xlu0 %3025 }
 0x417   : > { %3095 = vst.msk [vmem:[#allocation3 + $0xe8] sm:$0xff] %vm3065_vm15, %v3028_v12  ;;  %3094 = vst.msk [vmem:[#allocation3 + $0xe0] sm:$0xff] %vm3065_vm15, %v3026_v13 }
 0x418   : > { %3402 = vrot.lane.b32.xlu1 %v3315_v10, %s6620_s7  ;;  %3400 = vrot.lane.b32.xlu0 %v3314_v11, %s6620_s7  ;;  %v3508_v10 = vld [vmem:[#allocation2 + $0x15a] sm:$0xff]  ;;  %v3507_v11 = vld [vmem:[#allocation2 + $0x152] sm:$0xff] }
 0x41a   : > { %v3032_v18 = vpop.permute.xlu1 %3031  ;;  %v3030_v19 = vpop.permute.xlu0 %3029 }
 0x41b   : > { %3097 = vst.msk [vmem:[#allocation3 + $0xf8] sm:$0xff] %vm3065_vm15, %v3032_v18  ;;  %3096 = vst.msk [vmem:[#allocation3 + $0xf0] sm:$0xff] %vm3065_vm15, %v3030_v19  ;;  %vm5852_vm15 = vcmask 851744  }
 0x41c   : > { %3406 = vrot.lane.b32.xlu1 %v3317_v15, %s6620_s7  ;;  %3404 = vrot.lane.b32.xlu0 %v3316_v17, %s6620_s7  ;;  %v3510_v15 = vld [vmem:[#allocation2 + $0x172] sm:$0xff]  ;;  %v3509_v17 = vld [vmem:[#allocation2 + $0x16a] sm:$0xff] }
 0x41e   : > { %v3166_v23 = vpop.permute.xlu1 %3165  ;;  %v3164_v25 = vpop.permute.xlu0 %3163 }
 0x41f   : > { %3261 = vst.msk [vmem:[#allocation3 + $0x8] sm:$0xff] %vm3259_vm0, %v3166_v23  ;;  %3260 = vst.msk [vmem:[#allocation3] sm:$0xff] %vm3259_vm0, %v3164_v25 }
 0x420   : > { %3410 = vrot.lane.b32.xlu1 %v3319_v20, %s6620_s7  ;;  %3408 = vrot.lane.b32.xlu0 %v3318_v21, %s6620_s7  ;;  %v3512_v20 = vld [vmem:[#allocation2 + $0x18a] sm:$0xff]  ;;  %v3511_v21 = vld [vmem:[#allocation2 + $0x182] sm:$0xff] }
 0x422   : > { %v3170_v28 = vpop.permute.xlu1 %3169  ;;  %v3168_v50 = vpop.permute.xlu0 %3167 }
 0x423   : > { %3263 = vst.msk [vmem:[#allocation3 + $0x18] sm:$0xff] %vm3259_vm0, %v3170_v28  ;;  %3262 = vst.msk [vmem:[#allocation3 + $0x10] sm:$0xff] %vm3259_vm0, %v3168_v50 }
 0x424   : > { %3414 = vrot.lane.b32.xlu1 %v3321_v26, %s6620_s7  ;;  %3412 = vrot.lane.b32.xlu0 %v3320_v27, %s6620_s7  ;;  %v3514_v26 = vld [vmem:[#allocation2 + $0x1a2] sm:$0xff]  ;;  %v3513_v27 = vld [vmem:[#allocation2 + $0x19a] sm:$0xff] }
 0x426   : > { %v3174_v32 = vpop.permute.xlu1 %3173  ;;  %v3172_v52 = vpop.permute.xlu0 %3171 }
 0x427   : > { %3265 = vst.msk [vmem:[#allocation3 + $0x28] sm:$0xff] %vm3259_vm0, %v3174_v32  ;;  %3264 = vst.msk [vmem:[#allocation3 + $0x20] sm:$0xff] %vm3259_vm0, %v3172_v52 }
 0x428   : > { %3418 = vrot.lane.b32.xlu1 %v3323_v51, %s6620_s7  ;;  %3416 = vrot.lane.b32.xlu0 %v3322_v29, %s6620_s7  ;;  %v3516_v51 = vld [vmem:[#allocation2 + $0x1ba] sm:$0xff]  ;;  %v3515_v29 = vld [vmem:[#allocation2 + $0x1b2] sm:$0xff] }
 0x42a   : > { %v3178_v36 = vpop.permute.xlu1 %3177  ;;  %v3176_v54 = vpop.permute.xlu0 %3175 }
 0x42b   : > { %3267 = vst.msk [vmem:[#allocation3 + $0x38] sm:$0xff] %vm3259_vm0, %v3178_v36  ;;  %3266 = vst.msk [vmem:[#allocation3 + $0x30] sm:$0xff] %vm3259_vm0, %v3176_v54 }
 0x42c   : > { %3551 = vrot.lane.b32.xlu1 %v3486_v53, %s6621_s8  ;;  %3549 = vrot.lane.b32.xlu0 %v3485_v33, %s6621_s8  ;;  %v3679_v53 = vld [vmem:[#allocation2 + $0x53] sm:$0xff]  ;;  %v3678_v33 = vld [vmem:[#allocation2 + $0x4b] sm:$0xff] }
 0x42e   : > { %v3182_v57 = vpop.permute.xlu1 %3181  ;;  %v3180_v58 = vpop.permute.xlu0 %3179 }
 0x42f   : > { %3269 = vst.msk [vmem:[#allocation3 + $0x48] sm:$0xff] %vm3259_vm0, %v3182_v57  ;;  %3268 = vst.msk [vmem:[#allocation3 + $0x40] sm:$0xff] %vm3259_vm0, %v3180_v58 }
 0x430   : > { %3555 = vrot.lane.b32.xlu1 %v3488_v55, %s6621_s8  ;;  %3553 = vrot.lane.b32.xlu0 %v3487_v56, %s6621_s8  ;;  %v3681_v55 = vld [vmem:[#allocation2 + $0x6b] sm:$0xff]  ;;  %v3680_v56 = vld [vmem:[#allocation2 + $0x63] sm:$0xff] }
 0x432   : > { %v3186_v61 = vpop.permute.xlu1 %3185  ;;  %v3184_v62 = vpop.permute.xlu0 %3183 }
 0x433   : > { %3271 = vst.msk [vmem:[#allocation3 + $0x58] sm:$0xff] %vm3259_vm0, %v3186_v61  ;;  %3270 = vst.msk [vmem:[#allocation3 + $0x50] sm:$0xff] %vm3259_vm0, %v3184_v62 }
 0x434   : > { %3559 = vrot.lane.b32.xlu1 %v3490_v59, %s6621_s8  ;;  %3557 = vrot.lane.b32.xlu0 %v3489_v60, %s6621_s8  ;;  %v3683_v59 = vld [vmem:[#allocation2 + $0x83] sm:$0xff]  ;;  %v3682_v60 = vld [vmem:[#allocation2 + $0x7b] sm:$0xff] }
 0x436   : > { %v3190_v14 = vpop.permute.xlu1 %3189  ;;  %v3188_v16 = vpop.permute.xlu0 %3187 }
 0x437   : > { %3273 = vst.msk [vmem:[#allocation3 + $0x68] sm:$0xff] %vm3259_vm0, %v3190_v14  ;;  %3272 = vst.msk [vmem:[#allocation3 + $0x60] sm:$0xff] %vm3259_vm0, %v3188_v16 }
 0x438   : > { %3563 = vrot.lane.b32.xlu1 %v3492_v6, %s6621_s8  ;;  %3561 = vrot.lane.b32.xlu0 %v3491_v8, %s6621_s8  ;;  %v3685_v6 = vld [vmem:[#allocation2 + $0x9b] sm:$0xff]  ;;  %v3684_v8 = vld [vmem:[#allocation2 + $0x93] sm:$0xff] }
 0x43a   : > { %v3194_v30 = vpop.permute.xlu1 %3193  ;;  %v3192_v31 = vpop.permute.xlu0 %3191 }
 0x43b   : > { %3275 = vst.msk [vmem:[#allocation3 + $0x78] sm:$0xff] %vm3259_vm0, %v3194_v30  ;;  %3274 = vst.msk [vmem:[#allocation3 + $0x70] sm:$0xff] %vm3259_vm0, %v3192_v31 }
 0x43c   : > { %3567 = vrot.lane.b32.xlu1 %v3494_v22, %s6621_s8  ;;  %3565 = vrot.lane.b32.xlu0 %v3493_v24, %s6621_s8  ;;  %v3687_v22 = vld [vmem:[#allocation2 + $0xb3] sm:$0xff]  ;;  %v3686_v24 = vld [vmem:[#allocation2 + $0xab] sm:$0xff] }
 0x43e   : > { %v3198_v37 = vpop.permute.xlu1 %3197  ;;  %v3196_v38 = vpop.permute.xlu0 %3195 }
 0x43f   : > { %3277 = vst.msk [vmem:[#allocation3 + $0x88] sm:$0xff] %vm3259_vm0, %v3198_v37  ;;  %3276 = vst.msk [vmem:[#allocation3 + $0x80] sm:$0xff] %vm3259_vm0, %v3196_v38 }
 0x440   : > { %3571 = vrot.lane.b32.xlu1 %v3496_v34, %s6621_s8  ;;  %3569 = vrot.lane.b32.xlu0 %v3495_v35, %s6621_s8  ;;  %v3689_v34 = vld [vmem:[#allocation2 + $0xcb] sm:$0xff]  ;;  %v3688_v35 = vld [vmem:[#allocation2 + $0xc3] sm:$0xff] }
 0x442   : > { %v3202_v41 = vpop.permute.xlu1 %3201  ;;  %v3200_v42 = vpop.permute.xlu0 %3199 }
 0x443   : > { %3279 = vst.msk [vmem:[#allocation3 + $0x98] sm:$0xff] %vm3259_vm0, %v3202_v41  ;;  %3278 = vst.msk [vmem:[#allocation3 + $0x90] sm:$0xff] %vm3259_vm0, %v3200_v42 }
 0x444   : > { %3575 = vrot.lane.b32.xlu1 %v3498_v39, %s6621_s8  ;;  %3573 = vrot.lane.b32.xlu0 %v3497_v40, %s6621_s8  ;;  %v3691_v39 = vld [vmem:[#allocation2 + $0xe3] sm:$0xff]  ;;  %v3690_v40 = vld [vmem:[#allocation2 + $0xdb] sm:$0xff] }
 0x446   : > { %v3206_v45 = vpop.permute.xlu1 %3205  ;;  %v3204_v46 = vpop.permute.xlu0 %3203 }
 0x447   : > { %3281 = vst.msk [vmem:[#allocation3 + $0xa8] sm:$0xff] %vm3259_vm0, %v3206_v45  ;;  %3280 = vst.msk [vmem:[#allocation3 + $0xa0] sm:$0xff] %vm3259_vm0, %v3204_v46 }
 0x448   : > { %3579 = vrot.lane.b32.xlu1 %v3500_v43, %s6621_s8  ;;  %3577 = vrot.lane.b32.xlu0 %v3499_v44, %s6621_s8  ;;  %v3693_v43 = vld [vmem:[#allocation2 + $0xfb] sm:$0xff]  ;;  %v3692_v44 = vld [vmem:[#allocation2 + $0xf3] sm:$0xff] }
 0x44a   : > { %v3210_v49 = vpop.permute.xlu1 %3209  ;;  %v3208_v63 = vpop.permute.xlu0 %3207 }
 0x44b   : > { %3283 = vst.msk [vmem:[#allocation3 + $0xb8] sm:$0xff] %vm3259_vm0, %v3210_v49  ;;  %3282 = vst.msk [vmem:[#allocation3 + $0xb0] sm:$0xff] %vm3259_vm0, %v3208_v63 }
 0x44c   : > { %3583 = vrot.lane.b32.xlu1 %v3502_v48, %s6621_s8  ;;  %3581 = vrot.lane.b32.xlu0 %v3501_v47, %s6621_s8  ;;  %v3695_v48 = vld [vmem:[#allocation2 + $0x113] sm:$0xff]  ;;  %v3694_v47 = vld [vmem:[#allocation2 + $0x10b] sm:$0xff] }
 0x44e   : > { %v3214_v2 = vpop.permute.xlu1 %3213  ;;  %v3212_v3 = vpop.permute.xlu0 %3211 }
 0x44f   : > { %3285 = vst.msk [vmem:[#allocation3 + $0xc8] sm:$0xff] %vm3259_vm0, %v3214_v2  ;;  %3284 = vst.msk [vmem:[#allocation3 + $0xc0] sm:$0xff] %vm3259_vm0, %v3212_v3 }
 0x450   : > { %3587 = vrot.lane.b32.xlu1 %v3504_v0, %s6621_s8  ;;  %3585 = vrot.lane.b32.xlu0 %v3503_v1, %s6621_s8  ;;  %v3697_v0 = vld [vmem:[#allocation2 + $0x12b] sm:$0xff]  ;;  %v3696_v1 = vld [vmem:[#allocation2 + $0x123] sm:$0xff] }
 0x452   : > { %v3218_v7 = vpop.permute.xlu1 %3217  ;;  %v3216_v9 = vpop.permute.xlu0 %3215 }
 0x453   : > { %3287 = vst.msk [vmem:[#allocation3 + $0xd8] sm:$0xff] %vm3259_vm0, %v3218_v7  ;;  %3286 = vst.msk [vmem:[#allocation3 + $0xd0] sm:$0xff] %vm3259_vm0, %v3216_v9 }
 0x454   : > { %3591 = vrot.lane.b32.xlu1 %v3506_v4, %s6621_s8  ;;  %3589 = vrot.lane.b32.xlu0 %v3505_v5, %s6621_s8  ;;  %v3699_v4 = vld [vmem:[#allocation2 + $0x143] sm:$0xff]  ;;  %v3698_v5 = vld [vmem:[#allocation2 + $0x13b] sm:$0xff] }
 0x456   : > { %v3222_v12 = vpop.permute.xlu1 %3221  ;;  %v3220_v13 = vpop.permute.xlu0 %3219 }
 0x457   : > { %3289 = vst.msk [vmem:[#allocation3 + $0xe8] sm:$0xff] %vm3259_vm0, %v3222_v12  ;;  %3288 = vst.msk [vmem:[#allocation3 + $0xe0] sm:$0xff] %vm3259_vm0, %v3220_v13 }
 0x458   : > { %3595 = vrot.lane.b32.xlu1 %v3508_v10, %s6621_s8  ;;  %3593 = vrot.lane.b32.xlu0 %v3507_v11, %s6621_s8  ;;  %v3701_v10 = vld [vmem:[#allocation2 + $0x15b] sm:$0xff]  ;;  %v3700_v11 = vld [vmem:[#allocation2 + $0x153] sm:$0xff] }
 0x45a   : > { %v3226_v18 = vpop.permute.xlu1 %3225  ;;  %v3224_v19 = vpop.permute.xlu0 %3223 }
 0x45b   : > { %3291 = vst.msk [vmem:[#allocation3 + $0xf8] sm:$0xff] %vm3259_vm0, %v3226_v18  ;;  %3290 = vst.msk [vmem:[#allocation3 + $0xf0] sm:$0xff] %vm3259_vm0, %v3224_v19  ;;  %vm5992_vm0 = vcmask 850944  }
 0x45c   : > { %3599 = vrot.lane.b32.xlu1 %v3510_v15, %s6621_s8  ;;  %3597 = vrot.lane.b32.xlu0 %v3509_v17, %s6621_s8  ;;  %v3703_v15 = vld [vmem:[#allocation2 + $0x173] sm:$0xff]  ;;  %v3702_v17 = vld [vmem:[#allocation2 + $0x16b] sm:$0xff] }
 0x45e   : > { %v3359_v23 = vpop.permute.xlu1 %3358  ;;  %v3357_v25 = vpop.permute.xlu0 %3356 }
 0x45f   : > { %3454 = vst.msk [vmem:[#allocation3 + $0x8] sm:$0xff] %vm3452_vm1, %v3359_v23  ;;  %3453 = vst.msk [vmem:[#allocation3] sm:$0xff] %vm3452_vm1, %v3357_v25 }
 0x460   : > { %3603 = vrot.lane.b32.xlu1 %v3512_v20, %s6621_s8  ;;  %3601 = vrot.lane.b32.xlu0 %v3511_v21, %s6621_s8  ;;  %v3705_v20 = vld [vmem:[#allocation2 + $0x18b] sm:$0xff]  ;;  %v3704_v21 = vld [vmem:[#allocation2 + $0x183] sm:$0xff] }
 0x462   : > { %v3363_v28 = vpop.permute.xlu1 %3362  ;;  %v3361_v50 = vpop.permute.xlu0 %3360 }
 0x463   : > { %3456 = vst.msk [vmem:[#allocation3 + $0x18] sm:$0xff] %vm3452_vm1, %v3363_v28  ;;  %3455 = vst.msk [vmem:[#allocation3 + $0x10] sm:$0xff] %vm3452_vm1, %v3361_v50 }
 0x464   : > { %3607 = vrot.lane.b32.xlu1 %v3514_v26, %s6621_s8  ;;  %3605 = vrot.lane.b32.xlu0 %v3513_v27, %s6621_s8  ;;  %v3707_v26 = vld [vmem:[#allocation2 + $0x1a3] sm:$0xff]  ;;  %v3706_v27 = vld [vmem:[#allocation2 + $0x19b] sm:$0xff] }
 0x466   : > { %v3367_v32 = vpop.permute.xlu1 %3366  ;;  %v3365_v52 = vpop.permute.xlu0 %3364 }
 0x467   : > { %3458 = vst.msk [vmem:[#allocation3 + $0x28] sm:$0xff] %vm3452_vm1, %v3367_v32  ;;  %3457 = vst.msk [vmem:[#allocation3 + $0x20] sm:$0xff] %vm3452_vm1, %v3365_v52 }
 0x468   : > { %3611 = vrot.lane.b32.xlu1 %v3516_v51, %s6621_s8  ;;  %3609 = vrot.lane.b32.xlu0 %v3515_v29, %s6621_s8  ;;  %v3709_v51 = vld [vmem:[#allocation2 + $0x1bb] sm:$0xff]  ;;  %v3708_v29 = vld [vmem:[#allocation2 + $0x1b3] sm:$0xff]  ;;  %s6362_s8 = sshll.u32 %s9714_s13, 8 }
 0x46a   : > { %v3371_v36 = vpop.permute.xlu1 %3370  ;;  %v3369_v54 = vpop.permute.xlu0 %3368 }
 0x46b   : > { %3460 = vst.msk [vmem:[#allocation3 + $0x38] sm:$0xff] %vm3452_vm1, %v3371_v36  ;;  %3459 = vst.msk [vmem:[#allocation3 + $0x30] sm:$0xff] %vm3452_vm1, %v3369_v54 }
 0x46c   : > { %3744 = vrot.lane.b32.xlu1 %v3679_v53, %s6622_s9  ;;  %3742 = vrot.lane.b32.xlu0 %v3678_v33, %s6622_s9  ;;  %v3872_v53 = vld [vmem:[#allocation2 + $0x54] sm:$0xff]  ;;  %v3871_v33 = vld [vmem:[#allocation2 + $0x4c] sm:$0xff] }
 0x46e   : > { %v3375_v57 = vpop.permute.xlu1 %3374  ;;  %v3373_v58 = vpop.permute.xlu0 %3372 }
 0x46f   : > { %3462 = vst.msk [vmem:[#allocation3 + $0x48] sm:$0xff] %vm3452_vm1, %v3375_v57  ;;  %3461 = vst.msk [vmem:[#allocation3 + $0x40] sm:$0xff] %vm3452_vm1, %v3373_v58 }
 0x470   : > { %3748 = vrot.lane.b32.xlu1 %v3681_v55, %s6622_s9  ;;  %3746 = vrot.lane.b32.xlu0 %v3680_v56, %s6622_s9  ;;  %v3874_v55 = vld [vmem:[#allocation2 + $0x6c] sm:$0xff]  ;;  %v3873_v56 = vld [vmem:[#allocation2 + $0x64] sm:$0xff] }
 0x472   : > { %v3379_v61 = vpop.permute.xlu1 %3378  ;;  %v3377_v62 = vpop.permute.xlu0 %3376 }
 0x473   : > { %3464 = vst.msk [vmem:[#allocation3 + $0x58] sm:$0xff] %vm3452_vm1, %v3379_v61  ;;  %3463 = vst.msk [vmem:[#allocation3 + $0x50] sm:$0xff] %vm3452_vm1, %v3377_v62 }
 0x474   : > { %3752 = vrot.lane.b32.xlu1 %v3683_v59, %s6622_s9  ;;  %3750 = vrot.lane.b32.xlu0 %v3682_v60, %s6622_s9  ;;  %v3876_v59 = vld [vmem:[#allocation2 + $0x84] sm:$0xff]  ;;  %v3875_v60 = vld [vmem:[#allocation2 + $0x7c] sm:$0xff] }
 0x476   : > { %v3383_v14 = vpop.permute.xlu1 %3382  ;;  %v3381_v16 = vpop.permute.xlu0 %3380 }
 0x477   : > { %3466 = vst.msk [vmem:[#allocation3 + $0x68] sm:$0xff] %vm3452_vm1, %v3383_v14  ;;  %3465 = vst.msk [vmem:[#allocation3 + $0x60] sm:$0xff] %vm3452_vm1, %v3381_v16 }
 0x478   : > { %3756 = vrot.lane.b32.xlu1 %v3685_v6, %s6622_s9  ;;  %3754 = vrot.lane.b32.xlu0 %v3684_v8, %s6622_s9  ;;  %v3878_v6 = vld [vmem:[#allocation2 + $0x9c] sm:$0xff]  ;;  %v3877_v8 = vld [vmem:[#allocation2 + $0x94] sm:$0xff] }
 0x47a   : > { %v3387_v30 = vpop.permute.xlu1 %3386  ;;  %v3385_v31 = vpop.permute.xlu0 %3384 }
 0x47b   : > { %3468 = vst.msk [vmem:[#allocation3 + $0x78] sm:$0xff] %vm3452_vm1, %v3387_v30  ;;  %3467 = vst.msk [vmem:[#allocation3 + $0x70] sm:$0xff] %vm3452_vm1, %v3385_v31 }
 0x47c   : > { %3760 = vrot.lane.b32.xlu1 %v3687_v22, %s6622_s9  ;;  %3758 = vrot.lane.b32.xlu0 %v3686_v24, %s6622_s9  ;;  %v3880_v22 = vld [vmem:[#allocation2 + $0xb4] sm:$0xff]  ;;  %v3879_v24 = vld [vmem:[#allocation2 + $0xac] sm:$0xff] }
 0x47e   : > { %v3391_v37 = vpop.permute.xlu1 %3390  ;;  %v3389_v38 = vpop.permute.xlu0 %3388 }
 0x47f   : > { %3470 = vst.msk [vmem:[#allocation3 + $0x88] sm:$0xff] %vm3452_vm1, %v3391_v37  ;;  %3469 = vst.msk [vmem:[#allocation3 + $0x80] sm:$0xff] %vm3452_vm1, %v3389_v38 }
 0x480   : > { %3764 = vrot.lane.b32.xlu1 %v3689_v34, %s6622_s9  ;;  %3762 = vrot.lane.b32.xlu0 %v3688_v35, %s6622_s9  ;;  %v3882_v34 = vld [vmem:[#allocation2 + $0xcc] sm:$0xff]  ;;  %v3881_v35 = vld [vmem:[#allocation2 + $0xc4] sm:$0xff] }
 0x482   : > { %v3395_v41 = vpop.permute.xlu1 %3394  ;;  %v3393_v42 = vpop.permute.xlu0 %3392 }
 0x483   : > { %3472 = vst.msk [vmem:[#allocation3 + $0x98] sm:$0xff] %vm3452_vm1, %v3395_v41  ;;  %3471 = vst.msk [vmem:[#allocation3 + $0x90] sm:$0xff] %vm3452_vm1, %v3393_v42 }
 0x484   : > { %3768 = vrot.lane.b32.xlu1 %v3691_v39, %s6622_s9  ;;  %3766 = vrot.lane.b32.xlu0 %v3690_v40, %s6622_s9  ;;  %v3884_v39 = vld [vmem:[#allocation2 + $0xe4] sm:$0xff]  ;;  %v3883_v40 = vld [vmem:[#allocation2 + $0xdc] sm:$0xff] }
 0x486   : > { %v3399_v45 = vpop.permute.xlu1 %3398  ;;  %v3397_v46 = vpop.permute.xlu0 %3396 }
 0x487   : > { %3474 = vst.msk [vmem:[#allocation3 + $0xa8] sm:$0xff] %vm3452_vm1, %v3399_v45  ;;  %3473 = vst.msk [vmem:[#allocation3 + $0xa0] sm:$0xff] %vm3452_vm1, %v3397_v46 }
 0x488   : > { %3772 = vrot.lane.b32.xlu1 %v3693_v43, %s6622_s9  ;;  %3770 = vrot.lane.b32.xlu0 %v3692_v44, %s6622_s9  ;;  %v3886_v43 = vld [vmem:[#allocation2 + $0xfc] sm:$0xff]  ;;  %v3885_v44 = vld [vmem:[#allocation2 + $0xf4] sm:$0xff] }
 0x48a   : > { %v3403_v49 = vpop.permute.xlu1 %3402  ;;  %v3401_v63 = vpop.permute.xlu0 %3400 }
 0x48b   : > { %3476 = vst.msk [vmem:[#allocation3 + $0xb8] sm:$0xff] %vm3452_vm1, %v3403_v49  ;;  %3475 = vst.msk [vmem:[#allocation3 + $0xb0] sm:$0xff] %vm3452_vm1, %v3401_v63 }
 0x48c   : > { %3776 = vrot.lane.b32.xlu1 %v3695_v48, %s6622_s9  ;;  %3774 = vrot.lane.b32.xlu0 %v3694_v47, %s6622_s9  ;;  %v3888_v48 = vld [vmem:[#allocation2 + $0x114] sm:$0xff]  ;;  %v3887_v47 = vld [vmem:[#allocation2 + $0x10c] sm:$0xff] }
 0x48e   : > { %v3407_v2 = vpop.permute.xlu1 %3406  ;;  %v3405_v3 = vpop.permute.xlu0 %3404 }
 0x48f   : > { %3478 = vst.msk [vmem:[#allocation3 + $0xc8] sm:$0xff] %vm3452_vm1, %v3407_v2  ;;  %3477 = vst.msk [vmem:[#allocation3 + $0xc0] sm:$0xff] %vm3452_vm1, %v3405_v3 }
 0x490   : > { %3780 = vrot.lane.b32.xlu1 %v3697_v0, %s6622_s9  ;;  %3778 = vrot.lane.b32.xlu0 %v3696_v1, %s6622_s9  ;;  %v3890_v0 = vld [vmem:[#allocation2 + $0x12c] sm:$0xff]  ;;  %v3889_v1 = vld [vmem:[#allocation2 + $0x124] sm:$0xff] }
 0x492   : > { %v3411_v7 = vpop.permute.xlu1 %3410  ;;  %v3409_v9 = vpop.permute.xlu0 %3408 }
 0x493   : > { %3480 = vst.msk [vmem:[#allocation3 + $0xd8] sm:$0xff] %vm3452_vm1, %v3411_v7  ;;  %3479 = vst.msk [vmem:[#allocation3 + $0xd0] sm:$0xff] %vm3452_vm1, %v3409_v9 }
 0x494   : > { %3784 = vrot.lane.b32.xlu1 %v3699_v4, %s6622_s9  ;;  %3782 = vrot.lane.b32.xlu0 %v3698_v5, %s6622_s9  ;;  %v3892_v4 = vld [vmem:[#allocation2 + $0x144] sm:$0xff]  ;;  %v3891_v5 = vld [vmem:[#allocation2 + $0x13c] sm:$0xff] }
 0x496   : > { %v3415_v12 = vpop.permute.xlu1 %3414  ;;  %v3413_v13 = vpop.permute.xlu0 %3412 }
 0x497   : > { %3482 = vst.msk [vmem:[#allocation3 + $0xe8] sm:$0xff] %vm3452_vm1, %v3415_v12  ;;  %3481 = vst.msk [vmem:[#allocation3 + $0xe0] sm:$0xff] %vm3452_vm1, %v3413_v13 }
 0x498   : > { %3788 = vrot.lane.b32.xlu1 %v3701_v10, %s6622_s9  ;;  %3786 = vrot.lane.b32.xlu0 %v3700_v11, %s6622_s9  ;;  %v3894_v10 = vld [vmem:[#allocation2 + $0x15c] sm:$0xff]  ;;  %v3893_v11 = vld [vmem:[#allocation2 + $0x154] sm:$0xff] }
 0x49a   : > { %v3419_v18 = vpop.permute.xlu1 %3418  ;;  %v3417_v19 = vpop.permute.xlu0 %3416 }
 0x49b   : > { %3484 = vst.msk [vmem:[#allocation3 + $0xf8] sm:$0xff] %vm3452_vm1, %v3419_v18  ;;  %3483 = vst.msk [vmem:[#allocation3 + $0xf0] sm:$0xff] %vm3452_vm1, %v3417_v19  ;;  %v3895_v18 = vld [vmem:[#allocation2 + $0x16c] sm:$0xff]  ;;  %vm6238_vm1 = vcmask 64512  }
 0x49c   : > { %3792 = vrot.lane.b32.xlu1 %v3703_v15, %s6622_s9  ;;  %3790 = vrot.lane.b32.xlu0 %v3702_v17, %s6622_s9  ;;  %v5084_v15 = vlaneseq  ;;  %v3896_v17 = vld [vmem:[#allocation2 + $0x174] sm:$0xff] }
 0x49e   : > { %v3552_v23 = vpop.permute.xlu1 %3551  ;;  %v3550_v25 = vpop.permute.xlu0 %3549 }
 0x49f   : > { %3647 = vst.msk [vmem:[#allocation3 + $0x8] sm:$0xff] %vm3645_vm2, %v3552_v23  ;;  %3646 = vst.msk [vmem:[#allocation3] sm:$0xff] %vm3645_vm2, %v3550_v25  ;;  %v3898_v23 = vld [vmem:[#allocation2 + $0x18c] sm:$0xff]  ;;  %v3897_v25 = vld [vmem:[#allocation2 + $0x184] sm:$0xff] }
 0x4a0   : > { %3796 = vrot.lane.b32.xlu1 %v3705_v20, %s6622_s9  ;;  %3794 = vrot.lane.b32.xlu0 %v3704_v21, %s6622_s9  ;;  %v8081_v21 = vshrl.u32 %v5084_v15, 7  ;;  %v5057_v15 = vld [vmem:[#allocation2 + $0xf1] sm:$0xff] }
 0x4a2   : > { %v3556_v28 = vpop.permute.xlu1 %3555  ;;  %v3554_v50 = vpop.permute.xlu0 %3553  ;;  %vm5088_vm5 = vcmp.eq.s32.totalorder %v8081_v21, 0 }
 0x4a3   : > { %3649 = vst.msk [vmem:[#allocation3 + $0x18] sm:$0xff] %vm3645_vm2, %v3556_v28  ;;  %3648 = vst.msk [vmem:[#allocation3 + $0x10] sm:$0xff] %vm3645_vm2, %v3554_v50  ;;  %v8088_v28 = vadd.s32 16, %v8081_v21  ;;  %v3900_v50 = vld [vmem:[#allocation2 + $0x1a4] sm:$0xff] }
 0x4a4   : > { %3800 = vrot.lane.b32.xlu1 %v3707_v26, %s6622_s9  ;;  %3798 = vrot.lane.b32.xlu0 %v3706_v27, %s6622_s9 }
 0x4a5   : > { %vm5099_vm4 = vcmp.eq.s32.totalorder %v8088_v28, 17 }
 0x4a6   : > { %v3560_v32 = vpop.permute.xlu1 %3559  ;;  %v3558_v52 = vpop.permute.xlu0 %3557 }
 0x4a7   : > { %3651 = vst.msk [vmem:[#allocation3 + $0x28] sm:$0xff] %vm3645_vm2, %v3560_v32  ;;  %3650 = vst.msk [vmem:[#allocation3 + $0x20] sm:$0xff] %vm3645_vm2, %v3558_v52  ;;  %v5033_v52 = vld [vmem:[#allocation2 + $0x31] sm:$0xff] }
 0x4a8   : > { %3804 = vrot.lane.b32.xlu1 %v3709_v51, %s6622_s9  ;;  %3802 = vrot.lane.b32.xlu0 %v3708_v29, %s6622_s9  ;;  %v3899_v51 = vld [vmem:[#allocation2 + $0x19c] sm:$0xff] }
 0x4aa   : > { %v3564_v36 = vpop.permute.xlu1 %3563  ;;  %v3562_v54 = vpop.permute.xlu0 %3561 }
 0x4ab   : > { %3653 = vst.msk [vmem:[#allocation3 + $0x38] sm:$0xff] %vm3645_vm2, %v3564_v36  ;;  %3652 = vst.msk [vmem:[#allocation3 + $0x30] sm:$0xff] %vm3645_vm2, %v3562_v54  ;;  %v5037_v36 = vld [vmem:[#allocation2 + $0x51] sm:$0xff] }
 0x4ac   : > { %3937 = vrot.lane.b32.xlu1 %v3872_v53, %s6623_s10  ;;  %3935 = vrot.lane.b32.xlu0 %v3871_v33, %s6623_s10  ;;  %v5038_v53 = vld [vmem:[#allocation2 + $0x59] sm:$0x3]  ;;  %v5036_v33 = vld [vmem:[#allocation2 + $0x49] sm:$0xff] }
 0x4ad   : > { %v5114_v54 = vsel %vm5099_vm4, -inf, %v5038_v53 }
 0x4ae   : > { %v3568_v57 = vpop.permute.xlu1 %3567  ;;  %v3566_v58 = vpop.permute.xlu0 %3565 }
 0x4af   : > { %3655 = vst.msk [vmem:[#allocation3 + $0x48] sm:$0xff] %vm3645_vm2, %v3568_v57  ;;  %3654 = vst.msk [vmem:[#allocation3 + $0x40] sm:$0xff] %vm3645_vm2, %v3566_v58  ;;  %v3901_v57 = vld [vmem:[#allocation2 + $0x1b4] sm:$0xff] }
 0x4b0   : > { %3941 = vrot.lane.b32.xlu1 %v3874_v55, %s6623_s10  ;;  %3939 = vrot.lane.b32.xlu0 %v3873_v56, %s6623_s10  ;;  %v8102_v55 = vsel %vm5088_vm5, -inf, %v5036_v33  ;;  %v3902_v56 = vld [vmem:[#allocation2 + $0x1bc] sm:$0xff] }
 0x4b1   : > { %v8104_v58 = vld [vmem:[#allocation2 + $0x39] sm:$0xff] }
 0x4b2   : > { %v3572_v61 = vpop.permute.xlu1 %3571  ;;  %v3570_v62 = vpop.permute.xlu0 %3569 }
 0x4b3   : > { %3657 = vst.msk [vmem:[#allocation3 + $0x58] sm:$0xff] %vm3645_vm2, %v3572_v61  ;;  %3656 = vst.msk [vmem:[#allocation3 + $0x50] sm:$0xff] %vm3645_vm2, %v3570_v62  ;;  %v5220_v62 = vrot.slane %v5037_v36, 1 }
 0x4b4   : > { %3945 = vrot.lane.b32.xlu1 %v3876_v59, %s6623_s10  ;;  %3943 = vrot.lane.b32.xlu0 %v3875_v60, %s6623_s10  ;;  %v8108_v59 = vsel %vm5088_vm5, -inf, %v5033_v52  ;;  %v8193_v52 = vsel %vm5088_vm5, -inf, %v5057_v15 }
 0x4b6   : > { %v3576_v14 = vpop.permute.xlu1 %3575  ;;  %v3574_v16 = vpop.permute.xlu0 %3573 }
 0x4b7   : > { %3659 = vst.msk [vmem:[#allocation3 + $0x68] sm:$0xff] %vm3645_vm2, %v3576_v14  ;;  %3658 = vst.msk [vmem:[#allocation3 + $0x60] sm:$0xff] %vm3645_vm2, %v3574_v16  ;;  %v5062_v14 = vld [vmem:[#allocation2 + $0x119] sm:$0x3]  ;;  %v9635_v16 = vrot.slane %v8104_v58, 1 }
 0x4b8   : > { %3949 = vrot.lane.b32.xlu1 %v3878_v6, %s6623_s10  ;;  %3947 = vrot.lane.b32.xlu0 %v3877_v8, %s6623_s10  ;;  %v5222_v6 = vrot.slane %v5114_v54, 1  ;;  %v5219_v8 = vrot.slane %v8102_v55, 1 }
 0x4ba   : > { %v3580_v30 = vpop.permute.xlu1 %3579  ;;  %v3578_v31 = vpop.permute.xlu0 %3577 }
 0x4bb   : > { %3661 = vst.msk [vmem:[#allocation3 + $0x78] sm:$0xff] %vm3645_vm2, %v3580_v30  ;;  %3660 = vst.msk [vmem:[#allocation3 + $0x70] sm:$0xff] %vm3645_vm2, %v3578_v31  ;;  %v5214_v30 = vrot.slane %v8108_v59, 1  ;;  %v8117_v31 = vld [vmem:[#allocation2 + $0x111] sm:$0xff] }
 0x4bc   : > { %3953 = vrot.lane.b32.xlu1 %v3880_v22, %s6623_s10  ;;  %3951 = vrot.lane.b32.xlu0 %v3879_v24, %s6623_s10  ;;  %v5365_v22 = vrot.slane %v5037_v36, 2  ;;  %v5367_v24 = vrot.slane %v5114_v54, 2 }
 0x4be   : > { %v3584_v37 = vpop.permute.xlu1 %3583  ;;  %v3582_v38 = vpop.permute.xlu0 %3581 }
 0x4bf   : > { %3663 = vst.msk [vmem:[#allocation3 + $0x88] sm:$0xff] %vm3645_vm2, %v3584_v37  ;;  %3662 = vst.msk [vmem:[#allocation3 + $0x80] sm:$0xff] %vm3645_vm2, %v3582_v38  ;;  %v5364_v37 = vrot.slane %v8102_v55, 2  ;;  %v5138_v38 = vsel %vm5099_vm4, -inf, %v5062_v14  ;;  %v4071_v14 = vld [vmem:[#allocation2 + $0xa8] sm:$0xff] }
 0x4c0   : > { %3957 = vrot.lane.b32.xlu1 %v3882_v34, %s6623_s10  ;;  %3955 = vrot.lane.b32.xlu0 %v3881_v35, %s6623_s10  ;;  %v4066_v34 = vld [vmem:[#allocation2 + $0x68] sm:$0xff]  ;;  %v4065_v35 = vld [vmem:[#allocation2 + $0x60] sm:$0xff] }
 0x4c2   : > { %v3588_v41 = vpop.permute.xlu1 %3587  ;;  %v3586_v42 = vpop.permute.xlu0 %3585 }
 0x4c3   : > { %3665 = vst.msk [vmem:[#allocation3 + $0x98] sm:$0xff] %vm3645_vm2, %v3588_v41  ;;  %3664 = vst.msk [vmem:[#allocation3 + $0x90] sm:$0xff] %vm3645_vm2, %v3586_v42  ;;  %v8123_v41 = vsel %vm5208_vm6, %v5220_v62, %v5222_v6  ;;  %v5260_v42 = vrot.slane %v8117_v31, 1  ;;  %v5399_v6 = vrot.slane %v8193_v52, 2 }
 0x4c4   : > { %3961 = vrot.lane.b32.xlu1 %v3884_v39, %s6623_s10  ;;  %3959 = vrot.lane.b32.xlu0 %v3883_v40, %s6623_s10 }
 0x4c6   : > { %v3592_v45 = vpop.permute.xlu1 %3591  ;;  %v3590_v46 = vpop.permute.xlu0 %3589 }
 0x4c7   : > { %3667 = vst.msk [vmem:[#allocation3 + $0xa8] sm:$0xff] %vm3645_vm2, %v3592_v45  ;;  %3666 = vst.msk [vmem:[#allocation3 + $0xa0] sm:$0xff] %vm3645_vm2, %v3590_v46  ;;  %v8131_v45 = vsel %vm5208_vm6, %v5219_v8, %v5220_v62  ;;  %v5262_v46 = vrot.slane %v5138_v38, 1  ;;  %v8212_v62 = vld [vmem:[#allocation2 + $0x129] sm:$0xff] }
 0x4c8   : > { %3965 = vrot.lane.b32.xlu1 %v3886_v43, %s6623_s10  ;;  %3963 = vrot.lane.b32.xlu0 %v3885_v44, %s6623_s10  ;;  %v5326_v43 = vmax.f32 %v5037_v36, %v8123_v41  ;;  %v9634_v44 = vrot.slane %v8104_v58, 2  ;;  %v4072_v8 = vld [vmem:[#allocation2 + $0xb0] sm:$0xff] }
 0x4ca   : > { %v3596_v49 = vpop.permute.xlu1 %3595  ;;  %v3594_v63 = vpop.permute.xlu0 %3593 }
 0x4cb   : > { %3669 = vst.msk [vmem:[#allocation3 + $0xb8] sm:$0xff] %vm3645_vm2, %v3596_v49  ;;  %3668 = vst.msk [vmem:[#allocation3 + $0xb0] sm:$0xff] %vm3645_vm2, %v3594_v63  ;;  %v8141_v49 = vsel %vm5208_vm6, %v5214_v30, %v9635_v16  ;;  %v5325_v63 = vmax.f32 %v8102_v55, %v8131_v45 }
 0x4cc   : > { %3969 = vrot.lane.b32.xlu1 %v3888_v48, %s6623_s10  ;;  %3967 = vrot.lane.b32.xlu0 %v3887_v47, %s6623_s10  ;;  %v4068_v48 = vld [vmem:[#allocation2 + $0x80] sm:$0xff]  ;;  %v8136_v47 = vsel %vm5353_vm7, %v5365_v22, %v5367_v24 }
 0x4ce   : > { %v3600_v2 = vpop.permute.xlu1 %3599  ;;  %v3598_v3 = vpop.permute.xlu0 %3597 }
 0x4cf   : > { %3671 = vst.msk [vmem:[#allocation3 + $0xc8] sm:$0xff] %vm3645_vm2, %v3600_v2  ;;  %3670 = vst.msk [vmem:[#allocation3 + $0xc0] sm:$0xff] %vm3645_vm2, %v3598_v3  ;;  %v8146_v2 = vld [vmem:[#allocation2 + $0x69] sm:$0xff]  ;;  %v8148_v3 = vld [vmem:[#allocation2 + $0x61] sm:$0xff] }
 0x4d0   : > { %3973 = vrot.lane.b32.xlu1 %v3890_v0, %s6623_s10  ;;  %3971 = vrot.lane.b32.xlu0 %v3889_v1, %s6623_s10  ;;  %v5359_v0 = vrot.slane %v8108_v59, 2  ;;  %v4067_v1 = vld [vmem:[#allocation2 + $0x78] sm:$0xff] }
 0x4d2   : > { %v3604_v7 = vpop.permute.xlu1 %3603  ;;  %v3602_v9 = vpop.permute.xlu0 %3601 }
 0x4d3   : > { %3673 = vst.msk [vmem:[#allocation3 + $0xd8] sm:$0xff] %vm3645_vm2, %v3604_v7  ;;  %3672 = vst.msk [vmem:[#allocation3 + $0xd0] sm:$0xff] %vm3645_vm2, %v3602_v9  ;;  %v8156_v7 = vsel %vm5353_vm7, %v5364_v37, %v5365_v22 }
 0x4d4   : > { %3977 = vrot.lane.b32.xlu1 %v3892_v4, %s6623_s10  ;;  %3975 = vrot.lane.b32.xlu0 %v3891_v5, %s6623_s10  ;;  %v8151_v4 = vmax.f32 %v5326_v43, %v8136_v47  ;;  %v5323_v5 = vmax.f32 %v8108_v59, %v8141_v49 }
 0x4d6   : > { %v3608_v12 = vpop.permute.xlu1 %3607  ;;  %v3606_v13 = vpop.permute.xlu0 %3605 }
 0x4d7   : > { %3675 = vst.msk [vmem:[#allocation3 + $0xe8] sm:$0xff] %vm3645_vm2, %v3608_v12  ;;  %3674 = vst.msk [vmem:[#allocation3 + $0xe0] sm:$0xff] %vm3645_vm2, %v3606_v13  ;;  %v8161_v12 = vld [vmem:[#allocation2 + $0xf9] sm:$0xff]  ;;  %v8166_v13 = vsel %vm5208_vm6, %v5260_v42, %v5262_v46 }
 0x4d8   : > { %3981 = vrot.lane.b32.xlu1 %v3894_v10, %s6623_s10  ;;  %3979 = vrot.lane.b32.xlu0 %v3893_v11, %s6623_s10  ;;  %v8159_v11 = vmax.f32 %v5325_v63, %v8156_v7  ;;  %v4074_v63 = vld [vmem:[#allocation2 + $0xc8] sm:$0xff] }
 0x4da   : > { %v3612_v19 = vpop.permute.xlu1 %3611  ;;  %v3610_v20 = vpop.permute.xlu0 %3609 }
 0x4db   : > { %3677 = vst.msk [vmem:[#allocation3 + $0xf8] sm:$0xff] %vm3645_vm2, %v3612_v19  ;;  %3676 = vst.msk [vmem:[#allocation3 + $0xf0] sm:$0xff] %vm3645_vm2, %v3610_v20  ;;  %v8175_v19 = vsel %vm5088_vm5, -inf, %v8148_v3  ;;  %v5342_v20 = vmax.f32 %v8117_v31, %v8166_v13 }
 0x4dc   : > { %3985 = vrot.lane.b32.xlu1 %v3896_v17, %s6623_s10  ;;  %3983 = vrot.lane.b32.xlu0 %v3895_v18, %s6623_s10  ;;  %v5060_v17 = vld [vmem:[#allocation2 + $0x109] sm:$0xff]  ;;  %v5503_v18 = vmax.f32 %v8151_v4, %v8146_v2 }
 0x4dd   : > { %v8197_v53 = vsel %vm5088_vm5, -inf, %v5060_v17  ;;  %v8250_v17 = vld [vmem:[#allocation2 + $0x121] sm:$0xff] }
 0x4de   : > { %v3745_v26 = vpop.permute.xlu1 %3744  ;;  %v3743_v27 = vpop.permute.xlu0 %3742 }
 0x4df   : > { %3840 = vst.msk [vmem:[#allocation3 + $0x8] sm:$0xff] %vm3838_vm3, %v3745_v26  ;;  %3839 = vst.msk [vmem:[#allocation3] sm:$0xff] %vm3838_vm3, %v3743_v27  ;;  %v5405_v26 = vrot.slane %v8117_v31, 2  ;;  %v5407_v27 = vrot.slane %v5138_v38, 2 }
 0x4e0   : > { %3989 = vrot.lane.b32.xlu1 %v3898_v23, %s6623_s10  ;;  %3987 = vrot.lane.b32.xlu0 %v3897_v25, %s6623_s10  ;;  %v8184_v23 = vsel %vm5353_vm7, %v5359_v0, %v9634_v44  ;;  %v5502_v25 = vmax.f32 %v8159_v11, %v8175_v19  ;;  %v4073_v0 = vld [vmem:[#allocation2 + $0xc0] sm:$0xff] }
 0x4e1   : > { %v8200_v54 = vsel %vm5353_vm7, %v5405_v26, %v5407_v27  ;;  %v8313_v11 = vld [vmem:[#allocation2 + $0x79] sm:$0xff] }
 0x4e2   : > { %v3749_v29 = vpop.permute.xlu1 %3748  ;;  %v3747_v32 = vpop.permute.xlu0 %3746 }
 0x4e3   : > { %3842 = vst.msk [vmem:[#allocation3 + $0x18] sm:$0xff] %vm3838_vm3, %v3749_v29  ;;  %3841 = vst.msk [vmem:[#allocation3 + $0x10] sm:$0xff] %vm3838_vm3, %v3747_v32  ;;  %v5468_v29 = vmax.f32 %v5323_v5, %v8184_v23  ;;  %v9633_v32 = vrot.slane %v8161_v12, 1 }
 0x4e4   : > { %3993 = vrot.lane.b32.xlu1 %v3900_v50, %s6623_s10  ;;  %3991 = vrot.lane.b32.xlu0 %v3899_v51, %s6623_s10  ;;  %v4070_v50 = vld [vmem:[#allocation2 + $0x98] sm:$0xff]  ;;  %v4069_v51 = vld [vmem:[#allocation2 + $0x90] sm:$0xff] }
 0x4e5   : > { %v5500_v22 = vmax.f32 %v5468_v29, %v8102_v55 }
 0x4e6   : > { %v3753_v60 = vpop.permute.xlu1 %3752  ;;  %v3751_v61 = vpop.permute.xlu0 %3750 }
 0x4e7   : > { %3844 = vst.msk [vmem:[#allocation3 + $0x28] sm:$0xff] %vm3838_vm3, %v3753_v60  ;;  %3843 = vst.msk [vmem:[#allocation3 + $0x20] sm:$0xff] %vm3838_vm3, %v3751_v61  ;;  %v8207_v60 = vmax.f32 %v5342_v20, %v8200_v54  ;;  %v5259_v61 = vrot.slane %v8197_v53, 1 }
 0x4e8   : > { %3997 = vrot.lane.b32.xlu1 %v3902_v56, %s6623_s10  ;;  %3995 = vrot.lane.b32.xlu0 %v3901_v57, %s6623_s10  ;;  %v5254_v56 = vrot.slane %v8193_v52, 1  ;;  %v9632_v57 = vrot.slane %v8161_v12, 2 }
 0x4e9   : > { %v5519_v24 = vmax.f32 %v8207_v60, %v8212_v62 }
 0x4ea   : > { %v3757_v39 = vpop.permute.xlu1 %3756  ;;  %v3755_v40 = vpop.permute.xlu0 %3754  ;;  %v8221_v30 = vsel %vm5208_vm6, %v5254_v56, %v9633_v32  ;;  %v8237_v31 = vsel %vm5353_vm7, %v5399_v6, %v9632_v57  ;;  %v4076_v56 = vld [vmem:[#allocation2 + $0xe0] sm:$0xff] }
 0x4eb   : > { %3846 = vst.msk [vmem:[#allocation3 + $0x38] sm:$0xff] %vm3838_vm3, %v3757_v39  ;;  %3845 = vst.msk [vmem:[#allocation3 + $0x30] sm:$0xff] %vm3838_vm3, %v3755_v40  ;;  %v5339_v39 = vmax.f32 %v8193_v52, %v8221_v30  ;;  %v4081_v57 = vld [vmem:[#allocation2 + $0x120] sm:$0xff] }
 0x4ec   : > { %4131 = vrot.lane.b32.xlu1 %v4066_v34, %s6624_s11  ;;  %4129 = vrot.lane.b32.xlu0 %v4065_v35, %s6624_s11  ;;  %v8226_v34 = vsel %vm5208_vm6, %v5259_v61, %v5260_v42  ;;  %v5041_v35 = vld [vmem:[#allocation2 + $0x71] sm:$0x3]  ;;  %v5404_v42 = vrot.slane %v8197_v53, 2  ;;  %v4075_v61 = vld [vmem:[#allocation2 + $0xd8] sm:$0xff] }
 0x4ed   : > { %v5341_v40 = vmax.f32 %v8197_v53, %v8226_v34  ;;  %v5484_v43 = vmax.f32 %v5339_v39, %v8237_v31  ;;  %v5117_v46 = vsel %vm5099_vm4, -inf, %v5041_v35 }
 0x4ee   : > { %v3761_v9 = vpop.permute.xlu1 %3760  ;;  %v3759_v10 = vpop.permute.xlu0 %3758  ;;  %v8248_v5 = vsel %vm5353_vm7, %v5404_v42, %v5405_v26  ;;  %v8262_v26 = vsel %vm5088_vm5, -inf, %v8250_v17 }
 0x4ef   : > { %3848 = vst.msk [vmem:[#allocation3 + $0x48] sm:$0xff] %vm3838_vm3, %v3761_v9  ;;  %3847 = vst.msk [vmem:[#allocation3 + $0x40] sm:$0xff] %vm3838_vm3, %v3759_v10  ;;  %v5227_v9 = vrot.slane %v5117_v46, 1  ;;  %v8253_v20 = vmax.f32 %v5341_v40, %v8248_v5  ;;  %v5516_v27 = vmax.f32 %v5484_v43, %v8197_v53  ;;  %v5369_v43 = vrot.slane %v8175_v19, 2 }
 0x4f0   : > { %4135 = vrot.lane.b32.xlu1 %v4068_v48, %s6624_s11  ;;  %4133 = vrot.lane.b32.xlu0 %v4067_v1, %s6624_s11  ;;  %v5225_v48 = vrot.slane %v8146_v2, 1  ;;  %v5542_v1 = vmax.f32 %v5500_v22, %v8131_v45  ;;  %v5065_v22 = vld [vmem:[#allocation2 + $0x131] sm:$0x3] }
 0x4f1   : > { %v5518_v29 = vmax.f32 %v8253_v20, %v8262_v26  ;;  %v4083_v20 = vld [vmem:[#allocation2 + $0x138] sm:$0xff] }
 0x4f2   : > { %v3765_v33 = vpop.permute.xlu1 %3764  ;;  %v3763_v36 = vpop.permute.xlu0 %3762  ;;  %v5581_v6 = vmax.f32 %v5542_v1, %v8156_v7  ;;  %v4077_v1 = vld [vmem:[#allocation2 + $0xf0] sm:$0xff] }
 0x4f3   : > { %3850 = vst.msk [vmem:[#allocation3 + $0x58] sm:$0xff] %vm3838_vm3, %v3765_v33  ;;  %3849 = vst.msk [vmem:[#allocation3 + $0x50] sm:$0xff] %vm3838_vm3, %v3763_v36  ;;  %v8269_v33 = vsel %vm5208_vm6, %v5225_v48, %v5227_v9  ;;  %v5224_v36 = vrot.slane %v8175_v19, 1  ;;  %v5068_v9 = vld [vmem:[#allocation2 + $0x149] sm:$0x3] }
 0x4f4   : > { %4139 = vrot.lane.b32.xlu1 %v4070_v50, %s6624_s11  ;;  %4137 = vrot.lane.b32.xlu0 %v4069_v51, %s6624_s11  ;;  %v5370_v50 = vrot.slane %v8146_v2, 2  ;;  %v5372_v51 = vrot.slane %v5117_v46, 2  ;;  %v8297_v46 = vld [vmem:[#allocation2 + $0x81] sm:$0xff] }
 0x4f5   : > { %v5226_v40 = vsel %vm5208_vm6, %v5224_v36, %v5225_v48 }
 0x4f6   : > { %v3769_v37 = vpop.permute.xlu1 %3768  ;;  %v3767_v38 = vpop.permute.xlu0 %3766  ;;  %v8283_v39 = vsel %vm5353_vm7, %v5370_v50, %v5372_v51  ;;  %v8302_v48 = vmax.f32 %v5502_v25, %v5226_v40 }
 0x4f7   : > { %3852 = vst.msk [vmem:[#allocation3 + $0x68] sm:$0xff] %vm3838_vm3, %v3769_v37  ;;  %3851 = vst.msk [vmem:[#allocation3 + $0x60] sm:$0xff] %vm3838_vm3, %v3767_v38  ;;  %v5558_v38 = vmax.f32 %v5516_v27, %v8226_v34  ;;  %v5265_v27 = vrot.slane %v8212_v62, 1 }
 0x4f8   : > { %4143 = vrot.lane.b32.xlu1 %v4072_v8, %s6624_s11  ;;  %4141 = vrot.lane.b32.xlu0 %v4071_v14, %s6624_s11  ;;  %v5328_v8 = vmax.f32 %v8146_v2, %v8269_v33  ;;  %v8279_v14 = vmax.f32 %v5503_v18, %v8269_v33  ;;  %v5327_v18 = vmax.f32 %v8175_v19, %v5226_v40 }
 0x4f9   : > { %v5597_v25 = vmax.f32 %v5558_v38, %v8248_v5  ;;  %v4080_v38 = vld [vmem:[#allocation2 + $0x110] sm:$0xff] }
 0x4fa   : > { %v3773_v10 = vpop.permute.xlu1 %3772  ;;  %v3771_v15 = vpop.permute.xlu0 %3770  ;;  %v8289_v42 = vmax.f32 %v5328_v8, %v8283_v39  ;;  %v5584_v4 = vmax.f32 %v8279_v14, %v8283_v39 }
 0x4fb   : > { %3854 = vst.msk [vmem:[#allocation3 + $0x78] sm:$0xff] %vm3838_vm3, %v3773_v10  ;;  %3853 = vst.msk [vmem:[#allocation3 + $0x70] sm:$0xff] %vm3838_vm3, %v3771_v15  ;;  %v8309_v10 = vsel %vm5353_vm7, %v5369_v43, %v5370_v50  ;;  %v5613_v15 = vmax.f32 %v5581_v6, %v8175_v19  ;;  %v8326_v19 = vsel %vm5088_vm5, -inf, %v8313_v11  ;;  %v5410_v6 = vrot.slane %v8212_v62, 2 }
 0x4fc   : > { %4147 = vrot.lane.b32.xlu1 %v4074_v63, %s6624_s11  ;;  %4145 = vrot.lane.b32.xlu0 %v4073_v0, %s6624_s11  ;;  %v5141_v63 = vsel %vm5099_vm4, -inf, %v5065_v22  ;;  %v4078_v0 = vld [vmem:[#allocation2 + $0xf8] sm:$0xff] }
 0x4fd   : > { %v5267_v8 = vrot.slane %v5141_v63, 1  ;;  %v5655_v50 = vmax.f32 %v5613_v15, %v5226_v40  ;;  %v5412_v22 = vrot.slane %v5141_v63, 2 }
 0x4fe   : > { %v3777_v35 = vpop.permute.xlu1 %3776  ;;  %v3775_v37 = vpop.permute.xlu0 %3774 }
 0x4ff   : > { %3856 = vst.msk [vmem:[#allocation3 + $0x88] sm:$0xff] %vm3838_vm3, %v3777_v35  ;;  %3855 = vst.msk [vmem:[#allocation3 + $0x80] sm:$0xff] %vm3838_vm3, %v3775_v37  ;;  %v8334_v37 = vsel %vm5208_vm6, %v5265_v27, %v5267_v8  ;;  %v8337_v43 = vmax.f32 %v5655_v50, %v8309_v10  ;;  %v8348_v15 = vsel %vm5353_vm7, %v5410_v6, %v5412_v22 }
 0x500   : > { %4151 = vrot.lane.b32.xlu1 %v4076_v56, %s6624_s11  ;;  %4149 = vrot.lane.b32.xlu0 %v4075_v61, %s6624_s11  ;;  %v8317_v56 = vmax.f32 %v5327_v18, %v8309_v10  ;;  %v5583_v61 = vmax.f32 %v8302_v48, %v8309_v10  ;;  %v4079_v18 = vld [vmem:[#allocation2 + $0x108] sm:$0xff]  ;;  %v5344_v40 = vmax.f32 %v8212_v62, %v8334_v37  ;;  %v5144_v10 = vsel %vm5099_vm4, -inf, %v5068_v9 }
 0x501   : > { %v8345_v63 = vmax.f32 %v5519_v24, %v8334_v37  ;;  %9654 = vst [vmem:[#allocation4_spill] sm:$0xff] %v8348_v15  ;;  %v5629_v8 = vmax.f32 %v5597_v25, %v8262_v26  ;;  %v8362_v24 = vld [vmem:[#allocation2 + $0x141] sm:$0xff] }
 0x502   : > { %v3781_v51 = vpop.permute.xlu1 %3780  ;;  %v3779_v36 = vpop.permute.xlu0 %3778  ;;  %v8356_v50 = vmax.f32 %v5344_v40, %v8348_v15  ;;  %v5229_v40 = vrot.slane %v8326_v19, 1 }
 0x503   : > { %3858 = vst.msk [vmem:[#allocation3 + $0x98] sm:$0xff] %vm3838_vm3, %v3781_v51  ;;  %3857 = vst.msk [vmem:[#allocation3 + $0x90] sm:$0xff] %vm3838_vm3, %v3779_v36  ;;  %v5264_v51 = vrot.slane %v8262_v26, 1  ;;  %v5409_v36 = vrot.slane %v8262_v26, 2 }
 0x504   : > { %4155 = vrot.lane.b32.xlu1 %v4078_v0, %s6624_s11  ;;  %4153 = vrot.lane.b32.xlu0 %v4077_v1, %s6624_s11 }
 0x505   : > { %v5266_v22 = vsel %vm5208_vm6, %v5264_v51, %v5265_v27  ;;  %v8366_v25 = vsel %vm5353_vm7, %v5409_v36, %v5410_v6  ;;  %v8378_v27 = vld [vmem:[#allocation2 + $0x139] sm:$0xff] }
 0x506   : > { %v3785_v0 = vpop.permute.xlu1 %3784  ;;  %v3783_v1 = vpop.permute.xlu0 %3782 }
 0x507   : > { %3860 = vst.msk [vmem:[#allocation3 + $0xa8] sm:$0xff] %vm3838_vm3, %v3785_v0  ;;  %3859 = vst.msk [vmem:[#allocation3 + $0xa0] sm:$0xff] %vm3838_vm3, %v3783_v1  ;;  %v4082_v0 = vld [vmem:[#allocation2 + $0x128] sm:$0xff]  ;;  %v5343_v1 = vmax.f32 %v8262_v26, %v5266_v22 }
 0x508   : > { %4159 = vrot.lane.b32.xlu1 %v4080_v38, %s6624_s11  ;;  %4157 = vrot.lane.b32.xlu0 %v4079_v18, %s6624_s11  ;;  %v8374_v38 = vmax.f32 %v5518_v29, %v5266_v22  ;;  %v5671_v18 = vmax.f32 %v5629_v8, %v5266_v22  ;;  %v4085_v22 = vld [vmem:[#allocation2 + $0x150] sm:$0xff] }
 0x509   : > { %v8381_v6 = vmax.f32 %v5343_v1, %v8366_v25 }
 0x50a   : > { %v3789_v32 = vpop.permute.xlu1 %3788  ;;  %v3787_v44 = vpop.permute.xlu0 %3786  ;;  %v8386_v36 = vmax.f32 %v5671_v18, %v8366_v25  ;;  %v4088_v18 = vld [vmem:[#allocation2 + $0x170] sm:$0xff] }
 0x50b   : > { %3862 = vst.msk [vmem:[#allocation3 + $0xb8] sm:$0xff] %vm3838_vm3, %v3789_v32  ;;  %3861 = vst.msk [vmem:[#allocation3 + $0xb0] sm:$0xff] %vm3838_vm3, %v3787_v44  ;;  %v8393_v32 = vsel %vm5088_vm5, -inf, %v8378_v27  ;;  %v4084_v44 = vld [vmem:[#allocation2 + $0x140] sm:$0xff] }
 0x50c   : > { %9655 = vst [vmem:[#allocation5_spill] sm:$0xff] %v8386_v36  ;;  %4163 = vrot.lane.b32.xlu1 %v4082_v0, %s6624_s11  ;;  %4161 = vrot.lane.b32.xlu0 %v4081_v57, %s6624_s11  ;;  %v4086_v57 = vld [vmem:[#allocation2 + $0x158] sm:$0xff] }
 0x50e   : > { %v3793_v29 = vpop.permute.xlu1 %3792  ;;  %v3791_v8 = vpop.permute.xlu0 %3790 }
 0x50f   : > { %3864 = vst.msk [vmem:[#allocation3 + $0xc8] sm:$0xff] %vm3838_vm3, %v3793_v29  ;;  %3863 = vst.msk [vmem:[#allocation3 + $0xc0] sm:$0xff] %vm3838_vm3, %v3791_v8  ;;  %v4087_v29 = vld [vmem:[#allocation2 + $0x168] sm:$0xff] }
 0x510   : > { %4167 = vrot.lane.b32.xlu1 %v4084_v44, %s6624_s11  ;;  %4165 = vrot.lane.b32.xlu0 %v4083_v20, %s6624_s11  ;;  %v4090_v44 = vld [vmem:[#allocation2 + $0x188] sm:$0xff]  ;;  %v4089_v20 = vld [vmem:[#allocation2 + $0x180] sm:$0xff] }
 0x512   : > { %v3797_v0 = vpop.permute.xlu1 %3796  ;;  %v3795_v1 = vpop.permute.xlu0 %3794 }
 0x513   : > { %3866 = vst.msk [vmem:[#allocation3 + $0xd8] sm:$0xff] %vm3838_vm3, %v3797_v0  ;;  %3865 = vst.msk [vmem:[#allocation3 + $0xd0] sm:$0xff] %vm3838_vm3, %v3795_v1 }
 0x514   : > { %4171 = vrot.lane.b32.xlu1 %v4086_v57, %s6624_s11  ;;  %4169 = vrot.lane.b32.xlu0 %v4085_v22, %s6624_s11  ;;  %v4091_v57 = vld [vmem:[#allocation2 + $0x198] sm:$0xff] }
 0x516   : > { %v3801_v16 = vpop.permute.xlu1 %3800  ;;  %v3799_v8 = vpop.permute.xlu0 %3798 }
 0x517   : > { %3868 = vst.msk [vmem:[#allocation3 + $0xe8] sm:$0xff] %vm3838_vm3, %v3801_v16  ;;  %3867 = vst.msk [vmem:[#allocation3 + $0xe0] sm:$0xff] %vm3838_vm3, %v3799_v8  ;;  %v4092_v16 = vld [vmem:[#allocation2 + $0x1a0] sm:$0xff] }
 0x518   : > { %4175 = vrot.lane.b32.xlu1 %v4088_v18, %s6624_s11  ;;  %4173 = vrot.lane.b32.xlu0 %v4087_v29, %s6624_s11  ;;  %v4094_v18 = vld [vmem:[#allocation2 + $0x1b8] sm:$0xff]  ;;  %v4093_v29 = vld [vmem:[#allocation2 + $0x1b0] sm:$0xff] }
 0x51a   : > { %v3805_v0 = vpop.permute.xlu1 %3804  ;;  %v3803_v1 = vpop.permute.xlu0 %3802 }
 0x51b   : > { %3870 = vst.msk [vmem:[#allocation3 + $0xf8] sm:$0xff] %vm3838_vm3, %v3805_v0  ;;  %3869 = vst.msk [vmem:[#allocation3 + $0xf0] sm:$0xff] %vm3838_vm3, %v3803_v1 }
 0x51c   : > { %4179 = vrot.lane.b32.xlu1 %v4090_v44, %s6624_s11  ;;  %4177 = vrot.lane.b32.xlu0 %v4089_v20, %s6624_s11  ;;  %v4096_v44 = vld [vmem:[#allocation2 + $0x1d0] sm:$0xff]  ;;  %v4095_v20 = vld [vmem:[#allocation2 + $0x1c8] sm:$0xff] }
 0x51e   : > { %v3938_v22 = vpop.permute.xlu1 %3937  ;;  %v3936_v8 = vpop.permute.xlu0 %3935 }
 0x51f   : > { %4033 = vst.msk [vmem:[#allocation3 + $0x8] sm:$0xff] %vm4031_vm8, %v3938_v22  ;;  %4032 = vst.msk [vmem:[#allocation3] sm:$0xff] %vm4031_vm8, %v3936_v8 }
 0x520   : > { %4183 = vrot.lane.b32.xlu1 %v4092_v16, %s6624_s11  ;;  %4181 = vrot.lane.b32.xlu0 %v4091_v57, %s6624_s11  ;;  %v5056_v16 = vld [vmem:[#allocation2 + $0xe9] sm:$0x3] }
 0x522   : > { %v3942_v0 = vpop.permute.xlu1 %3941  ;;  %v3940_v1 = vpop.permute.xlu0 %3939 }
 0x523   : > { %4035 = vst.msk [vmem:[#allocation3 + $0x18] sm:$0xff] %vm4031_vm8, %v3942_v0  ;;  %4034 = vst.msk [vmem:[#allocation3 + $0x10] sm:$0xff] %vm4031_vm8, %v3940_v1  ;;  %v6626_v1 = vmov -inf  }
 0x524   : > { %4187 = vrot.lane.b32.xlu1 %v4094_v18, %s6624_s11  ;;  %4185 = vrot.lane.b32.xlu0 %v4093_v29, %s6624_s11  ;;  %v8431_v18 = vld [vmem:[#allocation2 + $0xe1] sm:$0xff]  ;;  %v5132_v29 = vsel %vm5099_vm4, -inf, %v5056_v16 }
 0x525   : > { %v9637_v51 = vrot.slane %v8431_v18, 2  ;;  %v5397_v26 = vrot.slane %v5132_v29, 2 }
 0x526   : > { %v3946_v22 = vpop.permute.xlu1 %3945  ;;  %v3944_v8 = vpop.permute.xlu0 %3943 }
 0x527   : > { %4037 = vst.msk [vmem:[#allocation3 + $0x28] sm:$0xff] %vm4031_vm8, %v3946_v22  ;;  %4036 = vst.msk [vmem:[#allocation3 + $0x20] sm:$0xff] %vm4031_vm8, %v3944_v8 }
 0x528   : > { %4191 = vrot.lane.b32.xlu1 %v4096_v44, %s6624_s11  ;;  %4189 = vrot.lane.b32.xlu0 %v4095_v20, %s6624_s11  ;;  %v8435_v44 = vrot.slane %v6626_v1, 1  ;;  %v8437_v20 = vrot.slane %v6626_v1, 2  ;;  %v5054_v1 = vld [vmem:[#allocation2 + $0xd9] sm:$0xff]  ;;  %s9512_s11 = scalar_lea.vmem %s9631_s3, %s6362_s8 }
 0x52a   : > { %v3950_v57 = vpop.permute.xlu1 %3949  ;;  %v3948_v0 = vpop.permute.xlu0 %3947  ;;  %9656 = vst [vmem:[#allocation6_spill] sm:$0xff] %v8435_v44  ;;  %9657 = vst [vmem:[#allocation7_spill] sm:$0xff] %v8437_v20 }
 0x52b   : > { %4039 = vst.msk [vmem:[#allocation3 + $0x38] sm:$0xff] %vm4031_vm8, %v3950_v57  ;;  %4038 = vst.msk [vmem:[#allocation3 + $0x30] sm:$0xff] %vm4031_vm8, %v3948_v0  ;;  %v5035_v57 = vld [vmem:[#allocation2 + $0x41] sm:$0x3]  ;;  %v8452_v0 = vmax.f32 %v8435_v44, %v8437_v20 }
 0x52c   : > { %4324 = vrot.lane.b32.xlu1 %v8146_v2, %s6625_s14  ;;  %4322 = vrot.lane.b32.xlu0 %v8148_v3, %s6625_s14  ;;  %v9636_v2 = vrot.slane %v8431_v18, 1  ;;  %v5252_v3 = vrot.slane %v5132_v29, 1  ;;  %v8448_v16 = vsel %vm5099_vm4, -inf, %v5035_v57  ;;  %v8469_v29 = vsel %vm5088_vm5, -inf, %v5054_v1 }
 0x52d   : > { %v8482_v1 = vsel %vm5353_vm7, %v9637_v51, %v5397_v26  ;;  %v5375_v57 = vrot.slane %v8297_v46, 2 }
 0x52e   : > { %v3954_v22 = vpop.permute.xlu1 %3953  ;;  %v3952_v8 = vpop.permute.xlu0 %3951  ;;  %9658 = vst [vmem:[#allocation8_spill] sm:$0xff] %v8482_v1 }
 0x52f   : > { %4041 = vst.msk [vmem:[#allocation3 + $0x48] sm:$0xff] %vm4031_vm8, %v3954_v22  ;;  %4040 = vst.msk [vmem:[#allocation3 + $0x40] sm:$0xff] %vm4031_vm8, %v3952_v8 }
 0x530   : > { %4356 = vrot.lane.b32.xlu1 %v8212_v62, %s6625_s14  ;;  %4354 = vrot.lane.b32.xlu0 %v8250_v17, %s6625_s14  ;;  %v8460_v62 = vsel %vm5208_vm6, %v9636_v2, %v5252_v3  ;;  %v5044_v17 = vld [vmem:[#allocation2 + $0x89] sm:$0x3]  ;;  %v5615_v3 = vmax.f32 %v5583_v61, %v8326_v19 }
 0x531   : > { %v4452_v61 = vld [vmem:[#allocation2 + $0x6a] sm:$0xff] }
 0x532   : > { %v3958_v22 = vpop.permute.xlu1 %3957  ;;  %v3956_v8 = vpop.permute.xlu0 %3955 }
 0x533   : > { %4043 = vst.msk [vmem:[#allocation3 + $0x58] sm:$0xff] %vm4031_vm8, %v3958_v22  ;;  %4042 = vst.msk [vmem:[#allocation3 + $0x50] sm:$0xff] %vm4031_vm8, %v3956_v8  ;;  %v5120_v22 = vsel %vm5099_vm4, -inf, %v5044_v17  ;;  %v5230_v8 = vrot.slane %v8297_v46, 1  ;;  %v5616_v17 = vmax.f32 %v5584_v4, %v8297_v46  ;;  %v5374_v4 = vrot.slane %v8326_v19, 2 }
 0x534   : > { %4328 = vrot.lane.b32.xlu1 %v8297_v46, %s6625_s14  ;;  %4326 = vrot.lane.b32.xlu0 %v8313_v11, %s6625_s14  ;;  %v5232_v2 = vrot.slane %v5120_v22, 1  ;;  %v5377_v26 = vrot.slane %v5120_v22, 2  ;;  %v5269_v22 = vrot.slane %v8393_v32, 1 }
 0x535   : > { %v5231_v51 = vsel %vm5208_vm6, %v5229_v40, %v5230_v8  ;;  %v5270_v40 = vrot.slane %v8362_v24, 1  ;;  %v8518_v9 = vsel %vm5353_vm7, %v5374_v4, %v5375_v57 }
 0x536   : > { %v3962_v60 = vpop.permute.xlu1 %3961  ;;  %v3960_v35 = vpop.permute.xlu0 %3959  ;;  %v5233_v11 = vsel %vm5208_vm6, %v5230_v8, %v5232_v2  ;;  %v5657_v48 = vmax.f32 %v5615_v3, %v5231_v51  ;;  %v5272_v2 = vrot.slane %v5144_v10, 1 }
 0x537   : > { %4045 = vst.msk [vmem:[#allocation3 + $0x68] sm:$0xff] %vm4031_vm8, %v3962_v60  ;;  %4044 = vst.msk [vmem:[#allocation3 + $0x60] sm:$0xff] %vm4031_vm8, %v3960_v35  ;;  %v5658_v14 = vmax.f32 %v5616_v17, %v5233_v11  ;;  %v4451_v35 = vld [vmem:[#allocation2 + $0x62] sm:$0xff]  ;;  %v8505_v60 = vsel %vm5353_vm7, %v5375_v57, %v5377_v26  ;;  %v9661_v26 = vmax.f32 %v8317_v56, %v8326_v19  ;;  %v5249_v56 = vrot.slane %v8469_v29, 1  ;;  %v8536_v57 = vld [vmem:[#allocation2 + $0x91] sm:$0xff] }
 0x538   : > { %4360 = vrot.lane.b32.xlu1 %v8362_v24, %s6625_s14  ;;  %4358 = vrot.lane.b32.xlu0 %v8378_v27, %s6625_s14  ;;  %v9659_v27 = vmax.f32 %v8289_v42, %v8297_v46  ;;  %v5330_v36 = vmax.f32 %v8297_v46, %v5233_v11  ;;  %v8529_v42 = vmax.f32 %v5657_v48, %v8518_v9  ;;  %v8549_v48 = vsel %vm5088_vm5, -inf, %v8536_v57 }
 0x539   : > { %v8515_v3 = vmax.f32 %v5658_v14, %v8505_v60  ;;  %v8523_v44 = vmax.f32 %v9661_v26, %v5231_v51  ;;  %v5273_v14 = vsel %vm5208_vm6, %v5270_v40, %v5272_v2  ;;  %9663 = vst [vmem:[#allocation11_spill] sm:$0xff] %v8536_v57  ;;  %v5329_v46 = vmax.f32 %v8326_v19, %v5231_v51  ;;  %v8555_v19 = vld [vmem:[#allocation2 + $0x99] sm:$0xff] }
 0x53a   : > { %v3966_v8 = vpop.permute.xlu1 %3965  ;;  %v3964_v20 = vpop.permute.xlu0 %3963  ;;  %v8512_v17 = vmax.f32 %v9659_v27, %v5233_v11  ;;  %9662 = vst [vmem:[#allocation10_spill] sm:$0xff] %v8529_v42  ;;  %v5415_v27 = vrot.slane %v8362_v24, 2  ;;  %v8544_v4 = vmax.f32 %v5330_v36, %v8505_v60  ;;  %v9665_v36 = vmax.f32 %v8356_v50, %v8362_v24  ;;  %v6569_v42 = vld [vmem:[#allocation2 + $0x12a] sm:$0xff] }
 0x53b   : > { %9660 = vst [vmem:[#allocation9_spill] sm:$0xff] %v8515_v3  ;;  %4047 = vst.msk [vmem:[#allocation3 + $0x78] sm:$0xff] %vm4031_vm8, %v3966_v8  ;;  %v8558_v51 = vmax.f32 %v5329_v46, %v8518_v9  ;;  %v5271_v26 = vsel %vm5208_vm6, %v5269_v22, %v5270_v40  ;;  %v5346_v46 = vmax.f32 %v8362_v24, %v5273_v14  ;;  %v6570_v40 = vld [vmem:[#allocation2 + $0x122] sm:$0xff] }
 0x53c   : > { %4046 = vst.msk [vmem:[#allocation3 + $0x70] sm:$0xff] %vm4031_vm8, %v3964_v20  ;;  %4517 = vrot.lane.b32.xlu1 %v4452_v61, %s6627_s15  ;;  %4515 = vrot.lane.b32.xlu0 %v4451_v35, %s6627_s15  ;;  %v5586_v20 = vmax.f32 %v8512_v17, %v8505_v60  ;;  %v5417_v61 = vrot.slane %v5144_v10, 2  ;;  %v9664_v35 = vmax.f32 %v8345_v63, %v8348_v15  ;;  %v5414_v10 = vrot.slane %v8393_v32, 2  ;;  %v8569_v63 = vld [vmem:[#allocation2 + $0x151] sm:$0xff] }
 0x53d   : > { %v8563_v60 = vmax.f32 %v9665_v36, %v5273_v14  ;;  %9666 = vst [vmem:[#allocation12_spill] sm:$0xff] %v8569_v63  ;;  %v5047_v36 = vld [vmem:[#allocation2 + $0xa1] sm:$0x3]  ;;  %v5506_v22 = vmax.f32 %v8558_v51, %v8549_v48  ;;  %v9668_v51 = vmax.f32 %v8381_v6, %v8393_v32 }
 0x53e   : > { %v5632_v2 = vmax.f32 %v9664_v35, %v8362_v24  ;;  %v3970_v8 = vpop.permute.xlu1 %3969  ;;  %v3968_v17 = vpop.permute.xlu0 %3967  ;;  %v5507_v35 = vmax.f32 %v8544_v4, %v8555_v19  ;;  %v8575_v11 = vsel %vm5353_vm7, %v5415_v27, %v5417_v61  ;;  %v8586_v24 = vsel %vm5088_vm5, -inf, %v8569_v63  ;;  %v4454_v4 = vld [vmem:[#allocation2 + $0x82] sm:$0xff]  ;;  %v4453_v61 = vld [vmem:[#allocation2 + $0x7a] sm:$0xff] }
 0x53f   : > { %4049 = vst.msk [vmem:[#allocation3 + $0x88] sm:$0xff] %vm4031_vm8, %v3970_v8  ;;  %4048 = vst.msk [vmem:[#allocation3 + $0x80] sm:$0xff] %vm4031_vm8, %v3968_v17  ;;  %v8596_v17 = vsel %vm5353_vm7, %v5414_v10, %v5415_v27  ;;  %v8603_v63 = vld [vmem:[#allocation2 + $0x159] sm:$0xff]  ;;  %v5123_v27 = vsel %vm5099_vm4, -inf, %v5047_v36  ;;  %v5235_v10 = vrot.slane %v8555_v19, 1  ;;  %v9670_v36 = vrot.slane %v8431_v18, 1 }
 0x540   : > { %v5674_v50 = vmax.f32 %v5632_v2, %v5273_v14  ;;  %4549 = vrot.lane.b32.xlu1 %v6569_v42, %s6627_s15  ;;  %4547 = vrot.lane.b32.xlu0 %v6570_v40, %s6627_s15  ;;  %v5345_v14 = vmax.f32 %v8393_v32, %v5271_v26  ;;  %v8590_v42 = vmax.f32 %v5346_v46, %v8575_v11  ;;  %v5071_v6 = vld [vmem:[#allocation2 + $0x161] sm:$0x3] }
 0x541   : > { %v8601_v40 = vmax.f32 %v9668_v51, %v5271_v26  ;;  %v9669_v46 = vmax.f32 %v8374_v38, %v8366_v25  ;;  %v5237_v51 = vrot.slane %v5123_v27, 1 }
 0x542   : > { %v8593_v2 = vmax.f32 %v5674_v50, %v8575_v11  ;;  %v3974_v8 = vpop.permute.xlu1 %3973  ;;  %v3972_v3 = vpop.permute.xlu0 %3971  ;;  %v8606_v57 = vmax.f32 %v5345_v14, %v8596_v17  ;;  %v5234_v14 = vrot.slane %v8549_v48, 1 }
 0x543   : > { %v5631_v50 = vmax.f32 %v9669_v46, %v8393_v32  ;;  %4051 = vst.msk [vmem:[#allocation3 + $0x98] sm:$0xff] %vm4031_vm8, %v3974_v8  ;;  %4050 = vst.msk [vmem:[#allocation3 + $0x90] sm:$0xff] %vm4031_vm8, %v3972_v3  ;;  %v5382_v32 = vrot.slane %v5123_v27, 2  ;;  %v5618_v3 = vmax.f32 %v5586_v20, %v8555_v19  ;;  %v8630_v8 = vsel %vm5208_vm6, %v5249_v56, %v9670_v36 }
 0x544   : > { %9667 = vst [vmem:[#allocation13_spill] sm:$0xff] %v8593_v2  ;;  %v5380_v2 = vrot.slane %v8555_v19, 2  ;;  %4521 = vrot.lane.b32.xlu1 %v4454_v4, %s6627_s15  ;;  %4519 = vrot.lane.b32.xlu0 %v4453_v61, %s6627_s15  ;;  %9671 = vst [vmem:[#allocation14_spill] sm:$0xff] %v8630_v8  ;;  %v5238_v46 = vsel %vm5208_vm6, %v5235_v10, %v5237_v51  ;;  %v5379_v4 = vrot.slane %v8549_v48, 2 }
 0x545   : > { %v5673_v38 = vmax.f32 %v5631_v50, %v5271_v26  ;;  %v5332_v26 = vmax.f32 %v8555_v19, %v5238_v46  ;;  %v8642_v50 = vmax.f32 %v5507_v35, %v5238_v46  ;;  %v5660_v56 = vmax.f32 %v5618_v3, %v5238_v46  ;;  %v6572_v35 = vld [vmem:[#allocation2 + $0x13a] sm:$0xff] }
 0x546   : > { %v3978_v61 = vpop.permute.xlu1 %3977  ;;  %v3976_v15 = vpop.permute.xlu0 %3975  ;;  %v8640_v20 = vsel %vm5353_vm7, %v5380_v2, %v5382_v32  ;;  %v5236_v27 = vsel %vm5208_vm6, %v5234_v14, %v5235_v10  ;;  %v8648_v51 = vsel %vm5353_vm7, %v5379_v4, %v5380_v2  ;;  %v5147_v10 = vsel %vm5099_vm4, -inf, %v5071_v6  ;;  %v8664_v14 = vld [vmem:[#allocation2 + $0xa9] sm:$0xff] }
 0x547   : > { %v8636_v25 = vmax.f32 %v5673_v38, %v8596_v17  ;;  %9673 = vst [vmem:[#allocation16_spill] sm:$0xff] %v8640_v20  ;;  %9674 = vst [vmem:[#allocation17_spill] sm:$0xff] %v8642_v50  ;;  %v9675_v38 = vmax.f32 %v8523_v44, %v8518_v9  ;;  %v8657_v32 = vmax.f32 %v5332_v26, %v8640_v20  ;;  %v5275_v3 = vrot.slane %v8603_v63, 1 }
 0x548   : > { %4053 = vst.msk [vmem:[#allocation3 + $0xa8] sm:$0xff] %vm4031_vm8, %v3978_v61  ;;  %4052 = vst.msk [vmem:[#allocation3 + $0xa0] sm:$0xff] %vm4031_vm8, %v3976_v15  ;;  %4551 = vrot.lane.b32.xlu0 %v6572_v35, %s6627_s15  ;;  %v5331_v2 = vmax.f32 %v8549_v48, %v5236_v27  ;;  %v8667_v44 = vmax.f32 %v5660_v56, %v8640_v20  ;;  %v8669_v9 = vmax.f32 %v5506_v22, %v5236_v27  ;;  %v6573_v35 = vld [vmem:[#allocation2 + $0x6b] sm:$0xff]  ;;  %v5059_v15 = vld [vmem:[#allocation2 + $0x101] sm:$0x3] }
 0x549   : > { %9672 = vst [vmem:[#allocation15_spill] sm:$0xff] %v8636_v25  ;;  %v5617_v36 = vmax.f32 %v9675_v38, %v8549_v48  ;;  %v6571_v25 = vld [vmem:[#allocation2 + $0x142] sm:$0xff]  ;;  %v8675_v61 = vsel %vm5088_vm5, -inf, %v8664_v14  ;;  %v5277_v6 = vrot.slane %v5147_v10, 1  ;;  %v5420_v26 = vrot.slane %v8603_v63, 2 }
 0x54a   : > { %4553 = vrot.lane.b32.xlu1 %v6571_v25, %s6627_s15  ;;  %v3982_v46 = vpop.permute.xlu1 %3981  ;;  %v3980_v4 = vpop.permute.xlu0 %3979  ;;  %v8678_v48 = vmax.f32 %v5331_v2, %v8648_v51  ;;  %v9677_v38 = vmax.f32 %v8563_v60, %v8575_v11  ;;  %v6574_v2 = vld [vmem:[#allocation2 + $0x63] sm:$0xff]  ;;  %v5419_v50 = vrot.slane %v8586_v24, 2 }
 0x54b   : > { %v5659_v25 = vmax.f32 %v5617_v36, %v5236_v27  ;;  %4055 = vst.msk [vmem:[#allocation3 + $0xb8] sm:$0xff] %vm4031_vm8, %v3982_v46  ;;  %4054 = vst.msk [vmem:[#allocation3 + $0xb0] sm:$0xff] %vm4031_vm8, %v3980_v4  ;;  %v5422_v27 = vrot.slane %v5147_v10, 2  ;;  %v5394_v46 = vrot.slane %v8469_v29, 2  ;;  %v5274_v10 = vrot.slane %v8586_v24, 1 }
 0x54c   : > { %v5634_v36 = vmax.f32 %v9677_v38, %v8603_v63  ;;  %4708 = vrot.lane.b32.xlu0 %v6574_v2, %s6628_s16  ;;  %v9678_v38 = vmax.f32 %v8590_v42, %v8603_v63  ;;  %v5337_v4 = vmax.f32 %v8469_v29, %v8630_v8 }
 0x54d   : > { %v8686_v56 = vmax.f32 %v5659_v25, %v8648_v51  ;;  %v5278_v25 = vsel %vm5208_vm6, %v5275_v3, %v5277_v6  ;;  %v8701_v60 = vsel %vm5353_vm7, %v5420_v26, %v5422_v27  ;;  %v5276_v6 = vsel %vm5208_vm6, %v5274_v10, %v5275_v3  ;;  %v6575_v10 = vld [vmem:[#allocation2 + $0x12b] sm:$0xff] }
 0x54e   : > { %4710 = vrot.lane.b32.xlu1 %v6573_v35, %s6628_s16  ;;  %v5348_v11 = vmax.f32 %v8603_v63, %v5278_v25  ;;  %v8706_v35 = vmax.f32 %v9678_v38, %v5278_v25  ;;  %v5676_v2 = vmax.f32 %v5634_v36, %v5278_v25  ;;  %v3986_v22 = vpop.permute.xlu1 %3985  ;;  %v3984_v20 = vpop.permute.xlu0 %3983  ;;  %v9679_v27 = vmax.f32 %v8601_v40, %v8596_v17  ;;  %v6576_v17 = vld [vmem:[#allocation2 + $0x123] sm:$0xff] }
 0x54f   : > { %9676 = vst [vmem:[#allocation18_spill] sm:$0xff] %v8686_v56  ;;  %4057 = vst.msk [vmem:[#allocation3 + $0xc8] sm:$0xff] %vm4031_vm8, %v3986_v22  ;;  %v5347_v3 = vmax.f32 %v8586_v24, %v5276_v6  ;;  %v8731_v40 = vsel %vm5099_vm4, -inf, %v5059_v15  ;;  %v8736_v22 = vsel %vm5353_vm7, %v5419_v50, %v5420_v26  ;;  %v8750_v15 = vld [vmem:[#allocation2 + $0x169] sm:$0xff]  ;;  %v9686_v36 = vmax.f32 %v8452_v0, %v8104_v58 }
 0x550   : > { %v5633_v56 = vmax.f32 %v9679_v27, %v8586_v24  ;;  %4056 = vst.msk [vmem:[#allocation3 + $0xc0] sm:$0xff] %vm4031_vm8, %v3984_v20  ;;  %v8719_v42 = vmax.f32 %v5348_v11, %v8701_v60  ;;  %v8724_v25 = vmax.f32 %v5676_v2, %v8701_v60  ;;  %4740 = vrot.lane.b32.xlu0 %v6576_v17, %s6628_s16  ;;  %v8733_v20 = vld [vmem:[#allocation2 + $0x171] sm:$0xff]  ;;  %v5257_v50 = vrot.slane %v8731_v40, 1 }
 0x551   : > { %v9680_v11 = vmax.f32 %v8606_v57, %v8586_v24  ;;  %v5498_v27 = vmax.f32 %v8452_v0, %v8108_v59  ;;  %v8755_v26 = vmax.f32 %v5347_v3, %v8736_v22  ;;  %v5362_v3 = vrot.slane %v8448_v16, 2 }
 0x552   : > { %4742 = vrot.lane.b32.xlu1 %v6575_v10, %s6628_s16  ;;  %v5675_v2 = vmax.f32 %v5633_v56, %v5276_v6  ;;  %v9681_v10 = vrot.slane %v8431_v18, 2  ;;  %v3990_v57 = vpop.permute.xlu1 %3989  ;;  %v3988_v24 = vpop.permute.xlu0 %3987  ;;  %v9683_v56 = vrot.slane %v8448_v16, 1  ;;  %v5402_v0 = vrot.slane %v8731_v40, 2 }
 0x553   : > { %v8741_v38 = vmax.f32 %v9680_v11, %v5276_v6  ;;  %v9684_v6 = vrot.slane %v8104_v58, 1  ;;  %4059 = vst.msk [vmem:[#allocation3 + $0xd8] sm:$0xff] %vm4031_vm8, %v3990_v57  ;;  %4058 = vst.msk [vmem:[#allocation3 + $0xd0] sm:$0xff] %vm4031_vm8, %v3988_v24  ;;  %v6577_v11 = vld [vmem:[#allocation2 + $0x83] sm:$0xff]  ;;  %v6578_v57 = vld [vmem:[#allocation2 + $0x7b] sm:$0xff]  ;;  %v5540_v8 = vmax.f32 %v5498_v27, %v8141_v49 }
 0x554   : > { %v8748_v17 = vsel %vm5353_vm7, %v5394_v46, %v9681_v10  ;;  %v8765_v46 = vsel %vm5088_vm5, -inf, %v8750_v15  ;;  %v8770_v10 = vmax.f32 %v5675_v2, %v8736_v22  ;;  %v6562_v2 = vld [vmem:[%s9629_s1] sm:$0xff]   ;;  %4712 = vrot.lane.b32.xlu0 %v6578_v57, %s6628_s16  ;;  %v9688_v57 = vrot.slane %v8161_v12, 1  ;;  %v6563_v49 = vld [vmem:[%s9629_s1 + $0x8] sm:$0xff]  }
 0x555   : > { %9682 = vst [vmem:[#allocation19_spill] sm:$0xff] %v8748_v17  ;;  %v5218_v59 = vsel %vm5208_vm6, %v9684_v6, %v9683_v56  ;;  %v9685_v56 = vmax.f32 %v8431_v18, %v8460_v62  ;;  %v5482_v24 = vmax.f32 %v5337_v4, %v8748_v17  ;;  %6465 = vmatprep.subr.bf16.mxu0 %v6562_v2  ;;  %v6579_v27 = vld [vmem:[#allocation2 + $0x143] sm:$0xff] }
 0x556   : > { %4714 = vrot.lane.b32.xlu1 %v6577_v11, %s6628_s16  ;;  %v5324_v16 = vmax.f32 %v8104_v58, %v5218_v59  ;;  %6511 = vmatprep.subr.bf16.mxu1 %v6562_v2  ;;  %v3994_v18 = vpop.permute.xlu1 %3993  ;;  %v9687_v11 = vrot.slane %v8104_v58, 2  ;;  %v8801_v17 = vsel %vm5208_vm6, %v9688_v57, %v5257_v50  ;;  %v6581_v57 = vld [vmem:[#allocation2 + $0x6c] sm:$0xff] }
 0x557   : > { %v5483_v6 = vmax.f32 %v9685_v56, %v8482_v1  ;;  %v3992_v56 = vpop.permute.xlu0 %3991  ;;  %v5541_v1 = vmax.f32 %v9686_v36, %v5218_v59  ;;  %6466 = vmatpush3.bf16.msra.mxu0 %v6562_v2  ;;  %6518 = vmatpush3.bf16.msra.mxu1 %v6562_v2  ;;  %4061 = vst.msk [vmem:[#allocation3 + $0xe8] sm:$0xff] %vm4031_vm8, %v3994_v18  ;;  %v6580_v59 = vld [vmem:[#allocation2 + $0x13b] sm:$0xff] }
 0x558   : > { %4060 = vst.msk [vmem:[#allocation3 + $0xe0] sm:$0xff] %vm4031_vm8, %v3992_v56  ;;  %v5363_v4 = vsel %vm5353_vm7, %v9687_v11, %v5362_v3  ;;  %4744 = vrot.lane.b32.xlu0 %v6580_v59, %s6628_s16  ;;  %v5340_v3 = vmax.f32 %v8161_v12, %v8801_v17  ;;  %v5514_v50 = vmax.f32 %v5482_v24, %v8193_v52  ;;  %v6564_v11 = vld [vmem:[%s9629_s1 + $0x10] sm:$0xff]  }
 0x559   : > { %v5515_v36 = vmax.f32 %v5483_v6, %v8161_v12  ;;  %v5469_v58 = vmax.f32 %v5324_v16, %v5363_v4  ;;  %6467 = vmatprep.subr.bf16.mxu0 %v6563_v49  ;;  %6512 = vmatprep.subr.bf16.mxu1 %v6563_v49  ;;  %v5580_v2 = vmax.f32 %v5541_v1, %v5363_v4  ;;  %v9689_v16 = vrot.slane %v8161_v12, 2 }
 0x55a   : > { %4746 = vrot.lane.b32.xlu1 %v6579_v27, %s6628_s16  ;;  %v3998_v40 = vpop.permute.xlu1 %3997  ;;  %v5579_v18 = vmax.f32 %v5540_v8, %v8184_v23  ;;  %v6583_v23 = vld [vmem:[#allocation2 + $0x51] sm:$0xff]  ;;  %v5556_v8 = vmax.f32 %v5514_v50, %v8221_v30  ;;  %v6585_v50 = vld [vmem:[#allocation2 + $0x124] sm:$0xff] }
 0x55b   : > { %v3996_v6 = vpop.permute.xlu0 %3995  ;;  %6468 = vmatpush3.bf16.msra.mxu0 %v6563_v49  ;;  %6519 = vmatpush3.bf16.msra.mxu1 %v6563_v49  ;;  %4063 = vst.msk [vmem:[#allocation3 + $0xf8] sm:$0xff] %vm4031_vm8, %v3998_v40  ;;  %v8819_v56 = vsel %vm5353_vm7, %v9689_v16, %v5402_v0  ;;  %v5557_v24 = vmax.f32 %v5515_v36, %v8801_v17  ;;  %v6582_v49 = vld [vmem:[#allocation2 + $0x64] sm:$0xff] }
 0x55c   : > { %4062 = vst.msk [vmem:[#allocation3 + $0xf0] sm:$0xff] %vm4031_vm8, %v3996_v6  ;;  %4901 = vrot.lane.b32.xlu0 %v6582_v49, %s6629_s23  ;;  %v5501_v1 = vmax.f32 %v5469_v58, %v6583_v23  ;;  %v5485_v12 = vmax.f32 %v5340_v3, %v8819_v56  ;;  %6469 = vmatprep.subr.bf16.mxu0 %v6564_v11  ;;  %v6565_v58 = vld [vmem:[%s9629_s1 + $0x18] sm:$0xff]   ;;  %v6584_v3 = vld [vmem:[#allocation2 + $0x12c] sm:$0xff]  ;;  %v6566_v49 = vld [vmem:[%s9629_s1 + $0x20] sm:$0xff]  }
 0x55d   : > { %6513 = vmatprep.subr.bf16.mxu1 %v6564_v11  ;;  %v5612_v36 = vmax.f32 %v5580_v2, %v6583_v23  ;;  %v5611_v27 = vmax.f32 %v5579_v18, %v8102_v55  ;;  %v5596_v59 = vmax.f32 %v5557_v24, %v8819_v56  ;;  %v6586_v6 = vld [vmem:[#allocation2 + $0x111] sm:$0xff]  ;;  %v5595_v2 = vmax.f32 %v5556_v8, %v8237_v31  ;;  %v6587_v23 = vld [vmem:[#allocation2 + $0x84] sm:$0xff] }
 0x55e   : > { %4903 = vrot.lane.b32.xlu1 %v6581_v57, %s6629_s23  ;;  %v4132_v4 = vpop.permute.xlu1 %4131  ;;  %v5543_v40 = vmax.f32 %v5501_v1, %v8123_v41  ;;  %v5517_v16 = vmax.f32 %v5485_v12, %v6586_v6  ;;  %v6588_v1 = vld [vmem:[#allocation2 + $0x7c] sm:$0xff] }
 0x55f   : > { %v4130_v0 = vpop.permute.xlu0 %4129  ;;  %6470 = vmatpush3.bf16.msra.mxu0 %v6564_v11  ;;  %6520 = vmatpush3.bf16.msra.mxu1 %v6564_v11  ;;  %4227 = vst.msk [vmem:[#allocation3 + $0x8] sm:$0xff] %vm4225_vm9, %v4132_v4  ;;  %v5654_v24 = vmax.f32 %v5612_v36, %v8123_v41  ;;  %v5653_v11 = vmax.f32 %v5611_v27, %v8131_v45 }
 0x560   : > { %4226 = vst.msk [vmem:[#allocation3] sm:$0xff] %vm4225_vm9, %v4130_v0  ;;  %4933 = vrot.lane.b32.xlu0 %v6585_v50, %s6629_s23  ;;  %6471 = vmatprep.subr.bf16.mxu0 %v6565_v58  ;;  %v5628_v57 = vmax.f32 %v5596_v59, %v6586_v6  ;;  %v5582_v12 = vmax.f32 %v5543_v40, %v8136_v47  ;;  %v6589_v59 = vld [vmem:[#allocation2 + $0x144] sm:$0xff] }
 0x561   : > { %6514 = vmatprep.subr.bf16.mxu1 %v6565_v58  ;;  %v5559_v8 = vmax.f32 %v5517_v16, %v8166_v13  ;;  %v5627_v4 = vmax.f32 %v5595_v2, %v8197_v53  ;;  %v5693_v0 = vmax.f32 %v5654_v24, %v8136_v47  ;;  %v5692_v36 = vmax.f32 %v5653_v11, %v8156_v7  ;;  %v6567_v53 = vld [vmem:[%s9629_s1 + $0x28] sm:$0xff]   ;;  %v6568_v16 = vld [vmem:[%s9629_s1 + $0x30] ss:$0 sps:$4 sm:$0xff]  }
 0x562   : > { %4935 = vrot.lane.b32.xlu1 %v6584_v3, %s6629_s23  ;;  %v4136_v55 = vpop.permute.xlu1 %4135  ;;  %v5670_v27 = vmax.f32 %v5628_v57, %v8166_v13  ;;  %v6591_v40 = vld [vmem:[#allocation2 + $0x69] sm:$0xff]  ;;  %v6043_v24 = vsel %vm6041_vm10, %v6568_v16, 0 }
 0x563   : > { %v4134_v18 = vpop.permute.xlu0 %4133  ;;  %6472 = vmatpush3.bf16.msra.mxu0 %v6565_v58  ;;  %6521 = vmatpush3.bf16.msra.mxu1 %v6565_v58  ;;  %4229 = vst.msk [vmem:[#allocation3 + $0x18] sm:$0xff] %vm4225_vm9, %v4136_v55  ;;  %v6590_v58 = vld [vmem:[#allocation2 + $0x13c] sm:$0xff]  ;;  %v5598_v3 = vmax.f32 %v5559_v8, %v8200_v54  ;;  %v5669_v50 = vmax.f32 %v5627_v4, %v8226_v34  ;;  %v6592_v55 = vld [vmem:[#allocation2 + $0x129] sm:$0xff] }
 0x564   : > { %4228 = vst.msk [vmem:[#allocation3 + $0x10] sm:$0xff] %vm4225_vm9, %v4134_v18  ;;  %4905 = vrot.lane.b32.xlu0 %v6588_v1, %s6629_s23  ;;  %6473 = vmatprep.subr.bf16.mxu0 %v6566_v49  ;;  %v5614_v47 = vmax.f32 %v5582_v12, %v6591_v40  ;;  %v5709_v6 = vmax.f32 %v5670_v27, %v8200_v54 }
 0x565   : > { %6515 = vmatprep.subr.bf16.mxu1 %v6566_v49  ;;  %v5708_v34 = vmax.f32 %v5669_v50, %v8248_v5  ;;  %v5630_v18 = vmax.f32 %v5598_v3, %v6592_v55  ;;  %v5239_v3 = vrot.slane %v8675_v61, 1  ;;  %v4455_v55 = vld [vmem:[#allocation2 + $0x92] sm:$0xff] }
 0x566   : > { %4907 = vrot.lane.b32.xlu1 %v6587_v23, %s6629_s23  ;;  %v4140_v41 = vpop.permute.xlu1 %4139  ;;  %v5656_v2 = vmax.f32 %v5614_v47, %v8269_v33  ;;  %v9690_v23 = vld [vmem:[#allocation4_spill] sm:$0xff] }
 0x567   : > { %v4138_v45 = vpop.permute.xlu0 %4137  ;;  %6474 = vmatpush3.bf16.msra.mxu0 %v6566_v49  ;;  %6522 = vmatpush3.bf16.msra.mxu1 %v6566_v49  ;;  %4231 = vst.msk [vmem:[#allocation3 + $0x28] sm:$0xff] %vm4225_vm9, %v4140_v41  ;;  %v5672_v33 = vmax.f32 %v5630_v18, %v8334_v37 }
 0x568   : > { %4230 = vst.msk [vmem:[#allocation3 + $0x20] sm:$0xff] %vm4225_vm9, %v4138_v45  ;;  %4937 = vrot.lane.b32.xlu0 %v6590_v58, %s6629_s23  ;;  %6475 = vmatprep.subr.bf16.mxu0 %v6567_v53  ;;  %v5695_v5 = vmax.f32 %v5656_v2, %v8283_v39  ;;  %v9691_v39 = vld [vmem:[#allocation5_spill] sm:$0xff]  ;;  %v4456_v2 = vld [vmem:[#allocation2 + $0x9a] sm:$0xff] }
 0x569   : > { %6516 = vmatprep.subr.bf16.mxu1 %v6567_v53  ;;  %v5711_v1 = vmax.f32 %v5672_v33, %v9690_v23  ;;  %v9695_v23 = vmax.f32 %v8678_v48, %v8675_v61 }
 0x56a   : > { %4939 = vrot.lane.b32.xlu1 %v6589_v59, %s6629_s23  ;;  %v4144_v7 = vpop.permute.xlu1 %4143 }
 0x56b   : > { %v4142_v13 = vpop.permute.xlu0 %4141  ;;  %6476 = vmatpush3.bf16.msra.mxu0 %v6567_v53  ;;  %6523 = vmatpush3.bf16.msra.mxu1 %v6567_v53  ;;  %4233 = vst.msk [vmem:[#allocation3 + $0x38] sm:$0xff] %vm4225_vm9, %v4144_v7  ;;  %v9694_v7 = vmax.f32 %v8669_v9, %v8648_v51 }
 0x56c   : > { %4232 = vst.msk [vmem:[#allocation3 + $0x30] sm:$0xff] %vm4225_vm9, %v4142_v13  ;;  %5756 = vrot.lane.b32.xlu0 %v5692_v36, %s6630_s5  ;;  %6525 = vmatprep.subr.msk.bf16.mxu0 %vm6041_vm10, %v6568_v16  ;;  %v8903_v36 = vld [vmem:[#allocation2 + $0xb1] sm:$0xff] }
 0x56d   : > { %6526 = vmatprep.subr.msk.bf16.mxu1 %vm6041_vm10, %v6568_v16  ;;  %v5240_v59 = vrot.slane %v8903_v36, 1  ;;  %v5509_v47 = vmax.f32 %v8657_v32, %v8903_v36  ;;  %v5619_v13 = vmax.f32 %v9694_v7, %v8675_v61  ;;  %v5384_v32 = vrot.slane %v8675_v61, 2 }
 0x56e   : > { %5758 = vrot.lane.b32.xlu1 %v5693_v0, %s6630_s5  ;;  %v4148_v54 = vpop.permute.xlu1 %4147  ;;  %v9693_v0 = vld [vmem:[#allocation12_spill] sm:$0xff] }
 0x56f   : > { %v4146_v11 = vpop.permute.xlu0 %4145  ;;  %6478 = vmatpush3.bf16.msra.mxu0 %v6043_v24  ;;  %6524 = vmatpush3.bf16.msra.mxu1 %v6043_v24  ;;  %4235 = vst.msk [vmem:[#allocation3 + $0x48] sm:$0xff] %vm4225_vm9, %v4148_v54  ;;  %v5241_v16 = vsel %vm5208_vm6, %v5239_v3, %v5240_v59  ;;  %v5280_v24 = vrot.slane %v8733_v20, 1 }
 0x570   : > { %4234 = vst.msk [vmem:[#allocation3 + $0x40] sm:$0xff] %vm4225_vm9, %v4146_v11  ;;  %5788 = vrot.lane.b32.xlu0 %v5708_v34, %s6630_s5  ;;  %v5074_v34 = vld [vmem:[#allocation2 + $0x179] sm:$0x3]  ;;  %v5661_v51 = vmax.f32 %v5619_v13, %v5241_v16  ;;  %v5279_v11 = vrot.slane %v8765_v46, 1  ;;  %v5424_v13 = vrot.slane %v8765_v46, 2 }
 0x571   : > { %v5150_v9 = vsel %vm5099_vm4, -inf, %v5074_v34 }
 0x572   : > { %5790 = vrot.lane.b32.xlu1 %v5709_v6, %s6630_s5  ;;  %v4152_v57 = vpop.permute.xlu1 %4151  ;;  %v5282_v54 = vrot.slane %v5150_v9, 1 }
 0x573   : > { %v4150_v49 = vpop.permute.xlu0 %4149  ;;  %4237 = vst.msk [vmem:[#allocation3 + $0x58] sm:$0xff] %vm4225_vm9, %v4152_v57 }
 0x574   : > { %4236 = vst.msk [vmem:[#allocation3 + $0x50] sm:$0xff] %vm4225_vm9, %v4150_v49  ;;  %5760 = vrot.lane.b32.xlu0 %v8337_v43, %s6630_s5  ;;  %v9692_v43 = vld [vmem:[#allocation11_spill] sm:$0xff] }
 0x576   : > { %5762 = vrot.lane.b32.xlu1 %v5695_v5, %s6630_s5  ;;  %v4156_v12 = vpop.permute.xlu1 %4155 }
 0x577   : > { %v4154_v8 = vpop.permute.xlu0 %4153  ;;  %4239 = vst.msk [vmem:[#allocation3 + $0x68] sm:$0xff] %vm4225_vm9, %v4156_v12  ;;  %v8953_v12 = vld [vmem:[#allocation2 + $0xc1] sm:$0xff] }
 0x578   : > { %4238 = vst.msk [vmem:[#allocation3 + $0x60] sm:$0xff] %vm4225_vm9, %v4154_v8  ;;  %5792 = vrot.lane.b32.xlu0 %v9691_v39, %s6630_s5 }
 0x57a   : > { %5794 = vrot.lane.b32.xlu1 %v5711_v1, %s6630_s5  ;;  %v4160_v37 = vpop.permute.xlu1 %4159  ;;  %v8949_v1 = vmax.f32 %v9695_v23, %v5241_v16  ;;  %v9030_v23 = vld [vmem:[#allocation2 + $0x189] sm:$0xff] }
 0x57b   : > { %v4158_v4 = vpop.permute.xlu0 %4157  ;;  %4241 = vst.msk [vmem:[#allocation3 + $0x78] sm:$0xff] %vm4225_vm9, %v4160_v37  ;;  %v5283_v37 = vsel %vm5208_vm6, %v5280_v24, %v5282_v54 }
 0x57c   : > { %4240 = vst.msk [vmem:[#allocation3 + $0x70] sm:$0xff] %vm4225_vm9, %v4158_v4  ;;  %4330 = vrot.lane.b32.xlu0 %v9692_v43, %s6625_s14  ;;  %v5425_v4 = vrot.slane %v8733_v20, 2  ;;  %v8969_v43 = vsel %vm5088_vm5, -inf, %v8953_v12 }
 0x57e   : > { %4332 = vrot.lane.b32.xlu1 %v8555_v19, %s6625_s14  ;;  %v4164_v41 = vpop.permute.xlu1 %4163  ;;  %v5050_v19 = vld [vmem:[#allocation2 + $0xb9] sm:$0x3] }
 0x57f   : > { %v4162_v45 = vpop.permute.xlu0 %4161  ;;  %4243 = vst.msk [vmem:[#allocation3 + $0x88] sm:$0xff] %vm4225_vm9, %v4164_v41  ;;  %v5333_v41 = vmax.f32 %v8675_v61, %v5241_v16  ;;  %v5350_v16 = vmax.f32 %v8733_v20, %v5283_v37 }
 0x580   : > { %4242 = vst.msk [vmem:[#allocation3 + $0x80] sm:$0xff] %vm4225_vm9, %v4162_v45  ;;  %4362 = vrot.lane.b32.xlu0 %v9693_v0, %s6625_s14  ;;  %v4472_v0 = vld [vmem:[#allocation2 + $0x15a] sm:$0xff] }
 0x582   : > { %4364 = vrot.lane.b32.xlu1 %v8603_v63, %s6625_s14  ;;  %v4168_v27 = vpop.permute.xlu1 %4167  ;;  %v5126_v63 = vsel %vm5099_vm4, -inf, %v5050_v19  ;;  %v5427_v19 = vrot.slane %v5150_v9, 2 }
 0x583   : > { %v4166_v53 = vpop.permute.xlu0 %4165  ;;  %4245 = vst.msk [vmem:[#allocation3 + $0x98] sm:$0xff] %vm4225_vm9, %v4168_v27  ;;  %v5242_v58 = vrot.slane %v5126_v63, 1  ;;  %v5387_v6 = vrot.slane %v5126_v63, 2  ;;  %v4471_v27 = vld [vmem:[#allocation2 + $0x152] sm:$0xff]  ;;  %v9696_v63 = vmax.f32 %v8706_v35, %v8701_v60  ;;  %v9698_v60 = vmax.f32 %v8755_v26, %v8765_v46 }
 0x584   : > { %4244 = vst.msk [vmem:[#allocation3 + $0x90] sm:$0xff] %vm4225_vm9, %v4166_v53  ;;  %4334 = vrot.lane.b32.xlu0 %v8664_v14, %s6625_s14  ;;  %v5385_v14 = vrot.slane %v8903_v36, 2 }
 0x585   : > { %v8933_v18 = vsel %vm5208_vm6, %v5240_v59, %v5242_v58  ;;  %v5636_v59 = vmax.f32 %v9696_v63, %v8733_v20  ;;  %v5281_v58 = vsel %vm5208_vm6, %v5279_v11, %v5280_v24  ;;  %v9024_v11 = vsel %vm5353_vm7, %v5424_v13, %v5425_v4  ;;  %v5077_v63 = vld [vmem:[#allocation2 + $0x191] sm:$0x3] }
 0x586   : > { %4336 = vrot.lane.b32.xlu1 %v8903_v36, %s6625_s14  ;;  %v4172_v50 = vpop.permute.xlu1 %4171  ;;  %v8941_v57 = vmax.f32 %v5509_v47, %v8933_v18  ;;  %v8944_v49 = vsel %vm5353_vm7, %v5384_v32, %v5385_v14  ;;  %v5334_v8 = vmax.f32 %v8903_v36, %v8933_v18  ;;  %v9697_v47 = vmax.f32 %v8719_v42, %v8733_v20  ;;  %v5053_v32 = vld [vmem:[#allocation2 + $0xd1] sm:$0x3] }
 0x587   : > { %v4170_v40 = vpop.permute.xlu0 %4169  ;;  %4247 = vst.msk [vmem:[#allocation3 + $0xa8] sm:$0xff] %vm4225_vm9, %v4172_v50  ;;  %v8958_v39 = vmax.f32 %v5661_v51, %v8944_v49  ;;  %v5589_v45 = vmax.f32 %v8949_v1, %v8944_v49  ;;  %v8983_v61 = vmax.f32 %v5333_v41, %v8944_v49  ;;  %v8994_v35 = vmax.f32 %v9698_v60, %v5281_v58 }
 0x588   : > { %4246 = vst.msk [vmem:[#allocation3 + $0xa0] sm:$0xff] %vm4225_vm9, %v4170_v40  ;;  %4366 = vrot.lane.b32.xlu0 %v8750_v15, %s6625_s14  ;;  %v8938_v15 = vsel %vm5353_vm7, %v5385_v14, %v5387_v6  ;;  %v8980_v40 = vld [vmem:[#allocation2 + $0xc9] sm:$0xff]  ;;  %v8988_v7 = vmax.f32 %v9697_v47, %v5283_v37  ;;  %v8998_v14 = vld [vmem:[#allocation2 + $0x181] sm:$0xff]  ;;  %v9003_v42 = vsel %vm5353_vm7, %v5425_v4, %v5427_v19  ;;  %v5244_v19 = vrot.slane %v8969_v43, 1 }
 0x589   : > { %v5590_v48 = vmax.f32 %v8941_v57, %v8938_v15  ;;  %v5479_v53 = vmax.f32 %v5334_v8, %v8938_v15  ;;  %v5678_v34 = vmax.f32 %v5636_v59, %v5283_v37  ;;  %v5510_v26 = vmax.f32 %v8983_v61, %v8969_v43  ;;  %v4474_v59 = vld [vmem:[#allocation2 + $0x172] sm:$0xff] }
 0x58a   : > { %4368 = vrot.lane.b32.xlu1 %v8733_v20, %s6625_s14  ;;  %v4176_v5 = vpop.permute.xlu1 %4175  ;;  %v5606_v51 = vmax.f32 %v8988_v7, %v9003_v42  ;;  %v9014_v9 = vsel %vm5088_vm5, -inf, %v8998_v14  ;;  %v5349_v20 = vmax.f32 %v8765_v46, %v5281_v58  ;;  %v9018_v24 = vmax.f32 %v5350_v16, %v9003_v42 }
 0x58b   : > { %v4174_v33 = vpop.permute.xlu0 %4173  ;;  %4249 = vst.msk [vmem:[#allocation3 + $0xb8] sm:$0xff] %vm4225_vm9, %v4176_v5  ;;  %v5511_v6 = vmax.f32 %v5479_v53, %v8980_v40  ;;  %v9021_v54 = vmax.f32 %v5678_v34, %v9003_v42  ;;  %v9699_v5 = vmax.f32 %v8741_v38, %v8736_v22  ;;  %v5605_v8 = vmax.f32 %v8994_v35, %v9024_v11 }
 0x58c   : > { %4248 = vst.msk [vmem:[#allocation3 + $0xb0] sm:$0xff] %vm4225_vm9, %v4174_v33  ;;  %4523 = vrot.lane.b32.xlu0 %v4455_v55, %s6627_s15  ;;  %v4457_v55 = vld [vmem:[#allocation2 + $0xaa] sm:$0xff]  ;;  %v9033_v1 = vmax.f32 %v5349_v20, %v9024_v11  ;;  %v5129_v37 = vsel %vm5099_vm4, -inf, %v5053_v32  ;;  %v5245_v4 = vrot.slane %v8980_v40, 1  ;;  %v5527_v22 = vmax.f32 %v9018_v24, %v9030_v23 }
 0x58d   : > { %v5635_v33 = vmax.f32 %v9699_v5, %v8765_v46  ;;  %v5247_v46 = vrot.slane %v5129_v37, 1  ;;  %v5390_v41 = vrot.slane %v8980_v40, 2  ;;  %v5622_v53 = vmax.f32 %v5590_v48, %v8980_v40 }
 0x58e   : > { %4525 = vrot.lane.b32.xlu1 %v4456_v2, %s6627_s15  ;;  %v4180_v3 = vpop.permute.xlu1 %4179  ;;  %v4458_v2 = vld [vmem:[#allocation2 + $0xb2] sm:$0xff]  ;;  %v5389_v61 = vrot.slane %v8969_v43, 2  ;;  %v5621_v47 = vmax.f32 %v5589_v45, %v8969_v43  ;;  %v5246_v20 = vsel %vm5208_vm6, %v5244_v19, %v5245_v4  ;;  %v5153_v45 = vsel %vm5099_vm4, -inf, %v5077_v63 }
 0x58f   : > { %v4178_v50 = vpop.permute.xlu0 %4177  ;;  %4251 = vst.msk [vmem:[#allocation3 + $0xc8] sm:$0xff] %vm4225_vm9, %v4180_v3  ;;  %v5677_v38 = vmax.f32 %v5635_v33, %v5281_v58  ;;  %v4473_v3 = vld [vmem:[#allocation2 + $0x16a] sm:$0xff]  ;;  %v5287_v33 = vrot.slane %v5153_v45, 1  ;;  %v5432_v19 = vrot.slane %v5153_v45, 2  ;;  %v5638_v63 = vmax.f32 %v5606_v51, %v9030_v23 }
 0x590   : > { %4250 = vst.msk [vmem:[#allocation3 + $0xc0] sm:$0xff] %vm4225_vm9, %v4178_v50  ;;  %4555 = vrot.lane.b32.xlu0 %v4471_v27, %s6627_s15  ;;  %v5392_v27 = vrot.slane %v5129_v37, 2  ;;  %v5248_v50 = vsel %vm5208_vm6, %v5245_v4, %v5247_v46  ;;  %v5335_v37 = vmax.f32 %v8969_v43, %v5246_v20  ;;  %v9083_v4 = vmax.f32 %v5510_v26, %v5246_v20 }
 0x591   : > { %v9052_v58 = vmax.f32 %v5677_v38, %v9024_v11  ;;  %v5336_v16 = vmax.f32 %v8980_v40, %v5248_v50  ;;  %v9061_v34 = vmax.f32 %v5511_v6, %v5248_v50  ;;  %v5664_v32 = vmax.f32 %v5622_v53, %v5248_v50 }
 0x592   : > { %4557 = vrot.lane.b32.xlu1 %v4472_v0, %s6627_s15  ;;  %v4184_v57 = vpop.permute.xlu1 %4183  ;;  %v5526_v0 = vmax.f32 %v9033_v1, %v9014_v9  ;;  %v9059_v48 = vsel %vm5353_vm7, %v5390_v41, %v5392_v27  ;;  %v5663_v38 = vmax.f32 %v5621_v47, %v5246_v20  ;;  %v5430_v46 = vrot.slane %v9030_v23, 2  ;;  %v4664_v47 = vld [vmem:[#allocation2 + $0x153] sm:$0xff] }
 0x593   : > { %v4182_v49 = vpop.permute.xlu0 %4181  ;;  %4253 = vst.msk [vmem:[#allocation3 + $0xd8] sm:$0xff] %vm4225_vm9, %v4184_v57  ;;  %v9075_v6 = vmax.f32 %v5336_v16, %v9059_v48  ;;  %v5592_v24 = vmax.f32 %v9061_v34, %v9059_v48  ;;  %v9080_v5 = vmax.f32 %v5664_v32, %v9059_v48  ;;  %v4649_v57 = vld [vmem:[#allocation2 + $0x9b] sm:$0xff]  ;;  %v5284_v50 = vrot.slane %v9014_v9, 1  ;;  %v4667_v1 = vld [vmem:[#allocation2 + $0x173] sm:$0xff] }
 0x594   : > { %4252 = vst.msk [vmem:[#allocation3 + $0xd0] sm:$0xff] %vm4225_vm9, %v4182_v49  ;;  %4527 = vrot.lane.b32.xlu0 %v4457_v55, %s6627_s15  ;;  %v5285_v55 = vrot.slane %v9030_v23, 1  ;;  %v4648_v49 = vld [vmem:[#allocation2 + $0x93] sm:$0xff]  ;;  %v9105_v7 = vsel %vm5353_vm7, %v5430_v46, %v5432_v19  ;;  %v5637_v16 = vmax.f32 %v5605_v8, %v9014_v9  ;;  %v4842_v19 = vld [vmem:[#allocation2 + $0x9c] sm:$0xff] }
 0x595   : > { %v4651_v8 = vld [vmem:[#allocation2 + $0xb3] sm:$0xff]  ;;  %v9709_v34 = vld [vmem:[#allocation8_spill] sm:$0xff] }
 0x596   : > { %4529 = vrot.lane.b32.xlu1 %v4458_v2, %s6627_s15  ;;  %v4188_v13 = vpop.permute.xlu1 %4187  ;;  %v9067_v2 = vsel %vm5353_vm7, %v5389_v61, %v5390_v41  ;;  %v5288_v53 = vsel %vm5208_vm6, %v5285_v55, %v5287_v33  ;;  %v4665_v61 = vld [vmem:[#allocation2 + $0x15b] sm:$0xff]  ;;  %v5286_v33 = vsel %vm5208_vm6, %v5284_v50, %v5285_v55  ;;  %v4650_v55 = vld [vmem:[#allocation2 + $0xab] sm:$0xff] }
 0x597   : > { %v4186_v60 = vpop.permute.xlu0 %4185  ;;  %4255 = vst.msk [vmem:[#allocation3 + $0xe8] sm:$0xff] %vm4225_vm9, %v4188_v13  ;;  %v9094_v43 = vmax.f32 %v5335_v37, %v9067_v2  ;;  %v5591_v26 = vmax.f32 %v9083_v4, %v9067_v2  ;;  %v9107_v42 = vmax.f32 %v5527_v22, %v5288_v53  ;;  %v5680_v51 = vmax.f32 %v5638_v63, %v5288_v53  ;;  %v4841_v63 = vld [vmem:[#allocation2 + $0x94] sm:$0xff]  ;;  %v4858_v50 = vld [vmem:[#allocation2 + $0x15c] sm:$0xff] }
 0x598   : > { %4254 = vst.msk [vmem:[#allocation3 + $0xe0] sm:$0xff] %vm4225_vm9, %v4186_v60  ;;  %4559 = vrot.lane.b32.xlu0 %v4473_v3, %s6627_s15  ;;  %v5352_v3 = vmax.f32 %v9030_v23, %v5288_v53  ;;  %v5429_v60 = vrot.slane %v9014_v9, 2  ;;  %v9133_v35 = vmax.f32 %v5526_v0, %v5286_v33  ;;  %v5679_v11 = vmax.f32 %v5637_v16, %v5286_v33  ;;  %v4666_v0 = vld [vmem:[#allocation2 + $0x16b] sm:$0xff]  ;;  %v4844_v16 = vld [vmem:[#allocation2 + $0xb4] sm:$0xff] }
 0x599   : > { %v5608_v22 = vmax.f32 %v9107_v42, %v9105_v7  ;;  %v9121_v45 = vmax.f32 %v5680_v51, %v9105_v7 }
 0x59a   : > { %4561 = vrot.lane.b32.xlu1 %v4474_v59, %s6627_s15  ;;  %v4192_v41 = vpop.permute.xlu1 %4191  ;;  %v9099_v59 = vmax.f32 %v5663_v38, %v9067_v2  ;;  %v9111_v13 = vmax.f32 %v5352_v3, %v9105_v7 }
 0x59b   : > { %v4190_v27 = vpop.permute.xlu0 %4189  ;;  %4257 = vst.msk [vmem:[#allocation3 + $0xf8] sm:$0xff] %vm4225_vm9, %v4192_v41 }
 0x59c   : > { %4256 = vst.msk [vmem:[#allocation3 + $0xf0] sm:$0xff] %vm4225_vm9, %v4190_v27  ;;  %4716 = vrot.lane.b32.xlu0 %v4648_v49, %s6628_s16  ;;  %v9128_v49 = vsel %vm5353_vm7, %v5429_v60, %v5430_v46 }
 0x59d   : > { %v5607_v38 = vmax.f32 %v9133_v35, %v9128_v49  ;;  %v9143_v46 = vmax.f32 %v5679_v11, %v9128_v49  ;;  %v4859_v11 = vld [vmem:[#allocation2 + $0x16c] sm:$0xff]  ;;  %v4475_v35 = vld [vmem:[#allocation2 + $0x182] sm:$0xff] }
 0x59e   : > { %4718 = vrot.lane.b32.xlu1 %v4649_v57, %s6628_s16  ;;  %v4325_v32 = vpop.permute.xlu1 %4324  ;;  %v5351_v57 = vmax.f32 %v9014_v9, %v5286_v33 }
 0x59f   : > { %v4323_v20 = vpop.permute.xlu0 %4322  ;;  %4420 = vst.msk [vmem:[#allocation3 + $0x8] sm:$0xff] %vm4418_vm11, %v4325_v32  ;;  %v4843_v32 = vld [vmem:[#allocation2 + $0xac] sm:$0xff] }
 0x5a0   : > { %4419 = vst.msk [vmem:[#allocation3] sm:$0xff] %vm4418_vm11, %v4323_v20  ;;  %4748 = vrot.lane.b32.xlu0 %v4664_v47, %s6628_s16  ;;  %v9138_v37 = vmax.f32 %v5351_v57, %v9128_v49  ;;  %v4860_v57 = vld [vmem:[#allocation2 + $0x174] sm:$0xff]  ;;  %v4476_v49 = vld [vmem:[#allocation2 + $0x18a] sm:$0xff] }
 0x5a2   : > { %4750 = vrot.lane.b32.xlu1 %v4665_v61, %s6628_s16  ;;  %v4357_v41 = vpop.permute.xlu1 %4356  ;;  %v4857_v61 = vld [vmem:[#allocation2 + $0x154] sm:$0xff] }
 0x5a3   : > { %v4355_v9 = vpop.permute.xlu0 %4354  ;;  %4436 = vst.msk [vmem:[#allocation3 + $0x88] sm:$0xff] %vm4418_vm11, %v4357_v41 }
 0x5a4   : > { %4435 = vst.msk [vmem:[#allocation3 + $0x80] sm:$0xff] %vm4418_vm11, %v4355_v9  ;;  %4720 = vrot.lane.b32.xlu0 %v4650_v55, %s6628_s16 }
 0x5a6   : > { %4722 = vrot.lane.b32.xlu1 %v4651_v8, %s6628_s16  ;;  %v4329_v27 = vpop.permute.xlu1 %4328 }
 0x5a7   : > { %v4327_v53 = vpop.permute.xlu0 %4326  ;;  %4422 = vst.msk [vmem:[#allocation3 + $0x18] sm:$0xff] %vm4418_vm11, %v4329_v27 }
 0x5a8   : > { %4421 = vst.msk [vmem:[#allocation3 + $0x10] sm:$0xff] %vm4418_vm11, %v4327_v53  ;;  %4752 = vrot.lane.b32.xlu0 %v4666_v0, %s6628_s16  ;;  %v9701_v0 = vld [vmem:[#allocation10_spill] sm:$0xff] }
 0x5aa   : > { %4754 = vrot.lane.b32.xlu1 %v4667_v1, %s6628_s16  ;;  %v4361_v3 = vpop.permute.xlu1 %4360  ;;  %v9700_v1 = vld [vmem:[#allocation9_spill] sm:$0xff] }
 0x5ab   : > { %v4359_v51 = vpop.permute.xlu0 %4358  ;;  %4438 = vst.msk [vmem:[#allocation3 + $0x98] sm:$0xff] %vm4418_vm11, %v4361_v3 }
 0x5ac   : > { %4437 = vst.msk [vmem:[#allocation3 + $0x90] sm:$0xff] %vm4418_vm11, %v4359_v51  ;;  %4909 = vrot.lane.b32.xlu0 %v4841_v63, %s6629_s23  ;;  %v9703_v63 = vld [vmem:[#allocation15_spill] sm:$0xff] }
 0x5ae   : > { %4911 = vrot.lane.b32.xlu1 %v4842_v19, %s6629_s23  ;;  %v4518_v47 = vpop.permute.xlu1 %4517  ;;  %v9702_v19 = vld [vmem:[#allocation13_spill] sm:$0xff] }
 0x5af   : > { %v4516_v60 = vpop.permute.xlu0 %4515  ;;  %4613 = vst.msk [vmem:[#allocation3 + $0x8] sm:$0xff] %vm4611_vm12, %v4518_v47 }
 0x5b0   : > { %4612 = vst.msk [vmem:[#allocation3] sm:$0xff] %vm4611_vm12, %v4516_v60  ;;  %4941 = vrot.lane.b32.xlu0 %v4857_v61, %s6629_s23 }
 0x5b2   : > { %4943 = vrot.lane.b32.xlu1 %v4858_v50, %s6629_s23  ;;  %v4550_v20 = vpop.permute.xlu1 %4549  ;;  %v9704_v50 = vld [vmem:[#allocation18_spill] sm:$0xff] }
 0x5b3   : > { %v4548_v33 = vpop.permute.xlu0 %4547  ;;  %4629 = vst.msk [vmem:[#allocation3 + $0x88] sm:$0xff] %vm4611_vm12, %v4550_v20  ;;  %v4285_v20 = vld [vmem:[#allocation2 + $0x1a1] sm:$0xff] }
 0x5b4   : > { %4628 = vst.msk [vmem:[#allocation3 + $0x80] sm:$0xff] %vm4611_vm12, %v4548_v33  ;;  %4913 = vrot.lane.b32.xlu0 %v4843_v32, %s6629_s23  ;;  %v4284_v33 = vld [vmem:[#allocation2 + $0x199] sm:$0xff]  ;;  %v5573_v28 = vrot.slane %v4285_v20, 2 }
 0x5b6   : > { %4915 = vrot.lane.b32.xlu1 %v4844_v16, %s6629_s23  ;;  %v4522_v8 = vpop.permute.xlu1 %4521 }
 0x5b7   : > { %v4520_v55 = vpop.permute.xlu0 %4519  ;;  %4615 = vst.msk [vmem:[#allocation3 + $0x18] sm:$0xff] %vm4611_vm12, %v4522_v8  ;;  %v5154_v8 = vsel %vm5088_vm5, -inf, %v4284_v33 }
 0x5b8   : > { %4614 = vst.msk [vmem:[#allocation3 + $0x10] sm:$0xff] %vm4611_vm12, %v4520_v55  ;;  %4945 = vrot.lane.b32.xlu0 %v4859_v11, %s6629_s23  ;;  %v4460_v55 = vld [vmem:[#allocation2 + $0xca] sm:$0xff]  ;;  %v5572_v42 = vrot.slane %v5154_v8, 2 }
 0x5ba   : > { %4947 = vrot.lane.b32.xlu1 %v4860_v57, %s6629_s23 }
 0x5bb   : > { %v4552_v9 = vpop.permute.xlu0 %4551 }
 0x5bc   : > { %v4554_v41 = vpop.permute.xlu1 %4553  ;;  %4630 = vst.msk [vmem:[#allocation3 + $0x90] sm:$0xff] %vm4611_vm12, %v4552_v9  ;;  %5764 = vrot.lane.b32.xlu0 %v9701_v0, %s6630_s5  ;;  %v5534_v9 = vrot.slane %v4285_v20, 1  ;;  %v5533_v0 = vrot.slane %v5154_v8, 1 }
 0x5bd   : > { %4631 = vst.msk [vmem:[#allocation3 + $0x98] sm:$0xff] %vm4611_vm12, %v4554_v41  ;;  %v4459_v41 = vld [vmem:[#allocation2 + $0xc2] sm:$0xff] }
 0x5be   : > { %5766 = vrot.lane.b32.xlu1 %v9700_v1, %s6630_s5 }
 0x5bf   : > { %v4709_v53 = vpop.permute.xlu0 %4708 }
 0x5c0   : > { %v4711_v27 = vpop.permute.xlu1 %4710  ;;  %4805 = vst.msk [vmem:[#allocation3] sm:$0xff] %vm4804_vm13, %v4709_v53  ;;  %5796 = vrot.lane.b32.xlu0 %v9703_v63, %s6630_s5  ;;  %v5639_v63 = vmax.f32 %v5607_v38, %v5154_v8 }
 0x5c1   : > { %4806 = vst.msk [vmem:[#allocation3 + $0x8] sm:$0xff] %vm4804_vm13, %v4711_v27 }
 0x5c2   : > { %5798 = vrot.lane.b32.xlu1 %v9702_v19, %s6630_s5  ;;  %v5640_v19 = vmax.f32 %v5608_v22, %v4285_v20 }
 0x5c3   : > { %v4741_v51 = vpop.permute.xlu0 %4740 }
 0x5c4   : > { %v4743_v3 = vpop.permute.xlu1 %4742  ;;  %4821 = vst.msk [vmem:[#allocation3 + $0x80] sm:$0xff] %vm4804_vm13, %v4741_v51  ;;  %5768 = vrot.lane.b32.xlu0 %v9704_v50, %s6630_s5  ;;  %v5535_v51 = vsel %vm5208_vm6, %v5533_v0, %v5534_v9  ;;  %v4652_v0 = vld [vmem:[#allocation2 + $0xc3] sm:$0xff] }
 0x5c5   : > { %4822 = vst.msk [vmem:[#allocation3 + $0x88] sm:$0xff] %vm4804_vm13, %v4743_v3  ;;  %v5681_v22 = vmax.f32 %v5639_v63, %v5535_v51 }
 0x5c6   : > { %5770 = vrot.lane.b32.xlu1 %v8667_v44, %s6630_s5 }
 0x5c7   : > { %v4713_v47 = vpop.permute.xlu0 %4712 }
 0x5c8   : > { %v4715_v61 = vpop.permute.xlu1 %4714  ;;  %4807 = vst.msk [vmem:[#allocation3 + $0x10] sm:$0xff] %vm4804_vm13, %v4713_v47  ;;  %5800 = vrot.lane.b32.xlu0 %v8770_v10, %s6630_s5  ;;  %v5529_v47 = vmax.f32 %v9111_v13, %v4285_v20 }
 0x5c9   : > { %4808 = vst.msk [vmem:[#allocation3 + $0x18] sm:$0xff] %vm4804_vm13, %v4715_v61 }
 0x5ca   : > { %5802 = vrot.lane.b32.xlu1 %v8724_v25, %s6630_s5 }
 0x5cb   : > { %v4745_v16 = vpop.permute.xlu0 %4744 }
 0x5cc   : > { %v4747_v60 = vpop.permute.xlu1 %4746  ;;  %4823 = vst.msk [vmem:[#allocation3 + $0x90] sm:$0xff] %vm4804_vm13, %v4745_v16  ;;  %4338 = vrot.lane.b32.xlu0 %v8953_v12, %s6625_s14  ;;  %v9207_v12 = vld [vmem:[#allocation2 + $0xe1] sm:$0xff]  ;;  %v5528_v16 = vmax.f32 %v9138_v37, %v5154_v8 }
 0x5cd   : > { %4824 = vst.msk [vmem:[#allocation3 + $0x98] sm:$0xff] %vm4804_vm13, %v4747_v60  ;;  %v4461_v37 = vld [vmem:[#allocation2 + $0xda] sm:$0xff] }
 0x5ce   : > { %4340 = vrot.lane.b32.xlu1 %v8980_v40, %s6625_s14  ;;  %v6594_v40 = vld [vmem:[#allocation2 + $0xd9] sm:$0xff] }
 0x5cf   : > { %v4902_v32 = vpop.permute.xlu0 %4901 }
 0x5d0   : > { %v4904_v44 = vpop.permute.xlu1 %4903  ;;  %4998 = vst.msk [vmem:[#allocation3] sm:$0xff] %vm4997_vm14, %v4902_v32  ;;  %4370 = vrot.lane.b32.xlu0 %v8998_v14, %s6625_s14  ;;  %v5080_v14 = vld [vmem:[#allocation2 + $0x1a9] sm:$0x3] }
 0x5d1   : > { %4999 = vst.msk [vmem:[#allocation3 + $0x8] sm:$0xff] %vm4997_vm14, %v4904_v44  ;;  %v5156_v11 = vsel %vm5099_vm4, -inf, %v5080_v14  ;;  %v9241_v44 = vsel %vm5353_vm7, %v5572_v42, %v5573_v28  ;;  %v4477_v14 = vld [vmem:[#allocation2 + $0x19a] sm:$0xff] }
 0x5d2   : > { %4372 = vrot.lane.b32.xlu1 %v9030_v23, %s6625_s14  ;;  %v5536_v1 = vrot.slane %v5156_v11, 1  ;;  %v5575_v3 = vrot.slane %v5156_v11, 2  ;;  %v9246_v32 = vmax.f32 %v5681_v22, %v9241_v44 }
 0x5d3   : > { %v4934_v10 = vpop.permute.xlu0 %4933 }
 0x5d4   : > { %v4936_v25 = vpop.permute.xlu1 %4935  ;;  %5014 = vst.msk [vmem:[#allocation3 + $0x80] sm:$0xff] %vm4997_vm14, %v4934_v10  ;;  %4342 = vrot.lane.b32.xlu0 %v6594_v40, %s6625_s14  ;;  %v5537_v21 = vsel %vm5208_vm6, %v5534_v9, %v5536_v1  ;;  %v9233_v38 = vsel %vm5353_vm7, %v5573_v28, %v5575_v3  ;;  %v4462_v10 = vld [vmem:[#allocation2 + $0xe2] sm:$0xff]  ;;  %v4653_v1 = vld [vmem:[#allocation2 + $0xcb] sm:$0xff] }
 0x5d5   : > { %5015 = vst.msk [vmem:[#allocation3 + $0x88] sm:$0xff] %vm4997_vm14, %v4936_v25  ;;  %v5682_v7 = vmax.f32 %v5640_v19, %v5537_v21  ;;  %v9250_v13 = vmax.f32 %v5529_v47, %v5537_v21  ;;  %v9252_v25 = vmax.f32 %v5528_v16, %v5535_v51  ;;  %v4669_v28 = vld [vmem:[#allocation2 + $0x18b] sm:$0xff]  ;;  %v4668_v3 = vld [vmem:[#allocation2 + $0x183] sm:$0xff] }
 0x5d6   : > { %4344 = vrot.lane.b32.xlu1 %v9207_v12, %s6625_s14 }
 0x5d7   : > { %v4906_v57 = vpop.permute.xlu0 %4905  ;;  %v9237_v60 = vmax.f32 %v5682_v7, %v9233_v38 }
 0x5d8   : > { %v4908_v23 = vpop.permute.xlu1 %4907  ;;  %5000 = vst.msk [vmem:[#allocation3 + $0x10] sm:$0xff] %vm4997_vm14, %v4906_v57  ;;  %4374 = vrot.lane.b32.xlu0 %v4284_v33, %s6625_s14  ;;  %v5610_v33 = vmax.f32 %v9250_v13, %v9233_v38  ;;  %v4478_v57 = vld [vmem:[#allocation2 + $0x1a2] sm:$0xff]  ;;  %v9712_v38 = vld [vmem:[#allocation7_spill] sm:$0xff] }
 0x5d9   : > { %5001 = vst.msk [vmem:[#allocation3 + $0x18] sm:$0xff] %vm4997_vm14, %v4908_v23  ;;  %v5609_v23 = vmax.f32 %v9252_v25, %v9241_v44 }
 0x5da   : > { %4376 = vrot.lane.b32.xlu1 %v4285_v20, %s6625_s14 }
 0x5db   : > { %v4938_v53 = vpop.permute.xlu0 %4937 }
 0x5dc   : > { %v4940_v27 = vpop.permute.xlu1 %4939  ;;  %5016 = vst.msk [vmem:[#allocation3 + $0x90] sm:$0xff] %vm4997_vm14, %v4938_v53  ;;  %4531 = vrot.lane.b32.xlu0 %v4459_v41, %s6627_s15 }
 0x5dd   : > { %5017 = vst.msk [vmem:[#allocation3 + $0x98] sm:$0xff] %vm4997_vm14, %v4940_v27 }
 0x5de   : > { %4533 = vrot.lane.b32.xlu1 %v4460_v55, %s6627_s15 }
 0x5df   : > { %v5757_v61 = vpop.permute.xlu0 %5756 }
 0x5e0   : > { %v5759_v50 = vpop.permute.xlu1 %5758  ;;  %5853 = vst.msk [vmem:[#allocation3] sm:$0xff] %vm5852_vm15, %v5757_v61  ;;  %4563 = vrot.lane.b32.xlu0 %v4475_v35, %s6627_s15  ;;  %v4655_v35 = vld [vmem:[#allocation2 + $0xe3] sm:$0xff] }
 0x5e1   : > { %5854 = vst.msk [vmem:[#allocation3 + $0x8] sm:$0xff] %vm5852_vm15, %v5759_v50  ;;  %v4654_v50 = vld [vmem:[#allocation2 + $0xdb] sm:$0xff] }
 0x5e2   : > { %4565 = vrot.lane.b32.xlu1 %v4476_v49, %s6627_s15 }
 0x5e3   : > { %v5789_v20 = vpop.permute.xlu0 %5788 }
 0x5e4   : > { %v5791_v40 = vpop.permute.xlu1 %5790  ;;  %5869 = vst.msk [vmem:[#allocation3 + $0x80] sm:$0xff] %vm5852_vm15, %v5789_v20  ;;  %4535 = vrot.lane.b32.xlu0 %v4461_v37, %s6627_s15  ;;  %v4670_v20 = vld [vmem:[#allocation2 + $0x19b] sm:$0xff] }
 0x5e5   : > { %5870 = vst.msk [vmem:[#allocation3 + $0x88] sm:$0xff] %vm5852_vm15, %v5791_v40  ;;  %v4671_v40 = vld [vmem:[#allocation2 + $0x1a3] sm:$0xff] }
 0x5e6   : > { %4537 = vrot.lane.b32.xlu1 %v4462_v10, %s6627_s15 }
 0x5e7   : > { %v5761_v8 = vpop.permute.xlu0 %5760  ;;  %v5885_v55 = vld [vmem:[#allocation3] sm:$0xff] }
 0x5e8   : > { %v5763_v11 = vpop.permute.xlu1 %5762  ;;  %v5886_v41 = vld [vmem:[#allocation3 + $0x8] sm:$0xff]  ;;  %5855 = vst.msk [vmem:[#allocation3 + $0x10] sm:$0xff] %vm5852_vm15, %v5761_v8  ;;  %4567 = vrot.lane.b32.xlu0 %v4477_v14, %s6627_s15 }
 0x5e9   : > { %5856 = vst.msk [vmem:[#allocation3 + $0x18] sm:$0xff] %vm5852_vm15, %v5763_v11  ;;  %v5917_v9 = vpack.c.bf16 %v5886_v41, %v5885_v55  ;;  %v4846_v11 = vld [vmem:[#allocation2 + $0xcc] sm:$0xff]  ;;  %v4845_v8 = vld [vmem:[#allocation2 + $0xc4] sm:$0xff] }
 0x5ea   : > { %4569 = vrot.lane.b32.xlu1 %v4478_v57, %s6627_s15 }
 0x5eb   : > { %6479 = vmatprep.mubr.msk.bf16.mxu0 %vm5992_vm0, %v5917_v9  ;;  %v5793_v53 = vpop.permute.xlu0 %5792  ;;  %v5901_v19 = vld [vmem:[#allocation3 + $0x80] sm:$0xff]  ;;  %v4862_v9 = vld [vmem:[#allocation2 + $0x18c] sm:$0xff] }
 0x5ec   : > { %v5795_v27 = vpop.permute.xlu1 %5794  ;;  %v5902_v63 = vld [vmem:[#allocation3 + $0x88] sm:$0xff]  ;;  %5871 = vst.msk [vmem:[#allocation3 + $0x90] sm:$0xff] %vm5852_vm15, %v5793_v53  ;;  %4724 = vrot.lane.b32.xlu0 %v4652_v0, %s6628_s16 }
 0x5ed   : > { %5872 = vst.msk [vmem:[#allocation3 + $0x98] sm:$0xff] %vm5852_vm15, %v5795_v27  ;;  %v5925_v21 = vpack.c.bf16 %v5902_v63, %v5901_v19  ;;  %v9705_v53 = vld [vmem:[#allocation17_spill] sm:$0xff]  ;;  %v9706_v19 = vld [vmem:[#allocation16_spill] sm:$0xff] }
 0x5ee   : > { %4726 = vrot.lane.b32.xlu1 %v4653_v1, %s6628_s16  ;;  %v4861_v1 = vld [vmem:[#allocation2 + $0x184] sm:$0xff]  ;;  %v9707_v63 = vmax.f32 %v9705_v53, %v9706_v19 }
 0x5ef   : > { %6495 = vmatprep.mubr.msk.bf16.mxu1 %vm5992_vm0, %v5925_v21  ;;  %v4331_v7 = vpop.permute.xlu0 %4330  ;;  %v5887_v42 = vld [vmem:[#allocation3 + $0x10] sm:$0xff] }
 0x5f0   : > { %v4333_v51 = vpop.permute.xlu1 %4332  ;;  %v5888_v22 = vld [vmem:[#allocation3 + $0x18] sm:$0xff]  ;;  %4423 = vst.msk [vmem:[#allocation3 + $0x20] sm:$0xff] %vm4418_vm11, %v4331_v7  ;;  %4756 = vrot.lane.b32.xlu0 %v4668_v3, %s6628_s16  ;;  %v5620_v21 = vmax.f32 %v9707_v63, %v8903_v36 }
 0x5f1   : > { %4424 = vst.msk [vmem:[#allocation3 + $0x28] sm:$0xff] %vm4418_vm11, %v4333_v51  ;;  %v5918_v49 = vpack.c.bf16 %v5888_v22, %v5887_v42  ;;  %v4847_v3 = vld [vmem:[#allocation2 + $0xdc] sm:$0xff]  ;;  %v4864_v22 = vld [vmem:[#allocation2 + $0x1a4] sm:$0xff] }
 0x5f2   : > { %4758 = vrot.lane.b32.xlu1 %v4669_v28, %s6628_s16  ;;  %v4848_v28 = vld [vmem:[#allocation2 + $0xe4] sm:$0xff]  ;;  %v5662_v42 = vmax.f32 %v5620_v21, %v8933_v18  ;;  %v4480_v63 = vld [vmem:[#allocation2 + $0x1ba] sm:$0xff]  ;;  %v4479_v21 = vld [vmem:[#allocation2 + $0x1b2] sm:$0xff] }
 0x5f3   : > { %6480 = vmatmul.mubr.msk.bf16.vlgmr.msra.gmra.mrb[0].mxu0 %vm5992_vm0, %v5918_v49  ;;  %v4363_v47 = vpop.permute.xlu0 %4362  ;;  %v5903_v16 = vld [vmem:[#allocation3 + $0x90] sm:$0xff]  ;;  %v4863_v49 = vld [vmem:[#allocation2 + $0x19c] sm:$0xff] }
 0x5f4   : > { %v4365_v61 = vpop.permute.xlu1 %4364  ;;  %v5904_v10 = vld [vmem:[#allocation3 + $0x98] sm:$0xff]  ;;  %4439 = vst.msk [vmem:[#allocation3 + $0xa0] sm:$0xff] %vm4418_vm11, %v4363_v47  ;;  %4728 = vrot.lane.b32.xlu0 %v4654_v50, %s6628_s16  ;;  %v5701_v36 = vmax.f32 %v5662_v42, %v8938_v15 }
 0x5f5   : > { %4440 = vst.msk [vmem:[#allocation3 + $0xa8] sm:$0xff] %vm4418_vm11, %v4365_v61  ;;  %v5926_v37 = vpack.c.bf16 %v5904_v10, %v5903_v16 }
 0x5f6   : > { %4730 = vrot.lane.b32.xlu1 %v4655_v35, %s6628_s16 }
 0x5f7   : > { %6496 = vmatmul.mubr.msk.bf16.vlgmr.msra.gmra.mrb[0].mxu1 %vm5992_vm0, %v5926_v37  ;;  %v4335_v14 = vpop.permute.xlu0 %4334 }
 0x5f8   : > { %v4337_v57 = vpop.permute.xlu1 %4336  ;;  %4425 = vst.msk [vmem:[#allocation3 + $0x30] sm:$0xff] %vm4418_vm11, %v4335_v14  ;;  %4760 = vrot.lane.b32.xlu0 %v4670_v20, %s6628_s16 }
 0x5f9   : > { %4426 = vst.msk [vmem:[#allocation3 + $0x38] sm:$0xff] %vm4418_vm11, %v4337_v57 }
 0x5fa   : > { %4762 = vrot.lane.b32.xlu1 %v4671_v40, %s6628_s16 }
 0x5fb   : > { %v4367_v41 = vpop.permute.xlu0 %4366 }
 0x5fc   : > { %v4369_v55 = vpop.permute.xlu1 %4368  ;;  %4441 = vst.msk [vmem:[#allocation3 + $0xb0] sm:$0xff] %vm4418_vm11, %v4367_v41  ;;  %4917 = vrot.lane.b32.xlu0 %v4845_v8, %s6629_s23  ;;  %v4288_v41 = vld [vmem:[#allocation2 + $0x1c9] sm:$0xff] }
 0x5fd   : > { %4442 = vst.msk [vmem:[#allocation3 + $0xb8] sm:$0xff] %vm4418_vm11, %v4369_v55  ;;  %v4289_v55 = vld [vmem:[#allocation2 + $0x1d1] sm:$0xff] }
 0x5fe   : > { %4919 = vrot.lane.b32.xlu1 %v4846_v11, %s6629_s23 }
 0x5ff   : > { %v4524_v27 = vpop.permute.xlu0 %4523 }
 0x600   : > { %v4526_v0 = vpop.permute.xlu1 %4525  ;;  %4616 = vst.msk [vmem:[#allocation3 + $0x20] sm:$0xff] %vm4611_vm12, %v4524_v27  ;;  %4949 = vrot.lane.b32.xlu0 %v4861_v1, %s6629_s23  ;;  %v4463_v27 = vld [vmem:[#allocation2 + $0xf2] sm:$0xff] }
 0x601   : > { %4617 = vst.msk [vmem:[#allocation3 + $0x28] sm:$0xff] %vm4611_vm12, %v4526_v0  ;;  %v4464_v0 = vld [vmem:[#allocation2 + $0xfa] sm:$0xff] }
 0x602   : > { %4951 = vrot.lane.b32.xlu1 %v4862_v9, %s6629_s23 }
 0x603   : > { %v4556_v7 = vpop.permute.xlu0 %4555 }
 0x604   : > { %v4558_v51 = vpop.permute.xlu1 %4557  ;;  %4632 = vst.msk [vmem:[#allocation3 + $0xa0] sm:$0xff] %vm4611_vm12, %v4556_v7  ;;  %4921 = vrot.lane.b32.xlu0 %v4847_v3, %s6629_s23  ;;  %v4465_v7 = vld [vmem:[#allocation2 + $0x10a] sm:$0xff] }
 0x605   : > { %4633 = vst.msk [vmem:[#allocation3 + $0xa8] sm:$0xff] %vm4611_vm12, %v4558_v51  ;;  %v4466_v51 = vld [vmem:[#allocation2 + $0x112] sm:$0xff] }
 0x606   : > { %4923 = vrot.lane.b32.xlu1 %v4848_v28, %s6629_s23 }
 0x607   : > { %v4528_v50 = vpop.permute.xlu0 %4527 }
 0x608   : > { %v4530_v35 = vpop.permute.xlu1 %4529  ;;  %4618 = vst.msk [vmem:[#allocation3 + $0x30] sm:$0xff] %vm4611_vm12, %v4528_v50  ;;  %4953 = vrot.lane.b32.xlu0 %v4863_v49, %s6629_s23  ;;  %v4482_v49 = vld [vmem:[#allocation2 + $0x1d2] sm:$0xff] }
 0x609   : > { %4619 = vst.msk [vmem:[#allocation3 + $0x38] sm:$0xff] %vm4611_vm12, %v4530_v35  ;;  %v4481_v35 = vld [vmem:[#allocation2 + $0x1ca] sm:$0xff] }
 0x60a   : > { %4955 = vrot.lane.b32.xlu1 %v4864_v22, %s6629_s23 }
 0x60b   : > { %v4560_v47 = vpop.permute.xlu0 %4559 }
 0x60c   : > { %v4562_v61 = vpop.permute.xlu1 %4561  ;;  %4634 = vst.msk [vmem:[#allocation3 + $0xb0] sm:$0xff] %vm4611_vm12, %v4560_v47  ;;  %5772 = vrot.lane.b32.xlu0 %v8958_v39, %s6630_s5 }
 0x60d   : > { %4635 = vst.msk [vmem:[#allocation3 + $0xb8] sm:$0xff] %vm4611_vm12, %v4562_v61 }
 0x60e   : > { %5774 = vrot.lane.b32.xlu1 %v5701_v36, %s6630_s5 }
 0x60f   : > { %v4717_v16 = vpop.permute.xlu0 %4716 }
 0x610   : > { %v4719_v18 = vpop.permute.xlu1 %4718  ;;  %4809 = vst.msk [vmem:[#allocation3 + $0x20] sm:$0xff] %vm4804_vm13, %v4717_v16  ;;  %5804 = vrot.lane.b32.xlu0 %v9052_v58, %s6630_s5  ;;  %v4270_v58 = vld [vmem:[#allocation2 + $0xf1] sm:$0xff]  ;;  %v4657_v16 = vld [vmem:[#allocation2 + $0xfb] sm:$0xff] }
 0x611   : > { %4810 = vst.msk [vmem:[#allocation3 + $0x28] sm:$0xff] %vm4804_vm13, %v4719_v18 }
 0x612   : > { %5806 = vrot.lane.b32.xlu1 %v9021_v54, %s6630_s5  ;;  %v4271_v54 = vld [vmem:[#allocation2 + $0xf9] sm:$0xff] }
 0x613   : > { %v4749_v10 = vpop.permute.xlu0 %4748 }
 0x614   : > { %v4751_v15 = vpop.permute.xlu1 %4750  ;;  %4825 = vst.msk [vmem:[#allocation3 + $0xa0] sm:$0xff] %vm4804_vm13, %v4749_v10  ;;  %5776 = vrot.lane.b32.xlu0 %v9099_v59, %s6630_s5  ;;  %v4286_v59 = vld [vmem:[#allocation2 + $0x1b1] sm:$0xff] }
 0x615   : > { %4826 = vst.msk [vmem:[#allocation3 + $0xa8] sm:$0xff] %vm4804_vm13, %v4751_v15  ;;  %v4656_v15 = vld [vmem:[#allocation2 + $0xf3] sm:$0xff] }
 0x616   : > { %5778 = vrot.lane.b32.xlu1 %v9080_v5, %s6630_s5  ;;  %v4287_v5 = vld [vmem:[#allocation2 + $0x1b9] sm:$0xff] }
 0x617   : > { %v4721_v37 = vpop.permute.xlu0 %4720 }
 0x618   : > { %v4723_v39 = vpop.permute.xlu1 %4722  ;;  %4811 = vst.msk [vmem:[#allocation3 + $0x30] sm:$0xff] %vm4804_vm13, %v4721_v37  ;;  %5808 = vrot.lane.b32.xlu0 %v9143_v46, %s6630_s5  ;;  %v4272_v46 = vld [vmem:[#allocation2 + $0x109] sm:$0xff] }
 0x619   : > { %4812 = vst.msk [vmem:[#allocation3 + $0x38] sm:$0xff] %vm4804_vm13, %v4723_v39 }
 0x61a   : > { %5810 = vrot.lane.b32.xlu1 %v9121_v45, %s6630_s5  ;;  %v4273_v45 = vld [vmem:[#allocation2 + $0x111] sm:$0xff] }
 0x61b   : > { %v4753_v20 = vpop.permute.xlu0 %4752 }
 0x61c   : > { %v4755_v40 = vpop.permute.xlu1 %4754  ;;  %4827 = vst.msk [vmem:[#allocation3 + $0xb0] sm:$0xff] %vm4804_vm13, %v4753_v20  ;;  %4346 = vrot.lane.b32.xlu0 %v4270_v58, %s6625_s14  ;;  %v4672_v20 = vld [vmem:[#allocation2 + $0x1b3] sm:$0xff] }
 0x61d   : > { %4828 = vst.msk [vmem:[#allocation3 + $0xb8] sm:$0xff] %vm4804_vm13, %v4755_v40  ;;  %v4673_v40 = vld [vmem:[#allocation2 + $0x1bb] sm:$0xff] }
 0x61e   : > { %4348 = vrot.lane.b32.xlu1 %v4271_v54, %s6625_s14 }
 0x61f   : > { %v4910_v14 = vpop.permute.xlu0 %4909 }
 0x620   : > { %v4912_v57 = vpop.permute.xlu1 %4911  ;;  %5002 = vst.msk [vmem:[#allocation3 + $0x20] sm:$0xff] %vm4997_vm14, %v4910_v14  ;;  %4378 = vrot.lane.b32.xlu0 %v4286_v59, %s6625_s14 }
 0x621   : > { %5003 = vst.msk [vmem:[#allocation3 + $0x28] sm:$0xff] %vm4997_vm14, %v4912_v57 }
 0x622   : > { %4380 = vrot.lane.b32.xlu1 %v4287_v5, %s6625_s14 }
 0x623   : > { %v4942_v8 = vpop.permute.xlu0 %4941 }
 0x624   : > { %v4944_v11 = vpop.permute.xlu1 %4943  ;;  %5018 = vst.msk [vmem:[#allocation3 + $0xa0] sm:$0xff] %vm4997_vm14, %v4942_v8  ;;  %4350 = vrot.lane.b32.xlu0 %v4272_v46, %s6625_s14  ;;  %v4659_v46 = vld [vmem:[#allocation2 + $0x113] sm:$0xff] }
 0x625   : > { %5019 = vst.msk [vmem:[#allocation3 + $0xa8] sm:$0xff] %vm4997_vm14, %v4944_v11  ;;  %v4658_v11 = vld [vmem:[#allocation2 + $0x10b] sm:$0xff] }
 0x626   : > { %4352 = vrot.lane.b32.xlu1 %v4273_v45, %s6625_s14 }
 0x627   : > { %v4914_v1 = vpop.permute.xlu0 %4913 }
 0x628   : > { %v4916_v9 = vpop.permute.xlu1 %4915  ;;  %5004 = vst.msk [vmem:[#allocation3 + $0x30] sm:$0xff] %vm4997_vm14, %v4914_v1  ;;  %4382 = vrot.lane.b32.xlu0 %v4288_v41, %s6625_s14 }
 0x629   : > { %5005 = vst.msk [vmem:[#allocation3 + $0x38] sm:$0xff] %vm4997_vm14, %v4916_v9 }
 0x62a   : > { %4384 = vrot.lane.b32.xlu1 %v4289_v55, %s6625_s14 }
 0x62b   : > { %v4946_v19 = vpop.permute.xlu0 %4945 }
 0x62c   : > { %v4948_v53 = vpop.permute.xlu1 %4947  ;;  %5020 = vst.msk [vmem:[#allocation3 + $0xb0] sm:$0xff] %vm4997_vm14, %v4946_v19  ;;  %4539 = vrot.lane.b32.xlu0 %v4463_v27, %s6627_s15  ;;  %v4674_v27 = vld [vmem:[#allocation2 + $0x1cb] sm:$0xff] }
 0x62d   : > { %5021 = vst.msk [vmem:[#allocation3 + $0xb8] sm:$0xff] %vm4997_vm14, %v4948_v53 }
 0x62e   : > { %4541 = vrot.lane.b32.xlu1 %v4464_v0, %s6627_s15  ;;  %v4675_v0 = vld [vmem:[#allocation2 + $0x1d3] sm:$0xff] }
 0x62f   : > { %v5765_v3 = vpop.permute.xlu0 %5764 }
 0x630   : > { %v5767_v28 = vpop.permute.xlu1 %5766  ;;  %5857 = vst.msk [vmem:[#allocation3 + $0x20] sm:$0xff] %vm5852_vm15, %v5765_v3  ;;  %4571 = vrot.lane.b32.xlu0 %v4479_v21, %s6627_s15  ;;  %v4849_v21 = vld [vmem:[#allocation2 + $0xf4] sm:$0xff] }
 0x631   : > { %5858 = vst.msk [vmem:[#allocation3 + $0x28] sm:$0xff] %vm5852_vm15, %v5767_v28 }
 0x632   : > { %4573 = vrot.lane.b32.xlu1 %v4480_v63, %s6627_s15  ;;  %v4850_v63 = vld [vmem:[#allocation2 + $0xfc] sm:$0xff] }
 0x633   : > { %v5797_v22 = vpop.permute.xlu0 %5796 }
 0x634   : > { %v5799_v42 = vpop.permute.xlu1 %5798  ;;  %5873 = vst.msk [vmem:[#allocation3 + $0xa0] sm:$0xff] %vm5852_vm15, %v5797_v22  ;;  %4543 = vrot.lane.b32.xlu0 %v4465_v7, %s6627_s15  ;;  %v5512_v7 = vmax.f32 %v9094_v43, %v8469_v29  ;;  %v4865_v22 = vld [vmem:[#allocation2 + $0x1b4] sm:$0xff]  ;;  %v5623_v43 = vmax.f32 %v5591_v26, %v8469_v29 }
 0x635   : > { %5874 = vst.msk [vmem:[#allocation3 + $0xa8] sm:$0xff] %vm5852_vm15, %v5799_v42  ;;  %v4866_v42 = vld [vmem:[#allocation2 + $0x1bc] sm:$0xff]  ;;  %v4868_v26 = vld [vmem:[#allocation2 + $0x1d4] sm:$0xff] }
 0x636   : > { %4545 = vrot.lane.b32.xlu1 %v4466_v51, %s6627_s15  ;;  %v5513_v51 = vmax.f32 %v9075_v6, %v9207_v12  ;;  %v5624_v6 = vmax.f32 %v5592_v24, %v9207_v12  ;;  %v9710_v24 = vld [vmem:[#allocation19_spill] sm:$0xff]  ;;  %v4867_v12 = vld [vmem:[#allocation2 + $0x1cc] sm:$0xff] }
 0x637   : > { %v5769_v36 = vpop.permute.xlu0 %5768  ;;  %v5889_v61 = vld [vmem:[#allocation3 + $0x20] sm:$0xff] }
 0x638   : > { %v5771_v50 = vpop.permute.xlu1 %5770  ;;  %v5890_v47 = vld [vmem:[#allocation3 + $0x28] sm:$0xff]  ;;  %5859 = vst.msk [vmem:[#allocation3 + $0x30] sm:$0xff] %vm5852_vm15, %v5769_v36  ;;  %4575 = vrot.lane.b32.xlu0 %v4481_v35, %s6627_s15  ;;  %v9708_v36 = vld [vmem:[#allocation14_spill] sm:$0xff]  ;;  %v5666_v48 = vmax.f32 %v5624_v6, %v8460_v62 }
 0x639   : > { %5860 = vst.msk [vmem:[#allocation3 + $0x38] sm:$0xff] %vm5852_vm15, %v5771_v50  ;;  %v5919_v18 = vpack.c.bf16 %v5890_v47, %v5889_v61  ;;  %v5555_v50 = vmax.f32 %v5513_v51, %v8460_v62  ;;  %v5554_v61 = vmax.f32 %v5512_v7, %v9708_v36  ;;  %v4852_v47 = vld [vmem:[#allocation2 + $0x114] sm:$0xff]  ;;  %v5665_v29 = vmax.f32 %v5623_v43, %v9708_v36 }
 0x63a   : > { %4577 = vrot.lane.b32.xlu1 %v4482_v49, %s6627_s15  ;;  %v5705_v62 = vmax.f32 %v5666_v48, %v9709_v34 }
 0x63b   : > { %6483 = vmatprep.mubr.msk.bf16.mxu0 %vm5992_vm0, %v5919_v18  ;;  %v5801_v39 = vpop.permute.xlu0 %5800  ;;  %v5905_v37 = vld [vmem:[#allocation3 + $0xa0] sm:$0xff]  ;;  %v4851_v18 = vld [vmem:[#allocation2 + $0x10c] sm:$0xff]  ;;  %v5594_v2 = vmax.f32 %v5555_v50, %v9709_v34  ;;  %v5593_v4 = vmax.f32 %v5554_v61, %v9710_v24 }
 0x63c   : > { %v5803_v10 = vpop.permute.xlu1 %5802  ;;  %v5906_v54 = vld [vmem:[#allocation3 + $0xa8] sm:$0xff]  ;;  %5875 = vst.msk [vmem:[#allocation3 + $0xb0] sm:$0xff] %vm5852_vm15, %v5801_v39  ;;  %4732 = vrot.lane.b32.xlu0 %v4656_v15, %s6628_s16 }
 0x63d   : > { %5876 = vst.msk [vmem:[#allocation3 + $0xb8] sm:$0xff] %vm5852_vm15, %v5803_v10  ;;  %v5927_v58 = vpack.c.bf16 %v5906_v54, %v5905_v37  ;;  %v5704_v37 = vmax.f32 %v5665_v29, %v9710_v24  ;;  %v6595_v54 = vld [vmem:[#allocation2 + $0xf9] sm:$0xff] }
 0x63e   : > { %4734 = vrot.lane.b32.xlu1 %v4657_v16, %s6628_s16 }
 0x63f   : > { %6499 = vmatprep.mubr.msk.bf16.mxu1 %vm5992_vm0, %v5927_v58  ;;  %v4339_v59 = vpop.permute.xlu0 %4338  ;;  %v5891_v57 = vld [vmem:[#allocation3 + $0x30] sm:$0xff]  ;;  %v5626_v58 = vmax.f32 %v5594_v2, %v6595_v54 }
 0x640   : > { %v4341_v5 = vpop.permute.xlu1 %4340  ;;  %v5892_v14 = vld [vmem:[#allocation3 + $0x38] sm:$0xff]  ;;  %4427 = vst.msk [vmem:[#allocation3 + $0x40] sm:$0xff] %vm4418_vm11, %v4339_v59  ;;  %4764 = vrot.lane.b32.xlu0 %v4672_v20, %s6628_s16 }
 0x641   : > { %4428 = vst.msk [vmem:[#allocation3 + $0x48] sm:$0xff] %vm4418_vm11, %v4341_v5  ;;  %v5920_v45 = vpack.c.bf16 %v5892_v14, %v5891_v57  ;;  %v5668_v59 = vmax.f32 %v5626_v58, %v8801_v17 }
 0x642   : > { %4766 = vrot.lane.b32.xlu1 %v4673_v40, %s6628_s16  ;;  %v5625_v40 = vmax.f32 %v5593_v4, %v8193_v52  ;;  %v9711_v52 = vld [vmem:[#allocation6_spill] sm:$0xff] }
 0x643   : > { %6484 = vmatmul.mubr.msk.bf16.gmra.mrb[4].mxu0 %vm5992_vm0, %v5920_v45  ;;  %v4371_v55 = vpop.permute.xlu0 %4370  ;;  %v5907_v41 = vld [vmem:[#allocation3 + $0xb0] sm:$0xff]  ;;  %v5707_v17 = vmax.f32 %v5668_v59, %v8819_v56 }
 0x644   : > { %v4373_v8 = vpop.permute.xlu1 %4372  ;;  %v5908_v9 = vld [vmem:[#allocation3 + $0xb8] sm:$0xff]  ;;  %4443 = vst.msk [vmem:[#allocation3 + $0xc0] sm:$0xff] %vm4418_vm11, %v4371_v55  ;;  %4736 = vrot.lane.b32.xlu0 %v4658_v11, %s6628_s16  ;;  %v5667_v57 = vmax.f32 %v5625_v40, %v8221_v30  ;;  %v5683_v11 = vmax.f32 %v5609_v23, %v9711_v52 }
 0x645   : > { %4444 = vst.msk [vmem:[#allocation3 + $0xc8] sm:$0xff] %vm4418_vm11, %v4373_v8  ;;  %v5928_v1 = vpack.c.bf16 %v5908_v9, %v5907_v41 }
 0x646   : > { %4738 = vrot.lane.b32.xlu1 %v4659_v46, %s6628_s16  ;;  %v5684_v46 = vmax.f32 %v5610_v33, %v9711_v52  ;;  %v5706_v30 = vmax.f32 %v5667_v57, %v8237_v31  ;;  %v5722_v56 = vmax.f32 %v5683_v11, %v9712_v38 }
 0x647   : > { %6500 = vmatmul.mubr.msk.bf16.gmra.mrb[4].mxu1 %vm5992_vm0, %v5928_v1  ;;  %v4343_v19 = vpop.permute.xlu0 %4342 }
 0x648   : > { %v4345_v53 = vpop.permute.xlu1 %4344  ;;  %4429 = vst.msk [vmem:[#allocation3 + $0x50] sm:$0xff] %vm4418_vm11, %v4343_v19  ;;  %4768 = vrot.lane.b32.xlu0 %v4674_v27, %s6628_s16 }
 0x649   : > { %4430 = vst.msk [vmem:[#allocation3 + $0x58] sm:$0xff] %vm4418_vm11, %v4345_v53 }
 0x64a   : > { %4770 = vrot.lane.b32.xlu1 %v4675_v0, %s6628_s16 }
 0x64b   : > { %v4375_v3 = vpop.permute.xlu0 %4374 }
 0x64c   : > { %v4377_v28 = vpop.permute.xlu1 %4376  ;;  %4445 = vst.msk [vmem:[#allocation3 + $0xd0] sm:$0xff] %vm4418_vm11, %v4375_v3  ;;  %4925 = vrot.lane.b32.xlu0 %v4849_v21, %s6629_s23 }
 0x64d   : > { %4446 = vst.msk [vmem:[#allocation3 + $0xd8] sm:$0xff] %vm4418_vm11, %v4377_v28 }
 0x64e   : > { %4927 = vrot.lane.b32.xlu1 %v4850_v63, %s6629_s23 }
 0x64f   : > { %v4532_v35 = vpop.permute.xlu0 %4531 }
 0x650   : > { %v4534_v49 = vpop.permute.xlu1 %4533  ;;  %4620 = vst.msk [vmem:[#allocation3 + $0x40] sm:$0xff] %vm4611_vm12, %v4532_v35  ;;  %4957 = vrot.lane.b32.xlu0 %v4865_v22, %s6629_s23 }
 0x651   : > { %4621 = vst.msk [vmem:[#allocation3 + $0x48] sm:$0xff] %vm4611_vm12, %v4534_v49 }
 0x652   : > { %4959 = vrot.lane.b32.xlu1 %v4866_v42, %s6629_s23 }
 0x653   : > { %v4564_v15 = vpop.permute.xlu0 %4563 }
 0x654   : > { %v4566_v16 = vpop.permute.xlu1 %4565  ;;  %4636 = vst.msk [vmem:[#allocation3 + $0xc0] sm:$0xff] %vm4611_vm12, %v4564_v15  ;;  %4929 = vrot.lane.b32.xlu0 %v4851_v18, %s6629_s23 }
 0x655   : > { %4637 = vst.msk [vmem:[#allocation3 + $0xc8] sm:$0xff] %vm4611_vm12, %v4566_v16 }
 0x656   : > { %4931 = vrot.lane.b32.xlu1 %v4852_v47, %s6629_s23 }
 0x657   : > { %v4536_v39 = vpop.permute.xlu0 %4535 }
 0x658   : > { %v4538_v10 = vpop.permute.xlu1 %4537  ;;  %4622 = vst.msk [vmem:[#allocation3 + $0x50] sm:$0xff] %vm4611_vm12, %v4536_v39  ;;  %4961 = vrot.lane.b32.xlu0 %v4867_v12, %s6629_s23 }
 0x659   : > { %4623 = vst.msk [vmem:[#allocation3 + $0x58] sm:$0xff] %vm4611_vm12, %v4538_v10 }
 0x65a   : > { %4963 = vrot.lane.b32.xlu1 %v4868_v26, %s6629_s23 }
 0x65b   : > { %v4568_v5 = vpop.permute.xlu0 %4567 }
 0x65c   : > { %v4570_v20 = vpop.permute.xlu1 %4569  ;;  %4638 = vst.msk [vmem:[#allocation3 + $0xd0] sm:$0xff] %vm4611_vm12, %v4568_v5  ;;  %5780 = vrot.lane.b32.xlu0 %v5704_v37, %s6630_s5 }
 0x65d   : > { %4639 = vst.msk [vmem:[#allocation3 + $0xd8] sm:$0xff] %vm4611_vm12, %v4570_v20 }
 0x65e   : > { %5782 = vrot.lane.b32.xlu1 %v5705_v62, %s6630_s5 }
 0x65f   : > { %v4725_v45 = vpop.permute.xlu0 %4724 }
 0x660   : > { %v4727_v14 = vpop.permute.xlu1 %4726  ;;  %4813 = vst.msk [vmem:[#allocation3 + $0x40] sm:$0xff] %vm4804_vm13, %v4725_v45  ;;  %5812 = vrot.lane.b32.xlu0 %v9246_v32, %s6630_s5 }
 0x661   : > { %4814 = vst.msk [vmem:[#allocation3 + $0x48] sm:$0xff] %vm4804_vm13, %v4727_v14 }
 0x662   : > { %5814 = vrot.lane.b32.xlu1 %v9237_v60, %s6630_s5  ;;  %v5723_v60 = vmax.f32 %v5684_v46, %v9712_v38 }
 0x663   : > { %v4757_v55 = vpop.permute.xlu0 %4756 }
 0x664   : > { %v4759_v8 = vpop.permute.xlu1 %4758  ;;  %4829 = vst.msk [vmem:[#allocation3 + $0xc0] sm:$0xff] %vm4804_vm13, %v4757_v55  ;;  %5784 = vrot.lane.b32.xlu0 %v5706_v30, %s6630_s5  ;;  %v9503_v55 = vld [vmem:[%s9630_s2] ss:$0 sm:$0xff] }
 0x665   : > { %4830 = vst.msk [vmem:[#allocation3 + $0xc8] sm:$0xff] %vm4804_vm13, %v4759_v8 }
 0x666   : > { %5786 = vrot.lane.b32.xlu1 %v5707_v17, %s6630_s5 }
 0x667   : > { %v4729_v32 = vpop.permute.xlu0 %4728 }
 0x668   : > { %v4731_v31 = vpop.permute.xlu1 %4730  ;;  %4815 = vst.msk [vmem:[#allocation3 + $0x50] sm:$0xff] %vm4804_vm13, %v4729_v32  ;;  %5816 = vrot.lane.b32.xlu0 %v5722_v56, %s6630_s5 }
 0x669   : > { %4816 = vst.msk [vmem:[#allocation3 + $0x58] sm:$0xff] %vm4804_vm13, %v4731_v31 }
 0x66a   : > { %5818 = vrot.lane.b32.xlu1 %v5723_v60, %s6630_s5 }
 0x66b   : > { %v4761_v13 = vpop.permute.xlu0 %4760 }
 0x66c   : > { %v4763_v44 = vpop.permute.xlu1 %4762  ;;  %4831 = vst.msk [vmem:[#allocation3 + $0xd0] sm:$0xff] %vm4804_vm13, %v4761_v13 }
 0x66d   : > { %4832 = vst.msk [vmem:[#allocation3 + $0xd8] sm:$0xff] %vm4804_vm13, %v4763_v44 }
 0x66f   : > { %v4918_v33 = vpop.permute.xlu0 %4917 }
 0x670   : > { %v4920_v25 = vpop.permute.xlu1 %4919  ;;  %5006 = vst.msk [vmem:[#allocation3 + $0x40] sm:$0xff] %vm4997_vm14, %v4918_v33 }
 0x671   : > { %5007 = vst.msk [vmem:[#allocation3 + $0x48] sm:$0xff] %vm4997_vm14, %v4920_v25 }
 0x673   : > { %v4950_v41 = vpop.permute.xlu0 %4949 }
 0x674   : > { %v4952_v23 = vpop.permute.xlu1 %4951  ;;  %5022 = vst.msk [vmem:[#allocation3 + $0xc0] sm:$0xff] %vm4997_vm14, %v4950_v41 }
 0x675   : > { %5023 = vst.msk [vmem:[#allocation3 + $0xc8] sm:$0xff] %vm4997_vm14, %v4952_v23 }
 0x677   : > { %v4922_v1 = vpop.permute.xlu0 %4921 }
 0x678   : > { %v4924_v9 = vpop.permute.xlu1 %4923  ;;  %5008 = vst.msk [vmem:[#allocation3 + $0x50] sm:$0xff] %vm4997_vm14, %v4922_v1 }
 0x679   : > { %5009 = vst.msk [vmem:[#allocation3 + $0x58] sm:$0xff] %vm4997_vm14, %v4924_v9 }
 0x67b   : > { %v4954_v27 = vpop.permute.xlu0 %4953 }
 0x67c   : > { %v4956_v0 = vpop.permute.xlu1 %4955  ;;  %5024 = vst.msk [vmem:[#allocation3 + $0xd0] sm:$0xff] %vm4997_vm14, %v4954_v27 }
 0x67d   : > { %5025 = vst.msk [vmem:[#allocation3 + $0xd8] sm:$0xff] %vm4997_vm14, %v4956_v0 }
 0x67f   : > { %v5773_v19 = vpop.permute.xlu0 %5772 }
 0x680   : > { %v5775_v53 = vpop.permute.xlu1 %5774  ;;  %5861 = vst.msk [vmem:[#allocation3 + $0x40] sm:$0xff] %vm5852_vm15, %v5773_v19 }
 0x681   : > { %5862 = vst.msk [vmem:[#allocation3 + $0x48] sm:$0xff] %vm5852_vm15, %v5775_v53 }
 0x683   : > { %v5805_v21 = vpop.permute.xlu0 %5804 }
 0x684   : > { %v5807_v63 = vpop.permute.xlu1 %5806  ;;  %5877 = vst.msk [vmem:[#allocation3 + $0xc0] sm:$0xff] %vm5852_vm15, %v5805_v21 }
 0x685   : > { %5878 = vst.msk [vmem:[#allocation3 + $0xc8] sm:$0xff] %vm5852_vm15, %v5807_v63 }
 0x687   : > { %v5777_v3 = vpop.permute.xlu0 %5776  ;;  %v5893_v51 = vld [vmem:[#allocation3 + $0x40] sm:$0xff] }
 0x688   : > { %v5779_v28 = vpop.permute.xlu1 %5778  ;;  %v5894_v7 = vld [vmem:[#allocation3 + $0x48] sm:$0xff]  ;;  %5863 = vst.msk [vmem:[#allocation3 + $0x50] sm:$0xff] %vm5852_vm15, %v5777_v3 }
 0x689   : > { %5864 = vst.msk [vmem:[#allocation3 + $0x58] sm:$0xff] %vm5852_vm15, %v5779_v28  ;;  %v5921_v42 = vpack.c.bf16 %v5894_v7, %v5893_v51 }
 0x68b   : > { %6487 = vmatprep.mubr.msk.bf16.mxu0 %vm5992_vm0, %v5921_v42  ;;  %v5809_v49 = vpop.permute.xlu0 %5808  ;;  %v5909_v35 = vld [vmem:[#allocation3 + $0xc0] sm:$0xff] }
 0x68c   : > { %v5811_v22 = vpop.permute.xlu1 %5810  ;;  %v5910_v6 = vld [vmem:[#allocation3 + $0xc8] sm:$0xff]  ;;  %5879 = vst.msk [vmem:[#allocation3 + $0xd0] sm:$0xff] %vm5852_vm15, %v5809_v49 }
 0x68d   : > { %5880 = vst.msk [vmem:[#allocation3 + $0xd8] sm:$0xff] %vm5852_vm15, %v5811_v22  ;;  %v5929_v43 = vpack.c.bf16 %v5910_v6, %v5909_v35 }
 0x68f   : > { %6503 = vmatprep.mubr.msk.bf16.mxu1 %vm5992_vm0, %v5929_v43  ;;  %v4347_v36 = vpop.permute.xlu0 %4346  ;;  %v5895_v61 = vld [vmem:[#allocation3 + $0x50] sm:$0xff] }
 0x690   : > { %v4349_v50 = vpop.permute.xlu1 %4348  ;;  %v5896_v47 = vld [vmem:[#allocation3 + $0x58] sm:$0xff]  ;;  %4431 = vst.msk [vmem:[#allocation3 + $0x60] sm:$0xff] %vm4418_vm11, %v4347_v36 }
 0x691   : > { %4432 = vst.msk [vmem:[#allocation3 + $0x68] sm:$0xff] %vm4418_vm11, %v4349_v50  ;;  %v5922_v18 = vpack.c.bf16 %v5896_v47, %v5895_v61 }
 0x693   : > { %6488 = vmatmul.mubr.msk.bf16.gmra.mrb[8].mxu0 %vm5992_vm0, %v5922_v18  ;;  %v4379_v15 = vpop.permute.xlu0 %4378  ;;  %v5911_v48 = vld [vmem:[#allocation3 + $0xd0] sm:$0xff] }
 0x694   : > { %v4381_v16 = vpop.permute.xlu1 %4380  ;;  %v5912_v29 = vld [vmem:[#allocation3 + $0xd8] sm:$0xff]  ;;  %4447 = vst.msk [vmem:[#allocation3 + $0xe0] sm:$0xff] %vm4418_vm11, %v4379_v15 }
 0x695   : > { %4448 = vst.msk [vmem:[#allocation3 + $0xe8] sm:$0xff] %vm4418_vm11, %v4381_v16  ;;  %v5930_v34 = vpack.c.bf16 %v5912_v29, %v5911_v48 }
 0x697   : > { %6504 = vmatmul.mubr.msk.bf16.gmra.mrb[8].mxu1 %vm5992_vm0, %v5930_v34  ;;  %v4351_v24 = vpop.permute.xlu0 %4350 }
 0x698   : > { %v4353_v2 = vpop.permute.xlu1 %4352  ;;  %4433 = vst.msk [vmem:[#allocation3 + $0x70] sm:$0xff] %vm4418_vm11, %v4351_v24 }
 0x699   : > { %4434 = vst.msk [vmem:[#allocation3 + $0x78] sm:$0xff] %vm4418_vm11, %v4353_v2 }
 0x69b   : > { %v4383_v26 = vpop.permute.xlu0 %4382 }
 0x69c   : > { %v4385_v4 = vpop.permute.xlu1 %4384  ;;  %4449 = vst.msk [vmem:[#allocation3 + $0xf0] sm:$0xff] %vm4418_vm11, %v4383_v26 }
 0x69d   : > { %4450 = vst.msk [vmem:[#allocation3 + $0xf8] sm:$0xff] %vm4418_vm11, %v4385_v4 }
 0x69f   : > { %v4540_v10 = vpop.permute.xlu0 %4539 }
 0x6a0   : > { %v4542_v12 = vpop.permute.xlu1 %4541  ;;  %4624 = vst.msk [vmem:[#allocation3 + $0x60] sm:$0xff] %vm4611_vm12, %v4540_v10 }
 0x6a1   : > { %4625 = vst.msk [vmem:[#allocation3 + $0x68] sm:$0xff] %vm4611_vm12, %v4542_v12 }
 0x6a3   : > { %v4572_v62 = vpop.permute.xlu0 %4571 }
 0x6a4   : > { %v4574_v39 = vpop.permute.xlu1 %4573  ;;  %4640 = vst.msk [vmem:[#allocation3 + $0xe0] sm:$0xff] %vm4611_vm12, %v4572_v62 }
 0x6a5   : > { %4641 = vst.msk [vmem:[#allocation3 + $0xe8] sm:$0xff] %vm4611_vm12, %v4574_v39 }
 0x6a7   : > { %v4544_v54 = vpop.permute.xlu0 %4543 }
 0x6a8   : > { %v4546_v37 = vpop.permute.xlu1 %4545  ;;  %4626 = vst.msk [vmem:[#allocation3 + $0x70] sm:$0xff] %vm4611_vm12, %v4544_v54 }
 0x6a9   : > { %4627 = vst.msk [vmem:[#allocation3 + $0x78] sm:$0xff] %vm4611_vm12, %v4546_v37 }
 0x6ab   : > { %v4576_v40 = vpop.permute.xlu0 %4575 }
 0x6ac   : > { %v4578_v58 = vpop.permute.xlu1 %4577  ;;  %4642 = vst.msk [vmem:[#allocation3 + $0xf0] sm:$0xff] %vm4611_vm12, %v4576_v40 }
 0x6ad   : > { %4643 = vst.msk [vmem:[#allocation3 + $0xf8] sm:$0xff] %vm4611_vm12, %v4578_v58 }
 0x6af   : > { %v4733_v5 = vpop.permute.xlu0 %4732 }
 0x6b0   : > { %v4735_v20 = vpop.permute.xlu1 %4734  ;;  %4817 = vst.msk [vmem:[#allocation3 + $0x60] sm:$0xff] %vm4804_vm13, %v4733_v5 }
 0x6b1   : > { %4818 = vst.msk [vmem:[#allocation3 + $0x68] sm:$0xff] %vm4804_vm13, %v4735_v20 }
 0x6b3   : > { %v4765_v57 = vpop.permute.xlu0 %4764 }
 0x6b4   : > { %v4767_v59 = vpop.permute.xlu1 %4766  ;;  %4833 = vst.msk [vmem:[#allocation3 + $0xe0] sm:$0xff] %vm4804_vm13, %v4765_v57 }
 0x6b5   : > { %4834 = vst.msk [vmem:[#allocation3 + $0xe8] sm:$0xff] %vm4804_vm13, %v4767_v59 }
 0x6b7   : > { %v4737_v45 = vpop.permute.xlu0 %4736 }
 0x6b8   : > { %v4739_v14 = vpop.permute.xlu1 %4738  ;;  %4819 = vst.msk [vmem:[#allocation3 + $0x70] sm:$0xff] %vm4804_vm13, %v4737_v45 }
 0x6b9   : > { %4820 = vst.msk [vmem:[#allocation3 + $0x78] sm:$0xff] %vm4804_vm13, %v4739_v14 }
 0x6bb   : > { %v4769_v46 = vpop.permute.xlu0 %4768 }
 0x6bc   : > { %v4771_v52 = vpop.permute.xlu1 %4770  ;;  %4835 = vst.msk [vmem:[#allocation3 + $0xf0] sm:$0xff] %vm4804_vm13, %v4769_v46 }
 0x6bd   : > { %4836 = vst.msk [vmem:[#allocation3 + $0xf8] sm:$0xff] %vm4804_vm13, %v4771_v52 }
 0x6bf   : > { %v4926_v30 = vpop.permute.xlu0 %4925 }
 0x6c0   : > { %v4928_v17 = vpop.permute.xlu1 %4927  ;;  %5010 = vst.msk [vmem:[#allocation3 + $0x60] sm:$0xff] %vm4997_vm14, %v4926_v30 }
 0x6c1   : > { %5011 = vst.msk [vmem:[#allocation3 + $0x68] sm:$0xff] %vm4997_vm14, %v4928_v17 }
 0x6c3   : > { %v4958_v8 = vpop.permute.xlu0 %4957 }
 0x6c4   : > { %v4960_v11 = vpop.permute.xlu1 %4959  ;;  %5026 = vst.msk [vmem:[#allocation3 + $0xe0] sm:$0xff] %vm4997_vm14, %v4958_v8 }
 0x6c5   : > { %5027 = vst.msk [vmem:[#allocation3 + $0xe8] sm:$0xff] %vm4997_vm14, %v4960_v11 }
 0x6c6   : > { %v6481_v38 = vpop.f32.mrb[0].mxu0 }
 0x6c7   : > { %v6088_v60 = vadd.f32 %v6481_v38, %v9503_v55  ;;  %v6079_v56 = vpop.f32.mrb[1].mxu0  ;;  %v4930_v33 = vpop.permute.xlu0 %4929 }
 0x6c8   : > { %v6080_v31 = vadd.f32 %v9503_v55, %v6079_v56  ;;  %v4932_v32 = vpop.permute.xlu1 %4931  ;;  %v6482_v44 = vpop.f32.mrb[2].mxu0  ;;  %5012 = vst.msk [vmem:[#allocation3 + $0x70] sm:$0xff] %vm4997_vm14, %v4930_v33 }
 0x6c9   : > { %v6208_v13 = vmax.f32 %v6088_v60, 0.0  ;;  %5013 = vst.msk [vmem:[#allocation3 + $0x78] sm:$0xff] %vm4997_vm14, %v4932_v32  ;;  %v6091_v25 = vadd.f32 %v6482_v44, %v9503_v55  ;;  %v6082_v23 = vpop.f32.mrb[3].mxu0 }
 0x6ca   : > { %v6206_v41 = vmax.f32 %v6080_v31, 0.0  ;;  %v6083_v9 = vadd.f32 %v9503_v55, %v6082_v23  ;;  %v6497_v1 = vpop.f32.mrb[0].mxu1 }
 0x6cb   : > { %6241 = vst.msk [vmem:[%s9512_s11 + $0x10] sm:$0xff] %vm6238_vm1, %v6208_v13  ;;  %v6209_v0 = vmax.f32 %v6091_v25, 0.0  ;;  %v6152_v27 = vadd.f32 %v6497_v1, %v9503_v55  ;;  %v6143_v53 = vpop.f32.mrb[1].mxu1  ;;  %v4962_v7 = vpop.permute.xlu0 %4961 }
 0x6cc   : > { %6239 = vst.msk [vmem:[%s9512_s11] sm:$0xff] %vm6238_vm1, %v6206_v41  ;;  %v6207_v19 = vmax.f32 %v6083_v9, 0.0  ;;  %v6144_v63 = vadd.f32 %v9503_v55, %v6143_v53  ;;  %v4964_v21 = vpop.permute.xlu1 %4963  ;;  %v6498_v28 = vpop.f32.mrb[2].mxu1 }
 0x6cd   : > { %6242 = vst.msk [vmem:[%s9512_s11 + $0x18] sm:$0xff] %vm6238_vm1, %v6209_v0  ;;  %v6224_v3 = vmax.f32 %v6152_v27, 0.0  ;;  %v6155_v51 = vadd.f32 %v6498_v28, %v9503_v55  ;;  %v6146_v42 = vpop.f32.mrb[3].mxu1 }
 0x6ce   : > { %5029 = vst.msk [vmem:[#allocation3 + $0xf8] sm:$0xff] %vm4997_vm14, %v4964_v21  ;;  %v6222_v22 = vmax.f32 %v6144_v63, 0.0  ;;  %5028 = vst.msk [vmem:[#allocation3 + $0xf0] sm:$0xff] %vm4997_vm14, %v4962_v7  ;;  %v6147_v49 = vadd.f32 %v9503_v55, %v6146_v42 }
 0x6cf   : > { %6240 = vst.msk [vmem:[%s9512_s11 + $0x8] sm:$0xff] %vm6238_vm1, %v6207_v19  ;;  %6257 = vst.msk [vmem:[%s9512_s11 + $0x90] sm:$0xff] %vm6238_vm1, %v6224_v3  ;;  %v6225_v35 = vmax.f32 %v6155_v51, 0.0  ;;  %v5781_v50 = vpop.permute.xlu0 %5780 }
 0x6d0   : > { %6255 = vst.msk [vmem:[%s9512_s11 + $0x80] sm:$0xff] %vm6238_vm1, %v6222_v22  ;;  %v6223_v6 = vmax.f32 %v6147_v49, 0.0  ;;  %v5783_v43 = vpop.permute.xlu1 %5782 }
 0x6d1   : > { %6258 = vst.msk [vmem:[%s9512_s11 + $0x98] sm:$0xff] %vm6238_vm1, %v6225_v35 }
 0x6d2   : > { %5866 = vst.msk [vmem:[#allocation3 + $0x68] sm:$0xff] %vm5852_vm15, %v5783_v43  ;;  %5865 = vst.msk [vmem:[#allocation3 + $0x60] sm:$0xff] %vm5852_vm15, %v5781_v50 }
 0x6d3   : > { %6256 = vst.msk [vmem:[%s9512_s11 + $0x88] sm:$0xff] %vm6238_vm1, %v6223_v6  ;;  %v5813_v61 = vpop.permute.xlu0 %5812 }
 0x6d4   : > { %v5815_v36 = vpop.permute.xlu1 %5814  ;;  %5881 = vst.msk [vmem:[#allocation3 + $0xe0] sm:$0xff] %vm5852_vm15, %v5813_v61 }
 0x6d5   : > { %5882 = vst.msk [vmem:[#allocation3 + $0xe8] sm:$0xff] %vm5852_vm15, %v5815_v36 }
 0x6d7   : > { %v5785_v16 = vpop.permute.xlu0 %5784 }
 0x6d8   : > { %v5787_v47 = vpop.permute.xlu1 %5786  ;;  %5867 = vst.msk [vmem:[#allocation3 + $0x70] sm:$0xff] %vm5852_vm15, %v5785_v16 }
 0x6d9   : > { %v5898_v18 = vld [vmem:[#allocation3 + $0x68] sm:$0xff]  ;;  %5868 = vst.msk [vmem:[#allocation3 + $0x78] sm:$0xff] %vm5852_vm15, %v5787_v47  ;;  %v5897_v15 = vld [vmem:[#allocation3 + $0x60] sm:$0xff] }
 0x6da   : > { %v5923_v48 = vpack.c.bf16 %v5898_v18, %v5897_v15 }
 0x6db   : > { %v5817_v2 = vpop.permute.xlu0 %5816  ;;  %v5913_v24 = vld [vmem:[#allocation3 + $0xe0] sm:$0xff] }
 0x6dc   : > { %6491 = vmatprep.mubr.msk.bf16.mxu0 %vm5992_vm0, %v5923_v48  ;;  %v5819_v29 = vpop.permute.xlu1 %5818  ;;  %v5914_v34 = vld [vmem:[#allocation3 + $0xe8] sm:$0xff]  ;;  %5883 = vst.msk [vmem:[#allocation3 + $0xf0] sm:$0xff] %vm5852_vm15, %v5817_v2 }
 0x6dd   : > { %5884 = vst.msk [vmem:[#allocation3 + $0xf8] sm:$0xff] %vm5852_vm15, %v5819_v29  ;;  %v5931_v4 = vpack.c.bf16 %v5914_v34, %v5913_v24 }
 0x6df   : > { %6507 = vmatprep.mubr.msk.bf16.mxu1 %vm5992_vm0, %v5931_v4  ;;  %v5899_v12 = vld [vmem:[#allocation3 + $0x70] sm:$0xff] }
 0x6e0   : > { %v5900_v26 = vld [vmem:[#allocation3 + $0x78] sm:$0xff] }
 0x6e1   : > { %v5924_v10 = vpack.c.bf16 %v5900_v26, %v5899_v12 }
 0x6e3   : > { %6492 = vmatmul.mubr.msk.bf16.gmra.mrb[12].mxu0 %vm5992_vm0, %v5924_v10  ;;  %v5915_v62 = vld [vmem:[#allocation3 + $0xf0] sm:$0xff] }
 0x6e4   : > { %v5916_v39 = vld [vmem:[#allocation3 + $0xf8] sm:$0xff] }
 0x6e5   : > { %v5932_v37 = vpack.c.bf16 %v5916_v39, %v5915_v62 }
 0x6e7   : > { %6508 = vmatmul.mubr.msk.bf16.gmra.mrb[12].mxu1 %vm5992_vm0, %v5932_v37 }
 0x716   : > { %v6485_v54 = vpop.f32.mrb[4].mxu0 }
 0x717   : > { %v6104_v58 = vadd.f32 %v6485_v54, %v9503_v55  ;;  %v6095_v40 = vpop.f32.mrb[5].mxu0 }
 0x718   : > { %v6096_v20 = vadd.f32 %v9503_v55, %v6095_v40  ;;  %v6486_v5 = vpop.f32.mrb[6].mxu0 }
 0x719   : > { %v6212_v59 = vmax.f32 %v6104_v58, 0.0  ;;  %v6107_v57 = vadd.f32 %v6486_v5, %v9503_v55  ;;  %v6098_v14 = vpop.f32.mrb[7].mxu0 }
 0x71a   : > { %v6210_v45 = vmax.f32 %v6096_v20, 0.0  ;;  %v6099_v52 = vadd.f32 %v9503_v55, %v6098_v14  ;;  %v6501_v46 = vpop.f32.mrb[4].mxu1 }
 0x71b   : > { %6245 = vst.msk [vmem:[%s9512_s11 + $0x30] sm:$0xff] %vm6238_vm1, %v6212_v59  ;;  %v6213_v17 = vmax.f32 %v6107_v57, 0.0  ;;  %v6168_v30 = vadd.f32 %v6501_v46, %v9503_v55  ;;  %v6159_v11 = vpop.f32.mrb[5].mxu1 }
 0x71c   : > { %6243 = vst.msk [vmem:[%s9512_s11 + $0x20] sm:$0xff] %vm6238_vm1, %v6210_v45  ;;  %v6211_v8 = vmax.f32 %v6099_v52, 0.0  ;;  %v6160_v38 = vadd.f32 %v9503_v55, %v6159_v11  ;;  %v6502_v60 = vpop.f32.mrb[6].mxu1 }
 0x71d   : > { %6246 = vst.msk [vmem:[%s9512_s11 + $0x38] sm:$0xff] %vm6238_vm1, %v6213_v17  ;;  %v6228_v56 = vmax.f32 %v6168_v30, 0.0  ;;  %v6171_v31 = vadd.f32 %v6502_v60, %v9503_v55  ;;  %v6162_v32 = vpop.f32.mrb[7].mxu1 }
 0x71e   : > { %6244 = vst.msk [vmem:[%s9512_s11 + $0x28] sm:$0xff] %vm6238_vm1, %v6211_v8  ;;  %v6226_v44 = vmax.f32 %v6160_v38, 0.0  ;;  %v6163_v13 = vadd.f32 %v9503_v55, %v6162_v32 }
 0x71f   : > { %6261 = vst.msk [vmem:[%s9512_s11 + $0xb0] sm:$0xff] %vm6238_vm1, %v6228_v56  ;;  %v6229_v25 = vmax.f32 %v6171_v31, 0.0 }
 0x720   : > { %6259 = vst.msk [vmem:[%s9512_s11 + $0xa0] sm:$0xff] %vm6238_vm1, %v6226_v44  ;;  %v6227_v33 = vmax.f32 %v6163_v13, 0.0 }
 0x721   : > { %6262 = vst.msk [vmem:[%s9512_s11 + $0xb8] sm:$0xff] %vm6238_vm1, %v6229_v25 }
 0x722   : > { %6260 = vst.msk [vmem:[%s9512_s11 + $0xa8] sm:$0xff] %vm6238_vm1, %v6227_v33 }
 0x766   : > { %v6489_v23 = vpop.f32.mrb[8].mxu0 }
 0x767   : > { %v6120_v41 = vadd.f32 %v6489_v23, %v9503_v55  ;;  %v6111_v9 = vpop.f32.mrb[9].mxu0 }
 0x768   : > { %v6112_v1 = vadd.f32 %v9503_v55, %v6111_v9  ;;  %v6490_v0 = vpop.f32.mrb[10].mxu0 }
 0x769   : > { %v6216_v27 = vmax.f32 %v6120_v41, 0.0  ;;  %v6123_v53 = vadd.f32 %v6490_v0, %v9503_v55  ;;  %v6114_v19 = vpop.f32.mrb[11].mxu0 }
 0x76a   : > { %v6214_v63 = vmax.f32 %v6112_v1, 0.0  ;;  %v6115_v21 = vadd.f32 %v9503_v55, %v6114_v19  ;;  %v6505_v28 = vpop.f32.mrb[8].mxu1 }
 0x76b   : > { %6249 = vst.msk [vmem:[%s9512_s11 + $0x50] sm:$0xff] %vm6238_vm1, %v6216_v27  ;;  %v6217_v3 = vmax.f32 %v6123_v53, 0.0  ;;  %v6184_v51 = vadd.f32 %v6505_v28, %v9503_v55  ;;  %v6175_v7 = vpop.f32.mrb[9].mxu1 }
 0x76c   : > { %6247 = vst.msk [vmem:[%s9512_s11 + $0x40] sm:$0xff] %vm6238_vm1, %v6214_v63  ;;  %v6215_v42 = vmax.f32 %v6115_v21, 0.0  ;;  %v6176_v22 = vadd.f32 %v9503_v55, %v6175_v7  ;;  %v6506_v49 = vpop.f32.mrb[10].mxu1 }
 0x76d   : > { %6250 = vst.msk [vmem:[%s9512_s11 + $0x58] sm:$0xff] %vm6238_vm1, %v6217_v3  ;;  %v6232_v35 = vmax.f32 %v6184_v51, 0.0  ;;  %v6187_v6 = vadd.f32 %v6506_v49, %v9503_v55  ;;  %v6178_v43 = vpop.f32.mrb[11].mxu1 }
 0x76e   : > { %6248 = vst.msk [vmem:[%s9512_s11 + $0x48] sm:$0xff] %vm6238_vm1, %v6215_v42  ;;  %v6230_v50 = vmax.f32 %v6176_v22, 0.0  ;;  %v6179_v36 = vadd.f32 %v9503_v55, %v6178_v43 }
 0x76f   : > { %6265 = vst.msk [vmem:[%s9512_s11 + $0xd0] sm:$0xff] %vm6238_vm1, %v6232_v35  ;;  %v6233_v61 = vmax.f32 %v6187_v6, 0.0 }
 0x770   : > { %6263 = vst.msk [vmem:[%s9512_s11 + $0xc0] sm:$0xff] %vm6238_vm1, %v6230_v50  ;;  %v6231_v47 = vmax.f32 %v6179_v36, 0.0 }
 0x771   : > { %6266 = vst.msk [vmem:[%s9512_s11 + $0xd8] sm:$0xff] %vm6238_vm1, %v6233_v61 }
 0x772   : > { %6264 = vst.msk [vmem:[%s9512_s11 + $0xc8] sm:$0xff] %vm6238_vm1, %v6231_v47 }
 0x7b6   : > { %v6493_v18 = vpop.f32.mrb[12].mxu0 }
 0x7b7   : > { %v6136_v16 = vadd.f32 %v6493_v18, %v9503_v55  ;;  %v6127_v15 = vpop.f32.mrb[13].mxu0 }
 0x7b8   : > { %v6128_v48 = vadd.f32 %v9503_v55, %v6127_v15  ;;  %v6494_v29 = vpop.f32.mrb[14].mxu0 }
 0x7b9   : > { %v6220_v34 = vmax.f32 %v6136_v16, 0.0  ;;  %v6139_v2 = vadd.f32 %v6494_v29, %v9503_v55  ;;  %v6130_v24 = vpop.f32.mrb[15].mxu0 }
 0x7ba   : > { %v6218_v4 = vmax.f32 %v6128_v48, 0.0  ;;  %v6131_v26 = vadd.f32 %v9503_v55, %v6130_v24  ;;  %v6509_v12 = vpop.f32.mrb[12].mxu1 }
 0x7bb   : > { %6253 = vst.msk [vmem:[%s9512_s11 + $0x70] sm:$0xff] %vm6238_vm1, %v6220_v34  ;;  %v6221_v10 = vmax.f32 %v6139_v2, 0.0  ;;  %v6200_v39 = vadd.f32 %v6509_v12, %v9503_v55  ;;  %v6191_v62 = vpop.f32.mrb[13].mxu1 }
 0x7bc   : > { %6251 = vst.msk [vmem:[%s9512_s11 + $0x60] sm:$0xff] %vm6238_vm1, %v6218_v4  ;;  %v6219_v37 = vmax.f32 %v6131_v26, 0.0  ;;  %v6192_v54 = vadd.f32 %v9503_v55, %v6191_v62  ;;  %v6510_v58 = vpop.f32.mrb[14].mxu1 }
 0x7bd   : > { %6254 = vst.msk [vmem:[%s9512_s11 + $0x78] sm:$0xff] %vm6238_vm1, %v6221_v10  ;;  %v6236_v40 = vmax.f32 %v6200_v39, 0.0  ;;  %v6203_v20 = vadd.f32 %v6510_v58, %v9503_v55  ;;  %v6194_v5 = vpop.f32.mrb[15].mxu1 }
 0x7be   : > { %6252 = vst.msk [vmem:[%s9512_s11 + $0x68] sm:$0xff] %vm6238_vm1, %v6219_v37  ;;  %v6234_v59 = vmax.f32 %v6192_v54, 0.0  ;;  %v6195_v57 = vadd.f32 %v9503_v55, %v6194_v5 }
 0x7bf   : > { %6269 = vst.msk [vmem:[%s9512_s11 + $0xf0] sm:$0xff] %vm6238_vm1, %v6236_v40  ;;  %v6237_v14 = vmax.f32 %v6203_v20, 0.0 }
 0x7c0   : > { %6267 = vst.msk [vmem:[%s9512_s11 + $0xe0] sm:$0xff] %vm6238_vm1, %v6234_v59  ;;  %v6235_v45 = vmax.f32 %v6195_v57, 0.0 }
 0x7c1   : > { %6270 = vst.msk [vmem:[%s9512_s11 + $0xf8] sm:$0xff] %vm6238_vm1, %v6237_v14 }
 0x7c2   : > { %6268 = vst.msk [vmem:[%s9512_s11 + $0xe8] sm:$0xff] %vm6238_vm1, %v6235_v45 }
 0x7c3 PF: > { %s13_s12 = sadd.s32 1, %s6602_s12  }
 0x7c4   : > { %p10_p4 = scmp.ge.s32.totalorder %s13_s12, 4  }
 0x7c6   :  { %12 = sbr.rel (!%p10_p4) target bundleno = 1 (0x1), region = 66 }

</bundles_post_ra>
